<compile_context>
chip_gen: v7x
topology: tpu7x:2x2x1
jax: 0.10.0
libtpu: 0.0.40
codegen_flags: <defaults>
</compile_context>

<pallas_src>
import functools

import jax
import jax.numpy as jnp
from jax import lax
from jax.experimental import pallas as pl
from jax.experimental.pallas import tpu as pltpu


def _round_up(x, m):
    return (x + m - 1) // m * m


def _tile_bytes(shape, itemsize):
    """Coarse physical-VMEM size of a block (last dim -> 128 lanes, 2nd-last -> 16)."""
    s = list(shape)
    s[-1] = _round_up(s[-1], 128)
    s[-2] = _round_up(s[-2], 16)
    n = 1
    for d in s:
        n *= d
    return n * itemsize


# --------------------------- fused Pallas kernel -----------------------------

def _make_block_kernel(s, nb, ho, wo, hp, wp1, cinp, coutp, chunks, has_shortcut):
    """conv1(3x3,s,pad1)+ReLU -> conv2(3x3,1,pad1)+ReLU -> (+1x1 shortcut, ReLU)."""
    taps = [(kh, kw) for kh in range(3) for kw in range(3)]

    def kernel(*refs):
        if has_shortcut:
            x_ref, w1_ref, w2_ref, ws_ref, o_ref, out1_scr, xk_scr = refs
        else:
            x_ref, w1_ref, w2_ref, o_ref, out1_scr, xk_scr = refs
            ws_ref = None
        cdt = out1_scr.dtype

        # Re-zero the 1-pixel halo border EVERY grid step.  The interior is fully
        # rewritten below, so this is safe under 'parallel' grid semantics and
        # megacore (fixes the program_id(0)==0 init bug flagged in review).
        zrow = jnp.zeros((nb, 1, wp1, coutp), cdt)
        zcol = jnp.zeros((nb, hp, 1, coutp), cdt)
        out1_scr[:, 0:1, :, :] = zrow
        out1_scr[:, ho + 1:ho + 2, :, :] = zrow
        out1_scr[:, :, 0:1, :] = zcol
        out1_scr[:, :, wo + 1:wo + 2, :] = zcol

        def x_slab(ph, r_start, c_start, hcs):
            # Phase-decomposed padded input:
            #   x_ref[b*s*s + a*s + bb, i, j, c] == x_pad[img b, i*s + a, j*s + bb, c]
            parts = [
                x_ref[b * s * s + ph,
                      r_start:r_start + hcs,
                      c_start:c_start + wo, :].reshape(hcs * wo, cinp)
                for b in range(nb)
            ]
            return parts[0] if nb == 1 else jnp.concatenate(parts, axis=0)

        # ---- conv1: 3x3, stride=s, pad=1, fused ReLU -> VMEM scratch ----------
        # Deep-K formulation: im2col the 9 taps into xk_scr (M, 9*Cinp) and do a
        # single MXU dot per row chunk (K = 9*Cinp instead of 9 dots at K=Cinp).
        for h0, hcs in chunks:
            m = nb * hcs * wo
            for t, (kh, kw) in enumerate(taps):
                ph = (kh % s) * s + (kw % s)
                r0, c0 = kh // s, kw // s
                xk_scr[0:m, t * cinp:(t + 1) * cinp] = x_slab(ph, r0 + h0, c0, hcs)
            o1 = jnp.dot(xk_scr[0:m, :], w1_ref[...],
                         preferred_element_type=jnp.float32)
            o1 = jnp.maximum(o1, 0.0).astype(cdt)
            out1_scr[:, 1 + h0:1 + h0 + hcs, 1:1 + wo, :] = (
                o1.reshape(nb, hcs, wo, coutp))

        # ---- conv2: 3x3, stride=1, pad=1, fused ReLU (+ 1x1 shortcut + ReLU) --
        # Row-chunked accumulation keeps the live f32 accumulator <= ~16 vregs.
        for h0, hcs in chunks:
            m = nb * hcs * wo
            acc = jnp.zeros((m, coutp), jnp.float32)
            for t, (kh, kw) in enumerate(taps):
                tt = out1_scr[:, h0 + kh:h0 + kh + hcs, kw:kw + wo, :]
                acc = acc + jnp.dot(tt.reshape(m, coutp), w2_ref[t],
                                    preferred_element_type=jnp.float32)
            out = jnp.maximum(acc, 0.0)

            if has_shortcut:
                # shortcut input x[i*s, j*s] == x_pad[i*s + 1, j*s + 1]
                # (same slab as conv1's centre tap); x block is already in VMEM.
                ph = (1 % s) * s + (1 % s)
                q = 1 // s
                xs = x_slab(ph, q + h0, q, hcs)
                sc = jnp.maximum(
                    jnp.dot(xs, ws_ref[...], preferred_element_type=jnp.float32),
                    0.0)
                out = jnp.maximum(out + sc, 0.0)

            # Lane/sublane-dense store: full (wo, Coutp) slabs, bf16.
            o_ref[:, h0:h0 + hcs, :, :] = (
                out.reshape(nb, hcs, wo, coutp).astype(o_ref.dtype))

    return kernel


# ------------------------------- module wrapper -------------------------------

class BasicBlockPallas:
    """Pallas implementation of alf BasicBlock (use_bias=False, use_norm=None, relu)."""
    expansion = 1

    def __init__(self, in_planes, planes, stride=1, *, key,
                 compute_dtype=jnp.bfloat16):
        self.in_planes = in_planes
        self.planes = planes
        self.stride = stride
        self.has_shortcut = (stride != 1) or (in_planes != planes)
        self.compute_dtype = compute_dtype
        self.cinp = _round_up(in_planes, 8)        # contraction-dim padding (>=8)
        self.coutp = _round_up(planes * self.expansion, 128)  # lane-dense Cout

        k1, k2, k3 = jax.random.split(key, 3)

        def vs_init(k, kh, kw, cin, cout):
            # variance-scaling-like init (fan_in, truncated normal approx)
            fan_in = kh * kw * cin
            scale = jnp.sqrt(2.0 / fan_in)
            return (jax.random.truncated_normal(
                k, -2.0, 2.0, (kh, kw, cin, cout), dtype=jnp.float32) * scale)

        # f32 master weights in HWIO layout (also used by the reference path).
        self.w1 = vs_init(k1, 3, 3, in_planes, planes)
        self.w2 = vs_init(k2, 3, 3, planes, planes)
        if self.has_shortcut:
            self.ws = vs_init(k3, 1, 1, in_planes, self.expansion * planes)

        def pad_pack(w, cin_p, cout_p):
            kh, kw, cin, cout = w.shape
            return jnp.pad(w, ((0, 0), (0, 0),
                               (0, cin_p - cin), (0, cout_p - cout)))

        # conv1 weights packed for the deep-K dot: (9*Cinp, Coutp).
        self.w1k = (pad_pack(self.w1, self.cinp, self.coutp)
                    .reshape(9 * self.cinp, self.coutp).astype(compute_dtype))
        # conv2 weights per tap: (9, Coutp, Coutp).
        self.w2k = (pad_pack(self.w2, self.coutp, self.coutp)
                    .reshape(9, self.coutp, self.coutp).astype(compute_dtype))
        if self.has_shortcut:
            self.wsk = (pad_pack(self.ws, self.cinp, self.coutp)
                        .reshape(self.cinp, self.coutp).astype(compute_dtype))

    def __call__(self, x_nchw):
        N, C, H, W = x_nchw.shape
        assert C == self.in_planes
        s = self.stride
        cdt = self.compute_dtype
        cinp, coutp = self.cinp, self.coutp
        ho = (H + 2 - 3) // s + 1
        wo = (W + 2 - 3) // s + 1

        # ---- wrapper preprocessing (minimized HBM passes) ---------------------
        # NCHW -> NHWC once, cast to bf16 early, ONE merged pad (spatial pad=1 +
        # stride-phase alignment + channel padding to Cinp).
        x = jnp.transpose(x_nchw, (0, 2, 3, 1)).astype(cdt)
        h_pad, w_pad = H + 2, W + 2
        hq, wq = -(-h_pad // s), -(-w_pad // s)
        xp = jnp.pad(x, ((0, 0),
                         (1, 1 + hq * s - h_pad),
                         (1, 1 + wq * s - w_pad),
                         (0, cinp - C)))
        if s == 1:
            x_prep = xp                       # no phase-decomposition copy needed
        else:
            # x_prep[n*s*s + a*s + b, i, j, c] == x_pad[n, i*s + a, j*s + b, c]
            x_prep = (xp.reshape(N, hq, s, wq, s, cinp)
                        .transpose(0, 2, 4, 1, 3, 5)
                        .reshape(N * s * s, hq, wq, cinp))

        # ---- batch folding: Nb images per grid step ---------------------------
        # Amortizes the ~0.35us/step grid overhead; keep >=2 steps when N>=2 so
        # both v7x TensorCores stay busy with dimension_semantics=('parallel',).
        nb = 1
        for cand in range(2, N + 1):
            if N % cand == 0 and N // cand >= 2 and cand * ho * wo <= 1024:
                nb = cand

        # ---- in-kernel row chunking: <=~128 M rows per accumulator ------------
        hc = max(1, min(ho, 128 // max(1, nb * wo)))
        chunks = [(h0, min(hc, ho - h0)) for h0 in range(0, ho, hc)]
        m_max = nb * max(c[1] for c in chunks) * wo
        hp = ho + 2
        wp1 = _round_up(wo + 2, 8)            # sublane-padded out1 scratch width

        kernel = _make_block_kernel(s, nb, ho, wo, hp, wp1, cinp, coutp,
                                    chunks, self.has_shortcut)

        in_specs = [
            pl.BlockSpec((nb * s * s, hq, wq, cinp), lambda i: (i, 0, 0, 0)),
            pl.BlockSpec((9 * cinp, coutp), lambda i: (0, 0)),
            pl.BlockSpec((9, coutp, coutp), lambda i: (0, 0, 0)),
        ]
        args = [x_prep, self.w1k, self.w2k]
        if self.has_shortcut:
            in_specs.append(pl.BlockSpec((cinp, coutp), lambda i: (0, 0)))
            args.append(self.wsk)

        # VMEM budget (double-buffered blocks + scratch) with headroom.
        est = (2 * _tile_bytes((nb * s * s, hq, wq, cinp), 2)
               + 2 * _tile_bytes((nb, ho, wo, coutp), 2)
               + 2 * (_tile_bytes((9 * cinp, coutp), 2)
                      + _tile_bytes((9, coutp, coutp), 2)
                      + (_tile_bytes((cinp, coutp), 2) if self.has_shortcut else 0))
               + _tile_bytes((nb, hp, wp1, coutp), 2)
               + _tile_bytes((m_max, 9 * cinp), 2))
        vmem_limit = int(min(96 * 1024 * 1024, max(32 * 1024 * 1024, 2 * est)))

        flops = 2 * N * ho * wo * coutp * (
            9 * cinp + 9 * coutp + (cinp if self.has_shortcut else 0))
        bytes_accessed = 2 * (x_prep.size + self.w1k.size + self.w2k.size
                              + (self.wsk.size if self.has_shortcut else 0)
                              + N * ho * wo * coutp)

        out_padded = pl.pallas_call(
            kernel,
            out_shape=jax.ShapeDtypeStruct((N, ho, wo, coutp), cdt),  # bf16 writeback
            grid=(N // nb,),
            in_specs=in_specs,
            out_specs=pl.BlockSpec((nb, ho, wo, coutp), lambda i: (i, 0, 0, 0)),
            scratch_shapes=[
                pltpu.VMEM((nb, hp, wp1, coutp), cdt),     # out1 + zero halo
                pltpu.VMEM((m_max, 9 * cinp), cdt),        # conv1 im2col (deep K)
            ],
            compiler_params=pltpu.CompilerParams(
                dimension_semantics=("parallel",),
                vmem_limit_bytes=vmem_limit),
            cost_estimate=pl.CostEstimate(flops=int(flops), transcendentals=0,
                                          bytes_accessed=int(bytes_accessed)),
        )(*args)

        # Module interface is NCHW / un-padded planes.  (If the consumer accepted
        # NHWC + channel-padded bf16, this slice/transpose/cast could be dropped.)
        out = out_padded[..., :self.planes * self.expansion].astype(jnp.float32)
        return jnp.transpose(out, (0, 3, 1, 2))


# --------------------------------- reference ----------------------------------

def reference_forward(block, x_nchw):
    """lax.conv reference with the same bf16-feed / f32-accumulate quantization points."""
    cd = block.compute_dtype

    def conv(x, w, s, p):
        return lax.conv_general_dilated(
            x.astype(cd), w.astype(cd),
            window_strides=(s, s), padding=[(p, p), (p, p)],
            dimension_numbers=('NCHW', 'HWIO', 'NCHW'),
            preferred_element_type=jnp.float32)

    o = jax.nn.relu(conv(x_nchw, block.w1, block.stride, 1))
    o = jax.nn.relu(conv(o, block.w2, 1, 1))
    if block.has_shortcut:
        sc = jax.nn.relu(conv(x_nchw, block.ws, block.stride, 0))
        o = jax.nn.relu(o + sc)
    return o


# ----------------------------------- main --------------------------------------

if __name__ == "__main__":
    # TODO(synk): set_parameters / param_length (hypernetwork parameter plumbing)
    # has no kernel equivalent; only the forward pass is implemented here.
    key = jax.random.PRNGKey(0)

    configs = [
        # (N, Cin, H, W, planes, stride)
        (2, 4, 16, 16, 8, 1),   # channel change -> shortcut branch, stride 1
        (2, 8, 16, 16, 8, 1),   # identity block (no shortcut)
        (2, 4, 16, 16, 8, 2),   # strided block -> phase decomposition + shortcut
    ]

    for idx, (N, Cin, H, W, planes, stride) in enumerate(configs):
        kx, kp, key = jax.random.split(key, 3)
        x = jax.random.normal(kx, (N, Cin, H, W), dtype=jnp.float32)

        block = BasicBlockPallas(Cin, planes, stride=stride, key=kp)
        fwd = jax.jit(lambda xx, blk=block: blk(xx))
        out = jax.block_until_ready(fwd(x))

        ref = jax.block_until_ready(reference_forward(block, x))
        ho = (H + 2 - 3) // stride + 1
        wo = (W + 2 - 3) // stride + 1
        assert out.shape == ref.shape == (N, planes, ho, wo), f"shape mismatch cfg {idx}"
        # bf16 MXU feeds, f32 accumulation on both sides; kernel output rounded to
        # bf16 (<=0.4% rel) -> 2e-2 tolerances leave a wide margin.
        assert jnp.allclose(out, ref, rtol=2e-2, atol=2e-2), f"mismatch cfg {idx}"

    print("KERNEL_OK")
</pallas_src>

<mosaic_0001>
module attributes {stable_mosaic.version = 11 : i64} {
  func.func @kernel(%arg0: i32, %arg1: memref<1x18x18x8xbf16, #tpu.memory_space<vmem>>, %arg2: memref<72x128xbf16, #tpu.memory_space<vmem>>, %arg3: memref<9x128x128xbf16, #tpu.memory_space<vmem>>, %arg4: memref<8x128xbf16, #tpu.memory_space<vmem>>, %arg5: memref<1x16x16x128xbf16, #tpu.memory_space<vmem>>, %arg6: memref<1x18x24x128xbf16, #tpu.memory_space<vmem>>, %arg7: memref<128x72xbf16, #tpu.memory_space<vmem>>) attributes {dimension_semantics = [#tpu.dimension_semantics<parallel>], iteration_bounds = array<i64: 2>, scalar_prefetch = 0 : i64, scratch_operands = 2 : i64, tpu.core_type = #tpu.core_type<tc>, window_params = [{transform_indices = @transform_0, window_bounds = array<i64: 1, 18, 18, 8>}, {pipeline_mode = #tpu.pipeline_mode<synchronous>, transform_indices = @transform_1, window_bounds = array<i64: 72, 128>}, {pipeline_mode = #tpu.pipeline_mode<synchronous>, transform_indices = @transform_2, window_bounds = array<i64: 9, 128, 128>}, {pipeline_mode = #tpu.pipeline_mode<synchronous>, transform_indices = @transform_3, window_bounds = array<i64: 8, 128>}, {transform_indices = @transform_4, window_bounds = array<i64: 1, 16, 16, 128>}]} {
    %cst = arith.constant 0.000000e+00 : bf16
    %0 = vector.broadcast %cst : bf16 to vector<1x1x24x128xbf16>
    %cst_0 = arith.constant 0.000000e+00 : bf16
    %1 = vector.broadcast %cst_0 : bf16 to vector<1x18x1x128xbf16>
    %c0 = arith.constant 0 : index
    %c0_1 = arith.constant 0 : index
    %c0_2 = arith.constant 0 : index
    %c0_3 = arith.constant 0 : index
    %2 = vector.load %arg6[%c0, %c0_1, %c0_2, %c0_3] : memref<1x18x24x128xbf16, #tpu.memory_space<vmem>>, vector<1x1x24x128xbf16>
    tpu.vector_store %arg6[%c0, %c0_1, %c0_2, %c0_3], %0 {strides = array<i32>} : memref<1x18x24x128xbf16, #tpu.memory_space<vmem>>, vector<1x1x24x128xbf16>,
    %c0_4 = arith.constant 0 : index
    %c17 = arith.constant 17 : index
    %c0_5 = arith.constant 0 : index
    %c0_6 = arith.constant 0 : index
    %3 = vector.load %arg6[%c0_4, %c17, %c0_5, %c0_6] : memref<1x18x24x128xbf16, #tpu.memory_space<vmem>>, vector<1x1x24x128xbf16>
    tpu.vector_store %arg6[%c0_4, %c17, %c0_5, %c0_6], %0 {strides = array<i32>} : memref<1x18x24x128xbf16, #tpu.memory_space<vmem>>, vector<1x1x24x128xbf16>,
    %c0_7 = arith.constant 0 : index
    %c0_8 = arith.constant 0 : index
    %c0_9 = arith.constant 0 : index
    %c0_10 = arith.constant 0 : index
    %4 = vector.load %arg6[%c0_7, %c0_8, %c0_9, %c0_10] : memref<1x18x24x128xbf16, #tpu.memory_space<vmem>>, vector<1x18x1x128xbf16>
    tpu.vector_store %arg6[%c0_7, %c0_8, %c0_9, %c0_10], %1 {strides = array<i32>} : memref<1x18x24x128xbf16, #tpu.memory_space<vmem>>, vector<1x18x1x128xbf16>,
    %c0_11 = arith.constant 0 : index
    %c0_12 = arith.constant 0 : index
    %c17_13 = arith.constant 17 : index
    %c0_14 = arith.constant 0 : index
    %5 = vector.load %arg6[%c0_11, %c0_12, %c17_13, %c0_14] : memref<1x18x24x128xbf16, #tpu.memory_space<vmem>>, vector<1x18x1x128xbf16>
    tpu.vector_store %arg6[%c0_11, %c0_12, %c17_13, %c0_14], %1 {strides = array<i32>} : memref<1x18x24x128xbf16, #tpu.memory_space<vmem>>, vector<1x18x1x128xbf16>,
    %c0_15 = arith.constant 0 : index
    %c0_16 = arith.constant 0 : index
    %c0_17 = arith.constant 0 : index
    %c0_18 = arith.constant 0 : index
    %6 = vector.load %arg1[%c0_15, %c0_16, %c0_17, %c0_18] : memref<1x18x18x8xbf16, #tpu.memory_space<vmem>>, vector<1x8x16x8xbf16>
    %7 = vector.shape_cast %6 : vector<1x8x16x8xbf16> to vector<8x16x8xbf16>
    %8 = vector.shape_cast %7 : vector<8x16x8xbf16> to vector<128x8xbf16>
    %c0_19 = arith.constant 0 : index
    %c0_20 = arith.constant 0 : index
    %9 = vector.load %arg7[%c0_19, %c0_20] : memref<128x72xbf16, #tpu.memory_space<vmem>>, vector<128x8xbf16>
    tpu.vector_store %arg7[%c0_19, %c0_20], %8 {strides = array<i32>} : memref<128x72xbf16, #tpu.memory_space<vmem>>, vector<128x8xbf16>,
    %c0_21 = arith.constant 0 : index
    %c0_22 = arith.constant 0 : index
    %c1 = arith.constant 1 : index
    %c0_23 = arith.constant 0 : index
    %10 = vector.load %arg1[%c0_21, %c0_22, %c1, %c0_23] : memref<1x18x18x8xbf16, #tpu.memory_space<vmem>>, vector<1x8x16x8xbf16>
    %11 = vector.shape_cast %10 : vector<1x8x16x8xbf16> to vector<8x16x8xbf16>
    %12 = vector.shape_cast %11 : vector<8x16x8xbf16> to vector<128x8xbf16>
    %c0_24 = arith.constant 0 : index
    %c8 = arith.constant 8 : index
    %13 = vector.load %arg7[%c0_24, %c8] : memref<128x72xbf16, #tpu.memory_space<vmem>>, vector<128x8xbf16>
    tpu.vector_store %arg7[%c0_24, %c8], %12 {strides = array<i32>} : memref<128x72xbf16, #tpu.memory_space<vmem>>, vector<128x8xbf16>,
    %c0_25 = arith.constant 0 : index
    %c0_26 = arith.constant 0 : index
    %c2 = arith.constant 2 : index
    %c0_27 = arith.constant 0 : index
    %14 = vector.load %arg1[%c0_25, %c0_26, %c2, %c0_27] : memref<1x18x18x8xbf16, #tpu.memory_space<vmem>>, vector<1x8x16x8xbf16>
    %15 = vector.shape_cast %14 : vector<1x8x16x8xbf16> to vector<8x16x8xbf16>
    %16 = vector.shape_cast %15 : vector<8x16x8xbf16> to vector<128x8xbf16>
    %c0_28 = arith.constant 0 : index
    %c16 = arith.constant 16 : index
    %17 = vector.load %arg7[%c0_28, %c16] : memref<128x72xbf16, #tpu.memory_space<vmem>>, vector<128x8xbf16>
    tpu.vector_store %arg7[%c0_28, %c16], %16 {strides = array<i32>} : memref<128x72xbf16, #tpu.memory_space<vmem>>, vector<128x8xbf16>,
    %c0_29 = arith.constant 0 : index
    %c1_30 = arith.constant 1 : index
    %c0_31 = arith.constant 0 : index
    %c0_32 = arith.constant 0 : index
    %18 = vector.load %arg1[%c0_29, %c1_30, %c0_31, %c0_32] : memref<1x18x18x8xbf16, #tpu.memory_space<vmem>>, vector<1x8x16x8xbf16>
    %19 = vector.shape_cast %18 : vector<1x8x16x8xbf16> to vector<8x16x8xbf16>
    %20 = vector.shape_cast %19 : vector<8x16x8xbf16> to vector<128x8xbf16>
    %c0_33 = arith.constant 0 : index
    %c24 = arith.constant 24 : index
    %21 = vector.load %arg7[%c0_33, %c24] : memref<128x72xbf16, #tpu.memory_space<vmem>>, vector<128x8xbf16>
    tpu.vector_store %arg7[%c0_33, %c24], %20 {strides = array<i32>} : memref<128x72xbf16, #tpu.memory_space<vmem>>, vector<128x8xbf16>,
    %c0_34 = arith.constant 0 : index
    %c1_35 = arith.constant 1 : index
    %c1_36 = arith.constant 1 : index
    %c0_37 = arith.constant 0 : index
    %22 = vector.load %arg1[%c0_34, %c1_35, %c1_36, %c0_37] : memref<1x18x18x8xbf16, #tpu.memory_space<vmem>>, vector<1x8x16x8xbf16>
    %23 = vector.shape_cast %22 : vector<1x8x16x8xbf16> to vector<8x16x8xbf16>
    %24 = vector.shape_cast %23 : vector<8x16x8xbf16> to vector<128x8xbf16>
    %c0_38 = arith.constant 0 : index
    %c32 = arith.constant 32 : index
    %25 = vector.load %arg7[%c0_38, %c32] : memref<128x72xbf16, #tpu.memory_space<vmem>>, vector<128x8xbf16>
    tpu.vector_store %arg7[%c0_38, %c32], %24 {strides = array<i32>} : memref<128x72xbf16, #tpu.memory_space<vmem>>, vector<128x8xbf16>,
    %c0_39 = arith.constant 0 : index
    %c1_40 = arith.constant 1 : index
    %c2_41 = arith.constant 2 : index
    %c0_42 = arith.constant 0 : index
    %26 = vector.load %arg1[%c0_39, %c1_40, %c2_41, %c0_42] : memref<1x18x18x8xbf16, #tpu.memory_space<vmem>>, vector<1x8x16x8xbf16>
    %27 = vector.shape_cast %26 : vector<1x8x16x8xbf16> to vector<8x16x8xbf16>
    %28 = vector.shape_cast %27 : vector<8x16x8xbf16> to vector<128x8xbf16>
    %c0_43 = arith.constant 0 : index
    %c40 = arith.constant 40 : index
    %29 = vector.load %arg7[%c0_43, %c40] : memref<128x72xbf16, #tpu.memory_space<vmem>>, vector<128x8xbf16>
    tpu.vector_store %arg7[%c0_43, %c40], %28 {strides = array<i32>} : memref<128x72xbf16, #tpu.memory_space<vmem>>, vector<128x8xbf16>,
    %c0_44 = arith.constant 0 : index
    %c2_45 = arith.constant 2 : index
    %c0_46 = arith.constant 0 : index
    %c0_47 = arith.constant 0 : index
    %30 = vector.load %arg1[%c0_44, %c2_45, %c0_46, %c0_47] : memref<1x18x18x8xbf16, #tpu.memory_space<vmem>>, vector<1x8x16x8xbf16>
    %31 = vector.shape_cast %30 : vector<1x8x16x8xbf16> to vector<8x16x8xbf16>
    %32 = vector.shape_cast %31 : vector<8x16x8xbf16> to vector<128x8xbf16>
    %c0_48 = arith.constant 0 : index
    %c48 = arith.constant 48 : index
    %33 = vector.load %arg7[%c0_48, %c48] : memref<128x72xbf16, #tpu.memory_space<vmem>>, vector<128x8xbf16>
    tpu.vector_store %arg7[%c0_48, %c48], %32 {strides = array<i32>} : memref<128x72xbf16, #tpu.memory_space<vmem>>, vector<128x8xbf16>,
    %c0_49 = arith.constant 0 : index
    %c2_50 = arith.constant 2 : index
    %c1_51 = arith.constant 1 : index
    %c0_52 = arith.constant 0 : index
    %34 = vector.load %arg1[%c0_49, %c2_50, %c1_51, %c0_52] : memref<1x18x18x8xbf16, #tpu.memory_space<vmem>>, vector<1x8x16x8xbf16>
    %35 = vector.shape_cast %34 : vector<1x8x16x8xbf16> to vector<8x16x8xbf16>
    %36 = vector.shape_cast %35 : vector<8x16x8xbf16> to vector<128x8xbf16>
    %c0_53 = arith.constant 0 : index
    %c56 = arith.constant 56 : index
    %37 = vector.load %arg7[%c0_53, %c56] : memref<128x72xbf16, #tpu.memory_space<vmem>>, vector<128x8xbf16>
    tpu.vector_store %arg7[%c0_53, %c56], %36 {strides = array<i32>} : memref<128x72xbf16, #tpu.memory_space<vmem>>, vector<128x8xbf16>,
    %c0_54 = arith.constant 0 : index
    %c2_55 = arith.constant 2 : index
    %c2_56 = arith.constant 2 : index
    %c0_57 = arith.constant 0 : index
    %38 = vector.load %arg1[%c0_54, %c2_55, %c2_56, %c0_57] : memref<1x18x18x8xbf16, #tpu.memory_space<vmem>>, vector<1x8x16x8xbf16>
    %39 = vector.shape_cast %38 : vector<1x8x16x8xbf16> to vector<8x16x8xbf16>
    %40 = vector.shape_cast %39 : vector<8x16x8xbf16> to vector<128x8xbf16>
    %c0_58 = arith.constant 0 : index
    %c64 = arith.constant 64 : index
    %41 = vector.load %arg7[%c0_58, %c64] : memref<128x72xbf16, #tpu.memory_space<vmem>>, vector<128x8xbf16>
    tpu.vector_store %arg7[%c0_58, %c64], %40 {strides = array<i32>} : memref<128x72xbf16, #tpu.memory_space<vmem>>, vector<128x8xbf16>,
    %c0_59 = arith.constant 0 : index
    %c0_60 = arith.constant 0 : index
    %42 = vector.load %arg7[%c0_59, %c0_60] : memref<128x72xbf16, #tpu.memory_space<vmem>>, vector<128x72xbf16>
    %c0_61 = arith.constant 0 : index
    %c0_62 = arith.constant 0 : index
    %43 = vector.load %arg2[%c0_61, %c0_62] : memref<72x128xbf16, #tpu.memory_space<vmem>>, vector<72x128xbf16>
    %cst_63 = arith.constant dense<0.000000e+00> : vector<128x128xf32>
    %44 = tpu.matmul %42, %43, %cst_63 {dimension_numbers = #tpu.dot_dimension_numbers<[1], [0], [0], [1], [0, 0, 1, 1], [], []>} : vector<128x72xbf16>, vector<72x128xbf16>, vector<128x128xf32> -> vector<128x128xf32>
    %cst_64 = arith.constant 0.000000e+00 : f32
    %45 = vector.broadcast %cst_64 : f32 to vector<128x128xf32>
    %46 = arith.maximumf %44, %45 : vector<128x128xf32>
    %47 = arith.truncf %46 : vector<128x128xf32> to vector<128x128xbf16>
    %48 = vector.shape_cast %47 : vector<128x128xbf16> to vector<1x8x16x128xbf16>
    %c0_65 = arith.constant 0 : index
    %c1_66 = arith.constant 1 : index
    %c1_67 = arith.constant 1 : index
    %c0_68 = arith.constant 0 : index
    %49 = vector.load %arg6[%c0_65, %c1_66, %c1_67, %c0_68] : memref<1x18x24x128xbf16, #tpu.memory_space<vmem>>, vector<1x8x16x128xbf16>
    tpu.vector_store %arg6[%c0_65, %c1_66, %c1_67, %c0_68], %48 {strides = array<i32>} : memref<1x18x24x128xbf16, #tpu.memory_space<vmem>>, vector<1x8x16x128xbf16>,
    %c0_69 = arith.constant 0 : index
    %c8_70 = arith.constant 8 : index
    %c0_71 = arith.constant 0 : index
    %c0_72 = arith.constant 0 : index
    %50 = vector.load %arg1[%c0_69, %c8_70, %c0_71, %c0_72] : memref<1x18x18x8xbf16, #tpu.memory_space<vmem>>, vector<1x8x16x8xbf16>
    %51 = vector.shape_cast %50 : vector<1x8x16x8xbf16> to vector<8x16x8xbf16>
    %52 = vector.shape_cast %51 : vector<8x16x8xbf16> to vector<128x8xbf16>
    %c0_73 = arith.constant 0 : index
    %c0_74 = arith.constant 0 : index
    %53 = vector.load %arg7[%c0_73, %c0_74] : memref<128x72xbf16, #tpu.memory_space<vmem>>, vector<128x8xbf16>
    tpu.vector_store %arg7[%c0_73, %c0_74], %52 {strides = array<i32>} : memref<128x72xbf16, #tpu.memory_space<vmem>>, vector<128x8xbf16>,
    %c0_75 = arith.constant 0 : index
    %c8_76 = arith.constant 8 : index
    %c1_77 = arith.constant 1 : index
    %c0_78 = arith.constant 0 : index
    %54 = vector.load %arg1[%c0_75, %c8_76, %c1_77, %c0_78] : memref<1x18x18x8xbf16, #tpu.memory_space<vmem>>, vector<1x8x16x8xbf16>
    %55 = vector.shape_cast %54 : vector<1x8x16x8xbf16> to vector<8x16x8xbf16>
    %56 = vector.shape_cast %55 : vector<8x16x8xbf16> to vector<128x8xbf16>
    %c0_79 = arith.constant 0 : index
    %c8_80 = arith.constant 8 : index
    %57 = vector.load %arg7[%c0_79, %c8_80] : memref<128x72xbf16, #tpu.memory_space<vmem>>, vector<128x8xbf16>
    tpu.vector_store %arg7[%c0_79, %c8_80], %56 {strides = array<i32>} : memref<128x72xbf16, #tpu.memory_space<vmem>>, vector<128x8xbf16>,
    %c0_81 = arith.constant 0 : index
    %c8_82 = arith.constant 8 : index
    %c2_83 = arith.constant 2 : index
    %c0_84 = arith.constant 0 : index
    %58 = vector.load %arg1[%c0_81, %c8_82, %c2_83, %c0_84] : memref<1x18x18x8xbf16, #tpu.memory_space<vmem>>, vector<1x8x16x8xbf16>
    %59 = vector.shape_cast %58 : vector<1x8x16x8xbf16> to vector<8x16x8xbf16>
    %60 = vector.shape_cast %59 : vector<8x16x8xbf16> to vector<128x8xbf16>
    %c0_85 = arith.constant 0 : index
    %c16_86 = arith.constant 16 : index
    %61 = vector.load %arg7[%c0_85, %c16_86] : memref<128x72xbf16, #tpu.memory_space<vmem>>, vector<128x8xbf16>
    tpu.vector_store %arg7[%c0_85, %c16_86], %60 {strides = array<i32>} : memref<128x72xbf16, #tpu.memory_space<vmem>>, vector<128x8xbf16>,
    %c0_87 = arith.constant 0 : index
    %c9 = arith.constant 9 : index
    %c0_88 = arith.constant 0 : index
    %c0_89 = arith.constant 0 : index
    %62 = vector.load %arg1[%c0_87, %c9, %c0_88, %c0_89] : memref<1x18x18x8xbf16, #tpu.memory_space<vmem>>, vector<1x8x16x8xbf16>
    %63 = vector.shape_cast %62 : vector<1x8x16x8xbf16> to vector<8x16x8xbf16>
    %64 = vector.shape_cast %63 : vector<8x16x8xbf16> to vector<128x8xbf16>
    %c0_90 = arith.constant 0 : index
    %c24_91 = arith.constant 24 : index
    %65 = vector.load %arg7[%c0_90, %c24_91] : memref<128x72xbf16, #tpu.memory_space<vmem>>, vector<128x8xbf16>
    tpu.vector_store %arg7[%c0_90, %c24_91], %64 {strides = array<i32>} : memref<128x72xbf16, #tpu.memory_space<vmem>>, vector<128x8xbf16>,
    %c0_92 = arith.constant 0 : index
    %c9_93 = arith.constant 9 : index
    %c1_94 = arith.constant 1 : index
    %c0_95 = arith.constant 0 : index
    %66 = vector.load %arg1[%c0_92, %c9_93, %c1_94, %c0_95] : memref<1x18x18x8xbf16, #tpu.memory_space<vmem>>, vector<1x8x16x8xbf16>
    %67 = vector.shape_cast %66 : vector<1x8x16x8xbf16> to vector<8x16x8xbf16>
    %68 = vector.shape_cast %67 : vector<8x16x8xbf16> to vector<128x8xbf16>
    %c0_96 = arith.constant 0 : index
    %c32_97 = arith.constant 32 : index
    %69 = vector.load %arg7[%c0_96, %c32_97] : memref<128x72xbf16, #tpu.memory_space<vmem>>, vector<128x8xbf16>
    tpu.vector_store %arg7[%c0_96, %c32_97], %68 {strides = array<i32>} : memref<128x72xbf16, #tpu.memory_space<vmem>>, vector<128x8xbf16>,
    %c0_98 = arith.constant 0 : index
    %c9_99 = arith.constant 9 : index
    %c2_100 = arith.constant 2 : index
    %c0_101 = arith.constant 0 : index
    %70 = vector.load %arg1[%c0_98, %c9_99, %c2_100, %c0_101] : memref<1x18x18x8xbf16, #tpu.memory_space<vmem>>, vector<1x8x16x8xbf16>
    %71 = vector.shape_cast %70 : vector<1x8x16x8xbf16> to vector<8x16x8xbf16>
    %72 = vector.shape_cast %71 : vector<8x16x8xbf16> to vector<128x8xbf16>
    %c0_102 = arith.constant 0 : index
    %c40_103 = arith.constant 40 : index
    %73 = vector.load %arg7[%c0_102, %c40_103] : memref<128x72xbf16, #tpu.memory_space<vmem>>, vector<128x8xbf16>
    tpu.vector_store %arg7[%c0_102, %c40_103], %72 {strides = array<i32>} : memref<128x72xbf16, #tpu.memory_space<vmem>>, vector<128x8xbf16>,
    %c0_104 = arith.constant 0 : index
    %c10 = arith.constant 10 : index
    %c0_105 = arith.constant 0 : index
    %c0_106 = arith.constant 0 : index
    %74 = vector.load %arg1[%c0_104, %c10, %c0_105, %c0_106] : memref<1x18x18x8xbf16, #tpu.memory_space<vmem>>, vector<1x8x16x8xbf16>
    %75 = vector.shape_cast %74 : vector<1x8x16x8xbf16> to vector<8x16x8xbf16>
    %76 = vector.shape_cast %75 : vector<8x16x8xbf16> to vector<128x8xbf16>
    %c0_107 = arith.constant 0 : index
    %c48_108 = arith.constant 48 : index
    %77 = vector.load %arg7[%c0_107, %c48_108] : memref<128x72xbf16, #tpu.memory_space<vmem>>, vector<128x8xbf16>
    tpu.vector_store %arg7[%c0_107, %c48_108], %76 {strides = array<i32>} : memref<128x72xbf16, #tpu.memory_space<vmem>>, vector<128x8xbf16>,
    %c0_109 = arith.constant 0 : index
    %c10_110 = arith.constant 10 : index
    %c1_111 = arith.constant 1 : index
    %c0_112 = arith.constant 0 : index
    %78 = vector.load %arg1[%c0_109, %c10_110, %c1_111, %c0_112] : memref<1x18x18x8xbf16, #tpu.memory_space<vmem>>, vector<1x8x16x8xbf16>
    %79 = vector.shape_cast %78 : vector<1x8x16x8xbf16> to vector<8x16x8xbf16>
    %80 = vector.shape_cast %79 : vector<8x16x8xbf16> to vector<128x8xbf16>
    %c0_113 = arith.constant 0 : index
    %c56_114 = arith.constant 56 : index
    %81 = vector.load %arg7[%c0_113, %c56_114] : memref<128x72xbf16, #tpu.memory_space<vmem>>, vector<128x8xbf16>
    tpu.vector_store %arg7[%c0_113, %c56_114], %80 {strides = array<i32>} : memref<128x72xbf16, #tpu.memory_space<vmem>>, vector<128x8xbf16>,
    %c0_115 = arith.constant 0 : index
    %c10_116 = arith.constant 10 : index
    %c2_117 = arith.constant 2 : index
    %c0_118 = arith.constant 0 : index
    %82 = vector.load %arg1[%c0_115, %c10_116, %c2_117, %c0_118] : memref<1x18x18x8xbf16, #tpu.memory_space<vmem>>, vector<1x8x16x8xbf16>
    %83 = vector.shape_cast %82 : vector<1x8x16x8xbf16> to vector<8x16x8xbf16>
    %84 = vector.shape_cast %83 : vector<8x16x8xbf16> to vector<128x8xbf16>
    %c0_119 = arith.constant 0 : index
    %c64_120 = arith.constant 64 : index
    %85 = vector.load %arg7[%c0_119, %c64_120] : memref<128x72xbf16, #tpu.memory_space<vmem>>, vector<128x8xbf16>
    tpu.vector_store %arg7[%c0_119, %c64_120], %84 {strides = array<i32>} : memref<128x72xbf16, #tpu.memory_space<vmem>>, vector<128x8xbf16>,
    %c0_121 = arith.constant 0 : index
    %c0_122 = arith.constant 0 : index
    %86 = vector.load %arg7[%c0_121, %c0_122] : memref<128x72xbf16, #tpu.memory_space<vmem>>, vector<128x72xbf16>
    %c0_123 = arith.constant 0 : index
    %c0_124 = arith.constant 0 : index
    %87 = vector.load %arg2[%c0_123, %c0_124] : memref<72x128xbf16, #tpu.memory_space<vmem>>, vector<72x128xbf16>
    %cst_125 = arith.constant dense<0.000000e+00> : vector<128x128xf32>
    %88 = tpu.matmul %86, %87, %cst_125 {dimension_numbers = #tpu.dot_dimension_numbers<[1], [0], [0], [1], [0, 0, 1, 1], [], []>} : vector<128x72xbf16>, vector<72x128xbf16>, vector<128x128xf32> -> vector<128x128xf32>
    %cst_126 = arith.constant 0.000000e+00 : f32
    %89 = vector.broadcast %cst_126 : f32 to vector<128x128xf32>
    %90 = arith.maximumf %88, %89 : vector<128x128xf32>
    %91 = arith.truncf %90 : vector<128x128xf32> to vector<128x128xbf16>
    %92 = vector.shape_cast %91 : vector<128x128xbf16> to vector<1x8x16x128xbf16>
    %c0_127 = arith.constant 0 : index
    %c9_128 = arith.constant 9 : index
    %c1_129 = arith.constant 1 : index
    %c0_130 = arith.constant 0 : index
    %93 = vector.load %arg6[%c0_127, %c9_128, %c1_129, %c0_130] : memref<1x18x24x128xbf16, #tpu.memory_space<vmem>>, vector<1x8x16x128xbf16>
    tpu.vector_store %arg6[%c0_127, %c9_128, %c1_129, %c0_130], %92 {strides = array<i32>} : memref<1x18x24x128xbf16, #tpu.memory_space<vmem>>, vector<1x8x16x128xbf16>,
    %cst_131 = arith.constant 0.000000e+00 : f32
    %94 = vector.broadcast %cst_131 : f32 to vector<128x128xf32>
    %c0_132 = arith.constant 0 : index
    %c0_133 = arith.constant 0 : index
    %c0_134 = arith.constant 0 : index
    %c0_135 = arith.constant 0 : index
    %95 = vector.load %arg6[%c0_132, %c0_133, %c0_134, %c0_135] : memref<1x18x24x128xbf16, #tpu.memory_space<vmem>>, vector<1x8x16x128xbf16>
    %96 = vector.shape_cast %95 : vector<1x8x16x128xbf16> to vector<128x128xbf16>
    %c0_136 = arith.constant 0 : index
    %c0_137 = arith.constant 0 : index
    %c0_138 = arith.constant 0 : index
    %97 = vector.load %arg3[%c0_136, %c0_137, %c0_138] : memref<9x128x128xbf16, #tpu.memory_space<vmem>>, vector<1x128x128xbf16>
    %98 = vector.shape_cast %97 : vector<1x128x128xbf16> to vector<128x128xbf16>
    %cst_139 = arith.constant dense<0.000000e+00> : vector<128x128xf32>
    %99 = tpu.matmul %96, %98, %cst_139 {dimension_numbers = #tpu.dot_dimension_numbers<[1], [0], [0], [1], [0, 0, 1, 1], [], []>} : vector<128x128xbf16>, vector<128x128xbf16>, vector<128x128xf32> -> vector<128x128xf32>
    %100 = arith.addf %94, %99 : vector<128x128xf32>
    %c0_140 = arith.constant 0 : index
    %c0_141 = arith.constant 0 : index
    %c1_142 = arith.constant 1 : index
    %c0_143 = arith.constant 0 : index
    %101 = vector.load %arg6[%c0_140, %c0_141, %c1_142, %c0_143] : memref<1x18x24x128xbf16, #tpu.memory_space<vmem>>, vector<1x8x16x128xbf16>
    %102 = vector.shape_cast %101 : vector<1x8x16x128xbf16> to vector<128x128xbf16>
    %c1_144 = arith.constant 1 : index
    %c0_145 = arith.constant 0 : index
    %c0_146 = arith.constant 0 : index
    %103 = vector.load %arg3[%c1_144, %c0_145, %c0_146] : memref<9x128x128xbf16, #tpu.memory_space<vmem>>, vector<1x128x128xbf16>
    %104 = vector.shape_cast %103 : vector<1x128x128xbf16> to vector<128x128xbf16>
    %cst_147 = arith.constant dense<0.000000e+00> : vector<128x128xf32>
    %105 = tpu.matmul %102, %104, %cst_147 {dimension_numbers = #tpu.dot_dimension_numbers<[1], [0], [0], [1], [0, 0, 1, 1], [], []>} : vector<128x128xbf16>, vector<128x128xbf16>, vector<128x128xf32> -> vector<128x128xf32>
    %106 = arith.addf %100, %105 : vector<128x128xf32>
    %c0_148 = arith.constant 0 : index
    %c0_149 = arith.constant 0 : index
    %c2_150 = arith.constant 2 : index
    %c0_151 = arith.constant 0 : index
    %107 = vector.load %arg6[%c0_148, %c0_149, %c2_150, %c0_151] : memref<1x18x24x128xbf16, #tpu.memory_space<vmem>>, vector<1x8x16x128xbf16>
    %108 = vector.shape_cast %107 : vector<1x8x16x128xbf16> to vector<128x128xbf16>
    %c2_152 = arith.constant 2 : index
    %c0_153 = arith.constant 0 : index
    %c0_154 = arith.constant 0 : index
    %109 = vector.load %arg3[%c2_152, %c0_153, %c0_154] : memref<9x128x128xbf16, #tpu.memory_space<vmem>>, vector<1x128x128xbf16>
    %110 = vector.shape_cast %109 : vector<1x128x128xbf16> to vector<128x128xbf16>
    %cst_155 = arith.constant dense<0.000000e+00> : vector<128x128xf32>
    %111 = tpu.matmul %108, %110, %cst_155 {dimension_numbers = #tpu.dot_dimension_numbers<[1], [0], [0], [1], [0, 0, 1, 1], [], []>} : vector<128x128xbf16>, vector<128x128xbf16>, vector<128x128xf32> -> vector<128x128xf32>
    %112 = arith.addf %106, %111 : vector<128x128xf32>
    %c0_156 = arith.constant 0 : index
    %c1_157 = arith.constant 1 : index
    %c0_158 = arith.constant 0 : index
    %c0_159 = arith.constant 0 : index
    %113 = vector.load %arg6[%c0_156, %c1_157, %c0_158, %c0_159] : memref<1x18x24x128xbf16, #tpu.memory_space<vmem>>, vector<1x8x16x128xbf16>
    %114 = vector.shape_cast %113 : vector<1x8x16x128xbf16> to vector<128x128xbf16>
    %c3 = arith.constant 3 : index
    %c0_160 = arith.constant 0 : index
    %c0_161 = arith.constant 0 : index
    %115 = vector.load %arg3[%c3, %c0_160, %c0_161] : memref<9x128x128xbf16, #tpu.memory_space<vmem>>, vector<1x128x128xbf16>
    %116 = vector.shape_cast %115 : vector<1x128x128xbf16> to vector<128x128xbf16>
    %cst_162 = arith.constant dense<0.000000e+00> : vector<128x128xf32>
    %117 = tpu.matmul %114, %116, %cst_162 {dimension_numbers = #tpu.dot_dimension_numbers<[1], [0], [0], [1], [0, 0, 1, 1], [], []>} : vector<128x128xbf16>, vector<128x128xbf16>, vector<128x128xf32> -> vector<128x128xf32>
    %118 = arith.addf %112, %117 : vector<128x128xf32>
    %c0_163 = arith.constant 0 : index
    %c1_164 = arith.constant 1 : index
    %c1_165 = arith.constant 1 : index
    %c0_166 = arith.constant 0 : index
    %119 = vector.load %arg6[%c0_163, %c1_164, %c1_165, %c0_166] : memref<1x18x24x128xbf16, #tpu.memory_space<vmem>>, vector<1x8x16x128xbf16>
    %120 = vector.shape_cast %119 : vector<1x8x16x128xbf16> to vector<128x128xbf16>
    %c4 = arith.constant 4 : index
    %c0_167 = arith.constant 0 : index
    %c0_168 = arith.constant 0 : index
    %121 = vector.load %arg3[%c4, %c0_167, %c0_168] : memref<9x128x128xbf16, #tpu.memory_space<vmem>>, vector<1x128x128xbf16>
    %122 = vector.shape_cast %121 : vector<1x128x128xbf16> to vector<128x128xbf16>
    %cst_169 = arith.constant dense<0.000000e+00> : vector<128x128xf32>
    %123 = tpu.matmul %120, %122, %cst_169 {dimension_numbers = #tpu.dot_dimension_numbers<[1], [0], [0], [1], [0, 0, 1, 1], [], []>} : vector<128x128xbf16>, vector<128x128xbf16>, vector<128x128xf32> -> vector<128x128xf32>
    %124 = arith.addf %118, %123 : vector<128x128xf32>
    %c0_170 = arith.constant 0 : index
    %c1_171 = arith.constant 1 : index
    %c2_172 = arith.constant 2 : index
    %c0_173 = arith.constant 0 : index
    %125 = vector.load %arg6[%c0_170, %c1_171, %c2_172, %c0_173] : memref<1x18x24x128xbf16, #tpu.memory_space<vmem>>, vector<1x8x16x128xbf16>
    %126 = vector.shape_cast %125 : vector<1x8x16x128xbf16> to vector<128x128xbf16>
    %c5 = arith.constant 5 : index
    %c0_174 = arith.constant 0 : index
    %c0_175 = arith.constant 0 : index
    %127 = vector.load %arg3[%c5, %c0_174, %c0_175] : memref<9x128x128xbf16, #tpu.memory_space<vmem>>, vector<1x128x128xbf16>
    %128 = vector.shape_cast %127 : vector<1x128x128xbf16> to vector<128x128xbf16>
    %cst_176 = arith.constant dense<0.000000e+00> : vector<128x128xf32>
    %129 = tpu.matmul %126, %128, %cst_176 {dimension_numbers = #tpu.dot_dimension_numbers<[1], [0], [0], [1], [0, 0, 1, 1], [], []>} : vector<128x128xbf16>, vector<128x128xbf16>, vector<128x128xf32> -> vector<128x128xf32>
    %130 = arith.addf %124, %129 : vector<128x128xf32>
    %c0_177 = arith.constant 0 : index
    %c2_178 = arith.constant 2 : index
    %c0_179 = arith.constant 0 : index
    %c0_180 = arith.constant 0 : index
    %131 = vector.load %arg6[%c0_177, %c2_178, %c0_179, %c0_180] : memref<1x18x24x128xbf16, #tpu.memory_space<vmem>>, vector<1x8x16x128xbf16>
    %132 = vector.shape_cast %131 : vector<1x8x16x128xbf16> to vector<128x128xbf16>
    %c6 = arith.constant 6 : index
    %c0_181 = arith.constant 0 : index
    %c0_182 = arith.constant 0 : index
    %133 = vector.load %arg3[%c6, %c0_181, %c0_182] : memref<9x128x128xbf16, #tpu.memory_space<vmem>>, vector<1x128x128xbf16>
    %134 = vector.shape_cast %133 : vector<1x128x128xbf16> to vector<128x128xbf16>
    %cst_183 = arith.constant dense<0.000000e+00> : vector<128x128xf32>
    %135 = tpu.matmul %132, %134, %cst_183 {dimension_numbers = #tpu.dot_dimension_numbers<[1], [0], [0], [1], [0, 0, 1, 1], [], []>} : vector<128x128xbf16>, vector<128x128xbf16>, vector<128x128xf32> -> vector<128x128xf32>
    %136 = arith.addf %130, %135 : vector<128x128xf32>
    %c0_184 = arith.constant 0 : index
    %c2_185 = arith.constant 2 : index
    %c1_186 = arith.constant 1 : index
    %c0_187 = arith.constant 0 : index
    %137 = vector.load %arg6[%c0_184, %c2_185, %c1_186, %c0_187] : memref<1x18x24x128xbf16, #tpu.memory_space<vmem>>, vector<1x8x16x128xbf16>
    %138 = vector.shape_cast %137 : vector<1x8x16x128xbf16> to vector<128x128xbf16>
    %c7 = arith.constant 7 : index
    %c0_188 = arith.constant 0 : index
    %c0_189 = arith.constant 0 : index
    %139 = vector.load %arg3[%c7, %c0_188, %c0_189] : memref<9x128x128xbf16, #tpu.memory_space<vmem>>, vector<1x128x128xbf16>
    %140 = vector.shape_cast %139 : vector<1x128x128xbf16> to vector<128x128xbf16>
    %cst_190 = arith.constant dense<0.000000e+00> : vector<128x128xf32>
    %141 = tpu.matmul %138, %140, %cst_190 {dimension_numbers = #tpu.dot_dimension_numbers<[1], [0], [0], [1], [0, 0, 1, 1], [], []>} : vector<128x128xbf16>, vector<128x128xbf16>, vector<128x128xf32> -> vector<128x128xf32>
    %142 = arith.addf %136, %141 : vector<128x128xf32>
    %c0_191 = arith.constant 0 : index
    %c2_192 = arith.constant 2 : index
    %c2_193 = arith.constant 2 : index
    %c0_194 = arith.constant 0 : index
    %143 = vector.load %arg6[%c0_191, %c2_192, %c2_193, %c0_194] : memref<1x18x24x128xbf16, #tpu.memory_space<vmem>>, vector<1x8x16x128xbf16>
    %144 = vector.shape_cast %143 : vector<1x8x16x128xbf16> to vector<128x128xbf16>
    %c8_195 = arith.constant 8 : index
    %c0_196 = arith.constant 0 : index
    %c0_197 = arith.constant 0 : index
    %145 = vector.load %arg3[%c8_195, %c0_196, %c0_197] : memref<9x128x128xbf16, #tpu.memory_space<vmem>>, vector<1x128x128xbf16>
    %146 = vector.shape_cast %145 : vector<1x128x128xbf16> to vector<128x128xbf16>
    %cst_198 = arith.constant dense<0.000000e+00> : vector<128x128xf32>
    %147 = tpu.matmul %144, %146, %cst_198 {dimension_numbers = #tpu.dot_dimension_numbers<[1], [0], [0], [1], [0, 0, 1, 1], [], []>} : vector<128x128xbf16>, vector<128x128xbf16>, vector<128x128xf32> -> vector<128x128xf32>
    %148 = arith.addf %142, %147 : vector<128x128xf32>
    %cst_199 = arith.constant 0.000000e+00 : f32
    %149 = vector.broadcast %cst_199 : f32 to vector<128x128xf32>
    %150 = arith.maximumf %148, %149 : vector<128x128xf32>
    %c0_200 = arith.constant 0 : index
    %c1_201 = arith.constant 1 : index
    %c1_202 = arith.constant 1 : index
    %c0_203 = arith.constant 0 : index
    %151 = vector.load %arg1[%c0_200, %c1_201, %c1_202, %c0_203] : memref<1x18x18x8xbf16, #tpu.memory_space<vmem>>, vector<1x8x16x8xbf16>
    %152 = vector.shape_cast %151 : vector<1x8x16x8xbf16> to vector<8x16x8xbf16>
    %153 = vector.shape_cast %152 : vector<8x16x8xbf16> to vector<128x8xbf16>
    %c0_204 = arith.constant 0 : index
    %c0_205 = arith.constant 0 : index
    %154 = vector.load %arg4[%c0_204, %c0_205] : memref<8x128xbf16, #tpu.memory_space<vmem>>, vector<8x128xbf16>
    %cst_206 = arith.constant dense<0.000000e+00> : vector<128x128xf32>
    %155 = tpu.matmul %153, %154, %cst_206 {dimension_numbers = #tpu.dot_dimension_numbers<[1], [0], [0], [1], [0, 0, 1, 1], [], []>} : vector<128x8xbf16>, vector<8x128xbf16>, vector<128x128xf32> -> vector<128x128xf32>
    %cst_207 = arith.constant 0.000000e+00 : f32
    %156 = vector.broadcast %cst_207 : f32 to vector<128x128xf32>
    %157 = arith.maximumf %155, %156 : vector<128x128xf32>
    %158 = arith.addf %150, %157 : vector<128x128xf32>
    %cst_208 = arith.constant 0.000000e+00 : f32
    %159 = vector.broadcast %cst_208 : f32 to vector<128x128xf32>
    %160 = arith.maximumf %158, %159 : vector<128x128xf32>
    %161 = vector.shape_cast %160 : vector<128x128xf32> to vector<1x8x16x128xf32>
    %162 = arith.truncf %161 : vector<1x8x16x128xf32> to vector<1x8x16x128xbf16>
    %c0_209 = arith.constant 0 : index
    %c0_210 = arith.constant 0 : index
    %c0_211 = arith.constant 0 : index
    %c0_212 = arith.constant 0 : index
    %163 = vector.load %arg5[%c0_209, %c0_210, %c0_211, %c0_212] : memref<1x16x16x128xbf16, #tpu.memory_space<vmem>>, vector<1x8x16x128xbf16>
    tpu.vector_store %arg5[%c0_209, %c0_210, %c0_211, %c0_212], %162 {strides = array<i32>} : memref<1x16x16x128xbf16, #tpu.memory_space<vmem>>, vector<1x8x16x128xbf16>,
    %cst_213 = arith.constant 0.000000e+00 : f32
    %164 = vector.broadcast %cst_213 : f32 to vector<128x128xf32>
    %c0_214 = arith.constant 0 : index
    %c8_215 = arith.constant 8 : index
    %c0_216 = arith.constant 0 : index
    %c0_217 = arith.constant 0 : index
    %165 = vector.load %arg6[%c0_214, %c8_215, %c0_216, %c0_217] : memref<1x18x24x128xbf16, #tpu.memory_space<vmem>>, vector<1x8x16x128xbf16>
    %166 = vector.shape_cast %165 : vector<1x8x16x128xbf16> to vector<128x128xbf16>
    %c0_218 = arith.constant 0 : index
    %c0_219 = arith.constant 0 : index
    %c0_220 = arith.constant 0 : index
    %167 = vector.load %arg3[%c0_218, %c0_219, %c0_220] : memref<9x128x128xbf16, #tpu.memory_space<vmem>>, vector<1x128x128xbf16>
    %168 = vector.shape_cast %167 : vector<1x128x128xbf16> to vector<128x128xbf16>
    %cst_221 = arith.constant dense<0.000000e+00> : vector<128x128xf32>
    %169 = tpu.matmul %166, %168, %cst_221 {dimension_numbers = #tpu.dot_dimension_numbers<[1], [0], [0], [1], [0, 0, 1, 1], [], []>} : vector<128x128xbf16>, vector<128x128xbf16>, vector<128x128xf32> -> vector<128x128xf32>
    %170 = arith.addf %164, %169 : vector<128x128xf32>
    %c0_222 = arith.constant 0 : index
    %c8_223 = arith.constant 8 : index
    %c1_224 = arith.constant 1 : index
    %c0_225 = arith.constant 0 : index
    %171 = vector.load %arg6[%c0_222, %c8_223, %c1_224, %c0_225] : memref<1x18x24x128xbf16, #tpu.memory_space<vmem>>, vector<1x8x16x128xbf16>
    %172 = vector.shape_cast %171 : vector<1x8x16x128xbf16> to vector<128x128xbf16>
    %c1_226 = arith.constant 1 : index
    %c0_227 = arith.constant 0 : index
    %c0_228 = arith.constant 0 : index
    %173 = vector.load %arg3[%c1_226, %c0_227, %c0_228] : memref<9x128x128xbf16, #tpu.memory_space<vmem>>, vector<1x128x128xbf16>
    %174 = vector.shape_cast %173 : vector<1x128x128xbf16> to vector<128x128xbf16>
    %cst_229 = arith.constant dense<0.000000e+00> : vector<128x128xf32>
    %175 = tpu.matmul %172, %174, %cst_229 {dimension_numbers = #tpu.dot_dimension_numbers<[1], [0], [0], [1], [0, 0, 1, 1], [], []>} : vector<128x128xbf16>, vector<128x128xbf16>, vector<128x128xf32> -> vector<128x128xf32>
    %176 = arith.addf %170, %175 : vector<128x128xf32>
    %c0_230 = arith.constant 0 : index
    %c8_231 = arith.constant 8 : index
    %c2_232 = arith.constant 2 : index
    %c0_233 = arith.constant 0 : index
    %177 = vector.load %arg6[%c0_230, %c8_231, %c2_232, %c0_233] : memref<1x18x24x128xbf16, #tpu.memory_space<vmem>>, vector<1x8x16x128xbf16>
    %178 = vector.shape_cast %177 : vector<1x8x16x128xbf16> to vector<128x128xbf16>
    %c2_234 = arith.constant 2 : index
    %c0_235 = arith.constant 0 : index
    %c0_236 = arith.constant 0 : index
    %179 = vector.load %arg3[%c2_234, %c0_235, %c0_236] : memref<9x128x128xbf16, #tpu.memory_space<vmem>>, vector<1x128x128xbf16>
    %180 = vector.shape_cast %179 : vector<1x128x128xbf16> to vector<128x128xbf16>
    %cst_237 = arith.constant dense<0.000000e+00> : vector<128x128xf32>
    %181 = tpu.matmul %178, %180, %cst_237 {dimension_numbers = #tpu.dot_dimension_numbers<[1], [0], [0], [1], [0, 0, 1, 1], [], []>} : vector<128x128xbf16>, vector<128x128xbf16>, vector<128x128xf32> -> vector<128x128xf32>
    %182 = arith.addf %176, %181 : vector<128x128xf32>
    %c0_238 = arith.constant 0 : index
    %c9_239 = arith.constant 9 : index
    %c0_240 = arith.constant 0 : index
    %c0_241 = arith.constant 0 : index
    %183 = vector.load %arg6[%c0_238, %c9_239, %c0_240, %c0_241] : memref<1x18x24x128xbf16, #tpu.memory_space<vmem>>, vector<1x8x16x128xbf16>
    %184 = vector.shape_cast %183 : vector<1x8x16x128xbf16> to vector<128x128xbf16>
    %c3_242 = arith.constant 3 : index
    %c0_243 = arith.constant 0 : index
    %c0_244 = arith.constant 0 : index
    %185 = vector.load %arg3[%c3_242, %c0_243, %c0_244] : memref<9x128x128xbf16, #tpu.memory_space<vmem>>, vector<1x128x128xbf16>
    %186 = vector.shape_cast %185 : vector<1x128x128xbf16> to vector<128x128xbf16>
    %cst_245 = arith.constant dense<0.000000e+00> : vector<128x128xf32>
    %187 = tpu.matmul %184, %186, %cst_245 {dimension_numbers = #tpu.dot_dimension_numbers<[1], [0], [0], [1], [0, 0, 1, 1], [], []>} : vector<128x128xbf16>, vector<128x128xbf16>, vector<128x128xf32> -> vector<128x128xf32>
    %188 = arith.addf %182, %187 : vector<128x128xf32>
    %c0_246 = arith.constant 0 : index
    %c9_247 = arith.constant 9 : index
    %c1_248 = arith.constant 1 : index
    %c0_249 = arith.constant 0 : index
    %189 = vector.load %arg6[%c0_246, %c9_247, %c1_248, %c0_249] : memref<1x18x24x128xbf16, #tpu.memory_space<vmem>>, vector<1x8x16x128xbf16>
    %190 = vector.shape_cast %189 : vector<1x8x16x128xbf16> to vector<128x128xbf16>
    %c4_250 = arith.constant 4 : index
    %c0_251 = arith.constant 0 : index
    %c0_252 = arith.constant 0 : index
    %191 = vector.load %arg3[%c4_250, %c0_251, %c0_252] : memref<9x128x128xbf16, #tpu.memory_space<vmem>>, vector<1x128x128xbf16>
    %192 = vector.shape_cast %191 : vector<1x128x128xbf16> to vector<128x128xbf16>
    %cst_253 = arith.constant dense<0.000000e+00> : vector<128x128xf32>
    %193 = tpu.matmul %190, %192, %cst_253 {dimension_numbers = #tpu.dot_dimension_numbers<[1], [0], [0], [1], [0, 0, 1, 1], [], []>} : vector<128x128xbf16>, vector<128x128xbf16>, vector<128x128xf32> -> vector<128x128xf32>
    %194 = arith.addf %188, %193 : vector<128x128xf32>
    %c0_254 = arith.constant 0 : index
    %c9_255 = arith.constant 9 : index
    %c2_256 = arith.constant 2 : index
    %c0_257 = arith.constant 0 : index
    %195 = vector.load %arg6[%c0_254, %c9_255, %c2_256, %c0_257] : memref<1x18x24x128xbf16, #tpu.memory_space<vmem>>, vector<1x8x16x128xbf16>
    %196 = vector.shape_cast %195 : vector<1x8x16x128xbf16> to vector<128x128xbf16>
    %c5_258 = arith.constant 5 : index
    %c0_259 = arith.constant 0 : index
    %c0_260 = arith.constant 0 : index
    %197 = vector.load %arg3[%c5_258, %c0_259, %c0_260] : memref<9x128x128xbf16, #tpu.memory_space<vmem>>, vector<1x128x128xbf16>
    %198 = vector.shape_cast %197 : vector<1x128x128xbf16> to vector<128x128xbf16>
    %cst_261 = arith.constant dense<0.000000e+00> : vector<128x128xf32>
    %199 = tpu.matmul %196, %198, %cst_261 {dimension_numbers = #tpu.dot_dimension_numbers<[1], [0], [0], [1], [0, 0, 1, 1], [], []>} : vector<128x128xbf16>, vector<128x128xbf16>, vector<128x128xf32> -> vector<128x128xf32>
    %200 = arith.addf %194, %199 : vector<128x128xf32>
    %c0_262 = arith.constant 0 : index
    %c10_263 = arith.constant 10 : index
    %c0_264 = arith.constant 0 : index
    %c0_265 = arith.constant 0 : index
    %201 = vector.load %arg6[%c0_262, %c10_263, %c0_264, %c0_265] : memref<1x18x24x128xbf16, #tpu.memory_space<vmem>>, vector<1x8x16x128xbf16>
    %202 = vector.shape_cast %201 : vector<1x8x16x128xbf16> to vector<128x128xbf16>
    %c6_266 = arith.constant 6 : index
    %c0_267 = arith.constant 0 : index
    %c0_268 = arith.constant 0 : index
    %203 = vector.load %arg3[%c6_266, %c0_267, %c0_268] : memref<9x128x128xbf16, #tpu.memory_space<vmem>>, vector<1x128x128xbf16>
    %204 = vector.shape_cast %203 : vector<1x128x128xbf16> to vector<128x128xbf16>
    %cst_269 = arith.constant dense<0.000000e+00> : vector<128x128xf32>
    %205 = tpu.matmul %202, %204, %cst_269 {dimension_numbers = #tpu.dot_dimension_numbers<[1], [0], [0], [1], [0, 0, 1, 1], [], []>} : vector<128x128xbf16>, vector<128x128xbf16>, vector<128x128xf32> -> vector<128x128xf32>
    %206 = arith.addf %200, %205 : vector<128x128xf32>
    %c0_270 = arith.constant 0 : index
    %c10_271 = arith.constant 10 : index
    %c1_272 = arith.constant 1 : index
    %c0_273 = arith.constant 0 : index
    %207 = vector.load %arg6[%c0_270, %c10_271, %c1_272, %c0_273] : memref<1x18x24x128xbf16, #tpu.memory_space<vmem>>, vector<1x8x16x128xbf16>
    %208 = vector.shape_cast %207 : vector<1x8x16x128xbf16> to vector<128x128xbf16>
    %c7_274 = arith.constant 7 : index
    %c0_275 = arith.constant 0 : index
    %c0_276 = arith.constant 0 : index
    %209 = vector.load %arg3[%c7_274, %c0_275, %c0_276] : memref<9x128x128xbf16, #tpu.memory_space<vmem>>, vector<1x128x128xbf16>
    %210 = vector.shape_cast %209 : vector<1x128x128xbf16> to vector<128x128xbf16>
    %cst_277 = arith.constant dense<0.000000e+00> : vector<128x128xf32>
    %211 = tpu.matmul %208, %210, %cst_277 {dimension_numbers = #tpu.dot_dimension_numbers<[1], [0], [0], [1], [0, 0, 1, 1], [], []>} : vector<128x128xbf16>, vector<128x128xbf16>, vector<128x128xf32> -> vector<128x128xf32>
    %212 = arith.addf %206, %211 : vector<128x128xf32>
    %c0_278 = arith.constant 0 : index
    %c10_279 = arith.constant 10 : index
    %c2_280 = arith.constant 2 : index
    %c0_281 = arith.constant 0 : index
    %213 = vector.load %arg6[%c0_278, %c10_279, %c2_280, %c0_281] : memref<1x18x24x128xbf16, #tpu.memory_space<vmem>>, vector<1x8x16x128xbf16>
    %214 = vector.shape_cast %213 : vector<1x8x16x128xbf16> to vector<128x128xbf16>
    %c8_282 = arith.constant 8 : index
    %c0_283 = arith.constant 0 : index
    %c0_284 = arith.constant 0 : index
    %215 = vector.load %arg3[%c8_282, %c0_283, %c0_284] : memref<9x128x128xbf16, #tpu.memory_space<vmem>>, vector<1x128x128xbf16>
    %216 = vector.shape_cast %215 : vector<1x128x128xbf16> to vector<128x128xbf16>
    %cst_285 = arith.constant dense<0.000000e+00> : vector<128x128xf32>
    %217 = tpu.matmul %214, %216, %cst_285 {dimension_numbers = #tpu.dot_dimension_numbers<[1], [0], [0], [1], [0, 0, 1, 1], [], []>} : vector<128x128xbf16>, vector<128x128xbf16>, vector<128x128xf32> -> vector<128x128xf32>
    %218 = arith.addf %212, %217 : vector<128x128xf32>
    %cst_286 = arith.constant 0.000000e+00 : f32
    %219 = vector.broadcast %cst_286 : f32 to vector<128x128xf32>
    %220 = arith.maximumf %218, %219 : vector<128x128xf32>
    %c0_287 = arith.constant 0 : index
    %c9_288 = arith.constant 9 : index
    %c1_289 = arith.constant 1 : index
    %c0_290 = arith.constant 0 : index
    %221 = vector.load %arg1[%c0_287, %c9_288, %c1_289, %c0_290] : memref<1x18x18x8xbf16, #tpu.memory_space<vmem>>, vector<1x8x16x8xbf16>
    %222 = vector.shape_cast %221 : vector<1x8x16x8xbf16> to vector<8x16x8xbf16>
    %223 = vector.shape_cast %222 : vector<8x16x8xbf16> to vector<128x8xbf16>
    %c0_291 = arith.constant 0 : index
    %c0_292 = arith.constant 0 : index
    %224 = vector.load %arg4[%c0_291, %c0_292] : memref<8x128xbf16, #tpu.memory_space<vmem>>, vector<8x128xbf16>
    %cst_293 = arith.constant dense<0.000000e+00> : vector<128x128xf32>
    %225 = tpu.matmul %223, %224, %cst_293 {dimension_numbers = #tpu.dot_dimension_numbers<[1], [0], [0], [1], [0, 0, 1, 1], [], []>} : vector<128x8xbf16>, vector<8x128xbf16>, vector<128x128xf32> -> vector<128x128xf32>
    %cst_294 = arith.constant 0.000000e+00 : f32
    %226 = vector.broadcast %cst_294 : f32 to vector<128x128xf32>
    %227 = arith.maximumf %225, %226 : vector<128x128xf32>
    %228 = arith.addf %220, %227 : vector<128x128xf32>
    %cst_295 = arith.constant 0.000000e+00 : f32
    %229 = vector.broadcast %cst_295 : f32 to vector<128x128xf32>
    %230 = arith.maximumf %228, %229 : vector<128x128xf32>
    %231 = vector.shape_cast %230 : vector<128x128xf32> to vector<1x8x16x128xf32>
    %232 = arith.truncf %231 : vector<1x8x16x128xf32> to vector<1x8x16x128xbf16>
    %c0_296 = arith.constant 0 : index
    %c8_297 = arith.constant 8 : index
    %c0_298 = arith.constant 0 : index
    %c0_299 = arith.constant 0 : index
    %233 = vector.load %arg5[%c0_296, %c8_297, %c0_298, %c0_299] : memref<1x16x16x128xbf16, #tpu.memory_space<vmem>>, vector<1x8x16x128xbf16>
    tpu.vector_store %arg5[%c0_296, %c8_297, %c0_298, %c0_299], %232 {strides = array<i32>} : memref<1x16x16x128xbf16, #tpu.memory_space<vmem>>, vector<1x8x16x128xbf16>,
    return
  }
  func.func @transform_0(%arg0: i32) -> (i32, i32, i32, i32) {
    %c0_i32 = arith.constant 0 : i32
    %c0_i32_0 = arith.constant 0 : i32
    %c0_i32_1 = arith.constant 0 : i32
    %c0_i32_2 = arith.constant 0 : i32
    return %arg0, %c0_i32, %c0_i32_0, %c0_i32_1 : i32, i32, i32, i32
  }
  func.func @transform_1(%arg0: i32) -> (i32, i32) {
    %c0_i32 = arith.constant 0 : i32
    %c0_i32_0 = arith.constant 0 : i32
    %c0_i32_1 = arith.constant 0 : i32
    return %c0_i32, %c0_i32_0 : i32, i32
  }
  func.func @transform_2(%arg0: i32) -> (i32, i32, i32) {
    %c0_i32 = arith.constant 0 : i32
    %c0_i32_0 = arith.constant 0 : i32
    %c0_i32_1 = arith.constant 0 : i32
    %c0_i32_2 = arith.constant 0 : i32
    return %c0_i32, %c0_i32_0, %c0_i32_1 : i32, i32, i32
  }
  func.func @transform_3(%arg0: i32) -> (i32, i32) {
    %c0_i32 = arith.constant 0 : i32
    %c0_i32_0 = arith.constant 0 : i32
    %c0_i32_1 = arith.constant 0 : i32
    return %c0_i32, %c0_i32_0 : i32, i32
  }
  func.func @transform_4(%arg0: i32) -> (i32, i32, i32, i32) {
    %c0_i32 = arith.constant 0 : i32
    %c0_i32_0 = arith.constant 0 : i32
    %c0_i32_1 = arith.constant 0 : i32
    %c0_i32_2 = arith.constant 0 : i32
    return %arg0, %c0_i32, %c0_i32_0, %c0_i32_1 : i32, i32, i32, i32
  }
}

</mosaic_0001>

<bundles_post_ra>
// kernel: _lambda_.1
= control target key start
LH: loop header
LB: loop body
LE: loop exit
PB: predicated region body
PF: predicated region fallthrough
CT: control target
= control target key end

     0   :  { %s14123_s15 = smov 0   ;;  %s17849_s0 = inlined_call_operand.vmem [shape: bf16[2,18,18,8], index: 0, kind: input, shape index: {}]   ;;  %s17850_s1 = inlined_call_operand.vmem [shape: bf16[72,128], index: 1, kind: input, shape index: {}]   ;;  %s17851_s2 = inlined_call_operand.vmem [shape: bf16[9,128,128], index: 2, kind: input, shape index: {}]   ;;  %s17852_s3 = inlined_call_operand.vmem [shape: bf16[8,128], index: 3, kind: input, shape index: {}]   ;;  %s17853_s4 = inlined_call_operand.vmem [shape: bf16[2,16,16,128], index: 4, kind: output, shape index: {}]  }
   0x1 LB: > { %s11082_s16 = sadd.s32 4294967295, %s14087_s15   ;;  %p11086_p0 = scmp.ge.s32.totalorder %s14087_s15, 1  ;;  %s14087_s15 = sphi %s14123_s15, %s14_s15  }
   0x2   : > { %p162_p1 = scmp.lt.s32.totalorder %s14087_s15, 3 }
   0x4   : > { %p163_p2 = pnand %p11086_p0, %p162_p1 }
   0x6   : > { %166 = sbr.rel (%p163_p2) target bundleno = 1169 (0x491), region = 36 }
   0xd   : > { %p188_p3 = scmp.lt.s32.totalorder %s11082_s16, 1  ;;  %vm716_vm0 = vcmask 1042432   ;;  %vm717_vm1 = vcmask 1046532   ;;  %s14089_s21 = smov 24   ;;  %vm416_vm3 = vsmask.f32 3328 }
   0xe   : > { %vm14134_vm2 = vmor %vm716_vm0, %vm717_vm1  ;;  %vm417_vm4 = vsmask.f32 7440  ;;  %s14090_s22 = smov 40   ;;  %s14091_s23 = smov 16   ;;  %vm17854_vm6 = vcmask 64512   ;;  %vm659_vm7 = vcmask 130112  }
   0xf   : > { %s18020_s16 = smov (!%p188_p3, %s11082_s16), 1  ;;  %vm14180_vm5 = vmor %vm416_vm3, %vm417_vm4  ;;  %s14092_s24 = smov 8   ;;  %vm823_vm8 = vcmask 195712   ;;  %vm913_vm9 = vcmask 261312   ;;  %vm1186_vm10 = vcmask 326912   ;;  %vm1347_vm11 = vcmask 392512  }
  0x10   : > { %s13798_s17 = smul.u32 216, %s18020_s16  ;;  %s14093_s25 = smov 32   ;;  %vm17856_vm12 = vcmask 458112   ;;  %vm1710_vm13 = vcmask 523712   ;;  %vm1871_vm14 = vcmask 589312   ;;  %vm17855_vm15 = vcmask 1043456  }
  0x11   : > { %s14094_s26 = smov 48   ;;  %s14095_s27 = smov 56   ;;  %vm1924_vm0 = vcmask 588800   ;;  %vm263_vm1 = vsmask.f32 7938  ;;  %vm206_vm3 = vcmask 1040384  }
  0x12   : > { %s14141_s20 = scalar_lea.vmem %s17849_s0, %s13798_s17  ;;  %s14096_s30 = smov 64   ;;  %vm207_vm4 = vsmask.f32 256 }
  0x13   : > { %v13816_v1 = vld [vmem:[%s14141_s20 + $0x18] sm:$0xff]   ;;  %v13817_v2 = vld [vmem:[%s14141_s20 + $0xc] sm:$0xff]   ;;  %v11180_v5 = vld [vmem:[%s14141_s20 + $0x14] sm:$0x1]  ;;  %s12382_s18 = sshll.u32 %s18020_s16, 7 }
  0x14   : > { %891 = vrot.lane.b32.xlu1 %v13816_v1, %s14089_s21  ;;  %v11178_v3 = vld [vmem:[%s14141_s20 + $0xc] sm:$0xe]  ;;  %v11179_v4 = vld [vmem:[%s14141_s20 + $0x10] sm:$0xf]  ;;  %889 = vrot.lane.b32.xlu0 %v13817_v2, %s14089_s21  ;;  %v1248_v8 = vrot.slane %v11180_v5, 5  ;;  %s17792_s29 = scalar_lea.vmem %s17853_s4, %s12382_s18 }
  0x15   : > { %v11202_v6 = vrot.slane %v11178_v3, 9  ;;  %v1245_v7 = vrot.slane %v11179_v4, 5  ;;  %v668_v9 = vld [vmem:[%s14141_s20] sm:$0xe]  ;;  %v669_v10 = vld [vmem:[%s14141_s20 + $0x4] sm:$0xf] }
  0x16   : > { %v670_v11 = vld [vmem:[%s14141_s20 + $0x8] sm:$0x1]  ;;  %v11106_v12 = vrot.slane %v668_v9, 9  ;;  %v721_v15 = vrot.slane %v669_v10, 5  ;;  %v671_v17 = vld [vmem:[%s14141_s20 + $0xc] sm:$0xe] }
  0x17   : > { %v1246_v13 = vsel %vm14134_vm2, %v11202_v6, %v1245_v7  ;;  %v1247_v14 = vrot.slane %v1245_v7, 4  ;;  %v724_v16 = vrot.slane %v670_v11, 5  ;;  %v672_v18 = vld [vmem:[%s14141_s20 + $0x10] sm:$0xf]  ;;  %v673_v19 = vld [vmem:[%s14141_s20 + $0x14] sm:$0x1] }
  0x18   : > { %v11107_v20 = vrot.slane %v671_v17, 9  ;;  %v722_v22 = vsel %vm14134_vm2, %v11106_v12, %v721_v15  ;;  %v723_v23 = vrot.slane %v721_v15, 4  ;;  %v728_v24 = vrot.slane %v672_v18, 5  ;;  %v392_v25 = vld [vmem:[%s14141_s20] sm:$0xf] }
  0x19   : > { %v1249_v21 = vsel %vm14134_vm2, %v1247_v14, %v1248_v8  ;;  %v393_v26 = vld [vmem:[%s14141_s20 + $0x4] sm:$0xf]  ;;  %v731_v28 = vrot.slane %v673_v19, 5  ;;  %v394_v29 = vld [vmem:[%s14141_s20 + $0x8] sm:$0x1]  ;;  %v420_v30 = vshrl.u32 %v392_v25, 16 }
  0x1a   : > { %v11210_v27 = vcombine.low %v1246_v13, %v1249_v21  ;;  %v423_v31 = vshll.u32 %v392_v25, 16  ;;  %v725_v32 = vsel %vm14134_vm2, %v723_v23, %v724_v16  ;;  %v729_v33 = vsel %vm14134_vm2, %v11107_v20, %v728_v24  ;;  %v11181_v36 = vld [vmem:[%s14141_s20 + $0x18] sm:$0xe]  ;;  %v11182_v37 = vld [vmem:[%s14141_s20 + $0x1c] sm:$0xf] }
  0x1b   : > { %v730_v34 = vrot.slane %v728_v24, 4  ;;  %v429_v35 = vshll.u32 %v393_v26, 16  ;;  %v11114_v38 = vcombine.low %v722_v22, %v725_v32  ;;  %v422_v39 = vrot.slane %v420_v30, 4  ;;  %v11183_v42 = vld [vmem:[%s14141_s20 + $0x20] sm:$0x1] }
  0x1c   : > { %1323 = vrot.lane.b32.xlu0 %v11210_v27, %s14090_s22  ;;  %v425_v40 = vrot.slane %v423_v31, 5  ;;  %v433_v41 = vshrl.u32 %v393_v26, 16  ;;  %v439_v45 = vshll.u32 %v394_v29, 16  ;;  %v11203_v46 = vrot.slane %v11181_v36, 9  ;;  %v395_v47 = vld [vmem:[%s14141_s20 + $0xc] sm:$0xf] }
  0x1d   : > { %v732_v43 = vsel %vm14134_vm2, %v730_v34, %v731_v28  ;;  %v431_v44 = vrot.slane %v429_v35, 5  ;;  %799 = vrot.lane.b32.xlu1 %v11114_v38, %s14091_s23  ;;  %v1252_v51 = vrot.slane %v11182_v37, 5  ;;  %v396_v52 = vld [vmem:[%s14141_s20 + $0x10] sm:$0xf]  ;;  %v1255_v55 = vrot.slane %v11183_v42, 5 }
  0x1e   : > { %v11115_v48 = vcombine.low %v729_v33, %v732_v43  ;;  %v426_v49 = vor.u32 %v425_v40, %v422_v39  ;;  %v435_v50 = vrot.slane %v433_v41, 4  ;;  %v441_v54 = vrot.slane %v439_v45, 5  ;;  %v397_v56 = vld [vmem:[%s14141_s20 + $0x14] sm:$0x1]  ;;  %v11149_v63 = vld [vmem:[%s14141_s20 + $0x18] sm:$0xf] }
  0x1f   : > { %v444_v57 = vshrl.u32 %v395_v47, 16  ;;  %v447_v58 = vshll.u32 %v395_v47, 16  ;;  %v1253_v61 = vsel %vm14134_vm2, %v11203_v46, %v1252_v51  ;;  %v1254_v62 = vrot.slane %v1252_v51, 4  ;;  %v11150_v5 = vld [vmem:[%s14141_s20 + $0x1c] sm:$0xf] }
  0x20   : > { %v427_v59 = vrot.slane %v426_v49, 4  ;;  %v436_v60 = vor.u32 %v435_v50, %v431_v44  ;;  %v453_v3 = vshll.u32 %v396_v52, 16  ;;  %v457_v4 = vshrl.u32 %v396_v52, 16  ;;  %v11151_v10 = vld [vmem:[%s14141_s20 + $0x20] sm:$0x1] }
  0x21   : > { %v446_v1 = vrot.slane %v444_v57, 4  ;;  %v449_v2 = vrot.slane %v447_v58, 5  ;;  %801 = vrot.lane.b32.xlu1 %v11115_v48, %s14091_s23  ;;  %v1256_v8 = vsel %vm14134_vm2, %v1254_v62, %v1255_v55  ;;  %v463_v9 = vshll.u32 %v397_v56, 16  ;;  %v11146_v11 = vld [vmem:[%s14141_s20 + $0xc] sm:$0xf] }
  0x22   : > { %v432_v6 = vsel %vm14180_vm5, %v427_v59, %v431_v44  ;;  %v437_v7 = vrot.slane %v436_v60, 4  ;;  %v11211_v12 = vcombine.low %v1253_v61, %v1256_v8  ;;  %v455_v14 = vrot.slane %v453_v3, 5  ;;  %v11147_v28 = vld [vmem:[%s14141_s20 + $0x10] sm:$0xf]  ;;  %v11148_v32 = vld [vmem:[%s14141_s20 + $0x14] sm:$0x1] }
  0x23   : > { %v450_v13 = vor.u32 %v449_v2, %v446_v1  ;;  %v459_v15 = vrot.slane %v457_v4, 4  ;;  %v465_v17 = vrot.slane %v463_v9, 5  ;;  %v971_v18 = vshrl.u32 %v11149_v63, 16  ;;  %v11242_v38 = vld [vmem:[%s14141_s20 + $0x18] sm:$0xf] }
  0x24   : > { %v442_v16 = vsel %vm14180_vm5, %v437_v7, %v441_v54  ;;  %v974_v19 = vshll.u32 %v11149_v63, 16  ;;  %v980_v23 = vshll.u32 %v11150_v5, 16  ;;  %v984_v26 = vshrl.u32 %v11150_v5, 16  ;;  %v11243_v47 = vld [vmem:[%s14141_s20 + $0x1c] sm:$0xf] }
  0x25   : > { %v11098_v20 = vcombine.low %v432_v6, %v442_v16  ;;  %v451_v21 = vrot.slane %v450_v13, 4  ;;  %v460_v22 = vor.u32 %v459_v15, %v455_v14  ;;  %1325 = vrot.lane.b32.xlu1 %v11211_v12, %s14090_s22  ;;  %v973_v24 = vrot.slane %v971_v18, 4  ;;  %v11244_v56 = vld [vmem:[%s14141_s20 + $0x20] sm:$0x1]  ;;  %v11245_v62 = vld [vmem:[%s14141_s20 + $0x24] sm:$0xf] }
  0x26   : > { %v976_v25 = vrot.slane %v974_v19, 5  ;;  %v990_v27 = vshll.u32 %v11151_v10, 16  ;;  %v982_v31 = vrot.slane %v980_v23, 5  ;;  %v947_v33 = vshrl.u32 %v11146_v11, 16  ;;  %v11246_v4 = vld [vmem:[%s14141_s20 + $0x28] sm:$0xf] }
  0x27   : > { %635 = vrot.lane.b32.xlu0 %v11098_v20, %s14092_s24  ;;  %v456_v29 = vsel %vm14180_vm5, %v451_v21, %v455_v14  ;;  %v461_v30 = vrot.slane %v460_v22, 4  ;;  %v986_v35 = vrot.slane %v984_v26, 4  ;;  %v950_v37 = vshll.u32 %v11146_v11, 16  ;;  %v11247_v12 = vld [vmem:[%s14141_s20 + $0x2c] sm:$0x1]  ;;  %v13819_v16 = vld [vmem:[%s14141_s20 + $0x24] sm:$0xff]  }
  0x28   : > { %v977_v34 = vor.u32 %v976_v25, %v973_v24  ;;  %v992_v36 = vrot.slane %v990_v27, 5  ;;  %v949_v40 = vrot.slane %v947_v33, 4  ;;  %v956_v41 = vshll.u32 %v11147_v28, 16  ;;  %v11274_v14 = vld [vmem:[%s14141_s20 + $0x18] sm:$0xe] }
  0x29   : > { %v466_v39 = vsel %vm14180_vm5, %v461_v30, %v465_v17  ;;  %v960_v42 = vshrl.u32 %v11147_v28, 16  ;;  %v987_v45 = vor.u32 %v986_v35, %v982_v31  ;;  %v952_v46 = vrot.slane %v950_v37, 5  ;;  %v11275_v20 = vld [vmem:[%s14141_s20 + $0x1c] sm:$0xf]  ;;  %v11276_v25 = vld [vmem:[%s14141_s20 + $0x20] sm:$0x1] }
  0x2a   : > { %v11099_v43 = vcombine.low %v456_v29, %v466_v39  ;;  %v978_v44 = vrot.slane %v977_v34, 4  ;;  %v958_v48 = vrot.slane %v956_v41, 5  ;;  %v966_v50 = vshll.u32 %v11148_v32, 16  ;;  %v398_v30 = vld [vmem:[%s14141_s20 + $0x18] sm:$0xf] }
  0x2b   : > { %v962_v49 = vrot.slane %v960_v42, 4  ;;  %v1471_v51 = vshrl.u32 %v11242_v38, 16  ;;  %v988_v54 = vrot.slane %v987_v45, 4  ;;  %v953_v55 = vor.u32 %v952_v46, %v949_v40  ;;  %v400_v41 = vld [vmem:[%s14141_s20 + $0x20] sm:$0x1] }
  0x2c   : > { %637 = vrot.lane.b32.xlu0 %v11099_v43, %s14092_s24  ;;  %v983_v52 = vsel %vm14180_vm5, %v978_v44, %v982_v31  ;;  %v1474_v57 = vshll.u32 %v11242_v38, 16  ;;  %v968_v59 = vrot.slane %v966_v50, 5  ;;  %v1480_v61 = vshll.u32 %v11243_v47, 16  ;;  %v13818_v31 = vld [vmem:[%s14141_s20 + $0x18] sm:$0xff]   ;;  %v11277_v42 = vld [vmem:[%s14141_s20 + $0x24] sm:$0xe] }
  0x2d   : > { %v963_v58 = vor.u32 %v962_v49, %v958_v48  ;;  %v1473_v60 = vrot.slane %v1471_v51, 4  ;;  %v993_v63 = vsel %vm14180_vm5, %v988_v54, %v992_v36  ;;  %v954_v1 = vrot.slane %v953_v55, 4  ;;  %v399_v36 = vld [vmem:[%s14141_s20 + $0x1c] sm:$0xf]  ;;  %v401_v54 = vld [vmem:[%s14141_s20 + $0x24] sm:$0xf] }
  0x2e   : > { %v1476_v2 = vrot.slane %v1474_v57, 5  ;;  %v1484_v3 = vshrl.u32 %v11243_v47, 16  ;;  %v11171_v5 = vcombine.low %v983_v52, %v993_v63  ;;  %v1482_v7 = vrot.slane %v1480_v61, 5  ;;  %v11278_v47 = vld [vmem:[%s14141_s20 + $0x28] sm:$0xf] }
  0x2f   : > { %v964_v6 = vrot.slane %v963_v58, 4  ;;  %v1490_v8 = vshll.u32 %v11244_v56, 16  ;;  %v959_v9 = vsel %vm14180_vm5, %v954_v1, %v958_v48  ;;  %v1495_v13 = vshrl.u32 %v11245_v62, 16  ;;  %v11279_v48 = vld [vmem:[%s14141_s20 + $0x2c] sm:$0x1] }
  0x30   : > { %v1477_v10 = vor.u32 %v1476_v2, %v1473_v60  ;;  %v1486_v11 = vrot.slane %v1484_v3, 4  ;;  %1164 = vrot.lane.b32.xlu1 %v11171_v5, %s14093_s25  ;;  %v1498_v18 = vshll.u32 %v11245_v62, 16  ;;  %v1504_v19 = vshll.u32 %v11246_v4, 16 }
  0x31   : > { %v969_v15 = vsel %vm14180_vm5, %v964_v6, %v968_v59  ;;  %v1492_v17 = vrot.slane %v1490_v8, 5  ;;  %v1497_v24 = vrot.slane %v1495_v13, 4  ;;  %v1508_v28 = vshrl.u32 %v11246_v4, 16  ;;  %v402_v8 = vld [vmem:[%s14141_s20 + $0x28] sm:$0xf] }
  0x32   : > { %v11170_v21 = vcombine.low %v959_v9, %v969_v15  ;;  %v1478_v22 = vrot.slane %v1477_v10, 4  ;;  %v1487_v23 = vor.u32 %v1486_v11, %v1482_v7  ;;  %v1500_v26 = vrot.slane %v1498_v18, 5 }
  0x33   : > { %v1506_v27 = vrot.slane %v1504_v19, 5  ;;  %v1514_v29 = vshll.u32 %v11247_v12, 16  ;;  %v11298_v34 = vrot.slane %v11274_v14, 9  ;;  %v1769_v35 = vrot.slane %v11275_v20, 5  ;;  %v403_v12 = vld [vmem:[%s14141_s20 + $0x2c] sm:$0x1] }
  0x34   : > { %1162 = vrot.lane.b32.xlu0 %v11170_v21, %s14093_s25  ;;  %v1483_v32 = vsel %vm14180_vm5, %v1478_v22, %v1482_v7  ;;  %v1488_v33 = vrot.slane %v1487_v23, 4  ;;  %1415 = vrot.lane.b32.xlu1 %v13819_v16, %s14094_s26  ;;  %v1501_v37 = vor.u32 %v1500_v26, %v1497_v24  ;;  %v1510_v38 = vrot.slane %v1508_v28, 4  ;;  %v674_v14 = vld [vmem:[%s14141_s20 + $0x18] sm:$0xe]  ;;  %v675_v19 = vld [vmem:[%s14141_s20 + $0x1c] sm:$0xf] }
  0x35   : > { %v1516_v39 = vrot.slane %v1514_v29, 5  ;;  %v1772_v40 = vrot.slane %v11276_v25, 5  ;;  %v1770_v44 = vsel %vm14134_vm2, %v11298_v34, %v1769_v35  ;;  %v1771_v45 = vrot.slane %v1769_v35, 4  ;;  %v13834_v20 = vld [vmem:[%s17850_s1] sm:$0xff]  }
  0x36   : > { %v1493_v43 = vsel %vm14180_vm5, %v1488_v33, %v1492_v17  ;;  %v468_v46 = vshrl.u32 %v398_v30, 16  ;;  %v1502_v50 = vrot.slane %v1501_v37, 4  ;;  %v1511_v51 = vor.u32 %v1510_v38, %v1506_v27  ;;  %v676_v25 = vld [vmem:[%s14141_s20 + $0x20] sm:$0x1]  ;;  %12874 = vmatprep.subr.bf16.mxu0 %v13834_v20  ;;  %v11152_v37 = vld [vmem:[%s14141_s20 + $0x24] sm:$0xf] }
  0x37   : > { %v11266_v49 = vcombine.low %v1483_v32, %v1493_v43  ;;  %v471_v52 = vshll.u32 %v398_v30, 16  ;;  %v1773_v55 = vsel %vm14134_vm2, %v1771_v45, %v1772_v40  ;;  %v477_v57 = vshll.u32 %v399_v36, 16  ;;  %v677_v30 = vld [vmem:[%s14141_s20 + $0x24] sm:$0xe]  ;;  %12875 = vmatpush3.bf16.msra.mxu0 %v13834_v20 }
  0x38   : > { %1413 = vrot.lane.b32.xlu0 %v13818_v31, %s14094_s26  ;;  %v470_v56 = vrot.slane %v468_v46, 4  ;;  %v481_v58 = vshrl.u32 %v399_v36, 16  ;;  %v1507_v59 = vsel %vm14180_vm5, %v1502_v50, %v1506_v27  ;;  %v1512_v60 = vrot.slane %v1511_v51, 4  ;;  %v678_v31 = vld [vmem:[%s14141_s20 + $0x28] sm:$0xf] }
  0x39   : > { %v11306_v61 = vcombine.low %v1770_v44, %v1773_v55  ;;  %v473_v62 = vrot.slane %v471_v52, 5  ;;  %v479_v63 = vrot.slane %v477_v57, 5  ;;  %v487_v2 = vshll.u32 %v400_v41, 16  ;;  %v679_v36 = vld [vmem:[%s14141_s20 + $0x2c] sm:$0x1] }
  0x3a   : > { %v483_v1 = vrot.slane %v481_v58, 4  ;;  %v11299_v3 = vrot.slane %v11277_v42, 9  ;;  %v1517_v4 = vsel %vm14180_vm5, %v1512_v60, %v1516_v39  ;;  %v1776_v6 = vrot.slane %v11278_v47, 5  ;;  %v11153_v42 = vld [vmem:[%s14141_s20 + $0x28] sm:$0xf] }
  0x3b   : > { %v474_v5 = vor.u32 %v473_v62, %v470_v56  ;;  %v1779_v7 = vrot.slane %v11279_v48, 5  ;;  %v11267_v9 = vcombine.low %v1507_v59, %v1517_v4  ;;  %v489_v11 = vrot.slane %v487_v2, 5  ;;  %v11154_v59 = vld [vmem:[%s14141_s20 + $0x2c] sm:$0x1]  ;;  %v11155_v2 = vld [vmem:[%s14141_s20 + $0x30] sm:$0xf] }
  0x3c   : > { %1686 = vrot.lane.b32.xlu0 %v11266_v49, %s14095_s27  ;;  %v484_v10 = vor.u32 %v483_v1, %v479_v63  ;;  %v492_v13 = vshrl.u32 %v401_v54, 16  ;;  %v1777_v16 = vsel %vm14134_vm2, %v11299_v3, %v1776_v6  ;;  %v1778_v17 = vrot.slane %v1776_v6, 4  ;;  %v11156_v3 = vld [vmem:[%s14141_s20 + $0x34] sm:$0xf] }
  0x3d   : > { %v475_v15 = vrot.slane %v474_v5, 4  ;;  %v495_v18 = vshll.u32 %v401_v54, 16  ;;  %1688 = vrot.lane.b32.xlu1 %v11267_v9, %s14095_s27  ;;  %v501_v23 = vshll.u32 %v402_v8, 16  ;;  %v505_v24 = vshrl.u32 %v402_v8, 16  ;;  %v11157_v9 = vld [vmem:[%s14141_s20 + $0x38] sm:$0x1] }
  0x3e   : > { %v485_v21 = vrot.slane %v484_v10, 4  ;;  %v494_v22 = vrot.slane %v492_v13, 4  ;;  %v1780_v27 = vsel %vm14134_vm2, %v1778_v17, %v1779_v7  ;;  %v511_v29 = vshll.u32 %v403_v12, 16  ;;  %v13820_v7 = vld [vmem:[%s14141_s20 + $0x24] sm:$0xff]   ;;  %v11186_v17 = vld [vmem:[%s14141_s20 + $0x2c] sm:$0x1] }
  0x3f   : > { %v480_v26 = vsel %vm14180_vm5, %v475_v15, %v479_v63  ;;  %v497_v28 = vrot.slane %v495_v18, 5  ;;  %v11307_v33 = vcombine.low %v1777_v16, %v1780_v27  ;;  %v503_v34 = vrot.slane %v501_v23, 5  ;;  %v11184_v10 = vld [vmem:[%s14141_s20 + $0x24] sm:$0xe]  ;;  %v11185_v16 = vld [vmem:[%s14141_s20 + $0x28] sm:$0xf] }
  0x40   : > { %1847 = vrot.lane.b32.xlu0 %v11306_v61, %s14096_s30  ;;  %v490_v32 = vsel %vm14180_vm5, %v485_v21, %v489_v11  ;;  %v507_v35 = vrot.slane %v505_v24, 4  ;;  %v513_v40 = vrot.slane %v511_v29, 5  ;;  %v11108_v41 = vrot.slane %v674_v14, 9  ;;  %v13837_v11 = vld [vmem:[%s17850_s1 + $0x8] sm:$0xff]   ;;  %v11188_v27 = vld [vmem:[%s14141_s20 + $0x34] sm:$0xf] }
  0x41   : > { %v11100_v38 = vcombine.low %v480_v26, %v490_v32  ;;  %v498_v39 = vor.u32 %v497_v28, %v494_v22  ;;  %v735_v44 = vrot.slane %v675_v19, 5  ;;  %v738_v45 = vrot.slane %v676_v25, 5  ;;  %v11187_v22 = vld [vmem:[%s14141_s20 + $0x30] sm:$0xe]  ;;  %12876 = vmatprep.subr.bf16.mxu0 %v13837_v11  ;;  %v11189_v32 = vld [vmem:[%s14141_s20 + $0x38] sm:$0x1] }
  0x42   : > { %v508_v43 = vor.u32 %v507_v35, %v503_v34  ;;  %v11109_v46 = vrot.slane %v677_v30, 9  ;;  %v742_v48 = vrot.slane %v678_v31, 5  ;;  %v745_v49 = vrot.slane %v679_v36, 5  ;;  %12877 = vmatpush3.bf16.msra.mxu0 %v13837_v11 }
  0x43   : > { %639 = vrot.lane.b32.xlu1 %v11100_v38, %s14092_s24  ;;  %v499_v47 = vrot.slane %v498_v39, 4  ;;  %v995_v50 = vshrl.u32 %v11152_v37, 16  ;;  %v736_v52 = vsel %vm14134_vm2, %v11108_v41, %v735_v44  ;;  %v737_v54 = vrot.slane %v735_v44, 4  ;;  %v13821_v38 = vld [vmem:[%s14141_s20 + $0x30] sm:$0xff]  }
  0x44   : > { %1849 = vrot.lane.b32.xlu0 %v11307_v33, %s14096_s30  ;;  %v509_v51 = vrot.slane %v508_v43, 4  ;;  %v998_v55 = vshll.u32 %v11152_v37, 16  ;;  %v743_v57 = vsel %vm14134_vm2, %v11109_v46, %v742_v48  ;;  %v744_v58 = vrot.slane %v742_v48, 4  ;;  %v13838_v33 = vld [vmem:[%s17850_s1 + $0x10] sm:$0xff]   ;;  %v13840_v43 = vld [vmem:[%s17850_s1 + $0x18] sm:$0xff]  }
  0x45   : > { %v504_v56 = vsel %vm14180_vm5, %v499_v47, %v503_v34  ;;  %v997_v60 = vrot.slane %v995_v50, 4  ;;  %v739_v62 = vsel %vm14134_vm2, %v737_v54, %v738_v45  ;;  %v1004_v1 = vshll.u32 %v11153_v42, 16  ;;  %v11248_v48 = vld [vmem:[%s14141_s20 + $0x30] sm:$0xf]  ;;  %12878 = vmatprep.subr.bf16.mxu0 %v13838_v33  ;;  %v11249_v54 = vld [vmem:[%s14141_s20 + $0x34] sm:$0xf] }
  0x46   : > { %v514_v61 = vsel %vm14180_vm5, %v509_v51, %v513_v40  ;;  %v1000_v63 = vrot.slane %v998_v55, 5  ;;  %v11116_v5 = vcombine.low %v736_v52, %v739_v62  ;;  %v746_v6 = vsel %vm14134_vm2, %v744_v58, %v745_v49  ;;  %12879 = vmatpush3.bf16.msra.mxu0 %v13838_v33 }
  0x47   : > { %v11101_v4 = vcombine.low %v504_v56, %v514_v61  ;;  %v1008_v8 = vshrl.u32 %v11153_v42, 16  ;;  %v11117_v12 = vcombine.low %v743_v57, %v746_v6  ;;  %v1006_v14 = vrot.slane %v1004_v1, 5  ;;  %12880 = vmatprep.subr.bf16.mxu0 %v13840_v43  ;;  %v11250_v61 = vld [vmem:[%s14141_s20 + $0x38] sm:$0x1]  ;;  %v11251_v1 = vld [vmem:[%s14141_s20 + $0x3c] sm:$0xf] }
  0x48   : > { %v1001_v13 = vor.u32 %v1000_v63, %v997_v60  ;;  %v1014_v15 = vshll.u32 %v11154_v59, 16  ;;  %803 = vrot.lane.b32.xlu0 %v11116_v5, %s14091_s23  ;;  %v1019_v19 = vshrl.u32 %v11155_v2, 16  ;;  %v1022_v20 = vshll.u32 %v11155_v2, 16  ;;  %v11252_v6 = vld [vmem:[%s14141_s20 + $0x40] sm:$0xf] }
  0x49   : > { %641 = vrot.lane.b32.xlu1 %v11101_v4, %s14092_s24  ;;  %v1010_v18 = vrot.slane %v1008_v8, 4  ;;  %v1028_v21 = vshll.u32 %v11156_v3, 16  ;;  %v1032_v25 = vshrl.u32 %v11156_v3, 16  ;;  %v1038_v26 = vshll.u32 %v11157_v9, 16 }
  0x4a   : > { %v1002_v23 = vrot.slane %v1001_v13, 4  ;;  %v1016_v24 = vrot.slane %v1014_v15, 5  ;;  %v1021_v29 = vrot.slane %v1019_v19, 4  ;;  %v1024_v30 = vrot.slane %v1022_v20, 5  ;;  %v11281_v13 = vld [vmem:[%s14141_s20 + $0x34] sm:$0xf]  ;;  %12881 = vmatpush3.bf16.msra.mxu0 %v13840_v43 }
  0x4b   : > { %v1011_v28 = vor.u32 %v1010_v18, %v1006_v14  ;;  %v1030_v31 = vrot.slane %v1028_v21, 5  ;;  %v1034_v35 = vrot.slane %v1032_v25, 4  ;;  %v1040_v36 = vrot.slane %v1038_v26, 5  ;;  %v11282_v18 = vld [vmem:[%s14141_s20 + $0x38] sm:$0x1]  ;;  %v13822_v19 = vld [vmem:[%s14141_s20 + $0x30] sm:$0xff]  }
  0x4c   : > { %v1007_v34 = vsel %vm14180_vm5, %v1002_v23, %v1006_v14  ;;  %v11204_v37 = vrot.slane %v11184_v10, 9  ;;  %893 = vrot.lane.b32.xlu0 %v13820_v7, %s14089_s21  ;;  %v1025_v40 = vor.u32 %v1024_v30, %v1021_v29  ;;  %v1259_v41 = vrot.slane %v11185_v16, 5  ;;  %v11253_v7 = vld [vmem:[%s14141_s20 + $0x44] sm:$0x1] }
  0x4d   : > { %805 = vrot.lane.b32.xlu1 %v11117_v12, %s14091_s23  ;;  %v1012_v39 = vrot.slane %v1011_v28, 4  ;;  %v1262_v42 = vrot.slane %v11186_v17, 5  ;;  %v1035_v44 = vor.u32 %v1034_v35, %v1030_v31  ;;  %v11205_v45 = vrot.slane %v11187_v22, 9  ;;  %v11280_v12 = vld [vmem:[%s14141_s20 + $0x30] sm:$0xe] }
  0x4e   : > { %v1266_v46 = vrot.slane %v11188_v27, 5  ;;  %v1269_v47 = vrot.slane %v11189_v32, 5  ;;  %v1026_v50 = vrot.slane %v1025_v40, 4  ;;  %v1260_v51 = vsel %vm14134_vm2, %v11204_v37, %v1259_v41  ;;  %v405_v37 = vld [vmem:[%s14141_s20 + $0x34] sm:$0xf] }
  0x4f   : > { %v1017_v49 = vsel %vm14180_vm5, %v1012_v39, %v1016_v24  ;;  %v1261_v52 = vrot.slane %v1259_v41, 4  ;;  %v1036_v56 = vrot.slane %v1035_v44, 4  ;;  %v1519_v62 = vshrl.u32 %v11248_v48, 16  ;;  %v404_v24 = vld [vmem:[%s14141_s20 + $0x30] sm:$0xf] }
  0x50   : > { %v11172_v55 = vcombine.low %v1007_v34, %v1017_v49  ;;  %v1267_v57 = vsel %vm14134_vm2, %v11205_v45, %v1266_v46  ;;  %v1268_v58 = vrot.slane %v1266_v46, 4  ;;  %v1031_v59 = vsel %vm14180_vm5, %v1026_v50, %v1030_v31  ;;  %v406_v46 = vld [vmem:[%s14141_s20 + $0x38] sm:$0x1] }
  0x51   : > { %895 = vrot.lane.b32.xlu1 %v13821_v38, %s14089_s21  ;;  %v1263_v60 = vsel %vm14134_vm2, %v1261_v52, %v1262_v42  ;;  %v1522_v63 = vshll.u32 %v11248_v48, 16  ;;  %v1041_v2 = vsel %vm14180_vm5, %v1036_v56, %v1040_v36  ;;  %v1528_v5 = vshll.u32 %v11249_v54, 16  ;;  %v13823_v38 = vld [vmem:[%s14141_s20 + $0x3c] sm:$0xff]  }
  0x52   : > { %1166 = vrot.lane.b32.xlu0 %v11172_v55, %s14093_s25  ;;  %v11212_v3 = vcombine.low %v1260_v51, %v1263_v60  ;;  %v1270_v4 = vsel %vm14134_vm2, %v1268_v58, %v1269_v47  ;;  %v11173_v8 = vcombine.low %v1031_v59, %v1041_v2  ;;  %v1521_v10 = vrot.slane %v1519_v62, 4  ;;  %v11283_v52 = vld [vmem:[%s14141_s20 + $0x3c] sm:$0xe]  ;;  %v11284_v58 = vld [vmem:[%s14141_s20 + $0x40] sm:$0xf] }
  0x53   : > { %v11213_v9 = vcombine.low %v1267_v57, %v1270_v4  ;;  %v1524_v11 = vrot.slane %v1522_v63, 5  ;;  %v1530_v14 = vrot.slane %v1528_v5, 5  ;;  %v1532_v15 = vshrl.u32 %v11249_v54, 16  ;;  %v11285_v59 = vld [vmem:[%s14141_s20 + $0x44] sm:$0x1] }
  0x54   : > { %v1538_v16 = vshll.u32 %v11250_v61, 16  ;;  %v1543_v17 = vshrl.u32 %v11251_v1, 16  ;;  %v1546_v21 = vshll.u32 %v11251_v1, 16  ;;  %v1552_v22 = vshll.u32 %v11252_v6, 16  ;;  %v407_v1 = vld [vmem:[%s14141_s20 + $0x3c] sm:$0xf] }
  0x55   : > { %1168 = vrot.lane.b32.xlu1 %v11173_v8, %s14093_s25  ;;  %v1525_v20 = vor.u32 %v1524_v11, %v1521_v10  ;;  %v1556_v23 = vshrl.u32 %v11252_v6, 16  ;;  %v1534_v25 = vrot.slane %v1532_v15, 4  ;;  %v1562_v28 = vshll.u32 %v11253_v7, 16  ;;  %v408_v6 = vld [vmem:[%s14141_s20 + $0x40] sm:$0xf] }
  0x56   : > { %1327 = vrot.lane.b32.xlu0 %v11212_v3, %s14090_s22  ;;  %v1540_v26 = vrot.slane %v1538_v16, 5  ;;  %v1545_v27 = vrot.slane %v1543_v17, 4  ;;  %v1548_v30 = vrot.slane %v1546_v21, 5  ;;  %v1554_v31 = vrot.slane %v1552_v22, 5  ;;  %v409_v11 = vld [vmem:[%s14141_s20 + $0x44] sm:$0x1] }
  0x57   : > { %v1526_v29 = vrot.slane %v1525_v20, 4  ;;  %v1558_v32 = vrot.slane %v1556_v23, 4  ;;  %v1535_v33 = vor.u32 %v1534_v25, %v1530_v14  ;;  %v1564_v34 = vrot.slane %v1562_v28, 5  ;;  %v680_v16 = vld [vmem:[%s14141_s20 + $0x30] sm:$0xe] }
  0x58   : > { %v11300_v35 = vrot.slane %v11280_v12, 9  ;;  %v1783_v36 = vrot.slane %v11281_v13, 5  ;;  %v1549_v40 = vor.u32 %v1548_v30, %v1545_v27  ;;  %v1786_v42 = vrot.slane %v11282_v18, 5  ;;  %v681_v21 = vld [vmem:[%s14141_s20 + $0x34] sm:$0xf] }
  0x59   : > { %1329 = vrot.lane.b32.xlu1 %v11213_v9, %s14090_s22  ;;  %v1531_v39 = vsel %vm14180_vm5, %v1526_v29, %v1530_v14  ;;  %v1559_v41 = vor.u32 %v1558_v32, %v1554_v31  ;;  %v1536_v43 = vrot.slane %v1535_v33, 4  ;;  %v516_v47 = vshrl.u32 %v404_v24, 16  ;;  %v682_v22 = vld [vmem:[%s14141_s20 + $0x38] sm:$0x1] }
  0x5a   : > { %1417 = vrot.lane.b32.xlu0 %v13822_v19, %s14094_s26  ;;  %v1784_v44 = vsel %vm14134_vm2, %v11300_v35, %v1783_v36  ;;  %v1785_v45 = vrot.slane %v1783_v36, 4  ;;  %v1550_v48 = vrot.slane %v1549_v40, 4  ;;  %v519_v50 = vshll.u32 %v404_v24, 16  ;;  %v684_v36 = vld [vmem:[%s14141_s20 + $0x40] sm:$0xf] }
  0x5b   : > { %v1560_v49 = vrot.slane %v1559_v41, 4  ;;  %v525_v51 = vshll.u32 %v405_v37, 16  ;;  %v1541_v54 = vsel %vm14180_vm5, %v1536_v43, %v1540_v26  ;;  %v518_v56 = vrot.slane %v516_v47, 4 }
  0x5c   : > { %v1787_v55 = vsel %vm14134_vm2, %v1785_v45, %v1786_v42  ;;  %v529_v57 = vshrl.u32 %v405_v37, 16  ;;  %v11268_v60 = vcombine.low %v1531_v39, %v1541_v54  ;;  %v1555_v61 = vsel %vm14180_vm5, %v1550_v48, %v1554_v31  ;;  %v683_v31 = vld [vmem:[%s14141_s20 + $0x3c] sm:$0xe]  ;;  %v685_v37 = vld [vmem:[%s14141_s20 + $0x44] sm:$0x1] }
  0x5d   : > { %1419 = vrot.lane.b32.xlu1 %v13823_v38, %s14094_s26  ;;  %v1565_v62 = vsel %vm14180_vm5, %v1560_v49, %v1564_v34  ;;  %v11308_v63 = vcombine.low %v1784_v44, %v1787_v55  ;;  %v521_v3 = vrot.slane %v519_v50, 5  ;;  %v527_v4 = vrot.slane %v525_v51, 5  ;;  %v11158_v38 = vld [vmem:[%s14141_s20 + $0x3c] sm:$0xf]  ;;  %v11159_v50 = vld [vmem:[%s14141_s20 + $0x40] sm:$0xf] }
  0x5e   : > { %v11269_v2 = vcombine.low %v1555_v61, %v1565_v62  ;;  %v531_v5 = vrot.slane %v529_v57, 4  ;;  %1690 = vrot.lane.b32.xlu0 %v11268_v60, %s14095_s27  ;;  %v535_v7 = vshll.u32 %v406_v46, 16  ;;  %v11301_v8 = vrot.slane %v11283_v52, 9  ;;  %v11161_v62 = vld [vmem:[%s14141_s20 + $0x48] sm:$0xf] }
  0x5f   : > { %v1790_v9 = vrot.slane %v11284_v58, 5  ;;  %v1793_v10 = vrot.slane %v11285_v59, 5  ;;  %v522_v12 = vor.u32 %v521_v3, %v518_v56  ;;  %v540_v14 = vshrl.u32 %v407_v1, 16  ;;  %v11160_v56 = vld [vmem:[%s14141_s20 + $0x44] sm:$0x1] }
  0x60   : > { %v532_v13 = vor.u32 %v531_v5, %v527_v4  ;;  %v543_v15 = vshll.u32 %v407_v1, 16  ;;  %v537_v17 = vrot.slane %v535_v7, 5  ;;  %v549_v20 = vshll.u32 %v408_v6, 16 }
  0x61   : > { %1692 = vrot.lane.b32.xlu1 %v11269_v2, %s14095_s27  ;;  %v1791_v18 = vsel %vm14134_vm2, %v11301_v8, %v1790_v9  ;;  %v1792_v19 = vrot.slane %v1790_v9, 4  ;;  %v523_v23 = vrot.slane %v522_v12, 4  ;;  %v542_v25 = vrot.slane %v540_v14, 4  ;;  %v11163_v9 = vld [vmem:[%s14141_s20 + $0x50] sm:$0x1] }
  0x62   : > { %v533_v24 = vrot.slane %v532_v13, 4  ;;  %v545_v26 = vrot.slane %v543_v15, 5  ;;  %1851 = vrot.lane.b32.xlu0 %v11308_v63, %s14096_s30  ;;  %v551_v28 = vrot.slane %v549_v20, 5  ;;  %v553_v29 = vshrl.u32 %v408_v6, 16  ;;  %v13824_v13 = vld [vmem:[%s14141_s20 + $0x3c] sm:$0xff]  }
  0x63   : > { %v1794_v27 = vsel %vm14134_vm2, %v1792_v19, %v1793_v10  ;;  %v559_v30 = vshll.u32 %v409_v11, 16  ;;  %v528_v32 = vsel %vm14180_vm5, %v523_v23, %v527_v4  ;;  %v11110_v42 = vrot.slane %v680_v16, 9  ;;  %v11162_v4 = vld [vmem:[%s14141_s20 + $0x4c] sm:$0xf]  ;;  %v11190_v10 = vld [vmem:[%s14141_s20 + $0x3c] sm:$0xe] }
  0x64   : > { %v538_v33 = vsel %vm14180_vm5, %v533_v24, %v537_v17  ;;  %v11309_v34 = vcombine.low %v1791_v18, %v1794_v27  ;;  %v546_v35 = vor.u32 %v545_v26, %v542_v25  ;;  %v555_v40 = vrot.slane %v553_v29, 4  ;;  %v11191_v16 = vld [vmem:[%s14141_s20 + $0x40] sm:$0xf]  ;;  %v11192_v17 = vld [vmem:[%s14141_s20 + $0x44] sm:$0x1] }
  0x65   : > { %v11102_v39 = vcombine.low %v528_v32, %v538_v33  ;;  %v561_v41 = vrot.slane %v559_v30, 5  ;;  %v749_v44 = vrot.slane %v681_v21, 5  ;;  %v752_v45 = vrot.slane %v682_v22, 5  ;;  %v11193_v22 = vld [vmem:[%s14141_s20 + $0x48] sm:$0xe] }
  0x66   : > { %v547_v43 = vrot.slane %v546_v35, 4  ;;  %v11111_v46 = vrot.slane %v683_v31, 9  ;;  %1853 = vrot.lane.b32.xlu0 %v11309_v34, %s14096_s30  ;;  %v556_v47 = vor.u32 %v555_v40, %v551_v28  ;;  %v756_v48 = vrot.slane %v684_v36, 5  ;;  %v11194_v27 = vld [vmem:[%s14141_s20 + $0x4c] sm:$0xf] }
  0x67   : > { %643 = vrot.lane.b32.xlu1 %v11102_v39, %s14092_s24  ;;  %v759_v49 = vrot.slane %v685_v37, 5  ;;  %v1043_v51 = vshrl.u32 %v11158_v38, 16  ;;  %v750_v54 = vsel %vm14134_vm2, %v11110_v42, %v749_v44  ;;  %v751_v55 = vrot.slane %v749_v44, 4  ;;  %v11195_v32 = vld [vmem:[%s14141_s20 + $0x50] sm:$0x1] }
  0x68   : > { %v552_v52 = vsel %vm14180_vm5, %v547_v43, %v551_v28  ;;  %v1046_v57 = vshll.u32 %v11158_v38, 16  ;;  %v557_v58 = vrot.slane %v556_v47, 4  ;;  %v757_v59 = vsel %vm14134_vm2, %v11111_v46, %v756_v48  ;;  %v11254_v46 = vld [vmem:[%s14141_s20 + $0x48] sm:$0xf] }
  0x69   : > { %v758_v60 = vrot.slane %v756_v48, 4  ;;  %v1045_v61 = vrot.slane %v1043_v51, 4  ;;  %v753_v63 = vsel %vm14134_vm2, %v751_v55, %v752_v45  ;;  %v1052_v2 = vshll.u32 %v11159_v50, 16  ;;  %v11255_v51 = vld [vmem:[%s14141_s20 + $0x4c] sm:$0xf] }
  0x6a   : > { %v1048_v1 = vrot.slane %v1046_v57, 5  ;;  %v1056_v3 = vshrl.u32 %v11159_v50, 16  ;;  %v562_v5 = vsel %vm14180_vm5, %v557_v58, %v561_v41  ;;  %v11118_v6 = vcombine.low %v750_v54, %v753_v63  ;;  %v13825_v41 = vld [vmem:[%s14141_s20 + $0x48] sm:$0xff]   ;;  %v11257_v58 = vld [vmem:[%s14141_s20 + $0x54] sm:$0xf] }
  0x6b   : > { %v760_v7 = vsel %vm14134_vm2, %v758_v60, %v759_v49  ;;  %v1062_v8 = vshll.u32 %v11160_v56, 16  ;;  %v11103_v11 = vcombine.low %v552_v52, %v562_v5  ;;  %v1054_v15 = vrot.slane %v1052_v2, 5  ;;  %v11256_v52 = vld [vmem:[%s14141_s20 + $0x50] sm:$0x1] }
  0x6c   : > { %v11119_v12 = vcombine.low %v757_v59, %v760_v7  ;;  %v1049_v14 = vor.u32 %v1048_v1, %v1045_v61  ;;  %807 = vrot.lane.b32.xlu0 %v11118_v6, %s14091_s23  ;;  %v1058_v18 = vrot.slane %v1056_v3, 4  ;;  %v1067_v20 = vshrl.u32 %v11161_v62, 16 }
  0x6d   : > { %v1064_v19 = vrot.slane %v1062_v8, 5  ;;  %v1070_v21 = vshll.u32 %v11161_v62, 16  ;;  %645 = vrot.lane.b32.xlu1 %v11103_v11, %s14092_s24  ;;  %v1076_v24 = vshll.u32 %v11162_v4, 16  ;;  %v1080_v25 = vshrl.u32 %v11162_v4, 16  ;;  %v11258_v4 = vld [vmem:[%s14141_s20 + $0x58] sm:$0xf] }
  0x6e   : > { %v1050_v23 = vrot.slane %v1049_v14, 4  ;;  %v1086_v26 = vshll.u32 %v11163_v9, 16  ;;  %v1059_v28 = vor.u32 %v1058_v18, %v1054_v15  ;;  %v1069_v29 = vrot.slane %v1067_v20, 4  ;;  %v11259_v9 = vld [vmem:[%s14141_s20 + $0x5c] sm:$0x1] }
  0x6f   : > { %v1072_v30 = vrot.slane %v1070_v21, 5  ;;  %v11206_v31 = vrot.slane %v11190_v10, 9  ;;  %v1078_v34 = vrot.slane %v1076_v24, 5  ;;  %v1082_v35 = vrot.slane %v1080_v25, 4  ;;  %v11286_v14 = vld [vmem:[%s14141_s20 + $0x48] sm:$0xe] }
  0x70   : > { %v1055_v33 = vsel %vm14180_vm5, %v1050_v23, %v1054_v15  ;;  %v1088_v36 = vrot.slane %v1086_v26, 5  ;;  %897 = vrot.lane.b32.xlu0 %v13824_v13, %s14089_s21  ;;  %v1060_v37 = vrot.slane %v1059_v28, 4  ;;  %v1273_v39 = vrot.slane %v11191_v16, 5  ;;  %v13826_v15 = vld [vmem:[%s14141_s20 + $0x48] sm:$0xff]   ;;  %v11288_v25 = vld [vmem:[%s14141_s20 + $0x50] sm:$0x1] }
  0x71   : > { %v1073_v38 = vor.u32 %v1072_v30, %v1069_v29  ;;  %v1276_v40 = vrot.slane %v11192_v17, 5  ;;  %809 = vrot.lane.b32.xlu1 %v11119_v12, %s14091_s23  ;;  %v1083_v42 = vor.u32 %v1082_v35, %v1078_v34  ;;  %v11207_v43 = vrot.slane %v11193_v22, 9  ;;  %v11287_v20 = vld [vmem:[%s14141_s20 + $0x4c] sm:$0xf]  ;;  %v410_v30 = vld [vmem:[%s14141_s20 + $0x48] sm:$0xf] }
  0x72   : > { %v1280_v44 = vrot.slane %v11194_v27, 5  ;;  %v1283_v45 = vrot.slane %v11195_v32, 5  ;;  %v1065_v47 = vsel %vm14180_vm5, %v1060_v37, %v1064_v19  ;;  %v1274_v49 = vsel %vm14134_vm2, %v11206_v31, %v1273_v39  ;;  %v411_v35 = vld [vmem:[%s14141_s20 + $0x4c] sm:$0xf] }
  0x73   : > { %v1074_v48 = vrot.slane %v1073_v38, 4  ;;  %v1275_v50 = vrot.slane %v1273_v39, 4  ;;  %v11174_v54 = vcombine.low %v1055_v33, %v1065_v47  ;;  %v1084_v55 = vrot.slane %v1083_v42, 4  ;;  %v11290_v47 = vld [vmem:[%s14141_s20 + $0x58] sm:$0xf] }
  0x74   : > { %v1281_v56 = vsel %vm14134_vm2, %v11207_v43, %v1280_v44  ;;  %v1282_v57 = vrot.slane %v1280_v44, 4  ;;  %v1567_v61 = vshrl.u32 %v11254_v46, 16  ;;  %v1570_v62 = vshll.u32 %v11254_v46, 16  ;;  %v412_v44 = vld [vmem:[%s14141_s20 + $0x50] sm:$0x1] }
  0x75   : > { %v1079_v59 = vsel %vm14180_vm5, %v1074_v48, %v1078_v34  ;;  %v1277_v60 = vsel %vm14134_vm2, %v1275_v50, %v1276_v40  ;;  %899 = vrot.lane.b32.xlu1 %v13825_v41, %s14089_s21  ;;  %1170 = vrot.lane.b32.xlu0 %v11174_v54, %s14093_s25  ;;  %v1089_v63 = vsel %vm14180_vm5, %v1084_v55, %v1088_v36  ;;  %v1576_v3 = vshll.u32 %v11255_v51, 16  ;;  %v13827_v40 = vld [vmem:[%s14141_s20 + $0x54] sm:$0xff]  }
  0x76   : > { %v11214_v1 = vcombine.low %v1274_v49, %v1277_v60  ;;  %v1284_v2 = vsel %vm14134_vm2, %v1282_v57, %v1283_v45  ;;  %v11175_v5 = vcombine.low %v1079_v59, %v1089_v63  ;;  %v1569_v7 = vrot.slane %v1567_v61, 4  ;;  %v11289_v46 = vld [vmem:[%s14141_s20 + $0x54] sm:$0xe] }
  0x77   : > { %v11215_v6 = vcombine.low %v1281_v56, %v1284_v2  ;;  %v1572_v8 = vrot.slane %v1570_v62, 5  ;;  %v1578_v10 = vrot.slane %v1576_v3, 5  ;;  %v1580_v11 = vshrl.u32 %v11255_v51, 16  ;;  %v413_v62 = vld [vmem:[%s14141_s20 + $0x54] sm:$0xf] }
  0x78   : > { %v1586_v12 = vshll.u32 %v11256_v52, 16  ;;  %v1591_v13 = vshrl.u32 %v11257_v58, 16  ;;  %v1594_v17 = vshll.u32 %v11257_v58, 16  ;;  %v1600_v18 = vshll.u32 %v11258_v4, 16  ;;  %v11291_v52 = vld [vmem:[%s14141_s20 + $0x5c] sm:$0x1] }
  0x79   : > { %v1573_v16 = vor.u32 %v1572_v8, %v1569_v7  ;;  %v1604_v19 = vshrl.u32 %v11258_v4, 16  ;;  %1172 = vrot.lane.b32.xlu1 %v11175_v5, %s14093_s25  ;;  %1331 = vrot.lane.b32.xlu0 %v11214_v1, %s14090_s22  ;;  %v1582_v21 = vrot.slane %v1580_v11, 4  ;;  %v1610_v24 = vshll.u32 %v11259_v9, 16  ;;  %v414_v4 = vld [vmem:[%s14141_s20 + $0x58] sm:$0xf] }
  0x7a   : > { %v1588_v22 = vrot.slane %v1586_v12, 5  ;;  %v1593_v23 = vrot.slane %v1591_v13, 4  ;;  %v1596_v27 = vrot.slane %v1594_v17, 5  ;;  %v1602_v28 = vrot.slane %v1600_v18, 5  ;;  %v415_v11 = vld [vmem:[%s14141_s20 + $0x5c] sm:$0x1] }
  0x7b   : > { %v1574_v26 = vrot.slane %v1573_v16, 4  ;;  %v1606_v29 = vrot.slane %v1604_v19, 4  ;;  %v1583_v31 = vor.u32 %v1582_v21, %v1578_v10  ;;  %v1612_v32 = vrot.slane %v1610_v24, 5  ;;  %v687_v19 = vld [vmem:[%s14141_s20 + $0x4c] sm:$0xf] }
  0x7c   : > { %v11302_v33 = vrot.slane %v11286_v14, 9  ;;  %v1797_v34 = vrot.slane %v11287_v20, 5  ;;  %v1597_v37 = vor.u32 %v1596_v27, %v1593_v23  ;;  %v1800_v39 = vrot.slane %v11288_v25, 5  ;;  %v686_v14 = vld [vmem:[%s14141_s20 + $0x48] sm:$0xe] }
  0x7d   : > { %v1579_v36 = vsel %vm14180_vm5, %v1574_v26, %v1578_v10  ;;  %v1607_v38 = vor.u32 %v1606_v29, %v1602_v28  ;;  %1333 = vrot.lane.b32.xlu1 %v11215_v6, %s14090_s22  ;;  %1421 = vrot.lane.b32.xlu0 %v13826_v15, %s14094_s26  ;;  %v1584_v41 = vrot.slane %v1583_v31, 4  ;;  %v564_v45 = vshrl.u32 %v410_v30, 16  ;;  %v688_v20 = vld [vmem:[%s14141_s20 + $0x50] sm:$0x1]  ;;  %v689_v21 = vld [vmem:[%s14141_s20 + $0x54] sm:$0xe] }
  0x7e   : > { %v1798_v42 = vsel %vm14134_vm2, %v11302_v33, %v1797_v34  ;;  %v1799_v43 = vrot.slane %v1797_v34, 4  ;;  %v1598_v48 = vrot.slane %v1597_v37, 4  ;;  %v567_v50 = vshll.u32 %v410_v30, 16  ;;  %v690_v34 = vld [vmem:[%s14141_s20 + $0x58] sm:$0xf] }
  0x7f   : > { %v1608_v49 = vrot.slane %v1607_v38, 4  ;;  %v573_v51 = vshll.u32 %v411_v35, 16  ;;  %v1589_v54 = vsel %vm14180_vm5, %v1584_v41, %v1588_v22  ;;  %v566_v56 = vrot.slane %v564_v45, 4  ;;  %v11165_v45 = vld [vmem:[%s14141_s20 + $0x58] sm:$0xf] }
  0x80   : > { %v1801_v55 = vsel %vm14134_vm2, %v1799_v43, %v1800_v39  ;;  %v577_v57 = vshrl.u32 %v411_v35, 16  ;;  %v11270_v58 = vcombine.low %v1579_v36, %v1589_v54  ;;  %v1603_v59 = vsel %vm14180_vm5, %v1598_v48, %v1602_v28  ;;  %v691_v35 = vld [vmem:[%s14141_s20 + $0x5c] sm:$0x1]  ;;  %v11164_v36 = vld [vmem:[%s14141_s20 + $0x54] sm:$0xf] }
  0x81   : > { %v1613_v60 = vsel %vm14180_vm5, %v1608_v49, %v1612_v32  ;;  %v11310_v61 = vcombine.low %v1798_v42, %v1801_v55  ;;  %1423 = vrot.lane.b32.xlu1 %v13827_v40, %s14094_s26  ;;  %v569_v1 = vrot.slane %v567_v50, 5  ;;  %v575_v2 = vrot.slane %v573_v51, 5  ;;  %v11166_v49 = vld [vmem:[%s14141_s20 + $0x5c] sm:$0x1] }
  0x82   : > { %v11271_v63 = vcombine.low %v1603_v59, %v1613_v60  ;;  %v579_v3 = vrot.slane %v577_v57, 4  ;;  %1694 = vrot.lane.b32.xlu0 %v11270_v58, %s14095_s27  ;;  %v583_v5 = vshll.u32 %v412_v44, 16  ;;  %v11303_v6 = vrot.slane %v11289_v46, 9 }
  0x83   : > { %v1804_v7 = vrot.slane %v11290_v47, 5  ;;  %v1807_v8 = vrot.slane %v11291_v52, 5  ;;  %v570_v9 = vor.u32 %v569_v1, %v566_v56  ;;  %v588_v12 = vshrl.u32 %v413_v62, 16 }
  0x84   : > { %v580_v10 = vor.u32 %v579_v3, %v575_v2  ;;  %v591_v13 = vshll.u32 %v413_v62, 16  ;;  %v585_v15 = vrot.slane %v583_v5, 5  ;;  %v597_v18 = vshll.u32 %v414_v4, 16 }
  0x85   : > { %v1805_v16 = vsel %vm14134_vm2, %v11303_v6, %v1804_v7  ;;  %v1806_v17 = vrot.slane %v1804_v7, 4  ;;  %1696 = vrot.lane.b32.xlu1 %v11271_v63, %s14095_s27  ;;  %v571_v22 = vrot.slane %v570_v9, 4  ;;  %v590_v24 = vrot.slane %v588_v12, 4  ;;  %v11169_v9 = vld [vmem:[%s14141_s20 + $0x68] sm:$0x1] }
  0x86   : > { %v581_v23 = vrot.slane %v580_v10, 4  ;;  %v593_v25 = vrot.slane %v591_v13, 5  ;;  %1855 = vrot.lane.b32.xlu0 %v11310_v61, %s14096_s30  ;;  %v599_v27 = vrot.slane %v597_v18, 5  ;;  %v601_v28 = vshrl.u32 %v414_v4, 16  ;;  %v14497_v56 = vpop.permute.xlu1 %891  ;;  %v11167_v61 = vld [vmem:[%s14141_s20 + $0x60] sm:$0xf]  ;;  %v14502_v62 = vpop.permute.xlu0 %889 }
  0x87   : > { %v1808_v26 = vsel %vm14134_vm2, %v1806_v17, %v1807_v8  ;;  %v607_v29 = vshll.u32 %v415_v11, 16  ;;  %v576_v30 = vsel %vm14180_vm5, %v571_v22, %v575_v2  ;;  %v11112_v40 = vrot.slane %v686_v14, 9  ;;  %v11168_v4 = vld [vmem:[%s14141_s20 + $0x64] sm:$0xf]  ;;  %v11196_v10 = vld [vmem:[%s14141_s20 + $0x54] sm:$0xe] }
  0x88   : > { %v586_v31 = vsel %vm14180_vm5, %v581_v23, %v585_v15  ;;  %v11311_v32 = vcombine.low %v1805_v16, %v1808_v26  ;;  %v594_v33 = vor.u32 %v593_v25, %v590_v24  ;;  %v603_v38 = vrot.slane %v601_v28, 4  ;;  %v13828_v13 = vld [vmem:[%s14141_s20 + $0x54] sm:$0xff]   ;;  %v11198_v17 = vld [vmem:[%s14141_s20 + $0x5c] sm:$0x1]  ;;  %v11199_v22 = vld [vmem:[%s14141_s20 + $0x60] sm:$0xe] }
  0x89   : > { %v11104_v37 = vcombine.low %v576_v30, %v586_v31  ;;  %v609_v39 = vrot.slane %v607_v29, 5  ;;  %v763_v42 = vrot.slane %v687_v19, 5  ;;  %v766_v43 = vrot.slane %v688_v20, 5  ;;  %v11197_v16 = vld [vmem:[%s14141_s20 + $0x58] sm:$0xf] }
  0x8a   : > { %v595_v41 = vrot.slane %v594_v33, 4  ;;  %v11113_v44 = vrot.slane %v689_v21, 9  ;;  %1857 = vrot.lane.b32.xlu0 %v11311_v32, %s14096_s30  ;;  %v604_v46 = vor.u32 %v603_v38, %v599_v27  ;;  %v770_v47 = vrot.slane %v690_v34, 5  ;;  %v11201_v33 = vld [vmem:[%s14141_s20 + $0x68] sm:$0x1] }
  0x8b   : > { %647 = vrot.lane.b32.xlu1 %v11104_v37, %s14092_s24  ;;  %v773_v48 = vrot.slane %v691_v35, 5  ;;  %v1091_v50 = vshrl.u32 %v11164_v36, 16  ;;  %v764_v52 = vsel %vm14134_vm2, %v11112_v40, %v763_v42  ;;  %v765_v54 = vrot.slane %v763_v42, 4 }
  0x8c   : > { %v600_v51 = vsel %vm14180_vm5, %v595_v41, %v599_v27  ;;  %v1094_v55 = vshll.u32 %v11164_v36, 16  ;;  %v605_v57 = vrot.slane %v604_v46, 4  ;;  %v771_v58 = vsel %vm14134_vm2, %v11113_v44, %v770_v47  ;;  %v11200_v27 = vld [vmem:[%s14141_s20 + $0x64] sm:$0xf] }
  0x8d   : > { %v772_v59 = vrot.slane %v770_v47, 4  ;;  %v1093_v60 = vrot.slane %v1091_v50, 4  ;;  %v767_v63 = vsel %vm14134_vm2, %v765_v54, %v766_v43  ;;  %v1100_v2 = vshll.u32 %v11165_v45, 16  ;;  %v11260_v43 = vld [vmem:[%s14141_s20 + $0x60] sm:$0xf] }
  0x8e   : > { %v1096_v1 = vrot.slane %v1094_v55, 5  ;;  %v1104_v3 = vshrl.u32 %v11165_v45, 16  ;;  %v610_v5 = vsel %vm14180_vm5, %v605_v57, %v609_v39  ;;  %v11120_v6 = vcombine.low %v764_v52, %v767_v63  ;;  %v14523_v34 = vpop.permute.xlu0 %1323  ;;  %v13829_v44 = vld [vmem:[%s14141_s20 + $0x60] sm:$0xff]  }
  0x8f   : > { %v774_v7 = vsel %vm14134_vm2, %v772_v59, %v773_v48  ;;  %v1110_v8 = vshll.u32 %v11166_v49, 16  ;;  %v11105_v11 = vcombine.low %v600_v51, %v610_v5  ;;  %v1102_v15 = vrot.slane %v1100_v2, 5  ;;  %v14520_v28 = vpop.permute.xlu1 %799  ;;  %v11261_v49 = vld [vmem:[%s14141_s20 + $0x64] sm:$0xf] }
  0x90   : > { %v11121_v12 = vcombine.low %v771_v58, %v774_v7  ;;  %v1097_v14 = vor.u32 %v1096_v1, %v1093_v60  ;;  %811 = vrot.lane.b32.xlu0 %v11120_v6, %s14091_s23  ;;  %v1106_v18 = vrot.slane %v1104_v3, 4  ;;  %v1115_v20 = vshrl.u32 %v11167_v61, 16  ;;  %v11262_v1 = vld [vmem:[%s14141_s20 + $0x68] sm:$0x1] }
  0x91   : > { %v1112_v19 = vrot.slane %v1110_v8, 5  ;;  %v1118_v21 = vshll.u32 %v11167_v61, 16  ;;  %649 = vrot.lane.b32.xlu1 %v11105_v11, %s14092_s24  ;;  %v1124_v24 = vshll.u32 %v11168_v4, 16  ;;  %v1128_v25 = vshrl.u32 %v11168_v4, 16  ;;  %v11263_v4 = vld [vmem:[%s14141_s20 + $0x6c] sm:$0xf] }
  0x92   : > { %v1098_v23 = vrot.slane %v1097_v14, 4  ;;  %v1134_v26 = vshll.u32 %v11169_v9, 16  ;;  %v1107_v29 = vor.u32 %v1106_v18, %v1102_v15  ;;  %v1117_v30 = vrot.slane %v1115_v20, 4  ;;  %v13839_v18 = vld [vmem:[%s14141_s20 + $0x18] sm:$0xff]   ;;  %v13847_v20 = vld [vmem:[%s14141_s20 + $0x30] sm:$0xff]  }
  0x93   : > { %v1120_v31 = vrot.slane %v1118_v21, 5  ;;  %v11208_v32 = vrot.slane %v11196_v10, 9  ;;  %v1126_v36 = vrot.slane %v1124_v24, 5  ;;  %v1130_v37 = vrot.slane %v1128_v25, 4  ;;  %v14540_v60 = vpop.permute.xlu1 %801  ;;  %v11264_v10 = vld [vmem:[%s14141_s20 + $0x70] sm:$0xf] }
  0x94   : > { %v1103_v35 = vsel %vm14180_vm5, %v1098_v23, %v1102_v15  ;;  %v1136_v38 = vrot.slane %v1134_v26, 5  ;;  %901 = vrot.lane.b32.xlu0 %v13828_v13, %s14089_s21  ;;  %v1108_v39 = vrot.slane %v1107_v29, 4  ;;  %v1287_v41 = vrot.slane %v11197_v16, 5  ;;  %v11265_v15 = vld [vmem:[%s14141_s20 + $0x74] sm:$0x1]  ;;  %v13832_v16 = vld [vmem:[%s14141_s20] sm:$0xff]  }
  0x95   : > { %v1121_v40 = vor.u32 %v1120_v31, %v1117_v30  ;;  %v1290_v42 = vrot.slane %v11198_v17, 5  ;;  %813 = vrot.lane.b32.xlu1 %v11121_v12, %s14091_s23  ;;  %v1131_v45 = vor.u32 %v1130_v37, %v1126_v36  ;;  %v11209_v46 = vrot.slane %v11199_v22, 9  ;;  %v13833_v17 = vld [vmem:[%s14141_s20 + $0xc] sm:$0xff]   ;;  %v13848_v21 = vld [vmem:[%s14141_s20 + $0x3c] sm:$0xff]   ;;  %384 = vst.msk [vmem:[#allocation3] sm:$0xff] %vm17854_vm6, %v13832_v16  ;;  %386 = vst.msk [vmem:[#allocation3 + $0x10] sm:$0xff] %vm17854_vm6, %v13839_v18 }
  0x96   : > { %v1294_v47 = vrot.slane %v11200_v27, 5  ;;  %v1297_v48 = vrot.slane %v11201_v33, 5  ;;  %v1113_v50 = vsel %vm14180_vm5, %v1108_v39, %v1112_v19  ;;  %v1288_v52 = vsel %vm14134_vm2, %v11208_v32, %v1287_v41  ;;  %v13841_v19 = vld [vmem:[%s14141_s20 + $0x24] sm:$0xff]   ;;  %v11292_v33 = vld [vmem:[%s14141_s20 + $0x60] sm:$0xe]  ;;  %385 = vst.msk [vmem:[#allocation3 + $0x8] sm:$0xff] %vm17854_vm6, %v13833_v17 }
  0x97   : > { %v1122_v51 = vrot.slane %v1121_v40, 4  ;;  %v1289_v54 = vrot.slane %v1287_v41, 4  ;;  %v11176_v55 = vcombine.low %v1103_v35, %v1113_v50  ;;  %v1132_v57 = vrot.slane %v1131_v45, 4  ;;  %v13853_v22 = vld [vmem:[%s14141_s20 + $0x48] sm:$0xff]   ;;  %v13830_v23 = vld [vmem:[%s14141_s20 + $0x60] sm:$0xff]   ;;  %387 = vst.msk [vmem:[#allocation3 + $0x18] sm:$0xff] %vm17854_vm6, %v13841_v19 }
  0x98   : > { %v14538_v58 = vsel %vm14134_vm2, %v11209_v46, %v1294_v47  ;;  %v1296_v59 = vrot.slane %v1294_v47, 4  ;;  %v1615_v2 = vshrl.u32 %v11260_v43, 16  ;;  %v1618_v3 = vshll.u32 %v11260_v43, 16  ;;  %v11293_v35 = vld [vmem:[%s14141_s20 + $0x64] sm:$0xf]  ;;  %388 = vst.msk [vmem:[#allocation3 + $0x20] sm:$0xff] %vm17854_vm6, %v13847_v20 }
  0x99   : > { %v1127_v61 = vsel %vm14180_vm5, %v1122_v51, %v1126_v36  ;;  %v1291_v63 = vsel %vm14134_vm2, %v1289_v54, %v1290_v42  ;;  %v14548_v5 = vpop.permute.xlu0 %635  ;;  %903 = vrot.lane.b32.xlu1 %v13829_v44, %s14089_s21  ;;  %1174 = vrot.lane.b32.xlu0 %v11176_v55, %s14093_s25  ;;  %v1137_v6 = vsel %vm14180_vm5, %v1132_v57, %v1136_v38  ;;  %v1624_v9 = vshll.u32 %v11261_v49, 16  ;;  %v13854_v36 = vld [vmem:[%s14141_s20 + $0x54] sm:$0xff]   ;;  %v11294_v41 = vld [vmem:[%s14141_s20 + $0x68] sm:$0x1]  ;;  %v14575_v42 = vpop.permute.xlu1 %1325 }
  0x9a   : > { %v11216_v7 = vcombine.low %v1288_v52, %v1291_v63  ;;  %v1298_v8 = vsel %vm14134_vm2, %v1296_v59, %v1297_v48  ;;  %v11177_v11 = vcombine.low %v1127_v61, %v1137_v6  ;;  %v1617_v13 = vrot.slane %v1615_v2, 4  ;;  %v11295_v47 = vld [vmem:[%s14141_s20 + $0x6c] sm:$0xe]  ;;  %v11296_v51 = vld [vmem:[%s14141_s20 + $0x70] sm:$0xf]  ;;  %389 = vst.msk [vmem:[#allocation3 + $0x28] sm:$0xff] %vm17854_vm6, %v13848_v21 }
  0x9b   : > { %v11217_v12 = vcombine.low %v14538_v58, %v1298_v8  ;;  %v1620_v14 = vrot.slane %v1618_v3, 5  ;;  %v14567_v24 = vrot.slane %v1624_v9, 5  ;;  %v1628_v25 = vshrl.u32 %v11261_v49, 16  ;;  %v13831_v52 = vld [vmem:[%s14141_s20 + $0x6c] sm:$0xff]   ;;  %v11297_v58 = vld [vmem:[%s14141_s20 + $0x74] sm:$0x1] }
  0x9c   : > { %v1634_v26 = vshll.u32 %v11262_v1, 16  ;;  %v1639_v27 = vshrl.u32 %v11263_v4, 16  ;;  %v1642_v30 = vshll.u32 %v11263_v4, 16  ;;  %v1648_v31 = vshll.u32 %v11264_v10, 16  ;;  %v11367_v59 = vld [vmem:[%s14141_s20 + $0x60] sm:$0xf] }
  0x9d   : > { %v1621_v29 = vor.u32 %v1620_v14, %v1617_v13  ;;  %v1652_v32 = vshrl.u32 %v11264_v10, 16  ;;  %1176 = vrot.lane.b32.xlu1 %v11177_v11, %s14093_s25  ;;  %1335 = vrot.lane.b32.xlu0 %v11216_v7, %s14090_s22  ;;  %v1630_v37 = vrot.slane %v1628_v25, 4  ;;  %v1658_v40 = vshll.u32 %v11265_v15, 16  ;;  %390 = vst.msk [vmem:[#allocation3 + $0x30] sm:$0xff] %vm17854_vm6, %v13853_v22  ;;  %391 = vst.msk [vmem:[#allocation3 + $0x38] sm:$0xff] %vm17854_vm6, %v13854_v36 }
  0x9e   : > { %v1636_v38 = vrot.slane %v1634_v26, 5  ;;  %v1641_v39 = vrot.slane %v1639_v27, 4  ;;  %v1644_v44 = vrot.slane %v1642_v30, 5  ;;  %v1650_v45 = vrot.slane %v1648_v31, 5  ;;  %v638_v48 = vpop.permute.xlu0 %637  ;;  %660 = vst.msk [vmem:[#allocation3] sm:$0xff] %vm659_vm7, %v14548_v5 }
  0x9f   : > { %v1622_v43 = vrot.slane %v1621_v29, 4  ;;  %v1654_v46 = vrot.slane %v1652_v32, 4  ;;  %v1631_v49 = vor.u32 %v1630_v37, %v14567_v24  ;;  %v1660_v50 = vrot.slane %v1658_v40, 5  ;;  %661 = vst.msk [vmem:[#allocation3 + $0x8] sm:$0xff] %vm659_vm7, %v638_v48  ;;  %v11368_v3 = vld [vmem:[%s14141_s20 + $0x64] sm:$0xf] }
  0xa0   : > { %v1645_v55 = vor.u32 %v1644_v44, %v1641_v39  ;;  %v11304_v63 = vrot.slane %v11292_v33, 9  ;;  %v1811_v1 = vrot.slane %v11293_v35, 5  ;;  %v1814_v2 = vrot.slane %v11294_v41, 5  ;;  %824 = vst.msk [vmem:[#allocation3] sm:$0xff] %vm823_vm8, %v14520_v28  ;;  %825 = vst.msk [vmem:[#allocation3 + $0x8] sm:$0xff] %vm823_vm8, %v14540_v60 }
  0xa1   : > { %v1627_v54 = vsel %vm14180_vm5, %v1622_v43, %v14567_v24  ;;  %v1655_v57 = vor.u32 %v1654_v46, %v1650_v45  ;;  %1337 = vrot.lane.b32.xlu1 %v11217_v12, %s14090_s22  ;;  %1425 = vrot.lane.b32.xlu0 %v13830_v23, %s14094_s26  ;;  %v1632_v61 = vrot.slane %v1631_v49, 4  ;;  %v11305_v7 = vrot.slane %v11295_v47, 9  ;;  %v11369_v9 = vld [vmem:[%s14141_s20 + $0x68] sm:$0x1]  ;;  %v11370_v10 = vld [vmem:[%s14141_s20 + $0x6c] sm:$0xf] }
  0xa2   : > { %v1646_v4 = vrot.slane %v1645_v55, 4  ;;  %v1818_v8 = vrot.slane %v11296_v51, 5  ;;  %v1812_v11 = vsel %vm14134_vm2, %v11304_v63, %v1811_v1  ;;  %v1813_v12 = vrot.slane %v1811_v1, 4  ;;  %v1165_v14 = vpop.permute.xlu1 %1164  ;;  %v11371_v26 = vld [vmem:[%s14141_s20 + $0x70] sm:$0xf]  ;;  %915 = vst.msk [vmem:[#allocation3 + $0x8] sm:$0xff] %vm913_vm9, %v14497_v56 }
  0xa3   : > { %v1656_v6 = vrot.slane %v1655_v57, 4  ;;  %v1637_v5 = vsel %vm14180_vm5, %v1632_v61, %v1636_v38  ;;  %v1821_v13 = vrot.slane %v11297_v58, 5  ;;  %v2433_v20 = vshrl.u32 %v11367_v59, 16  ;;  %v11372_v31 = vld [vmem:[%s14141_s20 + $0x74] sm:$0x1]  ;;  %914 = vst.msk [vmem:[#allocation3] sm:$0xff] %vm913_vm9, %v14502_v62 }
  0xa4   : > { %v11272_v15 = vcombine.low %v1627_v54, %v1637_v5  ;;  %v1651_v28 = vsel %vm14180_vm5, %v1646_v4, %v1650_v45  ;;  %v1819_v60 = vsel %vm14134_vm2, %v11305_v7, %v1818_v8  ;;  %v1815_v18 = vsel %vm14134_vm2, %v1813_v12, %v1814_v2  ;;  %v11399_v43 = vld [vmem:[%s14141_s20 + $0x60] sm:$0xe]  ;;  %v11401_v51 = vld [vmem:[%s14141_s20 + $0x68] sm:$0x1]  ;;  %v11402_v55 = vld [vmem:[%s14141_s20 + $0x6c] sm:$0xe] }
  0xa5   : > { %v1661_v16 = vsel %vm14180_vm5, %v1656_v6, %v1660_v50  ;;  %1427 = vrot.lane.b32.xlu1 %v13831_v52, %s14094_s26  ;;  %v1820_v19 = vrot.slane %v1818_v8, 4  ;;  %v11312_v22 = vcombine.low %v1812_v11, %v1815_v18  ;;  %v2436_v23 = vshll.u32 %v11367_v59, 16  ;;  %v11400_v50 = vld [vmem:[%s14141_s20 + $0x64] sm:$0xf]  ;;  %v11403_v63 = vld [vmem:[%s14141_s20 + $0x70] sm:$0xf] }
  0xa6   : > { %v11273_v17 = vcombine.low %v1651_v28, %v1661_v16  ;;  %v1163_v21 = vpop.permute.xlu0 %1162  ;;  %1698 = vrot.lane.b32.xlu0 %v11272_v15, %s14095_s27  ;;  %v2442_v24 = vshll.u32 %v11368_v3, 16  ;;  %v2446_v25 = vshrl.u32 %v11368_v3, 16  ;;  %v2435_v29 = vrot.slane %v2433_v20, 4  ;;  %v1416_v45 = vpop.permute.xlu1 %1415  ;;  %1188 = vst.msk [vmem:[#allocation3 + $0x8] sm:$0xff] %vm1186_vm10, %v1165_v14  ;;  %v11404_v6 = vld [vmem:[%s14141_s20 + $0x74] sm:$0x1] }
  0xa7   : > { %v1822_v27 = vsel %vm14134_vm2, %v1820_v19, %v1821_v13  ;;  %v2452_v30 = vshll.u32 %v11369_v9, 16  ;;  %v2457_v32 = vshrl.u32 %v11370_v10, 16  ;;  %v2438_v35 = vrot.slane %v2436_v23, 5  ;;  %1187 = vst.msk [vmem:[#allocation3] sm:$0xff] %vm1186_vm10, %v1163_v21  ;;  %v11463_v14 = vld [vmem:[%s14141_s20 + $0x6c] sm:$0xf] }
  0xa8   : > { %v11313_v33 = vcombine.low %v1819_v60, %v1822_v27  ;;  %v2444_v36 = vrot.slane %v2442_v24, 5  ;;  %v2448_v37 = vrot.slane %v2446_v25, 4  ;;  %v2460_v40 = vshll.u32 %v11370_v10, 16  ;;  %v11464_v60 = vld [vmem:[%s14141_s20 + $0x70] sm:$0xf]  ;;  %1348 = vst.msk [vmem:[#allocation3] sm:$0xff] %vm1347_vm11, %v14523_v34 }
  0xa9   : > { %1700 = vrot.lane.b32.xlu1 %v11273_v17, %s14095_s27  ;;  %v2454_v38 = vrot.slane %v2452_v30, 5  ;;  %v2459_v39 = vrot.slane %v2457_v32, 4  ;;  %v2466_v41 = vshll.u32 %v11371_v26, 16  ;;  %v2439_v46 = vor.u32 %v2438_v35, %v2435_v29  ;;  %1349 = vst.msk [vmem:[#allocation3 + $0x8] sm:$0xff] %vm1347_vm11, %v14575_v42  ;;  %v11465_v19 = vld [vmem:[%s14141_s20 + $0x74] sm:$0x1] }
  0xaa   : > { %v1414_v44 = vpop.permute.xlu0 %1413  ;;  %1859 = vrot.lane.b32.xlu0 %v11312_v22, %s14096_s30  ;;  %v2449_v47 = vor.u32 %v2448_v37, %v2444_v36  ;;  %v2470_v48 = vshrl.u32 %v11371_v26, 16  ;;  %v2476_v49 = vshll.u32 %v11372_v31, 16  ;;  %v2462_v52 = vrot.slane %v2460_v40, 5  ;;  %v11466_v20 = vld [vmem:[%s14141_s20 + $0x78] sm:$0xf]  ;;  %1439 = vst.msk [vmem:[#allocation3 + $0x8] sm:$0xff] %vm17856_vm12, %v1416_v45 }
  0xab   : > { %v2468_v54 = vrot.slane %v2466_v41, 5  ;;  %v2440_v57 = vrot.slane %v2439_v46, 4  ;;  %v11423_v2 = vrot.slane %v11399_v43, 9  ;;  %v2730_v3 = vrot.slane %v11400_v50, 5  ;;  %1438 = vst.msk [vmem:[#allocation3] sm:$0xff] %vm17856_vm12, %v1414_v44 }
  0xac   : > { %v2450_v58 = vrot.slane %v2449_v47, 4  ;;  %v2472_v59 = vrot.slane %v2470_v48, 4  ;;  %v2478_v61 = vrot.slane %v2476_v49, 5  ;;  %v2463_v1 = vor.u32 %v2462_v52, %v2459_v39  ;;  %v11467_v34 = vld [vmem:[%s14141_s20 + $0x7c] sm:$0xf]  ;;  %v13835_v39 = vld [vmem:[%s14141_s20 + $0x6c] sm:$0xff]  }
  0xad   : > { %1861 = vrot.lane.b32.xlu1 %v11313_v33, %s14096_s30  ;;  %v2733_v4 = vrot.slane %v11401_v51, 5  ;;  %v2445_v56 = vsel %vm14180_vm5, %v2440_v57, %v2444_v36  ;;  %v11424_v9 = vrot.slane %v11402_v55, 9  ;;  %v2731_v11 = vsel %vm14134_vm2, %v11423_v2, %v2730_v3  ;;  %v11468_v30 = vld [vmem:[%s14141_s20 + $0x80] sm:$0x1]  ;;  %v11495_v37 = vld [vmem:[%s14141_s20 + $0x6c] sm:$0xe] }
  0xae   : > { %v1687_v7 = vpop.permute.xlu0 %1686  ;;  %v2455_v62 = vsel %vm14180_vm5, %v2450_v58, %v2454_v38  ;;  %v2473_v8 = vor.u32 %v2472_v59, %v2468_v54  ;;  %v2464_v5 = vrot.slane %v2463_v1, 4  ;;  %v2732_v12 = vrot.slane %v2730_v3, 4  ;;  %v11496_v44 = vld [vmem:[%s14141_s20 + $0x70] sm:$0xf]  ;;  %v11497_v45 = vld [vmem:[%s14141_s20 + $0x74] sm:$0x1] }
  0xaf   : > { %v11391_v10 = vcombine.low %v2445_v56, %v2455_v62  ;;  %v1689_v13 = vpop.permute.xlu1 %1688  ;;  %v2737_v28 = vrot.slane %v11403_v63, 5  ;;  %v2740_v16 = vrot.slane %v11404_v6, 5  ;;  %1711 = vst.msk [vmem:[#allocation3] sm:$0xff] %vm1710_vm13, %v1687_v7  ;;  %v2954_v26 = vshrl.u32 %v11463_v14, 16  ;;  %v11498_v51 = vld [vmem:[%s14141_s20 + $0x78] sm:$0xe] }
  0xb0   : > { %v2474_v15 = vrot.slane %v2473_v8, 4  ;;  %v2469_v17 = vsel %vm14180_vm5, %v2464_v5, %v2468_v54  ;;  %v2734_v18 = vsel %vm14134_vm2, %v2732_v12, %v2733_v4  ;;  %1712 = vst.msk [vmem:[#allocation3 + $0x8] sm:$0xff] %vm1710_vm13, %v1689_v13  ;;  %v2957_v27 = vshll.u32 %v11463_v14, 16  ;;  %v11499_v58 = vld [vmem:[%s14141_s20 + $0x7c] sm:$0xf] }
  0xb1   : > { %2648 = vrot.lane.b32.xlu0 %v11391_v10, %s14092_s24  ;;  %v11431_v23 = vcombine.low %v2731_v11, %v2734_v18  ;;  %v2738_v24 = vsel %vm14134_vm2, %v11424_v9, %v2737_v28  ;;  %v2739_v25 = vrot.slane %v2737_v28, 4  ;;  %v2963_v29 = vshll.u32 %v11464_v60, 16  ;;  %v13836_v59 = vld [vmem:[%s14141_s20 + $0x78] sm:$0xff]   ;;  %v11500_v12 = vld [vmem:[%s14141_s20 + $0x80] sm:$0x1] }
  0xb2   : > { %v1848_v21 = vpop.permute.xlu0 %1847  ;;  %v2479_v22 = vsel %vm14180_vm5, %v2474_v15, %v2478_v61  ;;  %v2967_v32 = vshrl.u32 %v11464_v60, 16  ;;  %v2973_v33 = vshll.u32 %v11465_v19, 16  ;;  %v2978_v35 = vshrl.u32 %v11466_v20, 16  ;;  %v11559_v18 = vld [vmem:[%s14141_s20 + $0x78] sm:$0xf] }
  0xb3   : > { %v11392_v42 = vcombine.low %v2469_v17, %v2479_v22  ;;  %v2741_v31 = vsel %vm14134_vm2, %v2739_v25, %v2740_v16  ;;  %v2956_v40 = vrot.slane %v2954_v26, 4  ;;  %v2959_v41 = vrot.slane %v2957_v27, 5  ;;  %1872 = vst.msk [vmem:[#allocation3] sm:$0xff] %vm1871_vm14, %v1848_v21  ;;  %v13844_v17 = vld [vmem:[%s17850_s1 + $0x20] ss:$0 sps:$4 sm:$0xff]  }
  0xb4   : > { %v11432_v38 = vcombine.low %v2738_v24, %v2741_v31  ;;  %v2965_v43 = vrot.slane %v2963_v29, 5  ;;  %v2969_v47 = vrot.slane %v2967_v32, 4  ;;  %v2975_v48 = vrot.slane %v2973_v33, 5  ;;  %v11560_v22 = vld [vmem:[%s14141_s20 + $0x7c] sm:$0xf]  ;;  %v13860_v24 = vld [vmem:[%s14141_s20 + $0x6c] sm:$0xff]   ;;  %13794 = vmatprep.subr.msk.bf16.mxu0 %vm17855_vm15, %v13844_v17 }
  0xb5   : > { %v640_v36 = vpop.permute.xlu1 %639  ;;  %2650 = vrot.lane.b32.xlu1 %v11392_v42, %s14092_s24  ;;  %2808 = vrot.lane.b32.xlu0 %v11431_v23, %s14091_s23  ;;  %v2980_v49 = vrot.slane %v2978_v35, 4  ;;  %v2981_v50 = vshll.u32 %v11466_v20, 16  ;;  %v2960_v52 = vor.u32 %v2959_v41, %v2956_v40  ;;  %v2987_v54 = vshll.u32 %v11467_v34, 16  ;;  %v13859_v23 = vld [vmem:[%s14141_s20 + $0x60] sm:$0xff]   ;;  %v11563_v40 = vld [vmem:[%s14141_s20 + $0x88] sm:$0xf] }
  0xb6   : > { %662 = vst.msk [vmem:[#allocation3 + $0x10] sm:$0xff] %vm659_vm7, %v640_v36  ;;  %v1850_v46 = vpop.permute.xlu0 %1849  ;;  %v2991_v55 = vshrl.u32 %v11467_v34, 16  ;;  %v2997_v57 = vshll.u32 %v11468_v30, 16  ;;  %v2970_v61 = vor.u32 %v2969_v47, %v2965_v43  ;;  %v11519_v1 = vrot.slane %v11495_v37, 9  ;;  %v11561_v29 = vld [vmem:[%s14141_s20 + $0x80] sm:$0x1] }
  0xb7   : > { %v2983_v63 = vrot.slane %v2981_v50, 5  ;;  %v2961_v2 = vrot.slane %v2960_v52, 4  ;;  %v2989_v3 = vrot.slane %v2987_v54, 5  ;;  %1873 = vst.msk [vmem:[#allocation3 + $0x8] sm:$0xff] %vm1871_vm14, %v1850_v46  ;;  %v3251_v62 = vrot.slane %v11496_v44, 5  ;;  %v13842_v44 = vld [vmem:[%s14141_s20 + $0x78] sm:$0xff]  }
  0xb8   : > { %v2993_v4 = vrot.slane %v2991_v55, 4  ;;  %v2999_v6 = vrot.slane %v2997_v57, 5  ;;  %v2971_v7 = vrot.slane %v2970_v61, 4  ;;  %v3254_v8 = vrot.slane %v11497_v45, 5  ;;  %v11562_v30 = vld [vmem:[%s14141_s20 + $0x84] sm:$0xf] }
  0xb9   : > { %2810 = vrot.lane.b32.xlu1 %v11432_v38, %s14091_s23  ;;  %2897 = vrot.lane.b32.xlu0 %v13835_v39, %s14089_s21  ;;  %v2984_v56 = vor.u32 %v2983_v63, %v2980_v49  ;;  %v2966_v5 = vsel %vm14180_vm5, %v2961_v2, %v2965_v43  ;;  %v11520_v13 = vrot.slane %v11498_v51, 9  ;;  %v3258_v14 = vrot.slane %v11499_v58, 5  ;;  %v13863_v49 = vld [vmem:[%s17850_s1] sm:$0xff]   ;;  %v11591_v57 = vld [vmem:[%s14141_s20 + $0x78] sm:$0xe] }
  0xba   : > { %v804_v10 = vpop.permute.xlu0 %803  ;;  %v2994_v11 = vor.u32 %v2993_v4, %v2989_v3  ;;  %v2976_v15 = vsel %vm14180_vm5, %v2971_v7, %v2975_v48  ;;  %v3252_v16 = vsel %vm14134_vm2, %v11519_v1, %v3251_v62  ;;  %v3253_v60 = vrot.slane %v3251_v62, 4  ;;  %v1880_v37 = vld [vmem:[#allocation3] sm:$0xff]  ;;  %v11564_v48 = vld [vmem:[%s14141_s20 + $0x8c] sm:$0x1]  ;;  %12900 = vmatprep.subr.bf16.mxu1 %v13863_v49  ;;  %v13843_v62 = vld [vmem:[%s14141_s20 + $0x84] sm:$0xff]  }
  0xbb   : > { %v642_v9 = vpop.permute.xlu1 %641  ;;  %826 = vst.msk [vmem:[#allocation3 + $0x10] sm:$0xff] %vm823_vm8, %v804_v10  ;;  %v2985_v28 = vrot.slane %v2984_v56, 4  ;;  %v11487_v19 = vcombine.low %v2966_v5, %v2976_v15  ;;  %v3260_v21 = vrot.slane %v3258_v14, 4  ;;  %v3259_v42 = vsel %vm14134_vm2, %v11520_v13, %v3258_v14  ;;  %12884 = vmatprep.mubr.msk.bf16.mxu0 %vm1924_vm0, %v1880_v37  ;;  %v11592_v1 = vld [vmem:[%s14141_s20 + $0x7c] sm:$0xf]  ;;  %12901 = vmatpush3.bf16.msra.mxu1 %v13863_v49 }
  0xbc   : > { %663 = vst.msk [vmem:[#allocation3 + $0x18] sm:$0xff] %vm659_vm7, %v642_v9  ;;  %v2995_v20 = vrot.slane %v2994_v11, 4  ;;  %v3255_v34 = vsel %vm14134_vm2, %v3253_v60, %v3254_v8  ;;  %v3261_v26 = vrot.slane %v11500_v12, 5  ;;  %v1951_v38 = vsel %vm17855_vm15, %v13844_v17, 0  ;;  %v11593_v56 = vld [vmem:[%s14141_s20 + $0x80] sm:$0x1] }
  0xbd   : > { %2899 = vrot.lane.b32.xlu1 %v13836_v59, %s14089_s21  ;;  %v2990_v25 = vsel %vm14180_vm5, %v2985_v28, %v2989_v3  ;;  %3169 = vrot.lane.b32.xlu0 %v11487_v19, %s14093_s25  ;;  %v11527_v33 = vcombine.low %v3252_v16, %v3255_v34  ;;  %v3475_v39 = vshrl.u32 %v11559_v18, 16  ;;  %v3478_v45 = vshll.u32 %v11559_v18, 16  ;;  %2400 = vst.msk [vmem:[#allocation3] sm:$0xff] %vm17854_vm6, %v13859_v23  ;;  %v11373_v11 = vld [vmem:[%s14141_s20 + $0x78] sm:$0xf]  ;;  %v13864_v60 = vld [vmem:[%s17850_s1 + $0x8] sm:$0xff]  }
  0xbe   : > { %v894_v31 = vpop.permute.xlu0 %893  ;;  %v3000_v32 = vsel %vm14180_vm5, %v2995_v20, %v2999_v6  ;;  %v3262_v36 = vsel %vm14134_vm2, %v3260_v21, %v3261_v26  ;;  %v1881_v41 = vld [vmem:[#allocation3 + $0x8] sm:$0xff]  ;;  %12883 = vmatpush3.bf16.msra.mxu0 %v1951_v38  ;;  %v3484_v46 = vshll.u32 %v11560_v22, 16  ;;  %v3488_v47 = vshrl.u32 %v11560_v22, 16  ;;  %v11374_v28 = vld [vmem:[%s14141_s20 + $0x7c] sm:$0xf]  ;;  %12902 = vmatprep.subr.bf16.mxu1 %v13864_v60 }
  0xbf   : > { %v806_v27 = vpop.permute.xlu1 %805  ;;  %916 = vst.msk [vmem:[#allocation3 + $0x10] sm:$0xff] %vm913_vm9, %v894_v31  ;;  %v11488_v35 = vcombine.low %v2990_v25, %v3000_v32  ;;  %v11528_v43 = vcombine.low %v3259_v42, %v3262_v36  ;;  %v3477_v50 = vrot.slane %v3475_v39, 4  ;;  %v3494_v51 = vshll.u32 %v11561_v29, 16  ;;  %v11375_v21 = vld [vmem:[%s14141_s20 + $0x80] sm:$0x1]  ;;  %12903 = vmatpush3.bf16.msra.mxu1 %v13864_v60  ;;  %v13865_v39 = vld [vmem:[%s17850_s1 + $0x10] sm:$0xff]  }
  0xc0   : > { %827 = vst.msk [vmem:[#allocation3 + $0x18] sm:$0xff] %vm823_vm8, %v806_v27  ;;  %v3499_v52 = vshrl.u32 %v11562_v30, 16  ;;  %v3502_v54 = vshll.u32 %v11562_v30, 16  ;;  %v3480_v58 = vrot.slane %v3478_v45, 5  ;;  %v3486_v59 = vrot.slane %v3484_v46, 5  ;;  %12904 = vmatprep.subr.bf16.mxu1 %v13865_v39 }
  0xc1   : > { %2401 = vst.msk [vmem:[#allocation3 + $0x8] sm:$0xff] %vm17854_vm6, %v13860_v24  ;;  %3171 = vrot.lane.b32.xlu1 %v11488_v35, %s14093_s25  ;;  %3329 = vrot.lane.b32.xlu0 %v11527_v33, %s14090_s22  ;;  %v3490_v61 = vrot.slane %v3488_v47, 4  ;;  %v3508_v63 = vshll.u32 %v11563_v40, 16  ;;  %v3496_v3 = vrot.slane %v3494_v51, 5  ;;  %v3512_v7 = vshrl.u32 %v11563_v40, 16  ;;  %v13867_v51 = vld [vmem:[%s17850_s1 + $0x18] sm:$0xff]  }
  0xc2   : > { %v3501_v4 = vrot.slane %v3499_v52, 4  ;;  %v3504_v6 = vrot.slane %v3502_v54, 5  ;;  %12885 = vmatmul.mubr.msk.bf16.vlgmr.msra.gmra.mrb[0].mxu0 %vm1924_vm0, %v1881_v41  ;;  %v3481_v8 = vor.u32 %v3480_v58, %v3477_v50  ;;  %v3518_v5 = vshll.u32 %v11564_v48, 16  ;;  %v11594_v22 = vld [vmem:[%s14141_s20 + $0x84] sm:$0xe] }
  0xc3   : > { %v896_v55 = vpop.permute.xlu1 %895  ;;  %v3491_v9 = vor.u32 %v3490_v61, %v3486_v59  ;;  %v3510_v10 = vrot.slane %v3508_v63, 5  ;;  %v3514_v13 = vrot.slane %v3512_v7, 4  ;;  %v11615_v14 = vrot.slane %v11591_v57, 9  ;;  %v11595_v36 = vld [vmem:[%s14141_s20 + $0x88] sm:$0xf]  ;;  %12905 = vmatpush3.bf16.msra.mxu1 %v13865_v39 }
  0xc4   : > { %917 = vst.msk [vmem:[#allocation3 + $0x18] sm:$0xff] %vm913_vm9, %v896_v55  ;;  %v1167_v2 = vpop.permute.xlu0 %1166  ;;  %v3505_v12 = vor.u32 %v3504_v6, %v3501_v4  ;;  %v3772_v15 = vrot.slane %v11592_v1, 5  ;;  %v3482_v17 = vrot.slane %v3481_v8, 4  ;;  %v3520_v19 = vrot.slane %v3518_v5, 5  ;;  %v11596_v37 = vld [vmem:[%s14141_s20 + $0x8c] sm:$0x1]  ;;  %12906 = vmatprep.subr.bf16.mxu1 %v13867_v51 }
  0xc5   : > { %1189 = vst.msk [vmem:[#allocation3 + $0x10] sm:$0xff] %vm1186_vm10, %v1167_v2  ;;  %3331 = vrot.lane.b32.xlu1 %v11528_v43, %s14090_s22  ;;  %3418 = vrot.lane.b32.xlu0 %v13842_v44, %s14094_s26  ;;  %v3492_v18 = vrot.slane %v3491_v9, 4  ;;  %v3775_v20 = vrot.slane %v11593_v56, 5  ;;  %v3515_v25 = vor.u32 %v3514_v13, %v3510_v10  ;;  %v2481_v29 = vshrl.u32 %v11373_v11, 16  ;;  %v11376_v45 = vld [vmem:[%s14141_s20 + $0x84] sm:$0xf] }
  0xc6   : > { %v3506_v24 = vrot.slane %v3505_v12, 4  ;;  %v3773_v34 = vsel %vm14134_vm2, %v11615_v14, %v3772_v15  ;;  %v3774_v42 = vrot.slane %v3772_v15, 4  ;;  %v3487_v26 = vsel %vm14180_vm5, %v3482_v17, %v3486_v59  ;;  %v11377_v58 = vld [vmem:[%s14141_s20 + $0x88] sm:$0xf]  ;;  %v11378_v59 = vld [vmem:[%s14141_s20 + $0x8c] sm:$0x1] }
  0xc7   : > { %v1169_v16 = vpop.permute.xlu1 %1168  ;;  %v3497_v27 = vsel %vm14180_vm5, %v3492_v18, %v3496_v3  ;;  %v2484_v30 = vshll.u32 %v11373_v11, 16  ;;  %v3516_v33 = vrot.slane %v3515_v25, 4  ;;  %v2483_v41 = vrot.slane %v2481_v29, 4  ;;  %v11405_v3 = vld [vmem:[%s14141_s20 + $0x78] sm:$0xe]  ;;  %12907 = vmatpush3.bf16.msra.mxu1 %v13867_v51 }
  0xc8   : > { %1190 = vst.msk [vmem:[#allocation3 + $0x18] sm:$0xff] %vm1186_vm10, %v1169_v16  ;;  %v1328_v23 = vpop.permute.xlu0 %1327  ;;  %v11583_v31 = vcombine.low %v3487_v26, %v3497_v27  ;;  %v3511_v32 = vsel %vm14180_vm5, %v3506_v24, %v3510_v10  ;;  %v3776_v35 = vsel %vm14134_vm2, %v3774_v42, %v3775_v20  ;;  %v2490_v44 = vshll.u32 %v11374_v28, 16  ;;  %v11406_v8 = vld [vmem:[%s14141_s20 + $0x7c] sm:$0xf]  ;;  %v11407_v12 = vld [vmem:[%s14141_s20 + $0x80] sm:$0x1] }
  0xc9   : > { %1350 = vst.msk [vmem:[#allocation3 + $0x10] sm:$0xff] %vm1347_vm11, %v1328_v23  ;;  %3420 = vrot.lane.b32.xlu1 %v13843_v62, %s14094_s26  ;;  %v11623_v40 = vcombine.low %v3773_v34, %v3776_v35  ;;  %v2486_v43 = vrot.slane %v2484_v30, 5  ;;  %v3521_v47 = vsel %vm14180_vm5, %v3516_v33, %v3520_v19  ;;  %v2494_v48 = vshrl.u32 %v11374_v28, 16  ;;  %v11408_v60 = vld [vmem:[%s14141_s20 + $0x84] sm:$0xe] }
  0xca   : > { %3690 = vrot.lane.b32.xlu0 %v11583_v31, %s14095_s27  ;;  %v2500_v49 = vshll.u32 %v11375_v21, 16  ;;  %v11616_v50 = vrot.slane %v11594_v22, 9  ;;  %v11584_v52 = vcombine.low %v3511_v32, %v3521_v47  ;;  %v2492_v55 = vrot.slane %v2490_v44, 5  ;;  %v11409_v17 = vld [vmem:[%s14141_s20 + $0x88] sm:$0xf] }
  0xcb   : > { %v1330_v38 = vpop.permute.xlu1 %1329  ;;  %v2487_v54 = vor.u32 %v2486_v43, %v2483_v41  ;;  %v3779_v57 = vrot.slane %v11595_v36, 5  ;;  %v2496_v61 = vrot.slane %v2494_v48, 4  ;;  %v3782_v1 = vrot.slane %v11596_v37, 5  ;;  %v11410_v22 = vld [vmem:[%s14141_s20 + $0x8c] sm:$0x1] }
  0xcc   : > { %1351 = vst.msk [vmem:[#allocation3 + $0x18] sm:$0xff] %vm1347_vm11, %v1330_v38  ;;  %v1418_v46 = vpop.permute.xlu0 %1417  ;;  %v2502_v63 = vrot.slane %v2500_v49, 5  ;;  %v2505_v2 = vshrl.u32 %v11376_v45, 16  ;;  %v2508_v62 = vshll.u32 %v11376_v45, 16  ;;  %v2514_v5 = vshll.u32 %v11377_v58, 16 }
  0xcd   : > { %1440 = vst.msk [vmem:[#allocation3 + $0x10] sm:$0xff] %vm17856_vm12, %v1418_v46  ;;  %3692 = vrot.lane.b32.xlu1 %v11584_v52, %s14095_s27  ;;  %v2488_v6 = vrot.slane %v2487_v54, 4  ;;  %v3780_v7 = vsel %vm14134_vm2, %v11616_v50, %v3779_v57  ;;  %v3781_v56 = vrot.slane %v3779_v57, 4  ;;  %v2497_v9 = vor.u32 %v2496_v61, %v2492_v55  ;;  %v11469_v26 = vld [vmem:[%s14141_s20 + $0x84] sm:$0xf] }
  0xce   : > { %3850 = vrot.lane.b32.xlu0 %v11623_v40, %s14096_s30  ;;  %v2507_v10 = vrot.slane %v2505_v2, 4  ;;  %v2518_v11 = vshrl.u32 %v11377_v58, 16  ;;  %v2510_v28 = vrot.slane %v2508_v62, 5  ;;  %v2524_v16 = vshll.u32 %v11378_v59, 16  ;;  %v11470_v32 = vld [vmem:[%s14141_s20 + $0x88] sm:$0xf] }
  0xcf   : > { %v1420_v4 = vpop.permute.xlu1 %1419  ;;  %v2493_v14 = vsel %vm14180_vm5, %v2488_v6, %v2492_v55  ;;  %v3783_v15 = vsel %vm14134_vm2, %v3781_v56, %v3782_v1  ;;  %v2498_v18 = vrot.slane %v2497_v9, 4  ;;  %v2516_v20 = vrot.slane %v2514_v5, 5  ;;  %v11471_v46 = vld [vmem:[%s14141_s20 + $0x8c] sm:$0x1]  ;;  %v11472_v49 = vld [vmem:[%s14141_s20 + $0x90] sm:$0xf] }
  0xd0   : > { %1441 = vst.msk [vmem:[#allocation3 + $0x18] sm:$0xff] %vm17856_vm12, %v1420_v4  ;;  %v1691_v13 = vpop.permute.xlu0 %1690  ;;  %v11624_v19 = vcombine.low %v3780_v7, %v3783_v15  ;;  %v2520_v21 = vrot.slane %v2518_v11, 4  ;;  %v2511_v24 = vor.u32 %v2510_v28, %v2507_v10  ;;  %v2526_v25 = vrot.slane %v2524_v16, 5  ;;  %v11473_v55 = vld [vmem:[%s14141_s20 + $0x94] sm:$0xf]  ;;  %v13866_v6 = vld [vmem:[%s14141_s20 + $0x78] sm:$0xff]  }
  0xd1   : > { %1713 = vst.msk [vmem:[#allocation3 + $0x10] sm:$0xff] %vm1710_vm13, %v1691_v13  ;;  %v11425_v34 = vrot.slane %v11405_v3, 9  ;;  %v2744_v42 = vrot.slane %v11406_v8, 5  ;;  %v2503_v27 = vsel %vm14180_vm5, %v2498_v18, %v2502_v63  ;;  %v2747_v30 = vrot.slane %v11407_v12, 5  ;;  %v11474_v57 = vld [vmem:[%s14141_s20 + $0x98] sm:$0x1] }
  0xd2   : > { %3852 = vrot.lane.b32.xlu0 %v11624_v19, %s14096_s30  ;;  %v2521_v29 = vor.u32 %v2520_v21, %v2516_v20  ;;  %v11426_v31 = vrot.slane %v11408_v60, 9  ;;  %v11393_v35 = vcombine.low %v2493_v14, %v2503_v27  ;;  %v2512_v36 = vrot.slane %v2511_v24, 4  ;;  %v11501_v3 = vld [vmem:[%s14141_s20 + $0x84] sm:$0xe]  ;;  %v11502_v4 = vld [vmem:[%s14141_s20 + $0x88] sm:$0xf] }
  0xd3   : > { %v1693_v23 = vpop.permute.xlu1 %1692  ;;  %v2745_v37 = vsel %vm14134_vm2, %v11425_v34, %v2744_v42  ;;  %v2746_v38 = vrot.slane %v2744_v42, 4  ;;  %v2751_v40 = vrot.slane %v11409_v17, 5  ;;  %v2754_v41 = vrot.slane %v11410_v22, 5  ;;  %v13845_v56 = vld [vmem:[%s14141_s20 + $0x84] sm:$0xff]   ;;  %v11503_v10 = vld [vmem:[%s14141_s20 + $0x8c] sm:$0x1] }
  0xd4   : > { %1714 = vst.msk [vmem:[#allocation3 + $0x18] sm:$0xff] %vm1710_vm13, %v1693_v23  ;;  %v1852_v33 = vpop.permute.xlu0 %1851  ;;  %v2522_v39 = vrot.slane %v2521_v29, 4  ;;  %v3002_v43 = vshrl.u32 %v11469_v26, 16  ;;  %2652 = vrot.lane.b32.xlu1 %v11393_v35, %s14092_s24  ;;  %v2517_v44 = vsel %vm14180_vm5, %v2512_v36, %v2516_v20  ;;  %v3005_v47 = vshll.u32 %v11469_v26, 16  ;;  %v11504_v60 = vld [vmem:[%s14141_s20 + $0x90] sm:$0xe] }
  0xd5   : > { %1874 = vst.msk [vmem:[#allocation3 + $0x10] sm:$0xff] %vm1871_vm14, %v1852_v33  ;;  %v2748_v45 = vsel %vm14134_vm2, %v2746_v38, %v2747_v30  ;;  %v3011_v48 = vshll.u32 %v11470_v32, 16  ;;  %v2752_v52 = vsel %vm14134_vm2, %v11426_v31, %v2751_v40  ;;  %v2753_v54 = vrot.slane %v2751_v40, 4  ;;  %v11505_v17 = vld [vmem:[%s14141_s20 + $0x94] sm:$0xf]  ;;  %v13868_v20 = vld [vmem:[%s14141_s20 + $0x84] sm:$0xff]  }
  0xd6   : > { %v2527_v50 = vsel %vm14180_vm5, %v2522_v39, %v2526_v25  ;;  %v11433_v51 = vcombine.low %v2745_v37, %v2748_v45  ;;  %v3004_v63 = vrot.slane %v3002_v43, 4  ;;  %v3007_v1 = vrot.slane %v3005_v47, 5  ;;  %v14828_v18 = vld [vmem:[%s14141_s20 + $0x98] sm:$0x1]  ;;  %v13846_v29 = vld [vmem:[%s14141_s20 + $0x90] sm:$0xff]  }
  0xd7   : > { %v11394_v61 = vcombine.low %v2517_v44, %v2527_v50  ;;  %v14812_v2 = vrot.slane %v3011_v48, 5  ;;  %v2755_v7 = vsel %vm14134_vm2, %v2753_v54, %v2754_v41  ;;  %v3015_v62 = vshrl.u32 %v11470_v32, 16  ;;  %v11565_v36 = vld [vmem:[%s14141_s20 + $0x90] sm:$0xf]  ;;  %v11566_v47 = vld [vmem:[%s14141_s20 + $0x94] sm:$0xf] }
  0xd8   : > { %v1854_v59 = vpop.permute.xlu0 %1853  ;;  %2812 = vrot.lane.b32.xlu0 %v11433_v51, %s14091_s23  ;;  %v3021_v8 = vshll.u32 %v11471_v46, 16  ;;  %v3026_v9 = vshrl.u32 %v11472_v49, 16  ;;  %v11434_v5 = vcombine.low %v2752_v52, %v2755_v7  ;;  %v3008_v11 = vor.u32 %v3007_v1, %v3004_v63  ;;  %v11567_v51 = vld [vmem:[%s14141_s20 + $0x98] sm:$0x1]  ;;  %v11568_v54 = vld [vmem:[%s14141_s20 + $0x9c] sm:$0xf] }
  0xd9   : > { %v644_v58 = vpop.permute.xlu1 %643  ;;  %1875 = vst.msk [vmem:[#allocation3 + $0x18] sm:$0xff] %vm1871_vm14, %v1854_v59  ;;  %2654 = vrot.lane.b32.xlu1 %v11394_v61, %s14092_s24  ;;  %v3029_v12 = vshll.u32 %v11472_v49, 16  ;;  %v3035_v13 = vshll.u32 %v11473_v55, 16  ;;  %v3017_v14 = vrot.slane %v3015_v62, 4  ;;  %v3039_v16 = vshrl.u32 %v11473_v55, 16 }
  0xda   : > { %664 = vst.msk [vmem:[#allocation3 + $0x20] sm:$0xff] %vm659_vm7, %v644_v58  ;;  %v3023_v15 = vrot.slane %v3021_v8, 5  ;;  %v3028_v28 = vrot.slane %v3026_v9, 4  ;;  %v3009_v21 = vrot.slane %v3008_v11, 4  ;;  %v3045_v24 = vshll.u32 %v11474_v57, 16 }
  0xdb   : > { %v3031_v22 = vrot.slane %v3029_v12, 5  ;;  %v3037_v23 = vrot.slane %v3035_v13, 5  ;;  %v3018_v25 = vor.u32 %v3017_v14, %v14812_v2  ;;  %v3041_v34 = vrot.slane %v3039_v16, 4  ;;  %v11569_v1 = vld [vmem:[%s14141_s20 + $0xa0] sm:$0xf] }
  0xdc   : > { %v1882_v19 = vld [vmem:[#allocation3 + $0x10] sm:$0xff]  ;;  %2901 = vrot.lane.b32.xlu0 %v13845_v56, %s14089_s21  ;;  %v11521_v42 = vrot.slane %v11501_v3, 9  ;;  %v3265_v26 = vrot.slane %v11502_v4, 5  ;;  %v3014_v30 = vsel %vm14180_vm5, %v3009_v21, %v14812_v2  ;;  %v3047_v32 = vrot.slane %v3045_v24, 5  ;;  %v11570_v7 = vld [vmem:[%s14141_s20 + $0xa4] sm:$0x1] }
  0xdd   : > { %12888 = vmatprep.mubr.msk.bf16.mxu0 %vm1924_vm0, %v1882_v19  ;;  %2402 = vst.msk [vmem:[#allocation3 + $0x10] sm:$0xff] %vm17854_vm6, %v13866_v6  ;;  %2814 = vrot.lane.b32.xlu1 %v11434_v5, %s14091_s23  ;;  %v3032_v31 = vor.u32 %v3031_v22, %v3028_v28  ;;  %v3268_v33 = vrot.slane %v11503_v10, 5  ;;  %v3019_v37 = vrot.slane %v3018_v25, 4  ;;  %v3042_v38 = vor.u32 %v3041_v34, %v3037_v23  ;;  %v11597_v10 = vld [vmem:[%s14141_s20 + $0x90] sm:$0xe] }
  0xde   : > { %v808_v27 = vpop.permute.xlu0 %807  ;;  %v3266_v39 = vsel %vm14134_vm2, %v11521_v42, %v3265_v26  ;;  %v3267_v40 = vrot.slane %v3265_v26, 4  ;;  %v11522_v44 = vrot.slane %v11504_v60, 9  ;;  %v3272_v45 = vrot.slane %v11505_v17, 5  ;;  %v11598_v14 = vld [vmem:[%s14141_s20 + $0x94] sm:$0xf] }
  0xdf   : > { %v646_v35 = vpop.permute.xlu1 %645  ;;  %828 = vst.msk [vmem:[#allocation3 + $0x20] sm:$0xff] %vm823_vm8, %v808_v27  ;;  %v3033_v43 = vrot.slane %v3032_v31, 4  ;;  %v3275_v46 = vrot.slane %v14828_v18, 5  ;;  %v3024_v48 = vsel %vm14180_vm5, %v3019_v37, %v3023_v15  ;;  %v3043_v49 = vrot.slane %v3042_v38, 4  ;;  %v11599_v18 = vld [vmem:[%s14141_s20 + $0x98] sm:$0x1] }
  0xe0   : > { %665 = vst.msk [vmem:[#allocation3 + $0x28] sm:$0xff] %vm659_vm7, %v646_v35  ;;  %v1883_v41 = vld [vmem:[#allocation3 + $0x18] sm:$0xff]  ;;  %v3269_v50 = vsel %vm14134_vm2, %v3267_v40, %v3268_v33  ;;  %v3523_v52 = vshrl.u32 %v11565_v36, 16  ;;  %v11489_v57 = vcombine.low %v3014_v30, %v3024_v48  ;;  %v3273_v61 = vsel %vm14134_vm2, %v11522_v44, %v3272_v45  ;;  %v13850_v30 = vld [vmem:[%s14141_s20 + $0x9c] sm:$0xff]   ;;  %v11381_v40 = vld [vmem:[%s14141_s20 + $0x98] sm:$0x1] }
  0xe1   : > { %12889 = vmatmul.mubr.msk.bf16.gmra.mrb[4].mxu0 %vm1924_vm0, %v1883_v41  ;;  %2403 = vst.msk [vmem:[#allocation3 + $0x18] sm:$0xff] %vm17854_vm6, %v13868_v20  ;;  %2903 = vrot.lane.b32.xlu1 %v13846_v29, %s14089_s21  ;;  %v3038_v58 = vsel %vm14180_vm5, %v3033_v43, %v3037_v23  ;;  %v11529_v59 = vcombine.low %v3266_v39, %v3269_v50  ;;  %v3274_v3 = vrot.slane %v3272_v45, 4  ;;  %v3526_v6 = vshll.u32 %v11565_v36, 16  ;;  %v11379_v24 = vld [vmem:[%s14141_s20 + $0x90] sm:$0xf] }
  0xe2   : > { %v898_v55 = vpop.permute.xlu0 %897  ;;  %v3048_v2 = vsel %vm14180_vm5, %v3043_v49, %v3047_v32  ;;  %v3525_v4 = vrot.slane %v3523_v52, 4  ;;  %3173 = vrot.lane.b32.xlu0 %v11489_v57, %s14093_s25  ;;  %v3532_v62 = vshll.u32 %v11566_v47, 16  ;;  %v3536_v8 = vshrl.u32 %v11566_v47, 16  ;;  %v13849_v25 = vld [vmem:[%s14141_s20 + $0x90] sm:$0xff]   ;;  %v11600_v52 = vld [vmem:[%s14141_s20 + $0x9c] sm:$0xe] }
  0xe3   : > { %v810_v63 = vpop.permute.xlu1 %809  ;;  %918 = vst.msk [vmem:[#allocation3 + $0x20] sm:$0xff] %vm913_vm9, %v898_v55  ;;  %v11490_v56 = vcombine.low %v3038_v58, %v3048_v2  ;;  %v3542_v9 = vshll.u32 %v11567_v51, 16  ;;  %v3276_v5 = vsel %vm14134_vm2, %v3274_v3, %v3275_v46  ;;  %v3528_v11 = vrot.slane %v3526_v6, 5  ;;  %v11380_v29 = vld [vmem:[%s14141_s20 + $0x94] sm:$0xf] }
  0xe4   : > { %829 = vst.msk [vmem:[#allocation3 + $0x28] sm:$0xff] %vm823_vm8, %v810_v63  ;;  %v3547_v12 = vshrl.u32 %v11568_v54, 16  ;;  %v3550_v13 = vshll.u32 %v11568_v54, 16  ;;  %v11530_v15 = vcombine.low %v3273_v61, %v3276_v5  ;;  %v3534_v28 = vrot.slane %v3532_v62, 5  ;;  %v11602_v61 = vld [vmem:[%s14141_s20 + $0xa4] sm:$0x1] }
  0xe5   : > { %3175 = vrot.lane.b32.xlu1 %v11490_v56, %s14093_s25  ;;  %v3538_v16 = vrot.slane %v3536_v8, 4  ;;  %v3544_v60 = vrot.slane %v3542_v9, 5  ;;  %v3529_v20 = vor.u32 %v3528_v11, %v3525_v4  ;;  %v3556_v23 = vshll.u32 %v11569_v1, 16  ;;  %v11382_v4 = vld [vmem:[%s14141_s20 + $0x9c] sm:$0xf] }
  0xe6   : > { %v3549_v21 = vrot.slane %v3547_v12, 4  ;;  %v3552_v22 = vrot.slane %v3550_v13, 5  ;;  %3333 = vrot.lane.b32.xlu0 %v11529_v59, %s14090_s22  ;;  %v3560_v42 = vshrl.u32 %v11569_v1, 16  ;;  %v3566_v26 = vshll.u32 %v11570_v7, 16  ;;  %v11601_v59 = vld [vmem:[%s14141_s20 + $0xa0] sm:$0xf] }
  0xe7   : > { %v900_v17 = vpop.permute.xlu1 %899  ;;  %v1171_v19 = vpop.permute.xlu0 %1170  ;;  %v3539_v34 = vor.u32 %v3538_v16, %v3534_v28  ;;  %v11617_v27 = vrot.slane %v11597_v10, 9  ;;  %v3530_v31 = vrot.slane %v3529_v20, 4  ;;  %v3558_v33 = vrot.slane %v3556_v23, 5  ;;  %v11383_v13 = vld [vmem:[%s14141_s20 + $0xa0] sm:$0xf] }
  0xe8   : > { %919 = vst.msk [vmem:[#allocation3 + $0x28] sm:$0xff] %vm913_vm9, %v900_v17  ;;  %v3553_v32 = vor.u32 %v3552_v22, %v3549_v21  ;;  %v3786_v35 = vrot.slane %v11598_v14, 5  ;;  %v3562_v37 = vrot.slane %v3560_v42, 4  ;;  %v3568_v38 = vrot.slane %v3566_v26, 5  ;;  %v11384_v14 = vld [vmem:[%s14141_s20 + $0xa4] sm:$0x1] }
  0xe9   : > { %1191 = vst.msk [vmem:[#allocation3 + $0x20] sm:$0xff] %vm1186_vm10, %v1171_v19  ;;  %3335 = vrot.lane.b32.xlu1 %v11530_v15, %s14090_s22  ;;  %v3540_v36 = vrot.slane %v3539_v34, 4  ;;  %v3789_v39 = vrot.slane %v11599_v18, 5  ;;  %v3535_v44 = vsel %vm14180_vm5, %v3530_v31, %v3534_v28  ;;  %v2529_v50 = vshrl.u32 %v11379_v24, 16  ;;  %v11411_v17 = vld [vmem:[%s14141_s20 + $0x90] sm:$0xe] }
  0xea   : > { %v3554_v45 = vrot.slane %v3553_v32, 4  ;;  %v3787_v46 = vsel %vm14134_vm2, %v11617_v27, %v3786_v35  ;;  %v3788_v47 = vrot.slane %v3786_v35, 4  ;;  %3422 = vrot.lane.b32.xlu0 %v13849_v25, %s14094_s26  ;;  %v3563_v49 = vor.u32 %v3562_v37, %v3558_v33  ;;  %v11412_v22 = vld [vmem:[%s14141_s20 + $0x94] sm:$0xf]  ;;  %v11413_v26 = vld [vmem:[%s14141_s20 + $0x98] sm:$0x1] }
  0xeb   : > { %v1173_v41 = vpop.permute.xlu1 %1172  ;;  %v1332_v43 = vpop.permute.xlu0 %1331  ;;  %v3545_v48 = vsel %vm14180_vm5, %v3540_v36, %v3544_v60  ;;  %v2532_v51 = vshll.u32 %v11379_v24, 16  ;;  %v2538_v58 = vshll.u32 %v11380_v29, 16  ;;  %v2531_v2 = vrot.slane %v2529_v50, 4  ;;  %v11415_v35 = vld [vmem:[%s14141_s20 + $0xa0] sm:$0xf] }
  0xec   : > { %1192 = vst.msk [vmem:[#allocation3 + $0x28] sm:$0xff] %vm1186_vm10, %v1173_v41  ;;  %v11585_v54 = vcombine.low %v3535_v44, %v3545_v48  ;;  %v3559_v55 = vsel %vm14180_vm5, %v3554_v45, %v3558_v33  ;;  %v3790_v57 = vsel %vm14134_vm2, %v3788_v47, %v3789_v39  ;;  %v3564_v63 = vrot.slane %v3563_v49, 4  ;;  %v11414_v33 = vld [vmem:[%s14141_s20 + $0x9c] sm:$0xe] }
  0xed   : > { %1352 = vst.msk [vmem:[#allocation3 + $0x20] sm:$0xff] %vm1347_vm11, %v1332_v43  ;;  %3424 = vrot.lane.b32.xlu1 %v13850_v30, %s14094_s26  ;;  %v11625_v1 = vcombine.low %v3787_v46, %v3790_v57  ;;  %v2534_v3 = vrot.slane %v2532_v51, 5  ;;  %v2540_v56 = vrot.slane %v2538_v58, 5  ;;  %v2542_v62 = vshrl.u32 %v11380_v29, 16  ;;  %v11475_v47 = vld [vmem:[%s14141_s20 + $0x9c] sm:$0xf] }
  0xee   : > { %v2548_v8 = vshll.u32 %v11381_v40, 16  ;;  %v11618_v9 = vrot.slane %v11600_v52, 9  ;;  %3694 = vrot.lane.b32.xlu0 %v11585_v54, %s14095_s27  ;;  %v3569_v10 = vsel %vm14180_vm5, %v3564_v63, %v3568_v38  ;;  %v3793_v11 = vrot.slane %v11601_v59, 5  ;;  %v11416_v40 = vld [vmem:[%s14141_s20 + $0xa4] sm:$0x1] }
  0xef   : > { %v1334_v6 = vpop.permute.xlu1 %1333  ;;  %v1422_v7 = vpop.permute.xlu0 %1421  ;;  %v2535_v5 = vor.u32 %v2534_v3, %v2531_v2  ;;  %v3796_v12 = vrot.slane %v11602_v61, 5  ;;  %v11586_v15 = vcombine.low %v3559_v55, %v3569_v10  ;;  %v2544_v28 = vrot.slane %v2542_v62, 4  ;;  %v11476_v52 = vld [vmem:[%s14141_s20 + $0xa0] sm:$0xf]  ;;  %v11478_v62 = vld [vmem:[%s14141_s20 + $0xa8] sm:$0xf] }
  0xf0   : > { %1353 = vst.msk [vmem:[#allocation3 + $0x28] sm:$0xff] %vm1347_vm11, %v1334_v6  ;;  %v2550_v16 = vrot.slane %v2548_v8, 5  ;;  %v2553_v60 = vshrl.u32 %v11382_v4, 16  ;;  %v3794_v19 = vsel %vm14134_vm2, %v11618_v9, %v3793_v11  ;;  %v3795_v20 = vrot.slane %v3793_v11, 4  ;;  %v11477_v6 = vld [vmem:[%s14141_s20 + $0xa4] sm:$0x1] }
  0xf1   : > { %1442 = vst.msk [vmem:[#allocation3 + $0x20] sm:$0xff] %vm17856_vm12, %v1422_v7  ;;  %v2536_v18 = vrot.slane %v2535_v5, 4  ;;  %v2556_v21 = vshll.u32 %v11382_v4, 16  ;;  %3696 = vrot.lane.b32.xlu1 %v11586_v15, %s14095_s27  ;;  %v2545_v24 = vor.u32 %v2544_v28, %v2540_v56  ;;  %v2562_v34 = vshll.u32 %v11383_v13, 16  ;;  %v11479_v11 = vld [vmem:[%s14141_s20 + $0xac] sm:$0xf] }
  0xf2   : > { %v2555_v25 = vrot.slane %v2553_v60, 4  ;;  %v2566_v42 = vshrl.u32 %v11383_v13, 16  ;;  %3854 = vrot.lane.b32.xlu0 %v11625_v1, %s14096_s30  ;;  %v3797_v30 = vsel %vm14134_vm2, %v3795_v20, %v3796_v12  ;;  %v2572_v32 = vshll.u32 %v11384_v14, 16  ;;  %v11480_v12 = vld [vmem:[%s14141_s20 + $0xb0] sm:$0x1] }
  0xf3   : > { %v1424_v23 = vpop.permute.xlu1 %1423  ;;  %v2541_v29 = vsel %vm14180_vm5, %v2536_v18, %v2540_v56  ;;  %v2558_v31 = vrot.slane %v2556_v21, 5  ;;  %v2546_v36 = vrot.slane %v2545_v24, 4  ;;  %v11626_v37 = vcombine.low %v3794_v19, %v3797_v30  ;;  %v11508_v18 = vld [vmem:[%s14141_s20 + $0xa0] sm:$0xf]  ;;  %v13870_v19 = vld [vmem:[%s14141_s20 + $0x90] sm:$0xff]  }
  0xf4   : > { %1443 = vst.msk [vmem:[#allocation3 + $0x28] sm:$0xff] %vm17856_vm12, %v1424_v23  ;;  %v1695_v27 = vpop.permute.xlu0 %1694  ;;  %v2564_v38 = vrot.slane %v2562_v34, 5  ;;  %v2568_v39 = vrot.slane %v2566_v42, 4  ;;  %v2574_v43 = vrot.slane %v2572_v32, 5  ;;  %v11427_v44 = vrot.slane %v11411_v17, 9  ;;  %v13851_v21 = vld [vmem:[%s14141_s20 + $0x9c] sm:$0xff]  }
  0xf5   : > { %1715 = vst.msk [vmem:[#allocation3 + $0x20] sm:$0xff] %vm1710_vm13, %v1695_v27  ;;  %v2559_v41 = vor.u32 %v2558_v31, %v2555_v25  ;;  %v2758_v45 = vrot.slane %v11412_v22, 5  ;;  %v2551_v48 = vsel %vm14180_vm5, %v2546_v36, %v2550_v16  ;;  %v2761_v50 = vrot.slane %v11413_v26, 5  ;;  %v11507_v17 = vld [vmem:[%s14141_s20 + $0x9c] sm:$0xe] }
  0xf6   : > { %v2569_v49 = vor.u32 %v2568_v39, %v2564_v38  ;;  %v11428_v51 = vrot.slane %v11414_v33, 9  ;;  %v11395_v55 = vcombine.low %v2541_v29, %v2551_v48  ;;  %3856 = vrot.lane.b32.xlu0 %v11626_v37, %s14096_s30  ;;  %v2765_v63 = vrot.slane %v11415_v35, 5  ;;  %v11509_v25 = vld [vmem:[%s14141_s20 + $0xa4] sm:$0x1]  ;;  %v11510_v33 = vld [vmem:[%s14141_s20 + $0xa8] sm:$0xe] }
  0xf7   : > { %v1697_v46 = vpop.permute.xlu1 %1696  ;;  %v2560_v57 = vrot.slane %v2559_v41, 4  ;;  %v2759_v58 = vsel %vm14134_vm2, %v11427_v44, %v2758_v45  ;;  %v2760_v59 = vrot.slane %v2758_v45, 4  ;;  %v2768_v1 = vrot.slane %v11416_v40, 5  ;;  %v11511_v35 = vld [vmem:[%s14141_s20 + $0xac] sm:$0xf]  ;;  %v13871_v37 = vld [vmem:[%s14141_s20 + $0x9c] sm:$0xff]  }
  0xf8   : > { %1716 = vst.msk [vmem:[#allocation3 + $0x28] sm:$0xff] %vm1710_vm13, %v1697_v46  ;;  %v1856_v54 = vpop.permute.xlu0 %1855  ;;  %v2570_v61 = vrot.slane %v2569_v49, 4  ;;  %v3050_v2 = vshrl.u32 %v11475_v47, 16  ;;  %2656 = vrot.lane.b32.xlu1 %v11395_v55, %s14092_s24  ;;  %v3053_v7 = vshll.u32 %v11475_v47, 16  ;;  %v3059_v56 = vshll.u32 %v11476_v52, 16  ;;  %v13852_v49 = vld [vmem:[%s14141_s20 + $0xa8] sm:$0xff]  }
  0xf9   : > { %1876 = vst.msk [vmem:[#allocation3 + $0x20] sm:$0xff] %vm1871_vm14, %v1856_v54  ;;  %v2565_v3 = vsel %vm14180_vm5, %v2560_v57, %v2564_v38  ;;  %v2762_v4 = vsel %vm14134_vm2, %v2760_v59, %v2761_v50  ;;  %v2766_v10 = vsel %vm14134_vm2, %v11428_v51, %v2765_v63  ;;  %v2767_v5 = vrot.slane %v2765_v63, 4  ;;  %v11512_v47 = vld [vmem:[%s14141_s20 + $0xb0] sm:$0x1]  ;;  %v11571_v57 = vld [vmem:[%s14141_s20 + $0xa8] sm:$0xf] }
  0xfa   : > { %v2575_v8 = vsel %vm14180_vm5, %v2570_v61, %v2574_v43  ;;  %v11435_v9 = vcombine.low %v2759_v58, %v2762_v4  ;;  %v3052_v28 = vrot.slane %v3050_v2, 4  ;;  %v3055_v16 = vrot.slane %v3053_v7, 5 }
  0xfb   : > { %v11396_v15 = vcombine.low %v2565_v3, %v2575_v8  ;;  %v14945_v60 = vrot.slane %v3059_v56, 5  ;;  %v2769_v20 = vsel %vm14134_vm2, %v2767_v5, %v2768_v1  ;;  %v3063_v22 = vshrl.u32 %v11476_v52, 16  ;;  %v11572_v8 = vld [vmem:[%s14141_s20 + $0xac] sm:$0xf] }
  0xfc   : > { %v1858_v14 = vpop.permute.xlu0 %1857  ;;  %2816 = vrot.lane.b32.xlu0 %v11435_v9, %s14091_s23  ;;  %v3069_v23 = vshll.u32 %v11477_v6, 16  ;;  %v3074_v24 = vshrl.u32 %v11478_v62, 16  ;;  %v11436_v34 = vcombine.low %v2766_v10, %v2769_v20  ;;  %v3056_v42 = vor.u32 %v3055_v16, %v3052_v28  ;;  %v11573_v9 = vld [vmem:[%s14141_s20 + $0xb0] sm:$0x1]  ;;  %v11574_v28 = vld [vmem:[%s14141_s20 + $0xb4] sm:$0xf] }
  0xfd   : > { %v648_v13 = vpop.permute.xlu1 %647  ;;  %1877 = vst.msk [vmem:[#allocation3 + $0x28] sm:$0xff] %vm1871_vm14, %v1858_v14  ;;  %2658 = vrot.lane.b32.xlu1 %v11396_v15, %s14092_s24  ;;  %v3077_v26 = vshll.u32 %v11478_v62, 16  ;;  %v3083_v27 = vshll.u32 %v11479_v11, 16  ;;  %v3065_v29 = vrot.slane %v3063_v22, 4  ;;  %v3087_v32 = vshrl.u32 %v11479_v11, 16 }
  0xfe   : > { %666 = vst.msk [vmem:[#allocation3 + $0x30] sm:$0xff] %vm659_vm7, %v648_v13  ;;  %v3071_v30 = vrot.slane %v3069_v23, 5  ;;  %v3076_v31 = vrot.slane %v3074_v24, 4  ;;  %v3057_v38 = vrot.slane %v3056_v42, 4  ;;  %v3093_v41 = vshll.u32 %v11480_v12, 16 }
  0xff   : > { %v3079_v39 = vrot.slane %v3077_v26, 5  ;;  %v3085_v40 = vrot.slane %v3083_v27, 5  ;;  %v3066_v43 = vor.u32 %v3065_v29, %v14945_v60  ;;  %v3089_v44 = vrot.slane %v3087_v32, 4  ;;  %v11575_v16 = vld [vmem:[%s14141_s20 + $0xb8] sm:$0xf] }
 0x100   : > { %v1884_v36 = vld [vmem:[#allocation3 + $0x20] sm:$0xff]  ;;  %2905 = vrot.lane.b32.xlu0 %v13851_v21, %s14089_s21  ;;  %v11523_v45 = vrot.slane %v11507_v17, 9  ;;  %v3279_v46 = vrot.slane %v11508_v18, 5  ;;  %v3062_v50 = vsel %vm14180_vm5, %v3057_v38, %v14945_v60  ;;  %v3095_v52 = vrot.slane %v3093_v41, 5  ;;  %v11603_v21 = vld [vmem:[%s14141_s20 + $0xa8] sm:$0xe] }
 0x101   : > { %12892 = vmatprep.mubr.msk.bf16.mxu0 %vm1924_vm0, %v1884_v36  ;;  %2404 = vst.msk [vmem:[#allocation3 + $0x20] sm:$0xff] %vm17854_vm6, %v13870_v19  ;;  %2818 = vrot.lane.b32.xlu1 %v11436_v34, %s14091_s23  ;;  %v3080_v51 = vor.u32 %v3079_v39, %v3076_v31  ;;  %v3282_v54 = vrot.slane %v11509_v25, 5  ;;  %v3067_v58 = vrot.slane %v3066_v43, 4  ;;  %v3090_v59 = vor.u32 %v3089_v44, %v3085_v40  ;;  %v11576_v20 = vld [vmem:[%s14141_s20 + $0xbc] sm:$0x1]  ;;  %v13855_v44 = vld [vmem:[%s14141_s20 + $0xa8] sm:$0xff]  }
 0x102   : > { %v812_v48 = vpop.permute.xlu0 %811  ;;  %v3280_v61 = vsel %vm14134_vm2, %v11523_v45, %v3279_v46  ;;  %v3281_v63 = vrot.slane %v3279_v46, 4  ;;  %v11524_v3 = vrot.slane %v11510_v33, 9  ;;  %v3286_v4 = vrot.slane %v11511_v35, 5  ;;  %v11604_v34 = vld [vmem:[%s14141_s20 + $0xac] sm:$0xf] }
 0x103   : > { %v650_v55 = vpop.permute.xlu1 %649  ;;  %830 = vst.msk [vmem:[#allocation3 + $0x30] sm:$0xff] %vm823_vm8, %v812_v48  ;;  %v3081_v2 = vrot.slane %v3080_v51, 4  ;;  %v3289_v6 = vrot.slane %v11512_v47, 5  ;;  %v3072_v7 = vsel %vm14180_vm5, %v3067_v58, %v3071_v30  ;;  %v3091_v56 = vrot.slane %v3090_v59, 4  ;;  %v11605_v30 = vld [vmem:[%s14141_s20 + $0xb0] sm:$0x1] }
 0x104   : > { %667 = vst.msk [vmem:[#allocation3 + $0x38] sm:$0xff] %vm659_vm7, %v650_v55  ;;  %v1885_v1 = vld [vmem:[#allocation3 + $0x28] sm:$0xff]  ;;  %v3283_v62 = vsel %vm14134_vm2, %v3281_v63, %v3282_v54  ;;  %v3571_v10 = vshrl.u32 %v11571_v57, 16  ;;  %v11491_v11 = vcombine.low %v3062_v50, %v3072_v7  ;;  %v3287_v14 = vsel %vm14134_vm2, %v11524_v3, %v3286_v4  ;;  %v11385_v43 = vld [vmem:[%s14141_s20 + $0xa8] sm:$0xf]  ;;  %v13856_v50 = vld [vmem:[%s14141_s20 + $0xb4] sm:$0xff]  }
 0x105   : > { %12893 = vmatmul.mubr.msk.bf16.gmra.mrb[8].mxu0 %vm1924_vm0, %v1885_v1  ;;  %2405 = vst.msk [vmem:[#allocation3 + $0x28] sm:$0xff] %vm17854_vm6, %v13871_v37  ;;  %2907 = vrot.lane.b32.xlu1 %v13852_v49, %s14089_s21  ;;  %v3086_v12 = vsel %vm14180_vm5, %v3081_v2, %v3085_v40  ;;  %v11531_v13 = vcombine.low %v3280_v61, %v3283_v62  ;;  %v3288_v17 = vrot.slane %v3286_v4, 4  ;;  %v3574_v19 = vshll.u32 %v11571_v57, 16  ;;  %v11386_v49 = vld [vmem:[%s14141_s20 + $0xac] sm:$0xf] }
 0x106   : > { %v902_v5 = vpop.permute.xlu0 %901  ;;  %v3096_v60 = vsel %vm14180_vm5, %v3091_v56, %v3095_v52  ;;  %v3573_v18 = vrot.slane %v3571_v10, 4  ;;  %3177 = vrot.lane.b32.xlu0 %v11491_v11, %s14093_s25  ;;  %v3580_v23 = vshll.u32 %v11572_v8, 16  ;;  %v3584_v24 = vshrl.u32 %v11572_v8, 16  ;;  %v11387_v62 = vld [vmem:[%s14141_s20 + $0xb0] sm:$0x1] }
 0x107   : > { %v814_v15 = vpop.permute.xlu1 %813  ;;  %920 = vst.msk [vmem:[#allocation3 + $0x30] sm:$0xff] %vm913_vm9, %v902_v5  ;;  %v11492_v22 = vcombine.low %v3086_v12, %v3096_v60  ;;  %v3590_v25 = vshll.u32 %v11573_v9, 16  ;;  %v3290_v42 = vsel %vm14134_vm2, %v3288_v17, %v3289_v6  ;;  %v3576_v26 = vrot.slane %v3574_v19, 5  ;;  %v11606_v10 = vld [vmem:[%s14141_s20 + $0xb4] sm:$0xe] }
 0x108   : > { %831 = vst.msk [vmem:[#allocation3 + $0x38] sm:$0xff] %vm823_vm8, %v814_v15  ;;  %v3595_v27 = vshrl.u32 %v11574_v28, 16  ;;  %v3598_v29 = vshll.u32 %v11574_v28, 16  ;;  %v11532_v31 = vcombine.low %v3287_v14, %v3290_v42  ;;  %v3582_v32 = vrot.slane %v3580_v23, 5  ;;  %v11607_v14 = vld [vmem:[%s14141_s20 + $0xb8] sm:$0xf] }
 0x109   : > { %3179 = vrot.lane.b32.xlu1 %v11492_v22, %s14093_s25  ;;  %v3586_v33 = vrot.slane %v3584_v24, 4  ;;  %v3592_v35 = vrot.slane %v3590_v25, 5  ;;  %v3577_v38 = vor.u32 %v3576_v26, %v3573_v18  ;;  %v3604_v41 = vshll.u32 %v11575_v16, 16  ;;  %v11608_v15 = vld [vmem:[%s14141_s20 + $0xbc] sm:$0x1] }
 0x10a   : > { %v3597_v39 = vrot.slane %v3595_v27, 4  ;;  %v3600_v40 = vrot.slane %v3598_v29, 5  ;;  %3337 = vrot.lane.b32.xlu0 %v11531_v13, %s14090_s22  ;;  %v3608_v46 = vshrl.u32 %v11575_v16, 16  ;;  %v3614_v47 = vshll.u32 %v11576_v20, 16  ;;  %v11388_v18 = vld [vmem:[%s14141_s20 + $0xb4] sm:$0xf] }
 0x10b   : > { %v904_v36 = vpop.permute.xlu1 %903  ;;  %v1175_v37 = vpop.permute.xlu0 %1174  ;;  %v3587_v45 = vor.u32 %v3586_v33, %v3582_v32  ;;  %v11619_v48 = vrot.slane %v11603_v21, 9  ;;  %v3578_v51 = vrot.slane %v3577_v38, 4  ;;  %v3606_v54 = vrot.slane %v3604_v41, 5  ;;  %v11389_v27 = vld [vmem:[%s14141_s20 + $0xb8] sm:$0xf] }
 0x10c   : > { %921 = vst.msk [vmem:[#allocation3 + $0x38] sm:$0xff] %vm913_vm9, %v904_v36  ;;  %v3601_v52 = vor.u32 %v3600_v40, %v3597_v39  ;;  %v3800_v55 = vrot.slane %v11604_v34, 5  ;;  %v3610_v58 = vrot.slane %v3608_v46, 4  ;;  %v3616_v59 = vrot.slane %v3614_v47, 5  ;;  %v11390_v29 = vld [vmem:[%s14141_s20 + $0xbc] sm:$0x1] }
 0x10d   : > { %1193 = vst.msk [vmem:[#allocation3 + $0x30] sm:$0xff] %vm1186_vm10, %v1175_v37  ;;  %3339 = vrot.lane.b32.xlu1 %v11532_v31, %s14090_s22  ;;  %v3588_v57 = vrot.slane %v3587_v45, 4  ;;  %v3803_v61 = vrot.slane %v11605_v30, 5  ;;  %v3583_v2 = vsel %vm14180_vm5, %v3578_v51, %v3582_v32  ;;  %v2577_v8 = vshrl.u32 %v11385_v43, 16  ;;  %v11418_v36 = vld [vmem:[%s14141_s20 + $0xac] sm:$0xf] }
 0x10e   : > { %v3602_v3 = vrot.slane %v3601_v52, 4  ;;  %v3801_v4 = vsel %vm14134_vm2, %v11619_v48, %v3800_v55  ;;  %v3802_v6 = vrot.slane %v3800_v55, 4  ;;  %3426 = vrot.lane.b32.xlu0 %v13855_v44, %s14094_s26  ;;  %v3611_v56 = vor.u32 %v3610_v58, %v3606_v54  ;;  %v11419_v41 = vld [vmem:[%s14141_s20 + $0xb0] sm:$0x1]  ;;  %v11420_v48 = vld [vmem:[%s14141_s20 + $0xb4] sm:$0xe] }
 0x10f   : > { %v1177_v63 = vpop.permute.xlu1 %1176  ;;  %v1336_v1 = vpop.permute.xlu0 %1335  ;;  %v3593_v7 = vsel %vm14180_vm5, %v3588_v57, %v3592_v35  ;;  %v2580_v9 = vshll.u32 %v11385_v43, 16  ;;  %v2586_v13 = vshll.u32 %v11386_v49, 16  ;;  %v2579_v60 = vrot.slane %v2577_v8, 4  ;;  %v11417_v35 = vld [vmem:[%s14141_s20 + $0xa8] sm:$0xe] }
 0x110   : > { %1194 = vst.msk [vmem:[#allocation3 + $0x38] sm:$0xff] %vm1186_vm10, %v1177_v63  ;;  %v11587_v5 = vcombine.low %v3583_v2, %v3593_v7  ;;  %v3607_v11 = vsel %vm14180_vm5, %v3602_v3, %v3606_v54  ;;  %v3804_v12 = vsel %vm14134_vm2, %v3802_v6, %v3803_v61  ;;  %v3612_v28 = vrot.slane %v3611_v56, 4  ;;  %v11421_v55 = vld [vmem:[%s14141_s20 + $0xb8] sm:$0xf]  ;;  %v11422_v57 = vld [vmem:[%s14141_s20 + $0xbc] sm:$0x1] }
 0x111   : > { %1354 = vst.msk [vmem:[#allocation3 + $0x30] sm:$0xff] %vm1347_vm11, %v1336_v1  ;;  %3428 = vrot.lane.b32.xlu1 %v13856_v50, %s14094_s26  ;;  %v11627_v16 = vcombine.low %v3801_v4, %v3804_v12  ;;  %v2582_v17 = vrot.slane %v2580_v9, 5  ;;  %v2588_v21 = vrot.slane %v2586_v13, 5  ;;  %v2590_v22 = vshrl.u32 %v11386_v49, 16  ;;  %v11481_v58 = vld [vmem:[%s14141_s20 + $0xb4] sm:$0xf] }
 0x112   : > { %v2596_v23 = vshll.u32 %v11387_v62, 16  ;;  %v11620_v24 = vrot.slane %v11606_v10, 9  ;;  %3698 = vrot.lane.b32.xlu0 %v11587_v5, %s14095_s27  ;;  %v3617_v25 = vsel %vm14180_vm5, %v3612_v28, %v3616_v59  ;;  %v3807_v42 = vrot.slane %v11607_v14, 5  ;;  %v11482_v2 = vld [vmem:[%s14141_s20 + $0xb8] sm:$0xf] }
 0x113   : > { %v1338_v19 = vpop.permute.xlu1 %1337  ;;  %v1426_v20 = vpop.permute.xlu0 %1425  ;;  %v2583_v34 = vor.u32 %v2582_v17, %v2579_v60  ;;  %v3810_v26 = vrot.slane %v11608_v15, 5  ;;  %v11588_v30 = vcombine.low %v3607_v11, %v3617_v25  ;;  %v2592_v31 = vrot.slane %v2590_v22, 4  ;;  %v11483_v15 = vld [vmem:[%s14141_s20 + $0xbc] sm:$0x1]  ;;  %v11484_v28 = vld [vmem:[%s14141_s20 + $0xc0] sm:$0xf] }
 0x114   : > { %1355 = vst.msk [vmem:[#allocation3 + $0x38] sm:$0xff] %vm1347_vm11, %v1338_v19  ;;  %v2598_v32 = vrot.slane %v2596_v23, 5  ;;  %v2601_v33 = vshrl.u32 %v11388_v18, 16  ;;  %v3808_v38 = vsel %vm14134_vm2, %v11620_v24, %v3807_v42  ;;  %v3809_v39 = vrot.slane %v3807_v42, 4  ;;  %v11485_v19 = vld [vmem:[%s14141_s20 + $0xc4] sm:$0xf] }
 0x115   : > { %1444 = vst.msk [vmem:[#allocation3 + $0x30] sm:$0xff] %vm17856_vm12, %v1426_v20  ;;  %v2584_v37 = vrot.slane %v2583_v34, 4  ;;  %v2604_v40 = vshll.u32 %v11388_v18, 16  ;;  %3700 = vrot.lane.b32.xlu1 %v11588_v30, %s14095_s27  ;;  %v2593_v44 = vor.u32 %v2592_v31, %v2588_v21  ;;  %v2610_v46 = vshll.u32 %v11389_v27, 16 }
 0x116   : > { %v2603_v45 = vrot.slane %v2601_v33, 4  ;;  %v2614_v47 = vshrl.u32 %v11389_v27, 16  ;;  %3858 = vrot.lane.b32.xlu0 %v11627_v16, %s14096_s30  ;;  %v3811_v51 = vsel %vm14134_vm2, %v3809_v39, %v3810_v26  ;;  %v2620_v54 = vshll.u32 %v11390_v29, 16  ;;  %v11486_v27 = vld [vmem:[%s14141_s20 + $0xc8] sm:$0x1]  ;;  %v13857_v39 = vld [vmem:[%s14141_s20 + $0xb4] sm:$0xff]  }
 0x117   : > { %v1428_v43 = vpop.permute.xlu1 %1427  ;;  %v2589_v50 = vsel %vm14180_vm5, %v2584_v37, %v2588_v21  ;;  %v2606_v52 = vrot.slane %v2604_v40, 5  ;;  %v2594_v59 = vrot.slane %v2593_v44, 4  ;;  %v11628_v61 = vcombine.low %v3808_v38, %v3811_v51  ;;  %v15079_v29 = vld [vmem:[%s17850_s1 + $0x20] ss:$0 sps:$4 sm:$0xff]   ;;  %v13872_v37 = vld [vmem:[%s14141_s20 + $0xa8] sm:$0xff]  }
 0x118   : > { %1445 = vst.msk [vmem:[#allocation3 + $0x38] sm:$0xff] %vm17856_vm12, %v1428_v43  ;;  %v1699_v49 = vpop.permute.xlu0 %1698  ;;  %v2612_v63 = vrot.slane %v2610_v46, 5  ;;  %v2616_v1 = vrot.slane %v2614_v47, 4  ;;  %v2622_v4 = vrot.slane %v2620_v54, 5  ;;  %v11429_v6 = vrot.slane %v11417_v35, 9  ;;  %13795 = vmatprep.subr.msk.bf16.mxu1 %vm17855_vm15, %v15079_v29 }
 0x119   : > { %1717 = vst.msk [vmem:[#allocation3 + $0x30] sm:$0xff] %vm1710_vm13, %v1699_v49  ;;  %v2607_v3 = vor.u32 %v2606_v52, %v2603_v45  ;;  %v2772_v7 = vrot.slane %v11418_v36, 5  ;;  %v2599_v62 = vsel %vm14180_vm5, %v2594_v59, %v2598_v32  ;;  %v2775_v9 = vrot.slane %v11419_v41, 5  ;;  %v11513_v35 = vld [vmem:[%s14141_s20 + $0xb4] sm:$0xe] }
 0x11a   : > { %v2617_v8 = vor.u32 %v2616_v1, %v2612_v63  ;;  %v11430_v10 = vrot.slane %v11420_v48, 9  ;;  %v11397_v11 = vcombine.low %v2589_v50, %v2599_v62  ;;  %3860 = vrot.lane.b32.xlu0 %v11628_v61, %s14096_s30  ;;  %v2779_v60 = vrot.slane %v11421_v55, 5  ;;  %v11514_v36 = vld [vmem:[%s14141_s20 + $0xb8] sm:$0xf]  ;;  %v11515_v44 = vld [vmem:[%s14141_s20 + $0xbc] sm:$0x1] }
 0x11b   : > { %v1701_v56 = vpop.permute.xlu1 %1700  ;;  %v2608_v12 = vrot.slane %v2607_v3, 4  ;;  %v2773_v13 = vsel %vm14134_vm2, %v11429_v6, %v2772_v7  ;;  %v2774_v14 = vrot.slane %v2772_v7, 4  ;;  %v2782_v17 = vrot.slane %v11422_v57, 5  ;;  %v11516_v55 = vld [vmem:[%s14141_s20 + $0xc0] sm:$0xe]  ;;  %v13873_v61 = vld [vmem:[%s14141_s20 + $0xb4] sm:$0xff]  }
 0x11c   : > { %1718 = vst.msk [vmem:[#allocation3 + $0x38] sm:$0xff] %vm1710_vm13, %v1701_v56  ;;  %v1860_v5 = vpop.permute.xlu0 %1859  ;;  %v2618_v16 = vrot.slane %v2617_v8, 4  ;;  %v3098_v18 = vshrl.u32 %v11481_v58, 16  ;;  %2660 = vrot.lane.b32.xlu1 %v11397_v11, %s14092_s24  ;;  %v3101_v22 = vshll.u32 %v11481_v58, 16  ;;  %v3107_v23 = vshll.u32 %v11482_v2, 16  ;;  %v13858_v8 = vld [vmem:[%s14141_s20 + $0xc0] sm:$0xff]  }
 0x11d   : > { %1878 = vst.msk [vmem:[#allocation3 + $0x30] sm:$0xff] %vm1871_vm14, %v1860_v5  ;;  %v2613_v20 = vsel %vm14180_vm5, %v2608_v12, %v2612_v63  ;;  %v2776_v21 = vsel %vm14134_vm2, %v2774_v14, %v2775_v9  ;;  %v2780_v42 = vsel %vm14134_vm2, %v11430_v10, %v2779_v60  ;;  %v2781_v26 = vrot.slane %v2779_v60, 4  ;;  %v11517_v57 = vld [vmem:[%s14141_s20 + $0xc4] sm:$0xf]  ;;  %v15097_v58 = vld [vmem:[%s14141_s20 + $0xc8] sm:$0x1] }
 0x11e   : > { %v2623_v25 = vsel %vm14180_vm5, %v2618_v16, %v2622_v4  ;;  %v11437_v34 = vcombine.low %v2773_v13, %v2776_v21  ;;  %v3100_v31 = vrot.slane %v3098_v18, 4  ;;  %v3103_v32 = vrot.slane %v3101_v22, 5  ;;  %v11577_v4 = vld [vmem:[%s14141_s20 + $0xc0] sm:$0xf]  ;;  %v11579_v18 = vld [vmem:[%s14141_s20 + $0xc8] sm:$0x1] }
 0x11f   : > { %v1862_v24 = vpop.permute.xlu1 %1861  ;;  %v11398_v30 = vcombine.low %v2613_v20, %v2623_v25  ;;  %v15081_v33 = vrot.slane %v3107_v23, 5  ;;  %v2783_v38 = vsel %vm14134_vm2, %v2781_v26, %v2782_v17  ;;  %v3111_v40 = vshrl.u32 %v11482_v2, 16  ;;  %v11578_v17 = vld [vmem:[%s14141_s20 + $0xc4] sm:$0xf]  ;;  %v11580_v23 = vld [vmem:[%s14141_s20 + $0xcc] sm:$0xf] }
 0x120   : > { %1879 = vst.msk [vmem:[#allocation3 + $0x38] sm:$0xff] %vm1871_vm14, %v1862_v24  ;;  %2820 = vrot.lane.b32.xlu0 %v11437_v34, %s14091_s23  ;;  %v3117_v41 = vshll.u32 %v11483_v15, 16  ;;  %v3122_v43 = vshrl.u32 %v11484_v28, 16  ;;  %v11438_v45 = vcombine.low %v2780_v42, %v2783_v38  ;;  %v3104_v46 = vor.u32 %v3103_v32, %v3100_v31 }
 0x121   : > { %2662 = vrot.lane.b32.xlu1 %v11398_v30, %s14092_s24  ;;  %v3125_v47 = vshll.u32 %v11484_v28, 16  ;;  %v3131_v48 = vshll.u32 %v11485_v19, 16  ;;  %v3113_v50 = vrot.slane %v3111_v40, 4  ;;  %v3135_v54 = vshrl.u32 %v11485_v19, 16  ;;  %v11582_v40 = vld [vmem:[%s14141_s20 + $0xd4] sm:$0x1] }
 0x122   : > { %v3119_v51 = vrot.slane %v3117_v41, 5  ;;  %v3124_v52 = vrot.slane %v3122_v43, 4  ;;  %v3105_v63 = vrot.slane %v3104_v46, 4  ;;  %v3141_v3 = vshll.u32 %v11486_v27, 16  ;;  %v11609_v41 = vld [vmem:[%s14141_s20 + $0xc0] sm:$0xe] }
 0x123   : > { %v2649_v49 = vpop.permute.xlu0 %2648  ;;  %v3127_v1 = vrot.slane %v3125_v47, 5  ;;  %v3133_v2 = vrot.slane %v3131_v48, 5  ;;  %v3114_v6 = vor.u32 %v3113_v50, %v15081_v33  ;;  %v3137_v7 = vrot.slane %v3135_v54, 4  ;;  %v11610_v47 = vld [vmem:[%s14141_s20 + $0xc4] sm:$0xf] }
 0x124   : > { %2672 = vst.msk [vmem:[#allocation3] sm:$0xff] %vm659_vm7, %v2649_v49  ;;  %v1886_v59 = vld [vmem:[#allocation3 + $0x30] sm:$0xff]  ;;  %2909 = vrot.lane.b32.xlu0 %v13857_v39, %s14089_s21  ;;  %v11525_v56 = vrot.slane %v11513_v35, 9  ;;  %v3293_v62 = vrot.slane %v11514_v36, 5  ;;  %v3110_v9 = vsel %vm14180_vm5, %v3105_v63, %v15081_v33  ;;  %v3143_v5 = vrot.slane %v3141_v3, 5 }
 0x125   : > { %12896 = vmatprep.mubr.msk.bf16.mxu0 %vm1924_vm0, %v1886_v59  ;;  %2406 = vst.msk [vmem:[#allocation3 + $0x30] sm:$0xff] %vm17854_vm6, %v13872_v37  ;;  %2822 = vrot.lane.b32.xlu1 %v11438_v45, %s14091_s23  ;;  %v3128_v10 = vor.u32 %v3127_v1, %v3124_v52  ;;  %v3296_v11 = vrot.slane %v11515_v44, 5  ;;  %v3115_v15 = vrot.slane %v3114_v6, 4  ;;  %v3138_v28 = vor.u32 %v3137_v7, %v3133_v2  ;;  %v11581_v33 = vld [vmem:[%s14141_s20 + $0xd0] sm:$0xf] }
 0x126   : > { %v3294_v16 = vsel %vm14134_vm2, %v11525_v56, %v3293_v62  ;;  %v3295_v60 = vrot.slane %v3293_v62, 4  ;;  %v11526_v20 = vrot.slane %v11516_v55, 9  ;;  %v3300_v21 = vrot.slane %v11517_v57, 5  ;;  %v11611_v52 = vld [vmem:[%s14141_s20 + $0xc8] sm:$0x1] }
 0x127   : > { %v2651_v12 = vpop.permute.xlu1 %2650  ;;  %v2809_v13 = vpop.permute.xlu0 %2808  ;;  %v1887_v14 = vld [vmem:[#allocation3 + $0x38] sm:$0xff]  ;;  %v3129_v19 = vrot.slane %v3128_v10, 4  ;;  %v3303_v22 = vrot.slane %v15097_v58, 5  ;;  %v3120_v24 = vsel %vm14180_vm5, %v3115_v15, %v3119_v51  ;;  %v3139_v25 = vrot.slane %v3138_v28, 4  ;;  %v13874_v10 = vld [vmem:[%s17851_s2 + $0x40] sm:$0xff]  }
 0x128   : > { %2673 = vst.msk [vmem:[#allocation3 + $0x8] sm:$0xff] %vm659_vm7, %v2651_v12  ;;  %12897 = vmatmul.mubr.msk.bf16.gmra.mrb[12].mxu0 %vm1924_vm0, %v1887_v14  ;;  %v3297_v34 = vsel %vm14134_vm2, %v3295_v60, %v3296_v11  ;;  %v3619_v42 = vshrl.u32 %v11577_v4, 16  ;;  %v11493_v26 = vcombine.low %v3110_v9, %v3120_v24  ;;  %v3301_v31 = vsel %vm14134_vm2, %v11526_v20, %v3300_v21  ;;  %v11613_v6 = vld [vmem:[%s14141_s20 + $0xd0] sm:$0xf] }
 0x129   : > { %2832 = vst.msk [vmem:[#allocation3] sm:$0xff] %vm823_vm8, %v2809_v13  ;;  %2911 = vrot.lane.b32.xlu1 %v13858_v8, %s14089_s21  ;;  %v3134_v27 = vsel %vm14180_vm5, %v3129_v19, %v3133_v2  ;;  %v11533_v30 = vcombine.low %v3294_v16, %v3297_v34  ;;  %v3144_v36 = vsel %vm14180_vm5, %v3139_v25, %v3143_v5  ;;  %v3302_v37 = vrot.slane %v3300_v21, 4  ;;  %v13862_v5 = vld [vmem:[%s14141_s20 + $0xcc] sm:$0xff]  }
 0x12a   : > { %2407 = vst.msk [vmem:[#allocation3 + $0x38] sm:$0xff] %vm17854_vm6, %v13873_v61  ;;  %v3621_v38 = vrot.slane %v3619_v42, 4  ;;  %v3622_v39 = vshll.u32 %v11577_v4, 16  ;;  %3181 = vrot.lane.b32.xlu0 %v11493_v26, %s14093_s25  ;;  %v11494_v43 = vcombine.low %v3134_v27, %v3144_v36  ;;  %v3628_v44 = vshll.u32 %v11578_v17, 16  ;;  %v13861_v61 = vld [vmem:[%s14141_s20 + $0xc0] sm:$0xff]   ;;  %12926 = vmatprep.subr.bf16.mxu0 %v13874_v10  ;;  %vm15187_vm6 = vmand %vm206_vm3, %vm207_vm4 }
 0x12b   : > { %v2811_v32 = vpop.permute.xlu1 %2810  ;;  %v2898_v35 = vpop.permute.xlu0 %2897  ;;  %v3632_v45 = vshrl.u32 %v11578_v17, 16  ;;  %v3638_v46 = vshll.u32 %v11579_v18, 16  ;;  %v3304_v48 = vsel %vm14134_vm2, %v3302_v37, %v3303_v22  ;;  %v3643_v50 = vshrl.u32 %v11580_v23, 16  ;;  %v11612_v4 = vld [vmem:[%s14141_s20 + $0xcc] sm:$0xe]  ;;  %12927 = vmatpush3.bf16.msra.mxu0 %v13874_v10 }
 0x12c   : > { %2833 = vst.msk [vmem:[#allocation3 + $0x8] sm:$0xff] %vm823_vm8, %v2811_v32  ;;  %v3624_v49 = vrot.slane %v3622_v39, 5  ;;  %v3646_v51 = vshll.u32 %v11580_v23, 16  ;;  %v11534_v54 = vcombine.low %v3301_v31, %v3304_v48  ;;  %v3630_v55 = vrot.slane %v3628_v44, 5  ;;  %v11614_v17 = vld [vmem:[%s14141_s20 + $0xd4] sm:$0x1] }
 0x12d   : > { %2921 = vst.msk [vmem:[#allocation3] sm:$0xff] %vm913_vm9, %v2898_v35  ;;  %3183 = vrot.lane.b32.xlu1 %v11494_v43, %s14093_s25  ;;  %v3634_v57 = vrot.slane %v3632_v45, 4  ;;  %v3640_v58 = vrot.slane %v3638_v46, 5  ;;  %v3645_v1 = vrot.slane %v3643_v50, 4  ;;  %v3652_v3 = vshll.u32 %v11581_v33, 16  ;;  %v13876_v48 = vld [vmem:[%s17851_s2 + $0x50] sm:$0xff]  }
 0x12e   : > { %v3625_v63 = vor.u32 %v3624_v49, %v3621_v38  ;;  %v3648_v2 = vrot.slane %v3646_v51, 5  ;;  %3341 = vrot.lane.b32.xlu0 %v11533_v30, %s14090_s22  ;;  %v3656_v56 = vshrl.u32 %v11581_v33, 16  ;;  %v3662_v62 = vshll.u32 %v11582_v40, 16  ;;  %v215_v26 = vld [vmem:[#allocation2 + $0x18] sm:$0x1]  ;;  %v13875_v30 = vld [vmem:[%s17851_s2 + $0x48] sm:$0xff]  }
 0x12f   : > { %v2900_v59 = vpop.permute.xlu1 %2899  ;;  %v3635_v7 = vor.u32 %v3634_v57, %v3630_v55  ;;  %v11621_v8 = vrot.slane %v11609_v41, 9  ;;  %v3170_v9 = vpop.permute.xlu0 %3169  ;;  %v3654_v13 = vrot.slane %v3652_v3, 5  ;;  %v3814_v14 = vrot.slane %v11610_v47, 5  ;;  %v212_v27 = vld [vmem:[#allocation2 + $0xc] sm:$0x1]  ;;  %12928 = vmatprep.subr.bf16.mxu0 %v13875_v30 }
 0x130   : > { %2922 = vst.msk [vmem:[#allocation3 + $0x8] sm:$0xff] %vm913_vm9, %v2900_v59  ;;  %v3626_v11 = vrot.slane %v3625_v63, 4  ;;  %v3649_v12 = vor.u32 %v3648_v2, %v3645_v1  ;;  %v3658_v28 = vrot.slane %v3656_v56, 4  ;;  %v3664_v16 = vrot.slane %v3662_v62, 5  ;;  %v271_v35 = vld [vmem:[#allocation2 + $0x20] sm:$0x1]  ;;  %12929 = vmatpush3.bf16.msra.mxu0 %v13875_v30 }
 0x131   : > { %3193 = vst.msk [vmem:[#allocation3] sm:$0xff] %vm1186_vm10, %v3170_v9  ;;  %3343 = vrot.lane.b32.xlu1 %v11534_v54, %s14090_s22  ;;  %v3636_v15 = vrot.slane %v3635_v7, 4  ;;  %v3817_v60 = vrot.slane %v11611_v52, 5  ;;  %v15159_v20 = vsel %vm14134_vm2, %v11621_v8, %v3814_v14  ;;  %v3816_v21 = vrot.slane %v3814_v14, 4  ;;  %v268_v43 = vld [vmem:[#allocation2 + $0x14] sm:$0x1]  ;;  %12930 = vmatprep.subr.bf16.mxu0 %v13876_v48 }
 0x132   : > { %v3631_v18 = vsel %vm14180_vm5, %v3626_v11, %v3630_v55  ;;  %v3650_v19 = vrot.slane %v3649_v12, 4  ;;  %3430 = vrot.lane.b32.xlu0 %v13861_v61, %s14094_s26  ;;  %v3659_v24 = vor.u32 %v3658_v28, %v3654_v13  ;;  %v11622_v25 = vrot.slane %v11612_v4, 9  ;;  %v13878_v63 = vld [vmem:[%s17851_s2 + $0x60] sm:$0xff]   ;;  %v221_v1 = vld [vmem:[#allocation2 + $0x30] sm:$0x1]  ;;  %v13879_v7 = vld [vmem:[%s17851_s2 + $0x68] sm:$0xff]  }
 0x133   : > { %v3172_v22 = vpop.permute.xlu1 %3171  ;;  %v3641_v23 = vsel %vm14180_vm5, %v3636_v15, %v3640_v58  ;;  %v3821_v34 = vrot.slane %v11613_v6, 5  ;;  %v3330_v42 = vpop.permute.xlu0 %3329  ;;  %v3818_v32 = vsel %vm14134_vm2, %v3816_v21, %v3817_v60  ;;  %v3824_v33 = vrot.slane %v11614_v17, 5  ;;  %v13877_v58 = vld [vmem:[%s17851_s2 + $0x58] sm:$0xff]   ;;  %v218_v4 = vld [vmem:[#allocation2 + $0x24] sm:$0x1]  ;;  %v13880_v11 = vld [vmem:[%s17851_s2 + $0x70] sm:$0xff]  }
 0x134   : > { %3194 = vst.msk [vmem:[#allocation3 + $0x8] sm:$0xff] %vm1186_vm10, %v3172_v22  ;;  %v11589_v31 = vcombine.low %v3631_v18, %v3641_v23  ;;  %v3655_v36 = vsel %vm14180_vm5, %v3650_v19, %v3654_v13  ;;  %v3660_v37 = vrot.slane %v3659_v24, 4  ;;  %v11629_v39 = vcombine.low %v15159_v20, %v3818_v32  ;;  %12931 = vmatpush3.bf16.msra.mxu0 %v13876_v48  ;;  %v277_v15 = vld [vmem:[#allocation2 + $0x38] sm:$0x1]  ;;  %v274_v28 = vld [vmem:[#allocation2 + $0x2c] sm:$0x1] }
 0x135   : > { %3353 = vst.msk [vmem:[#allocation3] sm:$0xff] %vm1347_vm11, %v3330_v42  ;;  %3432 = vrot.lane.b32.xlu1 %v13862_v5, %s14094_s26  ;;  %v3823_v38 = vrot.slane %v3821_v34, 4  ;;  %v3951_v41 = vsel %vm17855_vm15, %v15079_v29, 0  ;;  %v3822_v45 = vsel %vm14134_vm2, %v11622_v25, %v3821_v34  ;;  %v216_v50 = vsel %vm15187_vm6, 0, %v215_v26  ;;  %vm15199_vm15 = vmand %vm206_vm3, %vm263_vm1  ;;  %12932 = vmatprep.subr.bf16.mxu0 %v13877_v58  ;;  %v227_v17 = vld [vmem:[#allocation2 + $0x48] sm:$0x1] }
 0x136   : > { %3702 = vrot.lane.b32.xlu0 %v11589_v31, %s14095_s27  ;;  %v3665_v44 = vsel %vm14180_vm5, %v3660_v37, %v3664_v16  ;;  %12909 = vmatpush3.bf16.msra.mxu1 %v3951_v41  ;;  %v17883_v51 = vmov 0  ;;  %v213_v52 = vsel %vm15187_vm6, 0, %v212_v27  ;;  %v14097_v54 = vmov 0   ;;  %217 = vst [vmem:[#allocation2 + $0x18] sm:$0x1] %v216_v50  ;;  %v13881_v23 = vld [vmem:[%s17851_s2 + $0x78] sm:$0xff]  }
 0x137   : > { %v3332_v40 = vpop.permute.xlu1 %3331  ;;  %v3825_v46 = vsel %vm14134_vm2, %v3823_v38, %v3824_v33  ;;  %v3419_v47 = vpop.permute.xlu0 %3418  ;;  %v11590_v49 = vcombine.low %v3655_v36, %v3665_v44  ;;  %v17884_v51 = vsel %vm15199_vm15, 4294967295, %v17883_v51  ;;  %199 = vst [vmem:[#allocation2] sm:$0xf] %v14097_v54  ;;  %200 = vst [vmem:[#allocation2 + $0x4] sm:$0xf] %v14097_v54  ;;  %v272_v55 = vsel %vm15199_vm15, 0, %v271_v35 }
 0x138   : > { %3354 = vst.msk [vmem:[#allocation3 + $0x8] sm:$0xff] %vm1347_vm11, %v3332_v40  ;;  %17885 = vst [vmem:[#allocation4_spill] sm:$0xff] %v17884_v51  ;;  %v269_v57 = vsel %vm15199_vm15, 0, %v268_v43  ;;  %v11630_v59 = vcombine.low %v3822_v45, %v3825_v46  ;;  %v222_v3 = vsel %vm15187_vm6, 0, %v221_v1  ;;  %12933 = vmatpush3.bf16.msra.mxu0 %v13877_v58  ;;  %v219_v56 = vsel %vm15187_vm6, 0, %v218_v4  ;;  %v14003_v29 = vld [vmem:[%s17851_s2 + $0x100] sm:$0xff]  }
 0x139   : > { %3442 = vst.msk [vmem:[#allocation3] sm:$0xff] %vm17856_vm12, %v3419_v47  ;;  %201 = vst [vmem:[#allocation2 + $0x8] sm:$0xf] %v14097_v54  ;;  %3704 = vrot.lane.b32.xlu1 %v11590_v49, %s14095_s27  ;;  %12934 = vmatprep.subr.bf16.mxu0 %v13878_v63  ;;  %v278_v16 = vsel %vm15199_vm15, 0, %v277_v15  ;;  %v275_v60 = vsel %vm15199_vm15, 0, %v274_v28  ;;  %v228_v21 = vsel %vm15187_vm6, 0, %v227_v17 }
 0x13a   : > { %203 = vst [vmem:[#allocation2 + $0xcc] sm:$0xf] %v14097_v54  ;;  %204 = vst [vmem:[#allocation2 + $0xd0] sm:$0xf] %v14097_v54  ;;  %3862 = vrot.lane.b32.xlu0 %v11629_v39, %s14096_s30  ;;  %v224_v58 = vld [vmem:[#allocation2 + $0x3c] sm:$0x1] }
 0x13b   : > { %205 = vst [vmem:[#allocation2 + $0xd4] sm:$0xf] %v14097_v54  ;;  %214 = vst [vmem:[#allocation2 + $0xc] sm:$0x1] %v213_v52  ;;  %v3421_v61 = vpop.permute.xlu1 %3420  ;;  %vm17886_vm3 = vcmask 1043456  }
 0x13c   : > { %273 = vst [vmem:[#allocation2 + $0x20] sm:$0x1] %v272_v55  ;;  %270 = vst [vmem:[#allocation2 + $0x14] sm:$0x1] %v269_v57  ;;  %v3691_v2 = vpop.permute.xlu0 %3690  ;;  %12935 = vmatpush3.bf16.msra.mxu0 %v13878_v63 }
 0x13d   : > { %3443 = vst.msk [vmem:[#allocation3 + $0x8] sm:$0xff] %vm17856_vm12, %v3421_v61  ;;  %223 = vst [vmem:[#allocation2 + $0x30] sm:$0x1] %v222_v3  ;;  %3864 = vrot.lane.b32.xlu1 %v11630_v59, %s14096_s30  ;;  %12936 = vmatprep.subr.bf16.mxu0 %v13879_v7  ;;  %v225_v59 = vsel %vm15187_vm6, 0, %v224_v58  ;;  %v283_v61 = vld [vmem:[#allocation2 + $0x50] sm:$0x1] }
 0x13e   : > { %3714 = vst.msk [vmem:[#allocation3] sm:$0xff] %vm1710_vm13, %v3691_v2  ;;  %v209_v62 = vld [vmem:[#allocation2] sm:$0x1]  ;;  %220 = vst [vmem:[#allocation2 + $0x24] sm:$0x1] %v219_v56  ;;  %v284_v1 = vsel %vm15199_vm15, 0, %v283_v61 }
 0x13f   : > { %v3693_v6 = vpop.permute.xlu1 %3692  ;;  %v210_v10 = vsel %vm15187_vm6, 0, %v209_v62  ;;  %v4332_v12 = vld [vmem:[#allocation2 + $0x4] sm:$0xf]  ;;  %279 = vst [vmem:[#allocation2 + $0x38] sm:$0x1] %v278_v16 }
 0x140   : > { %v265_v8 = vld [vmem:[#allocation2 + $0x8] sm:$0x1]  ;;  %3715 = vst.msk [vmem:[#allocation3 + $0x8] sm:$0xff] %vm1710_vm13, %v3693_v6  ;;  %v3851_v9 = vpop.permute.xlu0 %3850  ;;  %211 = vst [vmem:[#allocation2] sm:$0x1] %v210_v10  ;;  %v4381_v13 = vshll.u32 %v4332_v12, 16  ;;  %12937 = vmatpush3.bf16.msra.mxu0 %v13879_v7 }
 0x141   : > { %v266_v5 = vsel %vm15199_vm15, 0, %v265_v8  ;;  %3874 = vst.msk [vmem:[#allocation3] sm:$0xff] %vm1871_vm14, %v3851_v9  ;;  %v4385_v14 = vshrl.u32 %v4332_v12, 16  ;;  %276 = vst [vmem:[#allocation2 + $0x2c] sm:$0x1] %v275_v60  ;;  %12938 = vmatprep.subr.bf16.mxu0 %v13880_v11 }
 0x142   : > { %267 = vst [vmem:[#allocation2 + $0x8] sm:$0x1] %v266_v5  ;;  %v4383_v19 = vrot.slane %v4381_v13, 5  ;;  %229 = vst [vmem:[#allocation2 + $0x48] sm:$0x1] %v228_v21 }
 0x143   : > { %v4387_v20 = vrot.slane %v4385_v14, 4  ;;  %226 = vst [vmem:[#allocation2 + $0x3c] sm:$0x1] %v225_v59  ;;  %v280_v2 = vld [vmem:[#allocation2 + $0x44] sm:$0x1] }
 0x144   : > { %v3853_v18 = vpop.permute.xlu0 %3852  ;;  %12939 = vmatpush3.bf16.msra.mxu0 %v13880_v11  ;;  %285 = vst [vmem:[#allocation2 + $0x50] sm:$0x1] %v284_v1  ;;  %v281_v4 = vsel %vm15199_vm15, 0, %v280_v2  ;;  %v233_v6 = vld [vmem:[#allocation2 + $0x60] sm:$0x1] }
 0x145   : > { %3875 = vst.msk [vmem:[#allocation3 + $0x8] sm:$0xff] %vm1871_vm14, %v3853_v18  ;;  %v4388_v24 = vor.u32 %v4387_v20, %v4383_v19  ;;  %12940 = vmatprep.subr.bf16.mxu0 %v13881_v23  ;;  %282 = vst [vmem:[#allocation2 + $0x44] sm:$0x1] %v281_v4  ;;  %v234_v7 = vsel %vm15187_vm6, 0, %v233_v6  ;;  %v289_v21 = vld [vmem:[#allocation2 + $0x68] sm:$0x1] }
 0x146   : > { %v2653_v22 = vpop.permute.xlu1 %2652  ;;  %235 = vst [vmem:[#allocation2 + $0x60] sm:$0x1] %v234_v7  ;;  %v11962_v58 = vld [vmem:[%s14141_s20 + $0x24] sm:$0xf]  ;;  %v11963_v59 = vld [vmem:[%s14141_s20 + $0x28] sm:$0xf] }
 0x147   : > { %2674 = vst.msk [vmem:[#allocation3 + $0x10] sm:$0xff] %vm659_vm7, %v2653_v22  ;;  %v4331_v34 = vld [vmem:[#allocation2] sm:$0xf]  ;;  %v4389_v36 = vrot.slane %v4388_v24, 4  ;;  %v290_v22 = vsel %vm15199_vm15, 0, %v289_v21  ;;  %v7262_v2 = vshrl.u32 %v11962_v58, 16 }
 0x148   : > { %v3882_v25 = vld [vmem:[#allocation3] sm:$0xff]  ;;  %v4372_v26 = vshrl.u32 %v4331_v34, 16  ;;  %v4375_v27 = vshll.u32 %v4331_v34, 16  ;;  %12941 = vmatpush3.bf16.msra.mxu0 %v13881_v23  ;;  %v11956_v24 = vld [vmem:[%s14141_s20 + $0xc] sm:$0xf] }
 0x149   : > { %v4363_v42 = vld [vmem:[#allocation2 + $0x8] sm:$0x1]  ;;  %12910 = vmatprep.mubr.msk.bf16.mxu1 %vm1924_vm0, %v3882_v25  ;;  %v286_v23 = vld [vmem:[#allocation2 + $0x5c] sm:$0x1]  ;;  %291 = vst [vmem:[#allocation2 + $0x68] sm:$0x1] %v290_v22 }
 0x14a   : > { %v4391_v30 = vshll.u32 %v4363_v42, 16  ;;  %v2813_v31 = vpop.permute.xlu0 %2812  ;;  %v4374_v33 = vrot.slane %v4372_v26, 4  ;;  %v4377_v35 = vrot.slane %v4375_v27, 5  ;;  %v287_v34 = vsel %vm15199_vm15, 0, %v286_v23  ;;  %v7405_v42 = vld [vmem:[%s17852_s3] sm:$0xf] }
 0x14b   : > { %v2655_v32 = vpop.permute.xlu1 %2654  ;;  %2834 = vst.msk [vmem:[#allocation3 + $0x10] sm:$0xff] %vm823_vm8, %v2813_v31  ;;  %v11957_v26 = vld [vmem:[%s14141_s20 + $0x10] sm:$0xf]  ;;  %v7214_v27 = vshrl.u32 %v11956_v24, 16  ;;  %288 = vst [vmem:[#allocation2 + $0x5c] sm:$0x1] %v287_v34  ;;  %13796 = vmatprep.subr.msk.bf16.mxu1 %vm17886_vm3, %v7405_v42 }
 0x14c   : > { %v4393_v37 = vrot.slane %v4391_v30, 5  ;;  %2675 = vst.msk [vmem:[#allocation3 + $0x18] sm:$0xff] %vm659_vm7, %v2655_v32  ;;  %v3883_v38 = vld [vmem:[#allocation3 + $0x8] sm:$0xff]  ;;  %v4378_v39 = vor.u32 %v4377_v35, %v4374_v33  ;;  %v11958_v32 = vld [vmem:[%s14141_s20 + $0x14] sm:$0x1]  ;;  %v7217_v33 = vshll.u32 %v11956_v24, 16 }
 0x14d   : > { %12911 = vmatmul.mubr.msk.bf16.vlgmr.msra.gmra.mrb[0].mxu1 %vm1924_vm0, %v3883_v38  ;;  %v7223_v35 = vshll.u32 %v11957_v26, 16  ;;  %v7233_v38 = vshll.u32 %v11958_v32, 16  ;;  %v11966_v21 = vld [vmem:[%s14141_s20 + $0x34] sm:$0xf] }
 0x14e   : > { %v2902_v40 = vpop.permute.xlu0 %2901  ;;  %v4379_v43 = vrot.slane %v4378_v39, 4  ;;  %v4394_v44 = vsel %vm14180_vm5, %v4389_v36, %v4393_v37  ;;  %v7227_v36 = vshrl.u32 %v11957_v26, 16  ;;  %v7216_v37 = vrot.slane %v7214_v27, 4  ;;  %v11959_v39 = vld [vmem:[%s14141_s20 + $0x18] sm:$0xf] }
 0x14f   : > { %v2815_v41 = vpop.permute.xlu1 %2814  ;;  %2923 = vst.msk [vmem:[#allocation3 + $0x10] sm:$0xff] %vm913_vm9, %v2902_v40  ;;  %v11960_v40 = vld [vmem:[%s14141_s20 + $0x1c] sm:$0xf]  ;;  %v7235_v7 = vrot.slane %v7233_v38, 5 }
 0x150   : > { %2835 = vst.msk [vmem:[#allocation3 + $0x18] sm:$0xff] %vm823_vm8, %v2815_v41  ;;  %v4384_v45 = vsel %vm14180_vm5, %v4379_v43, %v4383_v19  ;;  %v230_v19 = vld [vmem:[#allocation2 + $0x54] sm:$0x1]  ;;  %v7219_v41 = vrot.slane %v7217_v33, 5  ;;  %v7225_v43 = vrot.slane %v7223_v35, 5 }
 0x151   : > { %v11676_v46 = vcombine.low %v4384_v45, %v4394_v44  ;;  %v231_v20 = vsel %vm15187_vm6, 0, %v230_v19  ;;  %v7229_v44 = vrot.slane %v7227_v36, 4  ;;  %v7238_v45 = vshrl.u32 %v11959_v39, 16 }
 0x152   : > { %232 = vst [vmem:[#allocation2 + $0x54] sm:$0x1] %v231_v20 }
 0x153   : > { %v2904_v47 = vpop.permute.xlu1 %2903  ;;  %12942 = vmatprep.mubr.bf16.mxu0 %v11676_v46  ;;  %v11961_v46 = vld [vmem:[%s14141_s20 + $0x20] sm:$0x1] }
 0x154   : > { %2924 = vst.msk [vmem:[#allocation3 + $0x18] sm:$0xff] %vm913_vm9, %v2904_v47  ;;  %v3174_v48 = vpop.permute.xlu0 %3173  ;;  %v7241_v47 = vshll.u32 %v11959_v39, 16 }
 0x155   : > { %3195 = vst.msk [vmem:[#allocation3 + $0x10] sm:$0xff] %vm1186_vm10, %v3174_v48  ;;  %v7247_v48 = vshll.u32 %v11960_v40, 16 }
 0x156   : > { %v7243_v61 = vrot.slane %v7241_v47, 5 }
 0x157   : > { %v3176_v49 = vpop.permute.xlu1 %3175 }
 0x158   : > { %3196 = vst.msk [vmem:[#allocation3 + $0x18] sm:$0xff] %vm1186_vm10, %v3176_v49  ;;  %v3334_v50 = vpop.permute.xlu0 %3333  ;;  %v7251_v49 = vshrl.u32 %v11960_v40, 16  ;;  %v7295_v40 = vshll.u32 %v11966_v21, 16 }
 0x159   : > { %3355 = vst.msk [vmem:[#allocation3 + $0x10] sm:$0xff] %vm1347_vm11, %v3334_v50  ;;  %v15313_v50 = vld [vmem:[%s17851_s2] sm:$0xff]  }
 0x15a   : > { %v7253_v1 = vrot.slane %v7251_v49, 4  ;;  %12958 = vmatprep.subr.bf16.mxu0 %v15313_v50 }
 0x15b   : > { %v3336_v52 = vpop.permute.xlu1 %3335 }
 0x15c   : > { %3356 = vst.msk [vmem:[#allocation3 + $0x18] sm:$0xff] %vm1347_vm11, %v3336_v52  ;;  %v3423_v54 = vpop.permute.xlu0 %3422 }
 0x15d   : > { %3444 = vst.msk [vmem:[#allocation3 + $0x10] sm:$0xff] %vm17856_vm12, %v3423_v54  ;;  %v7220_v54 = vor.u32 %v7219_v41, %v7216_v37 }
 0x15f   : > { %v3425_v55 = vpop.permute.xlu1 %3424  ;;  %v7221_v4 = vrot.slane %v7220_v54, 4 }
 0x160   : > { %3445 = vst.msk [vmem:[#allocation3 + $0x18] sm:$0xff] %vm17856_vm12, %v3425_v55  ;;  %v3695_v57 = vpop.permute.xlu0 %3694  ;;  %v7230_v55 = vor.u32 %v7229_v44, %v7225_v43 }
 0x161   : > { %3716 = vst.msk [vmem:[#allocation3 + $0x10] sm:$0xff] %vm1710_vm13, %v3695_v57  ;;  %v7240_v57 = vrot.slane %v7238_v45, 4 }
 0x162   : > { %v7231_v6 = vrot.slane %v7230_v55, 4 }
 0x163   : > { %v3697_v63 = vpop.permute.xlu1 %3696 }
 0x164   : > { %3717 = vst.msk [vmem:[#allocation3 + $0x18] sm:$0xff] %vm1710_vm13, %v3697_v63  ;;  %v3855_v3 = vpop.permute.xlu0 %3854  ;;  %v15318_v63 = vrot.slane %v7247_v48, 5 }
 0x165   : > { %3876 = vst.msk [vmem:[#allocation3 + $0x10] sm:$0xff] %vm1871_vm14, %v3855_v3 }
 0x168   : > { %v3857_v56 = vpop.permute.xlu0 %3856 }
 0x169   : > { %3877 = vst.msk [vmem:[#allocation3 + $0x18] sm:$0xff] %vm1871_vm14, %v3857_v56  ;;  %v7265_v56 = vshll.u32 %v11962_v58, 16  ;;  %v15364_v58 = vld [vmem:[%s14141_s20 + $0x38] sm:$0x1] }
 0x16a   : > { %v2657_v62 = vpop.permute.xlu1 %2656 }
 0x16b   : > { %2676 = vst.msk [vmem:[#allocation3 + $0x20] sm:$0xff] %vm659_vm7, %v2657_v62  ;;  %v7244_v62 = vor.u32 %v7243_v61, %v7240_v57 }
 0x16c   : > { %v3884_v8 = vld [vmem:[#allocation3 + $0x10] sm:$0xff] }
 0x16d   : > { %12914 = vmatprep.mubr.msk.bf16.mxu1 %vm1924_vm0, %v3884_v8  ;;  %v7257_v8 = vshll.u32 %v11961_v46, 16 }
 0x16e   : > { %v2817_v9 = vpop.permute.xlu0 %2816 }
 0x16f   : > { %v2659_v10 = vpop.permute.xlu1 %2658  ;;  %2836 = vst.msk [vmem:[#allocation3 + $0x20] sm:$0xff] %vm823_vm8, %v2817_v9  ;;  %v7271_v9 = vshll.u32 %v11963_v59, 16 }
 0x170   : > { %2677 = vst.msk [vmem:[#allocation3 + $0x28] sm:$0xff] %vm659_vm7, %v2659_v10  ;;  %v3885_v5 = vld [vmem:[#allocation3 + $0x18] sm:$0xff] }
 0x171   : > { %12915 = vmatmul.mubr.msk.bf16.gmra.mrb[4].mxu1 %vm1924_vm0, %v3885_v5  ;;  %v7254_v5 = vor.u32 %v7253_v1, %v15318_v63  ;;  %v15333_v19 = vrot.slane %v7271_v9, 5  ;;  %v2286_v1 = vld [vmem:[#allocation2 + $0x18] sm:$0xf] }
 0x172   : > { %v2906_v11 = vpop.permute.xlu0 %2905 }
 0x173   : > { %v2819_v12 = vpop.permute.xlu1 %2818  ;;  %2925 = vst.msk [vmem:[#allocation3 + $0x20] sm:$0xff] %vm913_vm9, %v2906_v11  ;;  %v7264_v11 = vrot.slane %v7262_v2, 4  ;;  %v15337_v34 = vrot.slane %v7254_v5, 4 }
 0x174   : > { %2837 = vst.msk [vmem:[#allocation3 + $0x28] sm:$0xff] %vm823_vm8, %v2819_v12  ;;  %v7267_v12 = vrot.slane %v7265_v56, 5 }
 0x176   : > { %v7268_v26 = vor.u32 %v7267_v12, %v7264_v11 }
 0x177   : > { %v2908_v13 = vpop.permute.xlu1 %2907 }
 0x178   : > { %2926 = vst.msk [vmem:[#allocation3 + $0x28] sm:$0xff] %vm913_vm9, %v2908_v13  ;;  %v3178_v14 = vpop.permute.xlu0 %3177  ;;  %v7275_v13 = vshrl.u32 %v11963_v59, 16  ;;  %v7299_v59 = vshrl.u32 %v11966_v21, 16 }
 0x179   : > { %3197 = vst.msk [vmem:[#allocation3 + $0x20] sm:$0xff] %vm1186_vm10, %v3178_v14  ;;  %v11965_v14 = vld [vmem:[%s14141_s20 + $0x30] sm:$0xf] }
 0x17a   : > { %v7277_v20 = vrot.slane %v7275_v13, 4  ;;  %v7286_v22 = vshrl.u32 %v11965_v14, 16  ;;  %v7289_v23 = vshll.u32 %v11965_v14, 16  ;;  %v2290_v13 = vld [vmem:[#allocation2 + $0x20] sm:$0x1]  ;;  %v7301_v21 = vrot.slane %v7299_v59, 4 }
 0x17b   : > { %v3180_v15 = vpop.permute.xlu1 %3179 }
 0x17c   : > { %3198 = vst.msk [vmem:[#allocation3 + $0x28] sm:$0xff] %vm1186_vm10, %v3180_v15  ;;  %v3338_v28 = vpop.permute.xlu0 %3337  ;;  %v7278_v39 = vor.u32 %v7277_v20, %v15333_v19  ;;  %v15351_v45 = vrot.slane %v7286_v22, 4  ;;  %v15353_v46 = vrot.slane %v7289_v23, 5  ;;  %v2283_v20 = vld [vmem:[#allocation2 + $0x14] sm:$0x1] }
 0x17d   : > { %3357 = vst.msk [vmem:[#allocation3 + $0x20] sm:$0xff] %vm1347_vm11, %v3338_v28  ;;  %v7226_v28 = vsel %vm14180_vm5, %v7221_v4, %v7225_v43  ;;  %v11969_v22 = vld [vmem:[%s14141_s20 + $0x40] sm:$0xf] }
 0x17e   : > { %v15366_v4 = vrot.slane %v7278_v39, 4  ;;  %v7292_v9 = vor.u32 %v15353_v46, %v15351_v45 }
 0x17f   : > { %v3340_v16 = vpop.permute.xlu1 %3339 }
 0x180   : > { %3358 = vst.msk [vmem:[#allocation3 + $0x28] sm:$0xff] %vm1347_vm11, %v3340_v16  ;;  %v3427_v60 = vpop.permute.xlu0 %3426 }
 0x181   : > { %3446 = vst.msk [vmem:[#allocation3 + $0x20] sm:$0xff] %vm17856_vm12, %v3427_v60  ;;  %v7236_v60 = vsel %vm14180_vm5, %v7231_v6, %v7235_v7  ;;  %v15368_v6 = vrot.slane %v7295_v40, 5  ;;  %v11972_v40 = vld [vmem:[%s14141_s20 + $0x4c] sm:$0xf] }
 0x182   : > { %v15342_v32 = vcombine.low %v7226_v28, %v7236_v60  ;;  %v11968_v28 = vld [vmem:[%s14141_s20 + $0x3c] sm:$0xf] }
 0x183   : > { %v3429_v17 = vpop.permute.xlu1 %3428  ;;  %v7310_v39 = vshrl.u32 %v11968_v28, 16 }
 0x184   : > { %3447 = vst.msk [vmem:[#allocation3 + $0x28] sm:$0xff] %vm17856_vm12, %v3429_v17  ;;  %v3699_v18 = vpop.permute.xlu0 %3698  ;;  %vm17887_vm12 = vmmov %vm17886_vm3  ;;  %v15330_v17 = vrot.slane %v7244_v62, 4  ;;  %v2279_v62 = vld [vmem:[#allocation2 + $0xc] sm:$0xf] }
 0x185   : > { %3718 = vst.msk [vmem:[#allocation3 + $0x20] sm:$0xff] %vm1710_vm13, %v3699_v18  ;;  %v7455_v31 = vsel %vm17887_vm12, %v7405_v42, 0  ;;  %v11964_v18 = vld [vmem:[%s14141_s20 + $0x2c] sm:$0x1]  ;;  %v15339_v42 = vrot.slane %v7257_v8, 5  ;;  %v7312_v59 = vrot.slane %v7310_v39, 4 }
 0x186   : > { %13215 = vmatpush3.bf16.msra.mxu1 %v7455_v31  ;;  %vm2114_vm12 = vsmask.f32 4368  ;;  %v7281_v33 = vshll.u32 %v11964_v18, 16  ;;  %v7250_v38 = vsel %vm14180_vm5, %v15330_v17, %v15318_v63  ;;  %v15432_v63 = vrot.slane %v7292_v9, 4 }
 0x187   : > { %v3701_v25 = vpop.permute.xlu1 %3700  ;;  %v7260_v49 = vsel %vm14180_vm5, %v15337_v34, %v15339_v42 }
 0x188   : > { %3719 = vst.msk [vmem:[#allocation3 + $0x28] sm:$0xff] %vm1710_vm13, %v3701_v25  ;;  %v3859_v30 = vpop.permute.xlu0 %3858  ;;  %v15361_v57 = vrot.slane %v7281_v33, 5  ;;  %v11971_v33 = vld [vmem:[%s14141_s20 + $0x48] sm:$0xf] }
 0x189   : > { %3878 = vst.msk [vmem:[#allocation3 + $0x20] sm:$0xff] %vm1871_vm14, %v3859_v30 }
 0x18a   : > { %v7284_v34 = vsel %vm14180_vm5, %v15366_v4, %v15361_v57 }
 0x18c   : > { %v3861_v52 = vpop.permute.xlu0 %3860 }
 0x18d   : > { %3879 = vst.msk [vmem:[#allocation3 + $0x28] sm:$0xff] %vm1871_vm14, %v3861_v52  ;;  %v15359_v52 = vrot.slane %v7268_v26, 4 }
 0x18e   : > { %v2661_v3 = vpop.permute.xlu1 %2660 }
 0x18f   : > { %2678 = vst.msk [vmem:[#allocation3 + $0x30] sm:$0xff] %vm659_vm7, %v2661_v3 }
 0x190   : > { %v3886_v10 = vld [vmem:[#allocation3 + $0x20] sm:$0xff] }
 0x191   : > { %12918 = vmatprep.mubr.msk.bf16.mxu1 %vm1924_vm0, %v3886_v10 }
 0x192   : > { %v2821_v15 = vpop.permute.xlu0 %2820 }
 0x193   : > { %v2663_v16 = vpop.permute.xlu1 %2662  ;;  %2838 = vst.msk [vmem:[#allocation3 + $0x30] sm:$0xff] %vm823_vm8, %v2821_v15  ;;  %v7305_v15 = vshll.u32 %v15364_v58, 16  ;;  %v7302_v58 = vor.u32 %v7301_v21, %v15368_v6 }
 0x194   : > { %2679 = vst.msk [vmem:[#allocation3 + $0x38] sm:$0xff] %vm659_vm7, %v2663_v16  ;;  %v3887_v24 = vld [vmem:[#allocation3 + $0x28] sm:$0xff]  ;;  %vm17888_vm7 = vmmov %vm17886_vm3 }
 0x195   : > { %v12886_v25 = vpop.f32.mrb[0].mxu0  ;;  %12919 = vmatmul.mubr.msk.bf16.gmra.mrb[8].mxu1 %vm1924_vm0, %v3887_v24  ;;  %v15434_v17 = vrot.slane %v7302_v58, 4 }
 0x196   : > { %v2910_v27 = vpop.permute.xlu0 %2909  ;;  %v2052_v30 = vmax.f32 %v12886_v25, 0.0  ;;  %v1987_v31 = vpop.f32.mrb[1].mxu0 }
 0x197   : > { %v2823_v35 = vpop.permute.xlu1 %2822  ;;  %2927 = vst.msk [vmem:[#allocation3 + $0x30] sm:$0xff] %vm913_vm9, %v2910_v27  ;;  %v2050_v36 = vmax.f32 %v1987_v31, 0.0  ;;  %v12887_v37 = vpop.f32.mrb[2].mxu0  ;;  %v11970_v31 = vld [vmem:[%s14141_s20 + $0x44] sm:$0x1] }
 0x198   : > { %2839 = vst.msk [vmem:[#allocation3 + $0x38] sm:$0xff] %vm823_vm8, %v2823_v35  ;;  %v12385_v41 = vpack.c.bf16 %v2052_v30, %v2052_v30  ;;  %v2053_v43 = vmax.f32 %v12887_v37, 0.0  ;;  %v1990_v44 = vpop.f32.mrb[3].mxu0  ;;  %vm15375_vm8 = vmand %vm17888_vm7, %vm263_vm1 }
 0x199   : > { %v12383_v47 = vpack.c.bf16 %v2050_v36, %v2050_v36  ;;  %v2051_v48 = vmax.f32 %v1990_v44, 0.0 }
 0x19a   : > { %v2134_v54 = vshrl.u32 %v12385_v41, 16  ;;  %v12386_v55 = vpack.c.bf16 %v2053_v43, %v2053_v43  ;;  %v2137_v56 = vshll.u32 %v12385_v41, 16 }
 0x19b   : > { %v2912_v61 = vpop.permute.xlu1 %2911  ;;  %v2117_v2 = vshrl.u32 %v12383_v47, 16  ;;  %v12384_v3 = vpack.c.bf16 %v2051_v48, %v2051_v48  ;;  %v2120_v12 = vshll.u32 %v12383_v47, 16 }
 0x19c   : > { %2928 = vst.msk [vmem:[#allocation3 + $0x38] sm:$0xff] %vm913_vm9, %v2912_v61  ;;  %v2136_v7 = vrot.slane %v2134_v54, 7  ;;  %v2142_v8 = vshrl.u32 %v12386_v55, 16  ;;  %v3182_v5 = vpop.permute.xlu0 %3181  ;;  %v2145_v18 = vshll.u32 %v12386_v55, 16  ;;  %vm15385_vm9 = vmor %vm207_vm4, %vm2114_vm12 }
 0x19d   : > { %v2119_v11 = vrot.slane %v2117_v2, 7  ;;  %v2125_v14 = vshrl.u32 %v12384_v3, 16  ;;  %3199 = vst.msk [vmem:[#allocation3 + $0x30] sm:$0xff] %vm1186_vm10, %v3182_v5  ;;  %v2128_v30 = vshll.u32 %v12384_v3, 16  ;;  %v7313_v3 = vshll.u32 %v11968_v28, 16 }
 0x19e   : > { %v2139_v16 = vor.u32 %v2137_v56, %v2136_v7  ;;  %v2144_v60 = vrot.slane %v2142_v8, 7  ;;  %v2140_v24 = vrot.slane %v2136_v7, 4  ;;  %v7319_v7 = vshll.u32 %v11969_v22, 16 }
 0x19f   : > { %v3184_v23 = vpop.permute.xlu1 %3183  ;;  %v2122_v25 = vor.u32 %v2120_v12, %v2119_v11  ;;  %v2127_v27 = vrot.slane %v2125_v14, 7  ;;  %v2123_v43 = vrot.slane %v2119_v11, 4  ;;  %v7323_v56 = vshrl.u32 %v11969_v22, 16 }
 0x1a0   : > { %3200 = vst.msk [vmem:[#allocation3 + $0x38] sm:$0xff] %vm1186_vm10, %v3184_v23  ;;  %v2287_v35 = vsel %vm15375_vm8, %v2139_v16, %v2286_v1  ;;  %v2147_v36 = vor.u32 %v2145_v18, %v2144_v60  ;;  %v2149_v37 = vrot.slane %v2144_v60, 4  ;;  %v3342_v41 = vpop.permute.xlu0 %3341  ;;  %v7334_v8 = vshrl.u32 %v11971_v33, 16 }
 0x1a1   : > { %2288 = vst [vmem:[#allocation2 + $0x18] sm:$0xf] %v2287_v35  ;;  %v2280_v44 = vsel %vm15375_vm8, %v2122_v25, %v2279_v62  ;;  %v2130_v47 = vor.u32 %v2128_v30, %v2127_v27  ;;  %v2132_v48 = vrot.slane %v2127_v27, 4  ;;  %3359 = vst.msk [vmem:[#allocation3 + $0x30] sm:$0xff] %vm1347_vm11, %v3342_v41  ;;  %v7329_v62 = vshll.u32 %v11970_v31, 16 }
 0x1a2   : > { %2281 = vst [vmem:[#allocation2 + $0xc] sm:$0xf] %v2280_v44  ;;  %v2148_v54 = vsel %vm15385_vm9, %v2140_v24, %v2147_v36  ;;  %v2291_v55 = vsel %vm15187_vm6, %v2149_v37, %v2290_v13  ;;  %v7337_v5 = vshll.u32 %v11971_v33, 16  ;;  %v15418_v12 = vcombine.low %v7250_v38, %v7260_v49 }
 0x1a3   : > { %v3344_v61 = vpop.permute.xlu1 %3343  ;;  %2289 = vst [vmem:[#allocation2 + $0x1c] sm:$0xf] %v2148_v54  ;;  %2292 = vst [vmem:[#allocation2 + $0x20] sm:$0x1] %v2291_v55  ;;  %v2131_v1 = vsel %vm15385_vm9, %v2123_v43, %v2130_v47  ;;  %v2284_v2 = vsel %vm15187_vm6, %v2132_v48, %v2283_v20  ;;  %v7315_v13 = vrot.slane %v7313_v3, 5  ;;  %v7343_v14 = vshll.u32 %v11972_v40, 16 }
 0x1a4   : > { %3360 = vst.msk [vmem:[#allocation3 + $0x38] sm:$0xff] %vm1347_vm11, %v3344_v61  ;;  %2282 = vst [vmem:[#allocation2 + $0x10] sm:$0xf] %v2131_v1  ;;  %v3431_v11 = vpop.permute.xlu0 %3430  ;;  %v7347_v28 = vshrl.u32 %v11972_v40, 16  ;;  %vm17893_vm10 = vcmask 458112   ;;  %v7274_v16 = vsel %vm14180_vm5, %v15359_v52, %v15333_v19  ;;  %v15436_v38 = vrot.slane %v7305_v15, 5 }
 0x1a5   : > { %2285 = vst [vmem:[#allocation2 + $0x14] sm:$0x1] %v2284_v2  ;;  %3448 = vst.msk [vmem:[#allocation3 + $0x30] sm:$0xff] %vm17893_vm10, %v3431_v11  ;;  %v7316_v49 = vor.u32 %v7315_v13, %v7312_v59  ;;  %v15438_v60 = vrot.slane %v7319_v7, 5  ;;  %v15440_v18 = vrot.slane %v7323_v56, 4  ;;  %v15445_v52 = vrot.slane %v7329_v62, 5 }
 0x1a6   : > { %vm17894_vm11 = vmmov %vm17893_vm10  ;;  %v15447_v57 = vrot.slane %v7334_v8, 4  ;;  %v15449_v45 = vrot.slane %v7337_v5, 5  ;;  %v15451_v46 = vrot.slane %v7343_v14, 5  ;;  %v15459_v22 = vrot.slane %v7347_v28, 4  ;;  %v11973_v1 = vld [vmem:[%s14141_s20 + $0x50] sm:$0x1] }
 0x1a7   : > { %v3433_v42 = vpop.permute.xlu1 %3432  ;;  %v15457_v21 = vrot.slane %v7316_v49, 4  ;;  %v15468_v30 = vcombine.low %v7274_v16, %v7284_v34  ;;  %v7298_v31 = vsel %vm14180_vm5, %v15432_v63, %v15368_v6  ;;  %v7308_v39 = vsel %vm14180_vm5, %v15434_v17, %v15436_v38  ;;  %v11974_v62 = vld [vmem:[%s14141_s20 + $0x54] sm:$0xf]  ;;  %v15497_v8 = vld [vmem:[%s17851_s2 + $0x40] sm:$0xff]   ;;  %v13887_v6 = vld [vmem:[%s17851_s2 + $0x28] sm:$0xff]  }
 0x1a8   : > { %3449 = vst.msk [vmem:[#allocation3 + $0x38] sm:$0xff] %vm17894_vm11, %v3433_v42  ;;  %v15443_v19 = vld [vmem:[#allocation2 + $0x18] sm:$0xf]  ;;  %v3703_v4 = vpop.permute.xlu0 %3702  ;;  %v7326_v14 = vor.u32 %v15440_v18, %v15438_v60  ;;  %v7340_v42 = vor.u32 %v15449_v45, %v15447_v57  ;;  %v7353_v49 = vshll.u32 %v11973_v1, 16  ;;  %13232 = vmatprep.subr.bf16.mxu1 %v15497_v8 }
 0x1a9   : > { %v15453_v9 = vld [vmem:[#allocation2 + $0xc] sm:$0xf]  ;;  %v4420_v15 = vshrl.u32 %v15443_v19, 16  ;;  %v4423_v20 = vshll.u32 %v15443_v19, 16  ;;  %3720 = vst.msk [vmem:[#allocation3 + $0x30] sm:$0xff] %vm1710_vm13, %v3703_v4  ;;  %v7322_v57 = vsel %vm14180_vm5, %v15457_v21, %v15438_v60 }
 0x1aa   : > { %v4396_v23 = vshrl.u32 %v15453_v9, 16  ;;  %v4399_v24 = vshll.u32 %v15453_v9, 16  ;;  %v15464_v25 = vld [vmem:[#allocation2 + $0x1c] sm:$0xf]  ;;  %v15466_v27 = vld [vmem:[#allocation2 + $0x20] sm:$0x1] }
 0x1ab   : > { %v15474_v33 = vld [vmem:[#allocation2 + $0x10] sm:$0xf]  ;;  %v4422_v36 = vrot.slane %v4420_v15, 4  ;;  %v4425_v37 = vrot.slane %v4423_v20, 5  ;;  %v11694_v40 = vcombine.low %v15443_v19, %v15464_v25  ;;  %v3705_v41 = vpop.permute.xlu1 %3704  ;;  %v4429_v59 = vshll.u32 %v15464_v25, 16 }
 0x1ac   : > { %v15476_v35 = vld [vmem:[#allocation2 + $0x14] sm:$0x1]  ;;  %v4398_v43 = vrot.slane %v4396_v23, 4  ;;  %v4401_v44 = vrot.slane %v4399_v24, 5  ;;  %v4405_v47 = vshll.u32 %v15474_v33, 16  ;;  %v4409_v48 = vshrl.u32 %v15474_v33, 16  ;;  %v3863_v54 = vpop.permute.xlu0 %3862 }
 0x1ad   : > { %3721 = vst.msk [vmem:[#allocation3 + $0x38] sm:$0xff] %vm1710_vm13, %v3705_v41  ;;  %v4415_v55 = vshll.u32 %v15476_v35, 16  ;;  %v4426_v58 = vor.u32 %v4425_v37, %v4422_v36  ;;  %v4433_v61 = vshrl.u32 %v15464_v25, 16  ;;  %v4439_v56 = vshll.u32 %v15466_v27, 16 }
 0x1ae   : > { %3880 = vst.msk [vmem:[#allocation3 + $0x30] sm:$0xff] %vm1871_vm14, %v3863_v54  ;;  %v4402_v2 = vor.u32 %v4401_v44, %v4398_v43  ;;  %v4407_v3 = vrot.slane %v4405_v47, 5  ;;  %v4411_v7 = vrot.slane %v4409_v48, 4  ;;  %v4431_v11 = vrot.slane %v4429_v59, 5 }
 0x1af   : > { %v4427_v5 = vrot.slane %v4426_v58, 4  ;;  %v4435_v13 = vrot.slane %v4433_v61, 4  ;;  %v3865_v28 = vpop.permute.xlu1 %3864  ;;  %v7350_v15 = vor.u32 %v15459_v22, %v15451_v46  ;;  %v7358_v20 = vshrl.u32 %v11974_v62, 16 }
 0x1b0   : > { %v4403_v16 = vrot.slane %v4402_v2, 4  ;;  %v4412_v34 = vor.u32 %v4411_v7, %v4407_v3  ;;  %3881 = vst.msk [vmem:[#allocation3 + $0x38] sm:$0xff] %vm1871_vm14, %v3865_v28  ;;  %v7361_v23 = vshll.u32 %v11974_v62, 16  ;;  %v4417_v18 = vrot.slane %v4415_v55, 5  ;;  %v13883_v62 = vld [vmem:[%s17851_s2 + $0x8] sm:$0xff]  }
 0x1b1   : > { %v4436_v4 = vor.u32 %v4435_v13, %v4431_v11  ;;  %v4441_v37 = vrot.slane %v4439_v56, 5  ;;  %v4432_v43 = vsel %vm14180_vm5, %v4427_v5, %v4431_v11  ;;  %v15513_v47 = vrot.slane %v7326_v14, 4  ;;  %v11975_v5 = vld [vmem:[%s14141_s20 + $0x58] sm:$0xf] }
 0x1b2   : > { %v4413_v36 = vrot.slane %v4412_v34, 4  ;;  %v4408_v54 = vsel %vm14180_vm5, %v4403_v16, %v4407_v3  ;;  %v15519_v58 = vrot.slane %v7340_v42, 4  ;;  %v15528_v14 = vrot.slane %v7358_v20, 4 }
 0x1b3   : > { %v4437_v44 = vrot.slane %v4436_v4, 4  ;;  %v15530_v34 = vrot.slane %v7350_v15, 4  ;;  %v15532_v42 = vrot.slane %v7361_v23, 5  ;;  %v13884_v23 = vld [vmem:[%s17851_s2 + $0x10] sm:$0xff]   ;;  %vm17895_vm13 = vcmask 64512  }
 0x1b4   : > { %v12890_v24 = vpop.f32.mrb[4].mxu0  ;;  %v4418_v55 = vsel %vm14180_vm5, %v4413_v36, %v4417_v18  ;;  %vm17896_vm14 = vmmov %vm17895_vm13  ;;  %v11693_v21 = vcombine.low %v15453_v9, %v15474_v33 }
 0x1b5   : > { %v2056_v45 = vmax.f32 %v12890_v24, 0.0  ;;  %v2003_v41 = vpop.f32.mrb[5].mxu0  ;;  %v3888_v59 = vld [vmem:[#allocation3 + $0x30] sm:$0xff]  ;;  %v11677_v2 = vcombine.low %v4408_v54, %v4418_v55  ;;  %v4442_v56 = vsel %vm14180_vm5, %v4437_v44, %v4441_v37  ;;  %v2300_v24 = vld [vmem:[#allocation2 + $0x30] sm:$0xf]  ;;  %v15535_v37 = vrot.slane %v7353_v49, 5 }
 0x1b6   : > { %v2054_v22 = vmax.f32 %v2003_v41, 0.0  ;;  %v12891_v48 = vpop.f32.mrb[6].mxu0  ;;  %12922 = vmatprep.mubr.msk.bf16.mxu1 %vm1924_vm0, %v3888_v59  ;;  %v11678_v13 = vcombine.low %v4432_v43, %v4442_v56  ;;  %v2293_v44 = vld [vmem:[#allocation2 + $0x24] sm:$0xf]  ;;  %v2304_v54 = vld [vmem:[#allocation2 + $0x38] sm:$0x1]  ;;  %v7364_v49 = vor.u32 %v15532_v42, %v15528_v14 }
 0x1b7   : > { %v12389_v61 = vpack.c.bf16 %v2056_v45, %v2056_v45  ;;  %v2057_v1 = vmax.f32 %v12891_v48, 0.0  ;;  %v2006_v7 = vpop.f32.mrb[7].mxu0  ;;  %12943 = vmatmul.mubr.bf16.vlgmr.msra.gmra.mrb[16].mxu0 %v11677_v2  ;;  %v3889_v4 = vld [vmem:[#allocation3 + $0x38] sm:$0xff]  ;;  %v7367_v45 = vshll.u32 %v11975_v5, 16 }
 0x1b8   : > { %v12387_v3 = vpack.c.bf16 %v2054_v22, %v2054_v22  ;;  %v2055_v11 = vmax.f32 %v2006_v7, 0.0  ;;  %12946 = vmatprep.mubr.bf16.mxu0 %v11678_v13  ;;  %12959 = vmatpush3.bf16.msra.mxu0 %v15313_v50  ;;  %v11977_v13 = vld [vmem:[%s14141_s20 + $0x60] sm:$0xf] }
 0x1b9   : > { %v2168_v28 = vshrl.u32 %v12389_v61, 16  ;;  %v12390_v16 = vpack.c.bf16 %v2057_v1, %v2057_v1  ;;  %12923 = vmatmul.mubr.msk.bf16.gmra.mrb[12].mxu1 %vm1924_vm0, %v3889_v4  ;;  %v2171_v41 = vshll.u32 %v12389_v61, 16  ;;  %12960 = vmatprep.subr.bf16.mxu0 %v13883_v62  ;;  %v2297_v1 = vld [vmem:[#allocation2 + $0x2c] sm:$0x1]  ;;  %v15545_v2 = vrot.slane %v7367_v45, 5  ;;  %vm17897_vm0 = vmmov %vm17895_vm13 }
 0x1ba   : > { %v2151_v36 = vshrl.u32 %v12387_v3, 16  ;;  %v12388_v18 = vpack.c.bf16 %v2055_v11, %v2055_v11  ;;  %v2154_v43 = vshll.u32 %v12387_v3, 16  ;;  %13216 = vmatprep.mubr.msk.bf16.mxu1 %vm17895_vm13, %v15342_v32  ;;  %v13885_v11 = vld [vmem:[%s17851_s2 + $0x18] sm:$0xff]   ;;  %v7371_v32 = vshrl.u32 %v11975_v5, 16  ;;  %vm17898_vm1 = vmmov %vm17897_vm0 }
 0x1bb   : > { %v2170_v20 = vrot.slane %v2168_v28, 7  ;;  %v2176_v15 = vshrl.u32 %v12390_v16, 16  ;;  %v2179_v48 = vshll.u32 %v12390_v16, 16  ;;  %v11976_v4 = vld [vmem:[%s14141_s20 + $0x5c] sm:$0x1]  ;;  %vm17899_vm4 = vmmov %vm17897_vm0 }
 0x1bc   : > { %v2153_v22 = vrot.slane %v2151_v36, 7  ;;  %v2159_v50 = vshrl.u32 %v12388_v18, 16  ;;  %v2162_v61 = vshll.u32 %v12388_v18, 16  ;;  %12961 = vmatpush3.bf16.msra.mxu0 %v13883_v62  ;;  %v11978_v36 = vld [vmem:[%s14141_s20 + $0x64] sm:$0xf]  ;;  %vm17900_vm3 = vmmov %vm17897_vm0 }
 0x1bd   : > { %v2173_v55 = vor.u32 %v2171_v41, %v2170_v20  ;;  %v2178_v59 = vrot.slane %v2176_v15, 7  ;;  %v2174_v7 = vrot.slane %v2170_v20, 4  ;;  %12962 = vmatprep.subr.bf16.mxu0 %v13884_v23  ;;  %v7373_v20 = vrot.slane %v7371_v32, 4  ;;  %v239_v41 = vld [vmem:[#allocation2 + $0x78] sm:$0x1]  ;;  %vm17901_vm12 = vmmov %vm17897_vm0 }
 0x1be   : > { %v2156_v56 = vor.u32 %v2154_v43, %v2153_v22  ;;  %v2161_v3 = vrot.slane %v2159_v50, 7  ;;  %v2157_v28 = vrot.slane %v2153_v22, 4  ;;  %v236_v43 = vld [vmem:[#allocation2 + $0x6c] sm:$0x1]  ;;  %v7332_v15 = vsel %vm14180_vm5, %v15513_v47, %v15445_v52  ;;  %v295_v47 = vld [vmem:[#allocation2 + $0x80] sm:$0x1]  ;;  %vm17902_vm7 = vmmov %vm17897_vm0 }
 0x1bf   : > { %v2301_v14 = vsel %vm15375_vm8, %v2173_v55, %v2300_v24  ;;  %v2181_v16 = vor.u32 %v2179_v48, %v2178_v59  ;;  %v2183_v42 = vrot.slane %v2178_v59, 4  ;;  %v7382_v22 = vshrl.u32 %v11977_v13, 16  ;;  %v292_v55 = vld [vmem:[#allocation2 + $0x74] sm:$0x1]  ;;  %v13886_v59 = vld [vmem:[%s17851_s2 + $0x20] sm:$0xff]   ;;  %vm17999_vm10 = vmmov %vm17897_vm0 }
 0x1c0   : > { %2302 = vst [vmem:[#allocation2 + $0x30] sm:$0xf] %v2301_v14  ;;  %v2294_v18 = vsel %vm15375_vm8, %v2156_v56, %v2293_v44  ;;  %v2164_v62 = vor.u32 %v2162_v61, %v2161_v3  ;;  %v2166_v45 = vrot.slane %v2161_v3, 4  ;;  %v13892_v44 = vld [vmem:[%s17851_s2 + $0x48] sm:$0xff]   ;;  %12963 = vmatpush3.bf16.msra.mxu0 %v13884_v23  ;;  %v7385_v52 = vshll.u32 %v11977_v13, 16  ;;  %vm18000_vm11 = vmmov %vm17897_vm0 }
 0x1c1   : > { %2295 = vst [vmem:[#allocation2 + $0x24] sm:$0xf] %v2294_v18  ;;  %v2182_v5 = vsel %vm15385_vm9, %v2174_v7, %v2181_v16  ;;  %v2305_v24 = vsel %vm15187_vm6, %v2183_v42, %v2304_v54  ;;  %v7346_v54 = vsel %vm14180_vm5, %v15519_v58, %v15451_v46  ;;  %13217 = vmatmul.mubr.msk.bf16.vlgmr.msra.gmra.mrb[16].mxu1 %vm17896_vm14, %v15418_v12  ;;  %v15581_v23 = vrot.slane %v7364_v49, 4  ;;  %v15586_v46 = vld [vmem:[%s17851_s2 + $0x50] sm:$0xff]   ;;  %v15596_v49 = vld [vmem:[%s14141_s20 + $0x68] sm:$0x1]  ;;  %vm18001_vm13 = vmmov %vm17897_vm0 }
 0x1c2   : > { %2303 = vst [vmem:[#allocation2 + $0x34] sm:$0xf] %v2182_v5  ;;  %2306 = vst [vmem:[#allocation2 + $0x38] sm:$0x1] %v2305_v24  ;;  %v2165_v48 = vsel %vm15385_vm9, %v2157_v28, %v2164_v62  ;;  %v2298_v50 = vsel %vm15187_vm6, %v2166_v45, %v2297_v1  ;;  %12964 = vmatprep.subr.bf16.mxu0 %v13885_v11  ;;  %v7377_v61 = vshll.u32 %v11976_v4, 16  ;;  %v7391_v1 = vshll.u32 %v11978_v36, 16 }
 0x1c3   : > { %2296 = vst [vmem:[#allocation2 + $0x28] sm:$0xf] %v2165_v48  ;;  %2299 = vst [vmem:[#allocation2 + $0x2c] sm:$0x1] %v2298_v50  ;;  %v7395_v7 = vshrl.u32 %v11978_v36, 16  ;;  %13220 = vmatprep.mubr.msk.bf16.mxu1 %vm17897_vm0, %v15468_v30  ;;  %v7356_v12 = vsel %vm14180_vm5, %v15530_v34, %v15535_v37  ;;  %v7374_v58 = vor.u32 %v7373_v20, %v15545_v2  ;;  %v15598_v56 = vrot.slane %v7382_v22, 4 }
 0x1c4   : > { %v240_v3 = vsel %vm15187_vm6, 0, %v239_v41  ;;  %13233 = vmatpush3.bf16.msra.mxu1 %v15497_v8  ;;  %v245_v32 = vld [vmem:[#allocation2 + $0x90] sm:$0x1]  ;;  %v15603_v13 = vrot.slane %v7385_v52, 5  ;;  %v15605_v30 = vrot.slane %v7391_v1, 5  ;;  %v237_v34 = vsel %vm15187_vm6, 0, %v236_v43  ;;  %12965 = vmatpush3.bf16.msra.mxu0 %v13885_v11  ;;  %vm18002_vm14 = vmmov %vm17897_vm0 }
 0x1c5   : > { %241 = vst [vmem:[#allocation2 + $0x78] sm:$0x1] %v240_v3  ;;  %v296_v37 = vsel %vm15199_vm15, 0, %v295_v47  ;;  %13234 = vmatprep.subr.bf16.mxu1 %v13892_v44  ;;  %v11983_v8 = vcombine.low %v7298_v31, %v7308_v39  ;;  %v11984_v14 = vcombine.low %v7322_v57, %v7332_v15  ;;  %v7397_v28 = vrot.slane %v7395_v7, 4  ;;  %238 = vst [vmem:[#allocation2 + $0x6c] sm:$0x1] %v237_v34 }
 0x1c6   : > { %297 = vst [vmem:[#allocation2 + $0x80] sm:$0x1] %v296_v37  ;;  %v293_v16 = vsel %vm15199_vm15, 0, %v292_v55  ;;  %v15630_v38 = vcombine.low %v7346_v54, %v7356_v12  ;;  %12966 = vmatprep.subr.bf16.mxu0 %v13886_v59  ;;  %v7370_v63 = vsel %vm14180_vm5, %v15581_v23, %v15545_v2  ;;  %v7379_v60 = vrot.slane %v7377_v61, 5  ;;  %v13888_v45 = vld [vmem:[%s17851_s2 + $0x30] sm:$0xff]   ;;  %v13898_v20 = vld [vmem:[%s17851_s2 + $0x58] sm:$0xff]  }
 0x1c7   : > { %v15628_v17 = vld [vmem:[#allocation2 + $0x30] sm:$0xf]  ;;  %294 = vst [vmem:[#allocation2 + $0x74] sm:$0x1] %v293_v16  ;;  %v7375_v11 = vrot.slane %v7374_v58, 4  ;;  %v246_v42 = vsel %vm15187_vm6, 0, %v245_v32  ;;  %v7388_v18 = vor.u32 %v15603_v13, %v15598_v56  ;;  %v7398_v15 = vor.u32 %v7397_v28, %v15605_v30 }
 0x1c8   : > { %v15641_v31 = vld [vmem:[#allocation2 + $0x24] sm:$0xf]  ;;  %v4468_v39 = vshrl.u32 %v15628_v17, 16  ;;  %v4471_v57 = vshll.u32 %v15628_v17, 16  ;;  %13235 = vmatpush3.bf16.msra.mxu1 %v13892_v44  ;;  %v7401_v62 = vshll.u32 %v15596_v49, 16  ;;  %12967 = vmatpush3.bf16.msra.mxu0 %v13886_v59 }
 0x1c9   : > { %v4444_v4 = vshrl.u32 %v15641_v31, 16  ;;  %v4447_v2 = vshll.u32 %v15641_v31, 16  ;;  %v15649_v36 = vld [vmem:[#allocation2 + $0x34] sm:$0xf]  ;;  %13236 = vmatprep.subr.bf16.mxu1 %v15586_v46  ;;  %247 = vst [vmem:[#allocation2 + $0x90] sm:$0x1] %v246_v42  ;;  %13221 = vmatmul.mubr.msk.bf16.gmra.mrb[20].mxu1 %vm17898_vm1, %v11983_v8  ;;  %v7380_v23 = vsel %vm14180_vm5, %v7375_v11, %v7379_v60  ;;  %vm18003_vm1 = vmmov %vm17897_vm0 }
 0x1ca   : > { %v15661_v41 = vld [vmem:[#allocation2 + $0x28] sm:$0xf]  ;;  %v15663_v43 = vld [vmem:[#allocation2 + $0x2c] sm:$0x1]  ;;  %v4470_v5 = vrot.slane %v4468_v39, 4  ;;  %v4473_v24 = vrot.slane %v4471_v57, 5  ;;  %v11696_v22 = vcombine.low %v15628_v17, %v15649_v36  ;;  %12968 = vmatprep.subr.bf16.mxu0 %v13887_v6  ;;  %13224 = vmatprep.mubr.msk.bf16.mxu1 %vm17899_vm4, %v11984_v14  ;;  %v11986_v16 = vcombine.low %v7370_v63, %v7380_v23 }
 0x1cb   : > { %v4446_v44 = vrot.slane %v4444_v4, 4  ;;  %v4449_v48 = vrot.slane %v4447_v2, 5  ;;  %v4453_v50 = vshll.u32 %v15661_v41, 16  ;;  %v4457_v54 = vshrl.u32 %v15661_v41, 16  ;;  %v15670_v52 = vld [vmem:[#allocation2 + $0x38] sm:$0x1] }
 0x1cc   : > { %v4474_v47 = vor.u32 %v4473_v24, %v4470_v5  ;;  %v4477_v55 = vshll.u32 %v15649_v36, 16  ;;  %v4481_v59 = vshrl.u32 %v15649_v36, 16  ;;  %13237 = vmatpush3.bf16.msra.mxu1 %v15586_v46  ;;  %v4463_v12 = vshll.u32 %v15663_v43, 16  ;;  %v13902_v58 = vld [vmem:[%s17851_s2 + $0x60] sm:$0xff]   ;;  %12969 = vmatpush3.bf16.msra.mxu0 %v13887_v6  ;;  %v13890_v8 = vld [vmem:[%s17851_s2 + $0x38] sm:$0xff]   ;;  %v13904_v6 = vld [vmem:[%s17851_s2 + $0x68] sm:$0xff]  }
 0x1cd   : > { %v4450_v61 = vor.u32 %v4449_v48, %v4446_v44  ;;  %v4455_v1 = vrot.slane %v4453_v50, 5  ;;  %v4459_v7 = vrot.slane %v4457_v54, 4  ;;  %13238 = vmatprep.subr.bf16.mxu1 %v13898_v20  ;;  %v4487_v3 = vshll.u32 %v15670_v52, 16  ;;  %12970 = vmatprep.subr.bf16.mxu0 %v13888_v45  ;;  %v4951_v2 = vld [vmem:[#allocation2 + $0xc] sm:$0xe]  ;;  %v13908_v44 = vld [vmem:[%s17851_s2 + $0x70] sm:$0xff]  }
 0x1ce   : > { %v4479_v49 = vrot.slane %v4477_v55, 5  ;;  %v4483_v56 = vrot.slane %v4481_v59, 4  ;;  %v7389_v32 = vrot.slane %v7388_v18, 4  ;;  %v7399_v37 = vrot.slane %v7398_v15, 4  ;;  %v4952_v24 = vld [vmem:[#allocation2 + $0x18] sm:$0xe] }
 0x1cf   : > { %v4451_v13 = vrot.slane %v4450_v61, 4  ;;  %v4460_v34 = vor.u32 %v4459_v7, %v4455_v1  ;;  %v7403_v46 = vrot.slane %v7401_v62, 5  ;;  %v4475_v14 = vrot.slane %v4474_v47, 4  ;;  %v301_v50 = vld [vmem:[#allocation2 + $0x98] sm:$0x1] }
 0x1d0   : > { %v4484_v28 = vor.u32 %v4483_v56, %v4479_v49  ;;  %v11695_v60 = vcombine.low %v15641_v31, %v15661_v41  ;;  %13239 = vmatpush3.bf16.msra.mxu1 %v13898_v20  ;;  %v4465_v57 = vrot.slane %v4463_v12, 5  ;;  %v4489_v42 = vrot.slane %v4487_v3, 5  ;;  %12971 = vmatpush3.bf16.msra.mxu0 %v13888_v45  ;;  %v242_v20 = vld [vmem:[#allocation2 + $0x84] sm:$0x1]  ;;  %v298_v55 = vld [vmem:[#allocation2 + $0x8c] sm:$0x1] }
 0x1d1   : > { %v4461_v39 = vrot.slane %v4460_v34, 4  ;;  %13240 = vmatprep.subr.bf16.mxu1 %v13902_v58  ;;  %v7394_v4 = vsel %vm14180_vm5, %v7389_v32, %v15605_v30  ;;  %v4456_v63 = vsel %vm14180_vm5, %v4451_v13, %v4455_v1  ;;  %13225 = vmatmul.mubr.msk.bf16.gmra.mrb[24].mxu1 %vm17900_vm3, %v15630_v38  ;;  %v7404_v62 = vsel %vm14180_vm5, %v7399_v37, %v7403_v46  ;;  %v15712_v38 = vld [vmem:[%s17851_s2 + $0x80] sm:$0xff]   ;;  %v4275_v9 = vld [vmem:[#allocation2 + $0x6c] sm:$0xf] }
 0x1d2   : > { %v4485_v11 = vrot.slane %v4484_v28, 4  ;;  %12972 = vmatprep.subr.bf16.mxu0 %v13890_v8  ;;  %v4983_v5 = vrot.slane %v15474_v33, 5  ;;  %v4480_v45 = vsel %vm14180_vm5, %v4475_v14, %v4479_v49  ;;  %13228 = vmatprep.mubr.msk.bf16.mxu1 %vm17901_vm12, %v11986_v16  ;;  %v243_v48 = vsel %vm15187_vm6, 0, %v242_v20  ;;  %v4953_v23 = vld [vmem:[#allocation2 + $0x24] sm:$0xe]  ;;  %v13910_v14 = vld [vmem:[%s17851_s2 + $0x78] sm:$0xff]  }
 0x1d3   : > { %v4466_v18 = vsel %vm14180_vm5, %v4461_v39, %v4465_v57  ;;  %244 = vst [vmem:[#allocation2 + $0x84] sm:$0x1] %v243_v48  ;;  %v302_v47 = vsel %vm15199_vm15, 0, %v301_v50  ;;  %v11709_v59 = vrot.slane %v4951_v2, 9  ;;  %v11987_v61 = vcombine.low %v7394_v4, %v7404_v62  ;;  %v4954_v4 = vld [vmem:[#allocation2 + $0x30] sm:$0xe] }
 0x1d4   : > { %v11679_v30 = vcombine.low %v4456_v63, %v4466_v18  ;;  %v4490_v15 = vsel %vm14180_vm5, %v4485_v11, %v4489_v42  ;;  %13241 = vmatpush3.bf16.msra.mxu1 %v13902_v58  ;;  %303 = vst [vmem:[#allocation2 + $0x98] sm:$0x1] %v302_v47  ;;  %v299_v1 = vsel %vm15199_vm15, 0, %v298_v55  ;;  %v4985_v7 = vrot.slane %v4983_v5, 4  ;;  %12973 = vmatpush3.bf16.msra.mxu0 %v13890_v8 }
 0x1d5   : > { %v11680_v54 = vcombine.low %v4480_v45, %v4490_v15  ;;  %13242 = vmatprep.subr.bf16.mxu1 %v13904_v6  ;;  %v4986_v12 = vrot.slane %v15476_v35, 5  ;;  %300 = vst [vmem:[#allocation2 + $0x8c] sm:$0x1] %v299_v1  ;;  %v15726_v58 = vsel %vm14134_vm2, %v11709_v59, %v4983_v5  ;;  %v11710_v49 = vrot.slane %v4952_v24, 9  ;;  %12990 = vmatprep.subr.bf16.mxu0 %v15712_v38 }
 0x1d6   : > { %12947 = vmatmul.mubr.bf16.gmra.mrb[20].mxu0 %v11679_v30  ;;  %v4990_v56 = vrot.slane %v15464_v25, 5  ;;  %v4997_v3 = vrot.slane %v15661_v41, 5  ;;  %v4993_v35 = vrot.slane %v15466_v27, 5  ;;  %v11711_v34 = vrot.slane %v4953_v23, 9  ;;  %v14068_v41 = vld [vmem:[#allocation2 + $0x8] sm:$0x1] }
 0x1d7   : > { %12950 = vmatprep.mubr.bf16.mxu0 %v11680_v54  ;;  %v15733_v13 = vsel %vm14134_vm2, %v4985_v7, %v4986_v12  ;;  %v5004_v37 = vrot.slane %v15649_v36, 5  ;;  %v5000_v39 = vrot.slane %v15663_v43, 5  ;;  %v11712_v50 = vrot.slane %v4954_v4, 9  ;;  %v2314_v54 = vld [vmem:[#allocation2 + $0x48] sm:$0xf] }
 0x1d8   : > { %v12894_v32 = vpop.f32.mrb[8].mxu0  ;;  %13243 = vmatpush3.bf16.msra.mxu1 %v13904_v6  ;;  %v4992_v16 = vrot.slane %v4990_v56, 4  ;;  %v15745_v27 = vsel %vm14134_vm2, %v11710_v49, %v4990_v56  ;;  %v15749_v11 = vsel %vm14134_vm2, %v11711_v34, %v4997_v3  ;;  %v4999_v42 = vrot.slane %v4997_v3, 4  ;;  %v251_v12 = vld [vmem:[#allocation2 + $0xa8] sm:$0x1] }
 0x1d9   : > { %v2060_v46 = vmax.f32 %v12894_v32, 0.0  ;;  %v2019_v8 = vpop.f32.mrb[9].mxu0  ;;  %13244 = vmatprep.subr.bf16.mxu1 %v13908_v44  ;;  %13229 = vmatmul.mubr.msk.bf16.gmra.mrb[28].mxu1 %vm17902_vm7, %v11987_v61  ;;  %v5006_v62 = vrot.slane %v5004_v37, 4  ;;  %v5007_v59 = vrot.slane %v15670_v52, 5  ;;  %v2307_v61 = vld [vmem:[#allocation2 + $0x3c] sm:$0xf]  ;;  %v15767_v7 = vsel %vm14134_vm2, %v11712_v50, %v5004_v37 }
 0x1da   : > { %v2058_v57 = vmax.f32 %v2019_v8, 0.0  ;;  %v12895_v6 = vpop.f32.mrb[10].mxu0  ;;  %v15754_v43 = vsel %vm14134_vm2, %v4992_v16, %v4993_v35  ;;  %v15760_v30 = vsel %vm14134_vm2, %v4999_v42, %v5000_v39  ;;  %v2318_v3 = vld [vmem:[#allocation2 + $0x50] sm:$0x1]  ;;  %v2311_v8 = vld [vmem:[#allocation2 + $0x44] sm:$0x1] }
 0x1db   : > { %v12393_v2 = vpack.c.bf16 %v2060_v46, %v2060_v46  ;;  %v2061_v63 = vmax.f32 %v12895_v6, 0.0  ;;  %v2022_v18 = vpop.f32.mrb[11].mxu0  ;;  %v15771_v35 = vsel %vm14134_vm2, %v5006_v62, %v5007_v59  ;;  %v252_v6 = vsel %vm15187_vm6, 0, %v251_v12  ;;  %v2332_v16 = vld [vmem:[#allocation2 + $0x68] sm:$0x1] }
 0x1dc   : > { %v12391_v20 = vpack.c.bf16 %v2058_v57, %v2058_v57  ;;  %v2059_v5 = vmax.f32 %v2022_v18, 0.0  ;;  %13245 = vmatpush3.bf16.msra.mxu1 %v13908_v44  ;;  %253 = vst [vmem:[#allocation2 + $0xa8] sm:$0x1] %v252_v6  ;;  %v15941_v36 = vld [vmem:[#allocation2 + $0x1c] sm:$0xf] }
 0x1dd   : > { %v2202_v45 = vshrl.u32 %v12393_v2, 16  ;;  %v12394_v15 = vpack.c.bf16 %v2061_v63, %v2061_v63  ;;  %13246 = vmatprep.subr.bf16.mxu1 %v13910_v14  ;;  %v2205_v23 = vshll.u32 %v12393_v2, 16 }
 0x1de   : > { %v2185_v47 = vshrl.u32 %v12391_v20, 16  ;;  %v12392_v55 = vpack.c.bf16 %v2059_v5, %v2059_v5  ;;  %v2188_v56 = vshll.u32 %v12391_v20, 16 }
 0x1df   : > { %v2204_v44 = vrot.slane %v2202_v45, 7  ;;  %v2210_v1 = vshrl.u32 %v12394_v15, 16  ;;  %v2213_v46 = vshll.u32 %v12394_v15, 16 }
 0x1e0   : > { %v2187_v49 = vrot.slane %v2185_v47, 7  ;;  %v2193_v32 = vshrl.u32 %v12392_v55, 16  ;;  %13247 = vmatpush3.bf16.msra.mxu1 %v13910_v14  ;;  %v2196_v57 = vshll.u32 %v12392_v55, 16 }
 0x1e1   : > { %v2207_v34 = vor.u32 %v2205_v23, %v2204_v44  ;;  %v2212_v52 = vrot.slane %v2210_v1, 7  ;;  %v2208_v42 = vrot.slane %v2204_v44, 4 }
 0x1e2   : > { %v2190_v39 = vor.u32 %v2188_v56, %v2187_v49  ;;  %v2195_v37 = vrot.slane %v2193_v32, 7  ;;  %v2191_v63 = vrot.slane %v2187_v49, 4 }
 0x1e3   : > { %v2315_v14 = vsel %vm15375_vm8, %v2207_v34, %v2314_v54  ;;  %v2215_v4 = vor.u32 %v2213_v46, %v2212_v52  ;;  %v2217_v2 = vrot.slane %v2212_v52, 4 }
 0x1e4   : > { %2316 = vst [vmem:[#allocation2 + $0x48] sm:$0xf] %v2315_v14  ;;  %v2308_v18 = vsel %vm15375_vm8, %v2190_v39, %v2307_v61  ;;  %v2198_v62 = vor.u32 %v2196_v57, %v2195_v37  ;;  %v2200_v20 = vrot.slane %v2195_v37, 4 }
 0x1e5   : > { %2309 = vst [vmem:[#allocation2 + $0x3c] sm:$0xf] %v2308_v18  ;;  %v2216_v5 = vsel %vm15385_vm9, %v2208_v42, %v2215_v4  ;;  %v2319_v45 = vsel %vm15187_vm6, %v2217_v2, %v2318_v3 }
 0x1e6   : > { %2317 = vst [vmem:[#allocation2 + $0x4c] sm:$0xf] %v2216_v5  ;;  %2320 = vst [vmem:[#allocation2 + $0x50] sm:$0x1] %v2319_v45  ;;  %v2199_v15 = vsel %vm15385_vm9, %v2191_v63, %v2198_v62  ;;  %v2312_v50 = vsel %vm15187_vm6, %v2200_v20, %v2311_v8 }
 0x1e7   : > { %2310 = vst [vmem:[#allocation2 + $0x40] sm:$0xf] %v2199_v15  ;;  %2313 = vst [vmem:[#allocation2 + $0x44] sm:$0x1] %v2312_v50 }
 0x1eb   : > { %v15789_v54 = vld [vmem:[#allocation2 + $0x48] sm:$0xf] }
 0x1ec   : > { %v15791_v47 = vld [vmem:[#allocation2 + $0x3c] sm:$0xf]  ;;  %v4516_v55 = vshrl.u32 %v15789_v54, 16  ;;  %v4519_v59 = vshll.u32 %v15789_v54, 16 }
 0x1ed   : > { %v4492_v44 = vshrl.u32 %v15791_v47, 16  ;;  %v4495_v23 = vshll.u32 %v15791_v47, 16  ;;  %v15797_v61 = vld [vmem:[#allocation2 + $0x4c] sm:$0xf]  ;;  %v4369_v1 = vld [vmem:[#allocation2 + $0x50] sm:$0x1] }
 0x1ee   : > { %v15799_v12 = vld [vmem:[#allocation2 + $0x40] sm:$0xf]  ;;  %v4368_v49 = vld [vmem:[#allocation2 + $0x44] sm:$0x1]  ;;  %v4518_v56 = vrot.slane %v4516_v55, 4  ;;  %v4521_v3 = vrot.slane %v4519_v59, 5 }
 0x1ef   : > { %v4494_v34 = vrot.slane %v4492_v44, 4  ;;  %v4497_v52 = vrot.slane %v4495_v23, 5  ;;  %v4501_v46 = vshll.u32 %v15799_v12, 16  ;;  %v4505_v8 = vshrl.u32 %v15799_v12, 16  ;;  %v4955_v20 = vld [vmem:[#allocation2 + $0x3c] sm:$0xe] }
 0x1f0   : > { %v4511_v39 = vshll.u32 %v4368_v49, 16  ;;  %v4522_v37 = vor.u32 %v4521_v3, %v4518_v56  ;;  %v4525_v57 = vshll.u32 %v15797_v61, 16  ;;  %v4529_v6 = vshrl.u32 %v15797_v61, 16  ;;  %v4956_v44 = vld [vmem:[#allocation2 + $0x48] sm:$0xe] }
 0x1f1   : > { %v4498_v42 = vor.u32 %v4497_v52, %v4494_v34  ;;  %v4503_v14 = vrot.slane %v4501_v46, 5  ;;  %v4507_v4 = vrot.slane %v4505_v8, 4  ;;  %v4535_v2 = vshll.u32 %v4369_v1, 16 }
 0x1f2   : > { %v4523_v63 = vrot.slane %v4522_v37, 4  ;;  %v4527_v18 = vrot.slane %v4525_v57, 5  ;;  %v4531_v62 = vrot.slane %v4529_v6, 4  ;;  %v4513_v50 = vrot.slane %v4511_v39, 5 }
 0x1f3   : > { %v4499_v5 = vrot.slane %v4498_v42, 4  ;;  %v4508_v45 = vor.u32 %v4507_v4, %v4503_v14  ;;  %v5011_v59 = vrot.slane %v15799_v12, 5  ;;  %v4537_v3 = vrot.slane %v4535_v2, 5  ;;  %v248_v4 = vld [vmem:[#allocation2 + $0x9c] sm:$0x1] }
 0x1f4   : > { %v4532_v55 = vor.u32 %v4531_v62, %v4527_v18  ;;  %v4528_v56 = vsel %vm14180_vm5, %v4523_v63, %v4527_v18  ;;  %v11713_v34 = vrot.slane %v4955_v20, 9  ;;  %v5014_v8 = vrot.slane %v4368_v49, 5  ;;  %v307_v18 = vld [vmem:[#allocation2 + $0xb0] sm:$0x1]  ;;  %v2321_v20 = vld [vmem:[#allocation2 + $0x54] sm:$0xf] }
 0x1f5   : > { %v4509_v23 = vrot.slane %v4508_v45, 4  ;;  %v5013_v46 = vrot.slane %v5011_v59, 4  ;;  %v5018_v37 = vrot.slane %v15797_v61, 5  ;;  %v4504_v57 = vsel %vm14180_vm5, %v4499_v5, %v4503_v14  ;;  %v304_v45 = vld [vmem:[#allocation2 + $0xa4] sm:$0x1] }
 0x1f6   : > { %v4533_v52 = vrot.slane %v4532_v55, 4  ;;  %v11714_v6 = vrot.slane %v4956_v44, 9  ;;  %v5021_v42 = vrot.slane %v4369_v1, 5  ;;  %v15821_v2 = vsel %vm14134_vm2, %v11713_v34, %v5011_v59 }
 0x1f7   : > { %v4514_v39 = vsel %vm14180_vm5, %v4509_v23, %v4513_v50  ;;  %v15825_v49 = vsel %vm14134_vm2, %v5013_v46, %v5014_v8  ;;  %v5020_v5 = vrot.slane %v5018_v37, 4  ;;  %v249_v1 = vsel %vm15187_vm6, 0, %v248_v4 }
 0x1f8   : > { %v11681_v62 = vcombine.low %v4504_v57, %v4514_v39  ;;  %v4538_v63 = vsel %vm14180_vm5, %v4533_v52, %v4537_v3  ;;  %250 = vst [vmem:[#allocation2 + $0x9c] sm:$0x1] %v249_v1  ;;  %v308_v50 = vsel %vm15199_vm15, 0, %v307_v18  ;;  %v305_v55 = vsel %vm15199_vm15, 0, %v304_v45  ;;  %v257_v52 = vld [vmem:[#allocation2 + $0xc0] sm:$0x1] }
 0x1f9   : > { %v11682_v14 = vcombine.low %v4528_v56, %v4538_v63  ;;  %v15837_v44 = vsel %vm14134_vm2, %v11714_v6, %v5018_v37  ;;  %v15841_v23 = vsel %vm14134_vm2, %v5020_v5, %v5021_v42  ;;  %309 = vst [vmem:[#allocation2 + $0xb0] sm:$0x1] %v308_v50  ;;  %306 = vst [vmem:[#allocation2 + $0xa4] sm:$0x1] %v305_v55  ;;  %v258_v57 = vsel %vm15187_vm6, 0, %v257_v52 }
 0x1fa   : > { %12951 = vmatmul.mubr.bf16.gmra.mrb[24].mxu0 %v11681_v62  ;;  %259 = vst [vmem:[#allocation2 + $0xc0] sm:$0x1] %v258_v57  ;;  %v2328_v50 = vld [vmem:[#allocation2 + $0x60] sm:$0xf] }
 0x1fb   : > { %v12898_v59 = vpop.f32.mrb[12].mxu0  ;;  %12954 = vmatprep.mubr.bf16.mxu0 %v11682_v14 }
 0x1fc   : > { %v2064_v56 = vmax.f32 %v12898_v59, 0.0  ;;  %v2035_v3 = vpop.f32.mrb[13].mxu0 }
 0x1fd   : > { %v2062_v46 = vmax.f32 %v2035_v3, 0.0  ;;  %v12899_v8 = vpop.f32.mrb[14].mxu0 }
 0x1fe   : > { %v12397_v39 = vpack.c.bf16 %v2064_v56, %v2064_v56  ;;  %v2065_v37 = vmax.f32 %v12899_v8, 0.0  ;;  %v2038_v6 = vpop.f32.mrb[15].mxu0 }
 0x1ff   : > { %v12395_v4 = vpack.c.bf16 %v2062_v46, %v2062_v46  ;;  %v2063_v42 = vmax.f32 %v2038_v6, 0.0 }
 0x200   : > { %v2236_v62 = vshrl.u32 %v12397_v39, 16  ;;  %v12398_v63 = vpack.c.bf16 %v2065_v37, %v2065_v37  ;;  %v2239_v1 = vshll.u32 %v12397_v39, 16  ;;  %v2325_v39 = vld [vmem:[#allocation2 + $0x5c] sm:$0x1] }
 0x201   : > { %v2219_v18 = vshrl.u32 %v12395_v4, 16  ;;  %v12396_v14 = vpack.c.bf16 %v2063_v42, %v2063_v42  ;;  %v2222_v59 = vshll.u32 %v12395_v4, 16 }
 0x202   : > { %v2238_v5 = vrot.slane %v2236_v62, 7  ;;  %v2244_v45 = vshrl.u32 %v12398_v63, 16  ;;  %v2247_v56 = vshll.u32 %v12398_v63, 16 }
 0x203   : > { %v2221_v55 = vrot.slane %v2219_v18, 7  ;;  %v2227_v3 = vshrl.u32 %v12396_v14, 16  ;;  %v2230_v46 = vshll.u32 %v12396_v14, 16 }
 0x204   : > { %v2241_v34 = vor.u32 %v2239_v1, %v2238_v5  ;;  %v2246_v52 = vrot.slane %v2244_v45, 7  ;;  %v2242_v6 = vrot.slane %v2238_v5, 4 }
 0x205   : > { %v2224_v8 = vor.u32 %v2222_v59, %v2221_v55  ;;  %v2229_v57 = vrot.slane %v2227_v3, 7  ;;  %v2225_v48 = vrot.slane %v2221_v55, 4 }
 0x206   : > { %v2329_v37 = vsel %vm15375_vm8, %v2241_v34, %v2328_v50  ;;  %v2249_v42 = vor.u32 %v2247_v56, %v2246_v52  ;;  %v2251_v62 = vrot.slane %v2246_v52, 4 }
 0x207   : > { %2330 = vst [vmem:[#allocation2 + $0x60] sm:$0xf] %v2329_v37  ;;  %v2322_v4 = vsel %vm15375_vm8, %v2224_v8, %v2321_v20  ;;  %v2232_v18 = vor.u32 %v2230_v46, %v2229_v57  ;;  %v2234_v1 = vrot.slane %v2229_v57, 4 }
 0x208   : > { %2323 = vst [vmem:[#allocation2 + $0x54] sm:$0xf] %v2322_v4  ;;  %v2250_v63 = vsel %vm15385_vm9, %v2242_v6, %v2249_v42  ;;  %v2333_v14 = vsel %vm15187_vm6, %v2251_v62, %v2332_v16 }
 0x209   : > { %2331 = vst [vmem:[#allocation2 + $0x64] sm:$0xf] %v2250_v63  ;;  %2334 = vst [vmem:[#allocation2 + $0x68] sm:$0x1] %v2333_v14  ;;  %v2233_v34 = vsel %vm15385_vm9, %v2225_v48, %v2232_v18  ;;  %v2326_v5 = vsel %vm15187_vm6, %v2234_v1, %v2325_v39 }
 0x20a   : > { %2324 = vst [vmem:[#allocation2 + $0x58] sm:$0xf] %v2233_v34  ;;  %2327 = vst [vmem:[#allocation2 + $0x5c] sm:$0x1] %v2326_v5 }
 0x20e   : > { %v7683_v20 = vld [vmem:[#allocation2 + $0x60] sm:$0xf] }
 0x20f   : > { %v7724_v45 = vshrl.u32 %v7683_v20, 16  ;;  %v7727_v50 = vshll.u32 %v7683_v20, 16  ;;  %v15859_v55 = vld [vmem:[#allocation2 + $0x54] sm:$0xf] }
 0x210   : > { %v7684_v59 = vld [vmem:[#allocation2 + $0x64] sm:$0xf]  ;;  %v7715_v3 = vld [vmem:[#allocation2 + $0x68] sm:$0x1]  ;;  %v4540_v52 = vshrl.u32 %v15859_v55, 16  ;;  %v4543_v16 = vshll.u32 %v15859_v55, 16 }
 0x211   : > { %v7726_v56 = vrot.slane %v7724_v45, 4  ;;  %v7729_v8 = vrot.slane %v7727_v50, 5  ;;  %v7733_v57 = vshll.u32 %v7684_v59, 16  ;;  %v7737_v48 = vshrl.u32 %v7684_v59, 16  ;;  %v15863_v46 = vld [vmem:[#allocation2 + $0x58] sm:$0xf] }
 0x212   : > { %v7743_v6 = vshll.u32 %v7715_v3, 16  ;;  %v4370_v37 = vld [vmem:[#allocation2 + $0x5c] sm:$0x1]  ;;  %v4542_v42 = vrot.slane %v4540_v52, 4  ;;  %v4545_v62 = vrot.slane %v4543_v16, 5  ;;  %v4549_v39 = vshll.u32 %v15863_v46, 16 }
 0x213   : > { %v7730_v4 = vor.u32 %v7729_v8, %v7726_v56  ;;  %v7735_v18 = vrot.slane %v7733_v57, 5  ;;  %v7739_v1 = vrot.slane %v7737_v48, 4  ;;  %v4553_v63 = vshrl.u32 %v15863_v46, 16  ;;  %v4957_v5 = vld [vmem:[#allocation2 + $0x54] sm:$0xe] }
 0x214   : > { %v4546_v14 = vor.u32 %v4545_v62, %v4542_v42  ;;  %v4551_v34 = vrot.slane %v4549_v39, 5  ;;  %v4559_v59 = vshll.u32 %v4370_v37, 16  ;;  %v5025_v24 = vrot.slane %v15863_v46, 5  ;;  %v15872_v39 = vld [vmem:[#allocation2 + $0x4] sm:$0xf] }
 0x215   : > { %v7731_v20 = vrot.slane %v7730_v4, 4  ;;  %v7740_v45 = vor.u32 %v7739_v1, %v7735_v18  ;;  %v4555_v50 = vrot.slane %v4553_v63, 4  ;;  %v7745_v28 = vrot.slane %v7743_v6, 5  ;;  %v14067_v4 = vld [vmem:[#allocation2] sm:$0xf] }
 0x216   : > { %v4547_v52 = vrot.slane %v4546_v14, 4  ;;  %v11715_v32 = vrot.slane %v4957_v5, 9  ;;  %v5027_v15 = vrot.slane %v5025_v24, 4  ;;  %v5028_v56 = vrot.slane %v4370_v37, 5 }
 0x217   : > { %v7741_v3 = vrot.slane %v7740_v45, 4  ;;  %v4556_v16 = vor.u32 %v4555_v50, %v4551_v34  ;;  %v7736_v8 = vsel %vm14180_vm5, %v7731_v20, %v7735_v18  ;;  %v4561_v42 = vrot.slane %v4559_v59, 5  ;;  %v254_v18 = vld [vmem:[#allocation2 + $0xb4] sm:$0x1]  ;;  %v313_v20 = vld [vmem:[#allocation2 + $0xc8] sm:$0x1] }
 0x218   : > { %v11692_v1 = vcombine.low %v14067_v4, %v15872_v39  ;;  %v15877_v6 = vsel %vm14134_vm2, %v11715_v32, %v5025_v24  ;;  %v15881_v37 = vsel %vm14134_vm2, %v5027_v15, %v5028_v56  ;;  %v255_v5 = vsel %vm15187_vm6, 0, %v254_v18  ;;  %v310_v15 = vld [vmem:[#allocation2 + $0xbc] sm:$0x1]  ;;  %v15898_v45 = vld [vmem:[%s17851_s2] sm:$0xff]   ;;  %v13897_v56 = vld [vmem:[%s17851_s2 + $0x88] sm:$0xff]  }
 0x219   : > { %v7746_v57 = vsel %vm14180_vm5, %v7741_v3, %v7745_v28  ;;  %v4557_v48 = vrot.slane %v4556_v16, 4  ;;  %v4552_v28 = vsel %vm14180_vm5, %v4547_v52, %v4551_v34  ;;  %256 = vst [vmem:[#allocation2 + $0xb4] sm:$0x1] %v255_v5  ;;  %v314_v32 = vsel %vm15199_vm15, 0, %v313_v20  ;;  %13264 = vmatprep.subr.bf16.mxu1 %v15898_v45  ;;  %v4282_v18 = vld [vmem:[#allocation2 + $0x78] sm:$0xf] }
 0x21a   : > { %v12028_v62 = vcombine.low %v7736_v8, %v7746_v57  ;;  %315 = vst [vmem:[#allocation2 + $0xc8] sm:$0x1] %v314_v32  ;;  %v311_v34 = vsel %vm15199_vm15, 0, %v310_v15  ;;  %v13900_v5 = vld [vmem:[%s17851_s2 + $0x90] sm:$0xff]  }
 0x21b   : > { %v4562_v63 = vsel %vm14180_vm5, %v4557_v48, %v4561_v42  ;;  %312 = vst [vmem:[#allocation2 + $0xbc] sm:$0x1] %v311_v34  ;;  %v4286_v34 = vld [vmem:[#allocation2 + $0x80] sm:$0x1] }
 0x21c   : > { %13248 = vmatprep.mubr.bf16.mxu1 %v12028_v62  ;;  %v11683_v24 = vcombine.low %v4552_v28, %v4562_v63 }
 0x21e   : > { %12955 = vmatmul.mubr.bf16.gmra.mrb[28].mxu0 %v11683_v24 }
 0x21f   : > { %12974 = vmatprep.mubr.bf16.mxu0 %v11692_v1 }
 0x220   : > { %v12912_v50 = vpop.f32.mrb[0].mxu1 }
 0x221   : > { %v4052_v59 = vmax.f32 %v12912_v50, 0.0  ;;  %v3987_v3 = vpop.f32.mrb[1].mxu1  ;;  %v4279_v50 = vld [vmem:[#allocation2 + $0x74] sm:$0x1] }
 0x222   : > { %v4050_v52 = vmax.f32 %v3987_v3, 0.0  ;;  %v12913_v16 = vpop.f32.mrb[2].mxu1  ;;  %v5482_v3 = vld [vmem:[#allocation2 + $0xc] sm:$0xf] }
 0x223   : > { %v12401_v8 = vpack.c.bf16 %v4052_v59, %v4052_v59  ;;  %v4053_v57 = vmax.f32 %v12913_v16, 0.0  ;;  %v3990_v48 = vpop.f32.mrb[3].mxu1  ;;  %v4976_v59 = vrot.slane %v15872_v39, 5 }
 0x224   : > { %v12399_v42 = vpack.c.bf16 %v4050_v52, %v4050_v52  ;;  %v4051_v62 = vmax.f32 %v3990_v48, 0.0 }
 0x225   : > { %v4132_v4 = vshrl.u32 %v12401_v8, 16  ;;  %v12402_v1 = vpack.c.bf16 %v4053_v57, %v4053_v57  ;;  %v4135_v24 = vshll.u32 %v12401_v8, 16  ;;  %v13903_v8 = vld [vmem:[%s17851_s2 + $0x98] sm:$0xff]   ;;  %v4978_v31 = vrot.slane %v4976_v59, 4 }
 0x226   : > { %12975 = vmatmul.mubr.bf16.vlgmr.msra.gmra.mrb[16].mxu0 %v11693_v21  ;;  %v4115_v28 = vshrl.u32 %v12399_v42, 16  ;;  %v12400_v63 = vpack.c.bf16 %v4051_v62, %v4051_v62  ;;  %v4950_v21 = vld [vmem:[#allocation2] sm:$0xe]  ;;  %v4118_v15 = vshll.u32 %v12399_v42, 16  ;;  %v5483_v42 = vld [vmem:[#allocation2 + $0x10] sm:$0xf] }
 0x227   : > { %12978 = vmatprep.mubr.bf16.mxu0 %v11694_v40  ;;  %12991 = vmatpush3.bf16.msra.mxu0 %v15712_v38  ;;  %v4134_v20 = vrot.slane %v4132_v4, 7  ;;  %v4140_v33 = vshrl.u32 %v12402_v1, 16  ;;  %v4143_v38 = vshll.u32 %v12402_v1, 16  ;;  %v11708_v48 = vrot.slane %v4950_v21, 9 }
 0x228   : > { %12992 = vmatprep.subr.bf16.mxu0 %v13897_v56  ;;  %v4117_v32 = vrot.slane %v4115_v28, 7  ;;  %v4123_v19 = vshrl.u32 %v12400_v63, 16  ;;  %v4126_v57 = vshll.u32 %v12400_v63, 16  ;;  %v5520_v17 = vshrl.u32 %v5483_v42, 16 }
 0x229   : > { %v4137_v25 = vor.u32 %v4135_v24, %v4134_v20  ;;  %v4142_v40 = vrot.slane %v4140_v33, 7  ;;  %v4138_v62 = vrot.slane %v4134_v20, 4  ;;  %v13906_v20 = vld [vmem:[%s17851_s2 + $0xa0] sm:$0xff]   ;;  %v15928_v33 = vld [vmem:[#allocation2 + $0x18] sm:$0xf] }
 0x22a   : > { %v4120_v52 = vor.u32 %v4118_v15, %v4117_v32  ;;  %v4125_v16 = vrot.slane %v4123_v19, 7  ;;  %v5507_v15 = vshrl.u32 %v5482_v3, 16  ;;  %v5510_v19 = vshll.u32 %v5482_v3, 16 }
 0x22b   : > { %12993 = vmatpush3.bf16.msra.mxu0 %v13897_v56  ;;  %v4283_v4 = vsel %vm15375_vm8, %v4137_v25, %v4282_v18  ;;  %v4145_v1 = vor.u32 %v4143_v38, %v4142_v40  ;;  %v4147_v28 = vrot.slane %v4142_v40, 4  ;;  %v4121_v56 = vrot.slane %v4117_v32, 4 }
 0x22c   : > { %12994 = vmatprep.subr.bf16.mxu0 %v13900_v5  ;;  %4284 = vst [vmem:[#allocation2 + $0x78] sm:$0xf] %v4283_v4  ;;  %v4276_v39 = vsel %vm15375_vm8, %v4120_v52, %v4275_v9  ;;  %v4128_v24 = vor.u32 %v4126_v57, %v4125_v16  ;;  %v4130_v63 = vrot.slane %v4125_v16, 4  ;;  %v15949_v25 = vsel %vm14134_vm2, %v11708_v48, %v4976_v59  ;;  %v13912_v48 = vld [vmem:[%s17851_s2 + $0xb0] sm:$0xff]  }
 0x22d   : > { %4277 = vst [vmem:[#allocation2 + $0x6c] sm:$0xf] %v4276_v39  ;;  %v4146_v18 = vsel %vm15385_vm9, %v4138_v62, %v4145_v1  ;;  %v4287_v21 = vsel %vm15187_vm6, %v4147_v28, %v4286_v34  ;;  %v5516_v34 = vshll.u32 %v5483_v42, 16  ;;  %v15953_v38 = vrot.slane %v5507_v15, 4  ;;  %v15965_v42 = vld [vmem:[#allocation2 + $0x24] sm:$0xf] }
 0x22e   : > { %12979 = vmatmul.mubr.bf16.gmra.mrb[20].mxu0 %v11695_v60  ;;  %v4979_v60 = vrot.slane %v14068_v41, 5  ;;  %4285 = vst [vmem:[#allocation2 + $0x7c] sm:$0xf] %v4146_v18  ;;  %4288 = vst [vmem:[#allocation2 + $0x80] sm:$0x1] %v4287_v21  ;;  %v4129_v9 = vsel %vm15385_vm9, %v4121_v56, %v4128_v24  ;;  %v4280_v32 = vsel %vm15187_vm6, %v4130_v63, %v4279_v50  ;;  %v15955_v50 = vrot.slane %v5510_v19, 5 }
 0x22f   : > { %12982 = vmatprep.mubr.bf16.mxu0 %v11696_v22  ;;  %12995 = vmatpush3.bf16.msra.mxu0 %v13900_v5  ;;  %4278 = vst [vmem:[#allocation2 + $0x70] sm:$0xf] %v4129_v9  ;;  %4281 = vst [vmem:[#allocation2 + $0x74] sm:$0x1] %v4280_v32  ;;  %v5531_v22 = vshrl.u32 %v15928_v33, 16  ;;  %v13909_v5 = vld [vmem:[%s17851_s2 + $0xa8] sm:$0xff]   ;;  %v17904_v59 = vcombine.low %v15791_v47, %v15799_v12  ;;  %v17906_v28 = vcombine.low %v15789_v54, %v15797_v61 }
 0x230   : > { %12996 = vmatprep.subr.bf16.mxu0 %v13903_v8  ;;  %v4980_v40 = vsel %vm14134_vm2, %v4978_v31, %v4979_v60  ;;  %v15959_v52 = vrot.slane %v5516_v34, 5  ;;  %v15961_v16 = vrot.slane %v5520_v17, 4  ;;  %v5534_v57 = vshll.u32 %v15928_v33, 16  ;;  %v5489_v34 = vld [vmem:[#allocation2 + $0x28] sm:$0xf] }
 0x231   : > { %v15984_v39 = vrot.slane %v5531_v22, 4  ;;  %v5544_v24 = vshrl.u32 %v15941_v36, 16  ;;  %v11732_v54 = vcombine.low %v15949_v25, %v4980_v40  ;;  %v5555_v17 = vshrl.u32 %v15965_v42, 16  ;;  %v5487_v33 = vld [vmem:[#allocation2 + $0x20] sm:$0x1] }
 0x233   : > { %12997 = vmatpush3.bf16.msra.mxu0 %v13903_v8  ;;  %v15957_v3 = vld [vmem:[#allocation2 + $0x78] sm:$0xf]  ;;  %v5540_v8 = vshll.u32 %v15941_v36, 16 }
 0x234   : > { %12998 = vmatprep.subr.bf16.mxu0 %v13906_v20  ;;  %17903 = vst [vmem:[#allocation5_spill] sm:$0xff] %v15957_v3  ;;  %v15973_v62 = vld [vmem:[#allocation2 + $0x6c] sm:$0xf]  ;;  %v7772_v4 = vshrl.u32 %v15957_v3, 16  ;;  %v7775_v1 = vshll.u32 %v15957_v3, 16 }
 0x235   : > { %17905 = vst [vmem:[#allocation6_spill] sm:$0xff] %v15973_v62  ;;  %v7748_v56 = vshrl.u32 %v15973_v62, 16  ;;  %v7751_v47 = vshll.u32 %v15973_v62, 16  ;;  %v15982_v12 = vld [vmem:[#allocation2 + $0x7c] sm:$0xf]  ;;  %v13933_v62 = vld [vmem:[#allocation2 + $0x54] sm:$0xff]  }
 0x236   : > { %12983 = vmatmul.mubr.bf16.gmra.mrb[24].mxu0 %v17904_v59  ;;  %17907 = vst [vmem:[#allocation7_spill] sm:$0xff] %v15982_v12  ;;  %v15987_v63 = vld [vmem:[#allocation2 + $0x70] sm:$0xf]  ;;  %v15989_v18 = vld [vmem:[#allocation2 + $0x74] sm:$0x1]  ;;  %v7774_v21 = vrot.slane %v7772_v4, 4  ;;  %v11699_v4 = vcombine.low %v15859_v55, %v15863_v46 }
 0x237   : > { %12986 = vmatprep.mubr.bf16.mxu0 %v17906_v28  ;;  %12999 = vmatpush3.bf16.msra.mxu0 %v13906_v20  ;;  %17908 = vst [vmem:[#allocation8_spill] sm:$0xff] %v15987_v63  ;;  %v7777_v31 = vrot.slane %v7775_v1, 5  ;;  %v7750_v61 = vrot.slane %v7748_v56, 4  ;;  %v7753_v20 = vrot.slane %v7751_v47, 5  ;;  %v7757_v41 = vshll.u32 %v15987_v63, 16  ;;  %v13913_v1 = vld [vmem:[%s17851_s2 + $0xb8] sm:$0xff]  }
 0x238   : > { %13000 = vmatprep.subr.bf16.mxu0 %v13909_v5  ;;  %v7761_v60 = vshrl.u32 %v15987_v63, 16  ;;  %v15994_v9 = vld [vmem:[#allocation2 + $0x80] sm:$0x1]  ;;  %v7781_v15 = vshll.u32 %v15982_v12, 16  ;;  %v7785_v19 = vshrl.u32 %v15982_v12, 16  ;;  %v7767_v40 = vshll.u32 %v15989_v18, 16 }
 0x239   : > { %v7778_v32 = vor.u32 %v7777_v31, %v7774_v21  ;;  %v7754_v22 = vor.u32 %v7753_v20, %v7750_v61  ;;  %v7759_v59 = vrot.slane %v7757_v41, 5  ;;  %v7791_v47 = vshll.u32 %v15994_v9, 16  ;;  %v13914_v55 = vld [vmem:[%s17851_s2 + $0xc0] sm:$0xff]  }
 0x23a   : > { %v7763_v25 = vrot.slane %v7761_v60, 4  ;;  %v7783_v28 = vrot.slane %v7781_v15, 5  ;;  %v7787_v56 = vrot.slane %v7785_v19, 4  ;;  %v5558_v61 = vshll.u32 %v15965_v42, 16  ;;  %v13924_v15 = vld [vmem:[%s17851_s2 + $0x100] sm:$0xff]  }
 0x23b   : > { %13001 = vmatpush3.bf16.msra.mxu0 %v13909_v5  ;;  %v7755_v21 = vrot.slane %v7754_v22, 4  ;;  %v5484_v5 = vld [vmem:[#allocation2 + $0x14] sm:$0x1]  ;;  %v5564_v20 = vshll.u32 %v5489_v34, 16  ;;  %v7779_v41 = vrot.slane %v7778_v32, 4  ;;  %v5568_v46 = vshrl.u32 %v5489_v34, 16 }
 0x23c   : > { %13002 = vmatprep.subr.bf16.mxu0 %v13912_v48  ;;  %v7764_v31 = vor.u32 %v7763_v25, %v7759_v59  ;;  %v7788_v60 = vor.u32 %v7787_v56, %v7783_v28  ;;  %v7769_v14 = vrot.slane %v7767_v40, 5  ;;  %v7793_v25 = vrot.slane %v7791_v47, 5  ;;  %v16103_v34 = vld [vmem:[#allocation2 + $0x3c] sm:$0xf] }
 0x23d   : > { %v7760_v42 = vsel %vm14180_vm5, %v7755_v21, %v7759_v59  ;;  %v5526_v40 = vshll.u32 %v5484_v5, 16  ;;  %v13940_v59 = vld [vmem:[%s17851_s2 + $0x8] sm:$0xff]   ;;  %v5546_v21 = vrot.slane %v5544_v24, 4  ;;  %v5560_v5 = vrot.slane %v5558_v61, 5  ;;  %v13942_v24 = vld [vmem:[%s17851_s2 + $0x10] sm:$0xff]  }
 0x23e   : > { %12987 = vmatmul.mubr.bf16.gmra.mrb[28].mxu0 %v11699_v4  ;;  %v7765_v19 = vrot.slane %v7764_v31, 4  ;;  %v7789_v22 = vrot.slane %v7788_v60, 4  ;;  %v5536_v4 = vrot.slane %v5534_v57, 5  ;;  %v16031_v57 = vrot.slane %v5540_v8, 5  ;;  %v5490_v8 = vld [vmem:[#allocation2 + $0x2c] sm:$0x1] }
 0x23f   : > { %13003 = vmatpush3.bf16.msra.mxu0 %v13912_v48  ;;  %13006 = vmatprep.mubr.bf16.mxu0 %v11732_v54  ;;  %v7784_v48 = vsel %vm14180_vm5, %v7779_v41, %v7783_v28  ;;  %v13915_v28 = vld [vmem:[%s17851_s2 + $0xc8] sm:$0xff]   ;;  %v5557_v31 = vrot.slane %v5555_v17, 4  ;;  %v16036_v41 = vrot.slane %v5564_v20, 5  ;;  %v17910_v61 = vcombine.low %v15745_v27, %v15754_v43  ;;  %v16060_v27 = vld [vmem:[#allocation2 + $0x30] sm:$0xf] }
 0x240   : > { %13004 = vmatprep.subr.bf16.mxu0 %v13913_v1  ;;  %v7770_v32 = vsel %vm14180_vm5, %v7765_v19, %v7769_v14  ;;  %v7794_v54 = vsel %vm14180_vm5, %v7789_v22, %v7793_v25  ;;  %v5513_v14 = vor.u32 %v15955_v50, %v15953_v38  ;;  %v5523_v38 = vor.u32 %v15961_v16, %v15959_v52 }
 0x241   : > { %v12029_v56 = vcombine.low %v7760_v42, %v7770_v32  ;;  %v12030_v47 = vcombine.low %v7784_v48, %v7794_v54  ;;  %v5537_v36 = vor.u32 %v5536_v4, %v15984_v39  ;;  %v17909_v50 = vcombine.low %v15726_v58, %v15733_v13  ;;  %v13916_v13 = vld [vmem:[%s17851_s2 + $0xd0] sm:$0xff]   ;;  %v13944_v48 = vld [vmem:[%s17851_s2 + $0x18] sm:$0xff]  }
 0x242   : > { %v16051_v16 = vrot.slane %v5526_v40, 5  ;;  %v5550_v39 = vshll.u32 %v5487_v33, 16  ;;  %v16057_v60 = vrot.slane %v5513_v14, 4  ;;  %v16062_v22 = vrot.slane %v5523_v38, 4  ;;  %v4296_v38 = vld [vmem:[#allocation2 + $0x90] sm:$0xf] }
 0x243   : > { %13005 = vmatpush3.bf16.msra.mxu0 %v13913_v1  ;;  %13249 = vmatmul.mubr.bf16.vlgmr.msra.gmra.mrb[32].mxu1 %v12029_v56  ;;  %v5570_v1 = vrot.slane %v5568_v46, 4  ;;  %v5561_v46 = vor.u32 %v5560_v5, %v5557_v31  ;;  %v16064_v25 = vrot.slane %v5537_v36, 4  ;;  %v5574_v56 = vshll.u32 %v5490_v8, 16 }
 0x244   : > { %13022 = vmatprep.subr.bf16.mxu0 %v13914_v55  ;;  %13252 = vmatprep.mubr.bf16.mxu1 %v12030_v47  ;;  %v12916_v17 = vpop.f32.mrb[4].mxu1  ;;  %v16071_v14 = vrot.slane %v5550_v39, 5  ;;  %v5582_v8 = vshll.u32 %v16060_v27, 16 }
 0x245   : > { %13265 = vmatpush3.bf16.msra.mxu1 %v15898_v45  ;;  %v5547_v45 = vor.u32 %v5546_v21, %v16031_v57  ;;  %v4056_v20 = vmax.f32 %v12916_v17, 0.0  ;;  %v4003_v58 = vpop.f32.mrb[5].mxu1  ;;  %v5571_v19 = vor.u32 %v5570_v1, %v16036_v41  ;;  %v16076_v31 = vrot.slane %v5561_v46, 4  ;;  %v16080_v1 = vld [vmem:[#allocation2 + $0x34] sm:$0xf] }
 0x246   : > { %13007 = vmatmul.mubr.bf16.vlgmr.msra.gmra.mrb[16].mxu0 %v17909_v50  ;;  %13266 = vmatprep.subr.bf16.mxu1 %v13940_v59  ;;  %v4054_v43 = vmax.f32 %v4003_v58, 0.0  ;;  %v5579_v50 = vshrl.u32 %v16060_v27, 16  ;;  %v13918_v58 = vld [vmem:[%s17851_s2 + $0xe0] sm:$0xff]   ;;  %v16090_v46 = vrot.slane %v5574_v56, 5  ;;  %v4293_v56 = vld [vmem:[#allocation2 + $0x8c] sm:$0x1] }
 0x247   : > { %13010 = vmatprep.mubr.bf16.mxu0 %v17910_v61  ;;  %13023 = vmatpush3.bf16.msra.mxu0 %v13914_v55  ;;  %v12917_v55 = vpop.f32.mrb[6].mxu1  ;;  %v12405_v42 = vpack.c.bf16 %v4056_v20, %v4056_v20  ;;  %v16069_v47 = vrot.slane %v5547_v45, 4  ;;  %v16078_v5 = vrot.slane %v5571_v19, 4  ;;  %v4289_v45 = vld [vmem:[#allocation2 + $0x84] sm:$0xf]  ;;  %v17911_v20 = vcombine.low %v15749_v11, %v15760_v30 }
 0x248   : > { %13024 = vmatprep.subr.bf16.mxu0 %v13915_v28  ;;  %v4057_v32 = vmax.f32 %v12917_v55, 0.0  ;;  %v4006_v4 = vpop.f32.mrb[7].mxu1  ;;  %v12403_v54 = vpack.c.bf16 %v4054_v43, %v4054_v43  ;;  %v13946_v19 = vld [vmem:[%s17851_s2 + $0x20] sm:$0xff]   ;;  %v4300_v43 = vld [vmem:[#allocation2 + $0x98] sm:$0x1]  ;;  %v5588_v11 = vshll.u32 %v16080_v1, 16 }
 0x249   : > { %13267 = vmatpush3.bf16.msra.mxu1 %v13940_v59  ;;  %v4055_v40 = vmax.f32 %v4006_v4, 0.0  ;;  %v4166_v33 = vshrl.u32 %v12405_v42, 16  ;;  %v13917_v59 = vld [vmem:[%s17851_s2 + $0xd8] sm:$0xff]   ;;  %v4169_v61 = vshll.u32 %v12405_v42, 16  ;;  %v17912_v42 = vcombine.low %v15767_v7, %v15771_v35  ;;  %v13948_v7 = vld [vmem:[%s17851_s2 + $0x28] sm:$0xff]  }
 0x24a   : > { %13268 = vmatprep.subr.bf16.mxu1 %v13942_v24  ;;  %v12406_v21 = vpack.c.bf16 %v4057_v32, %v4057_v32  ;;  %v4149_v36 = vshrl.u32 %v12403_v54, 16  ;;  %v4152_v27 = vshll.u32 %v12403_v54, 16  ;;  %v16101_v54 = vrot.slane %v5579_v50, 4 }
 0x24b   : > { %13025 = vmatpush3.bf16.msra.mxu0 %v13915_v28  ;;  %v12404_v28 = vpack.c.bf16 %v4055_v40, %v4055_v40  ;;  %v4168_v17 = vrot.slane %v4166_v33, 7  ;;  %v16099_v40 = vld [vmem:[#allocation2 + $0x38] sm:$0x1] }
 0x24c   : > { %13026 = vmatprep.subr.bf16.mxu0 %v13916_v13  ;;  %v4174_v39 = vshrl.u32 %v12406_v21, 16  ;;  %v4177_v4 = vshll.u32 %v12406_v21, 16 }
 0x24d   : > { %13269 = vmatpush3.bf16.msra.mxu1 %v13942_v24  ;;  %v4151_v24 = vrot.slane %v4149_v36, 7  ;;  %v4157_v55 = vshrl.u32 %v12404_v28, 16  ;;  %v4171_v30 = vor.u32 %v4169_v61, %v4168_v17  ;;  %v4160_v36 = vshll.u32 %v12404_v28, 16  ;;  %v8302_v28 = vld [vmem:[#allocation2 + $0x6c] sm:$0xe] }
 0x24e   : > { %13011 = vmatmul.mubr.bf16.gmra.mrb[20].mxu0 %v17911_v20  ;;  %13270 = vmatprep.subr.bf16.mxu1 %v13944_v48  ;;  %v4176_v32 = vrot.slane %v4174_v39, 7  ;;  %v4172_v35 = vrot.slane %v4168_v17, 4  ;;  %v13919_v39 = vld [vmem:[%s17851_s2 + $0xe8] sm:$0xff]  }
 0x24f   : > { %13014 = vmatprep.mubr.bf16.mxu0 %v17912_v42  ;;  %13027 = vmatpush3.bf16.msra.mxu0 %v13916_v13  ;;  %v4154_v33 = vor.u32 %v4152_v27, %v4151_v24  ;;  %v4159_v20 = vrot.slane %v4157_v55, 7  ;;  %v4297_v13 = vsel %vm15375_vm8, %v4171_v30, %v4296_v38  ;;  %v4155_v50 = vrot.slane %v4151_v24, 4 }
 0x250   : > { %13028 = vmatprep.subr.bf16.mxu0 %v13917_v59  ;;  %v4179_v21 = vor.u32 %v4177_v4, %v4176_v32  ;;  %v4181_v61 = vrot.slane %v4176_v32, 4  ;;  %4298 = vst [vmem:[#allocation2 + $0x90] sm:$0xf] %v4297_v13  ;;  %v16119_v42 = vrot.slane %v5582_v8, 5  ;;  %v5592_v30 = vshrl.u32 %v16080_v1, 16  ;;  %v13920_v1 = vld [vmem:[%s17851_s2 + $0xf0] sm:$0xff]  }
 0x251   : > { %13271 = vmatpush3.bf16.msra.mxu1 %v13944_v48  ;;  %v4290_v48 = vsel %vm15375_vm8, %v4154_v33, %v4289_v45  ;;  %v4162_v27 = vor.u32 %v4160_v36, %v4159_v20  ;;  %v4164_v55 = vrot.slane %v4159_v20, 4  ;;  %v8334_v32 = vrot.slane %v15987_v63, 5  ;;  %v8303_v4 = vld [vmem:[#allocation2 + $0x78] sm:$0xe] }
 0x252   : > { %13272 = vmatprep.subr.bf16.mxu1 %v13946_v19  ;;  %4291 = vst [vmem:[#allocation2 + $0x84] sm:$0xf] %v4290_v48  ;;  %v4180_v38 = vsel %vm15385_vm9, %v4172_v35, %v4179_v21  ;;  %v4301_v17 = vsel %vm15187_vm6, %v4181_v61, %v4300_v43  ;;  %v17913_v8 = vcombine.low %v15821_v2, %v15825_v49  ;;  %v16134_v43 = vld [vmem:[#allocation2 + $0x40] sm:$0xf]  ;;  %v12061_v33 = vrot.slane %v8302_v28, 9 }
 0x253   : > { %13029 = vmatpush3.bf16.msra.mxu0 %v13917_v59  ;;  %4299 = vst [vmem:[#allocation2 + $0x94] sm:$0xf] %v4180_v38  ;;  %4302 = vst [vmem:[#allocation2 + $0x98] sm:$0x1] %v4301_v17  ;;  %v4163_v45 = vsel %vm15385_vm9, %v4155_v50, %v4162_v27  ;;  %v4294_v59 = vsel %vm15187_vm6, %v4164_v55, %v4293_v56  ;;  %v5603_v56 = vshrl.u32 %v16103_v34, 16  ;;  %v8341_v20 = vrot.slane %v15982_v12, 5 }
 0x254   : > { %13030 = vmatprep.subr.bf16.mxu0 %v13918_v58  ;;  %4292 = vst [vmem:[#allocation2 + $0x88] sm:$0xf] %v4163_v45  ;;  %4295 = vst [vmem:[#allocation2 + $0x8c] sm:$0x1] %v4294_v59  ;;  %v17914_v2 = vcombine.low %v15837_v44, %v15841_v23  ;;  %v8336_v49 = vrot.slane %v8334_v32, 4  ;;  %v8337_v36 = vrot.slane %v15989_v18, 5  ;;  %v16153_v44 = vsel %vm14134_vm2, %v12061_v33, %v8334_v32 }
 0x255   : > { %13273 = vmatpush3.bf16.msra.mxu1 %v13946_v19  ;;  %v13950_v19 = vld [vmem:[%s17851_s2 + $0x30] sm:$0xff]   ;;  %v16145_v35 = vrot.slane %v5588_v11, 5  ;;  %v12062_v13 = vrot.slane %v8303_v4, 9  ;;  %v8343_v21 = vrot.slane %v8341_v20, 4  ;;  %v8344_v61 = vrot.slane %v15994_v9, 5  ;;  %17915 = vst [vmem:[#allocation9_spill] sm:$0xff] %v16153_v44 }
 0x256   : > { %13015 = vmatmul.mubr.bf16.gmra.mrb[24].mxu0 %v17913_v8  ;;  %13274 = vmatprep.subr.bf16.mxu1 %v13948_v7  ;;  %v16148_v50 = vrot.slane %v5592_v30, 4  ;;  %v16157_v23 = vsel %vm14134_vm2, %v8336_v49, %v8337_v36  ;;  %v13953_v9 = vld [vmem:[%s17851_s2 + $0x38] sm:$0xff]   ;;  %v13921_v27 = vld [vmem:[#allocation2 + $0xc] sm:$0xff]   ;;  %v5616_v45 = vshrl.u32 %v16134_v43, 16 }
 0x257   : > { %13018 = vmatprep.mubr.bf16.mxu0 %v17914_v2  ;;  %13031 = vmatpush3.bf16.msra.mxu0 %v13918_v58  ;;  %17916 = vst [vmem:[#allocation10_spill] sm:$0xff] %v16157_v23  ;;  %v16159_v18 = vld [vmem:[#allocation2 + $0x90] sm:$0xf]  ;;  %v16161_v58 = vrot.slane %v5603_v56, 4  ;;  %v16174_v48 = vsel %vm14134_vm2, %v8343_v21, %v8344_v61  ;;  %v13922_v38 = vld [vmem:[%s17851_s2 + $0xf8] sm:$0xff]   ;;  %v13934_v44 = vld [vmem:[%s17851_s2 + $0x128] sm:$0xff]  }
 0x258   : > { %13032 = vmatprep.subr.bf16.mxu0 %v13919_v39  ;;  %17917 = vst [vmem:[#allocation11_spill] sm:$0xff] %v16159_v18  ;;  %17919 = vst [vmem:[#allocation13_spill] sm:$0xff] %v16174_v48  ;;  %v7820_v17 = vshrl.u32 %v16159_v18, 16  ;;  %v7823_v30 = vshll.u32 %v16159_v18, 16  ;;  %v4314_v18 = vld [vmem:[#allocation2 + $0xb0] sm:$0x1] }
 0x259   : > { %13275 = vmatpush3.bf16.msra.mxu1 %v13948_v7  ;;  %v16170_v7 = vsel %vm14134_vm2, %v12062_v13, %v8341_v20  ;;  %v16176_v55 = vld [vmem:[#allocation2 + $0x84] sm:$0xf]  ;;  %v17923_v13 = vcombine.low %v15877_v6, %v15881_v37 }
 0x25a   : > { %13276 = vmatprep.subr.bf16.mxu1 %v13950_v19  ;;  %17918 = vst [vmem:[#allocation12_spill] sm:$0xff] %v16170_v7  ;;  %17920 = vst [vmem:[#allocation14_spill] sm:$0xff] %v16176_v55  ;;  %v7796_v32 = vshrl.u32 %v16176_v55, 16  ;;  %v16188_v4 = vld [vmem:[#allocation2 + $0x94] sm:$0xf]  ;;  %v7822_v20 = vrot.slane %v7820_v17, 4 }
 0x25b   : > { %13033 = vmatpush3.bf16.msra.mxu0 %v13919_v39  ;;  %v7799_v39 = vshll.u32 %v16176_v55, 16  ;;  %17921 = vst [vmem:[#allocation15_spill] sm:$0xff] %v16188_v4  ;;  %v16190_v8 = vld [vmem:[#allocation2 + $0x98] sm:$0x1]  ;;  %v16192_v56 = vld [vmem:[#allocation2 + $0x88] sm:$0xf] }
 0x25c   : > { %13034 = vmatprep.subr.bf16.mxu0 %v13920_v1  ;;  %17922 = vst [vmem:[#allocation16_spill] sm:$0xff] %v16192_v56  ;;  %v16194_v33 = vld [vmem:[#allocation2 + $0x8c] sm:$0x1]  ;;  %v7825_v2 = vrot.slane %v7823_v30, 5  ;;  %v7798_v21 = vrot.slane %v7796_v32, 4  ;;  %v7805_v59 = vshll.u32 %v16192_v56, 16 }
 0x25d   : > { %13277 = vmatpush3.bf16.msra.mxu1 %v13950_v19  ;;  %v7801_v61 = vrot.slane %v7799_v39, 5  ;;  %v7809_v11 = vshrl.u32 %v16192_v56, 16  ;;  %v13955_v17 = vld [vmem:[%s17851_s2 + $0x80] sm:$0xff]   ;;  %v7815_v19 = vshll.u32 %v16194_v33, 16  ;;  %v7829_v36 = vshll.u32 %v16188_v4, 16 }
 0x25e   : > { %13019 = vmatmul.mubr.bf16.gmra.mrb[28].mxu0 %v17923_v13  ;;  %13278 = vmatprep.subr.bf16.mxu1 %v13953_v9  ;;  %v7826_v30 = vor.u32 %v7825_v2, %v7822_v20  ;;  %v7833_v6 = vshrl.u32 %v16188_v4, 16  ;;  %v7807_v32 = vrot.slane %v7805_v59, 5  ;;  %v7839_v13 = vshll.u32 %v16190_v8, 16  ;;  %v8304_v20 = vld [vmem:[#allocation2 + $0x84] sm:$0xe] }
 0x25f   : > { %13035 = vmatpush3.bf16.msra.mxu0 %v13920_v1  ;;  %13038 = vmatprep.mubr.bf16.mxu0 %v13921_v27  ;;  %v7802_v37 = vor.u32 %v7801_v61, %v7798_v21  ;;  %v7811_v39 = vrot.slane %v7809_v11, 4  ;;  %v7831_v1 = vrot.slane %v7829_v36, 5  ;;  %v7817_v28 = vrot.slane %v7815_v19, 5  ;;  %v8305_v59 = vld [vmem:[#allocation2 + $0x90] sm:$0xe] }
 0x260   : > { %13036 = vmatprep.subr.bf16.mxu0 %v13922_v38  ;;  %v7827_v24 = vrot.slane %v7826_v30, 4  ;;  %v7835_v27 = vrot.slane %v7833_v6, 4  ;;  %v7841_v61 = vrot.slane %v7839_v13, 5  ;;  %v5595_v30 = vor.u32 %v16148_v50, %v16145_v35  ;;  %v13925_v13 = vld [vmem:[#allocation2 + $0x24] sm:$0xff]   ;;  %v4303_v7 = vld [vmem:[#allocation2 + $0x9c] sm:$0xf] }
 0x261   : > { %13279 = vmatpush3.bf16.msra.mxu1 %v13953_v9  ;;  %v7803_v2 = vrot.slane %v7802_v37, 4  ;;  %v7812_v49 = vor.u32 %v7811_v39, %v7807_v32  ;;  %v8348_v36 = vrot.slane %v16192_v56, 5  ;;  %v13926_v37 = vld [vmem:[%s17851_s2 + $0x108] sm:$0xff]   ;;  %v12063_v39 = vrot.slane %v8304_v20, 9 }
 0x262   : > { %13296 = vmatprep.subr.bf16.mxu1 %v13955_v17  ;;  %v7836_v21 = vor.u32 %v7835_v27, %v7831_v1  ;;  %v7832_v19 = vsel %vm14180_vm5, %v7827_v24, %v7831_v1  ;;  %v13923_v17 = vld [vmem:[#allocation2 + $0x18] sm:$0xff]   ;;  %v8351_v50 = vrot.slane %v16194_v33, 5  ;;  %v8355_v11 = vrot.slane %v16188_v4, 5  ;;  %v13928_v33 = vld [vmem:[%s17851_s2 + $0x110] sm:$0xff]  }
 0x263   : > { %13037 = vmatpush3.bf16.msra.mxu0 %v13922_v38  ;;  %v7808_v9 = vsel %vm14180_vm5, %v7803_v2, %v7807_v32  ;;  %v7813_v6 = vrot.slane %v7812_v49, 4  ;;  %v8350_v27 = vrot.slane %v8348_v36, 4  ;;  %v5497_v32 = vld [vmem:[#allocation2 + $0x48] sm:$0xf]  ;;  %v16234_v24 = vsel %vm14134_vm2, %v12063_v39, %v8348_v36 }
 0x264   : > { %13054 = vmatprep.subr.bf16.mxu0 %v13924_v15  ;;  %v7837_v38 = vrot.slane %v7836_v21, 4  ;;  %17924 = vst [vmem:[#allocation17_spill] sm:$0xff] %v16234_v24  ;;  %v12064_v1 = vrot.slane %v8305_v59, 9  ;;  %v8358_v2 = vrot.slane %v16190_v8, 5  ;;  %v8357_v59 = vrot.slane %v8355_v11, 4 }
 0x265   : > { %v7818_v49 = vsel %vm14180_vm5, %v7813_v6, %v7817_v28  ;;  %v16242_v28 = vld [vmem:[#allocation2 + $0x44] sm:$0x1]  ;;  %v16244_v6 = vld [vmem:[#allocation2 + $0x4c] sm:$0xf]  ;;  %v16248_v36 = vsel %vm14134_vm2, %v8350_v27, %v8351_v50  ;;  %v5630_v39 = vshll.u32 %v5497_v32, 16  ;;  %v17929_v50 = vshll.u32 %v16103_v34, 16 }
 0x266   : > { %13039 = vmatmul.mubr.bf16.vlgmr.msra.gmra.mrb[16].mxu0 %v13923_v17  ;;  %v12031_v20 = vcombine.low %v7808_v9, %v7818_v49  ;;  %v7842_v21 = vsel %vm14180_vm5, %v7837_v38, %v7841_v61  ;;  %17925 = vst [vmem:[#allocation18_spill] sm:$0xff] %v16244_v6  ;;  %17926 = vst [vmem:[#allocation19_spill] sm:$0xff] %v16248_v36  ;;  %v5627_v17 = vshrl.u32 %v5497_v32, 16  ;;  %v5636_v32 = vshll.u32 %v16244_v6, 16 }
 0x267   : > { %13042 = vmatprep.mubr.bf16.mxu0 %v13925_v13  ;;  %13055 = vmatpush3.bf16.msra.mxu0 %v13924_v15  ;;  %v12032_v8 = vcombine.low %v7832_v19, %v7842_v21  ;;  %v16262_v19 = vsel %vm14134_vm2, %v12064_v1, %v8355_v11  ;;  %v16266_v38 = vsel %vm14134_vm2, %v8357_v59, %v8358_v2  ;;  %v13927_v13 = vld [vmem:[#allocation2 + $0x30] sm:$0xff]   ;;  %v16274_v49 = vrot.slane %v17929_v50, 5  ;;  %v16291_v50 = vld [vmem:[#allocation2 + $0x58] sm:$0xf] }
 0x268   : > { %13056 = vmatprep.subr.bf16.mxu0 %v13926_v37  ;;  %13253 = vmatmul.mubr.bf16.gmra.mrb[36].mxu1 %v12031_v20  ;;  %17927 = vst [vmem:[#allocation20_spill] sm:$0xff] %v16262_v19  ;;  %17928 = vst [vmem:[#allocation21_spill] sm:$0xff] %v16266_v38  ;;  %v5500_v20 = vld [vmem:[#allocation2 + $0x54] sm:$0xf]  ;;  %v12920_v1 = vpop.f32.mrb[8].mxu1  ;;  %v17930_v21 = vor.u32 %v16119_v42, %v16101_v54  ;;  %v16288_v34 = vrot.slane %v5595_v30, 4 }
 0x269   : > { %13256 = vmatprep.mubr.bf16.mxu1 %v12032_v8  ;;  %17931 = vst [vmem:[#allocation22_spill] sm:$0xff] %v16291_v50  ;;  %v4060_v9 = vmax.f32 %v12920_v1, 0.0  ;;  %v4019_v11 = vpop.f32.mrb[9].mxu1  ;;  %v17932_v27 = vshll.u32 %v16134_v43, 16  ;;  %v16302_v54 = vrot.slane %v5616_v45, 4  ;;  %v5640_v42 = vshrl.u32 %v16244_v6, 16 }
 0x26a   : > { %v16286_v59 = vrot.slane %v17930_v21, 4  ;;  %v4058_v30 = vmax.f32 %v4019_v11, 0.0  ;;  %v12921_v21 = vpop.f32.mrb[10].mxu1  ;;  %v13929_v8 = vld [vmem:[#allocation2 + $0x3c] sm:$0xff]   ;;  %v16305_v1 = vrot.slane %v5627_v17, 4  ;;  %v16307_v15 = vrot.slane %v5630_v39, 5 }
 0x26b   : > { %13057 = vmatpush3.bf16.msra.mxu0 %v13926_v37  ;;  %v13930_v37 = vld [vmem:[%s17851_s2 + $0x118] sm:$0xff]   ;;  %v16298_v2 = vrot.slane %v17932_v27, 5  ;;  %v5651_v61 = vshrl.u32 %v5500_v20, 16  ;;  %v12409_v51 = vpack.c.bf16 %v4060_v9, %v4060_v9  ;;  %v4061_v38 = vmax.f32 %v12921_v21, 0.0  ;;  %v4022_v19 = vpop.f32.mrb[11].mxu1  ;;  %v13932_v27 = vld [vmem:[%s17851_s2 + $0x120] sm:$0xff]  }
 0x26c   : > { %13058 = vmatprep.subr.bf16.mxu0 %v13928_v33  ;;  %v16312_v45 = vrot.slane %v5636_v32, 5  ;;  %v5654_v36 = vshll.u32 %v5500_v20, 16  ;;  %v12407_v24 = vpack.c.bf16 %v4058_v30, %v4058_v30  ;;  %v4059_v11 = vmax.f32 %v4022_v19, 0.0  ;;  %v4310_v19 = vld [vmem:[#allocation2 + $0xa8] sm:$0xf] }
 0x26d   : > { %v5660_v9 = vshll.u32 %v16291_v50, 16  ;;  %v4200_v39 = vshrl.u32 %v12409_v51, 16  ;;  %v16323_v20 = vrot.slane %v5640_v42, 4  ;;  %v16325_v30 = vrot.slane %v5651_v61, 4  ;;  %v16333_v61 = vld [vmem:[#allocation2 + $0x50] sm:$0x1] }
 0x26e   : > { %13043 = vmatmul.mubr.bf16.gmra.mrb[20].mxu0 %v13927_v13  ;;  %v12410_v13 = vpack.c.bf16 %v4061_v38, %v4061_v38  ;;  %v5664_v21 = vshrl.u32 %v16291_v50, 16  ;;  %v4203_v48 = vshll.u32 %v12409_v51, 16  ;;  %v13931_v38 = vld [vmem:[#allocation2 + $0x48] sm:$0xff]   ;;  %v16331_v4 = vrot.slane %v5654_v36, 5 }
 0x26f   : > { %13046 = vmatprep.mubr.bf16.mxu0 %v13929_v8  ;;  %13059 = vmatpush3.bf16.msra.mxu0 %v13928_v33  ;;  %v4183_v8 = vshrl.u32 %v12407_v24, 16  ;;  %v12408_v33 = vpack.c.bf16 %v4059_v11, %v4059_v11  ;;  %v4202_v17 = vrot.slane %v4200_v39, 7  ;;  %v4186_v32 = vshll.u32 %v12407_v24, 16 }
 0x270   : > { %13060 = vmatprep.subr.bf16.mxu0 %v13930_v37  ;;  %v4208_v23 = vshrl.u32 %v12410_v13, 16  ;;  %v16335_v11 = vrot.slane %v5660_v9, 5  ;;  %v4211_v55 = vshll.u32 %v12410_v13, 16  ;;  %v5609_v12 = vor.u32 %v16274_v49, %v16161_v58  ;;  %v4307_v9 = vld [vmem:[#allocation2 + $0xa4] sm:$0x1] }
 0x271   : > { %v4185_v42 = vrot.slane %v4183_v8, 7  ;;  %v4191_v56 = vshrl.u32 %v12408_v33, 16  ;;  %v4205_v39 = vor.u32 %v4203_v48, %v4202_v17  ;;  %v4194_v36 = vshll.u32 %v12408_v33, 16 }
 0x272   : > { %v4210_v51 = vrot.slane %v4208_v23, 7  ;;  %v5666_v8 = vrot.slane %v5664_v21, 4  ;;  %v4206_v24 = vrot.slane %v4202_v17, 4  ;;  %v13936_v17 = vld [vmem:[%s17851_s2 + $0x130] sm:$0xff]  }
 0x273   : > { %13061 = vmatpush3.bf16.msra.mxu0 %v13930_v37  ;;  %v4188_v3 = vor.u32 %v4186_v32, %v4185_v42  ;;  %v4193_v63 = vrot.slane %v4191_v56, 7  ;;  %v4311_v37 = vsel %vm15375_vm8, %v4205_v39, %v4310_v19  ;;  %v4189_v23 = vrot.slane %v4185_v42, 4  ;;  %v16343_v56 = vld [vmem:[#allocation2 + $0x5c] sm:$0x1] }
 0x274   : > { %13062 = vmatprep.subr.bf16.mxu0 %v13932_v27  ;;  %v4213_v50 = vor.u32 %v4211_v55, %v4210_v51  ;;  %v4215_v6 = vrot.slane %v4210_v51, 4  ;;  %4312 = vst [vmem:[#allocation2 + $0xa8] sm:$0xf] %v4311_v37  ;;  %v5667_v32 = vor.u32 %v5666_v8, %v16335_v11  ;;  %v5670_v19 = vshll.u32 %v16343_v56, 16 }
 0x275   : > { %v4304_v48 = vsel %vm15375_vm8, %v4188_v3, %v4303_v7  ;;  %v4196_v13 = vor.u32 %v4194_v36, %v4193_v63  ;;  %v4198_v58 = vrot.slane %v4193_v63, 4  ;;  %v5619_v3 = vor.u32 %v16302_v54, %v16298_v2 }
 0x276   : > { %13047 = vmatmul.mubr.bf16.gmra.mrb[24].mxu0 %v13931_v38  ;;  %4305 = vst [vmem:[#allocation2 + $0x9c] sm:$0xf] %v4304_v48  ;;  %v4214_v49 = vsel %vm15385_vm9, %v4206_v24, %v4213_v50  ;;  %v4315_v55 = vsel %vm15187_vm6, %v4215_v6, %v4314_v18  ;;  %v5633_v18 = vor.u32 %v16307_v15, %v16305_v1  ;;  %v17933_v50 = vshll.u32 %v16099_v40, 16 }
 0x277   : > { %13050 = vmatprep.mubr.bf16.mxu0 %v13933_v62  ;;  %13063 = vmatpush3.bf16.msra.mxu0 %v13932_v27  ;;  %v5646_v62 = vshll.u32 %v16333_v61, 16  ;;  %4313 = vst [vmem:[#allocation2 + $0xac] sm:$0xf] %v4214_v49  ;;  %4316 = vst [vmem:[#allocation2 + $0xb0] sm:$0x1] %v4315_v55  ;;  %v4197_v63 = vsel %vm15385_vm9, %v4189_v23, %v4196_v13  ;;  %v4308_v7 = vsel %vm15187_vm6, %v4198_v58, %v4307_v9 }
 0x278   : > { %13064 = vmatprep.subr.bf16.mxu0 %v13934_v44  ;;  %v5643_v6 = vor.u32 %v16323_v20, %v16312_v45  ;;  %4306 = vst [vmem:[#allocation2 + $0xa0] sm:$0xf] %v4197_v63  ;;  %4309 = vst [vmem:[#allocation2 + $0xa4] sm:$0x1] %v4308_v7  ;;  %v5600_v54 = vrot.slane %v17933_v50, 5  ;;  %v5657_v27 = vor.u32 %v16331_v4, %v16325_v30  ;;  %v5620_v33 = vrot.slane %v5619_v3, 4 }
 0x279   : > { %v17934_v15 = vsel %vm14180_vm5, %v16062_v22, %v16051_v16  ;;  %v17935_v1 = vsel %vm14180_vm5, %v16057_v60, %v15959_v52  ;;  %v17936_v4 = vsel %vm14180_vm5, %v16069_v47, %v16071_v14  ;;  %v17938_v16 = vsel %vm14180_vm5, %v16078_v5, %v16090_v46  ;;  %v16403_v22 = vld [vmem:[#allocation2 + $0x60] sm:$0xf]  ;;  %v16421_v46 = vld [vmem:[#allocation2 + $0x64] sm:$0xf] }
 0x27a   : > { %v11796_v40 = vcombine.low %v17935_v1, %v17934_v15  ;;  %v17939_v52 = vsel %vm14180_vm5, %v16076_v31, %v16036_v41  ;;  %v13935_v47 = vld [vmem:[#allocation2 + $0x60] sm:$0xff]   ;;  %v5601_v14 = vsel %vm14180_vm5, %v16288_v34, %v5600_v54  ;;  %v16415_v41 = vrot.slane %v5609_v12, 4 }
 0x27b   : > { %13065 = vmatpush3.bf16.msra.mxu0 %v13934_v44  ;;  %v17937_v44 = vsel %vm14180_vm5, %v16064_v25, %v16031_v57  ;;  %v16401_v60 = vcombine.low %v17939_v52, %v17938_v16  ;;  %v13937_v57 = vld [vmem:[%s17851_s2 + $0x138] sm:$0xff]   ;;  %v5591_v25 = vsel %vm14180_vm5, %v16286_v59, %v16145_v35  ;;  %v17940_v31 = vshll.u32 %v16242_v28, 16  ;;  %v16429_v35 = vld [vmem:[#allocation2 + $0xa8] sm:$0xf]  ;;  %v13939_v12 = vld [vmem:[%s17851_s2 + $0x140] sm:$0xff]  }
 0x27c   : > { %v16389_v20 = vcombine.low %v17937_v44, %v17936_v4  ;;  %13066 = vmatprep.subr.bf16.mxu0 %v13936_v17  ;;  %v16423_v30 = vrot.slane %v5633_v18, 4  ;;  %v16425_v21 = vrot.slane %v5643_v6, 4  ;;  %v16427_v38 = vrot.slane %v5646_v62, 5  ;;  %v13941_v44 = vld [vmem:[%s17851_s2 + $0x148] sm:$0xff]  }
 0x27d   : > { %v16419_v5 = vrot.slane %v17940_v31, 5  ;;  %v16434_v59 = vrot.slane %v5657_v27, 4  ;;  %v16436_v34 = vrot.slane %v5667_v32, 4  ;;  %v16438_v42 = vrot.slane %v5670_v19, 5  ;;  %v16441_v51 = vld [vmem:[#allocation2 + $0x9c] sm:$0xf] }
 0x27e   : > { %13051 = vmatmul.mubr.bf16.gmra.mrb[28].mxu0 %v13935_v47  ;;  %v5675_v39 = vshrl.u32 %v16403_v22, 16  ;;  %v7868_v36 = vshrl.u32 %v16429_v35, 16  ;;  %v7871_v8 = vshll.u32 %v16429_v35, 16  ;;  %v5684_v24 = vshll.u32 %v16421_v46, 16  ;;  %v16449_v48 = vld [vmem:[#allocation2 + $0xac] sm:$0xf] }
 0x27f   : > { %13067 = vmatpush3.bf16.msra.mxu0 %v13936_v17  ;;  %13070 = vmatprep.mubr.bf16.mxu0 %v11796_v40  ;;  %v5688_v37 = vshrl.u32 %v16421_v46, 16  ;;  %v7844_v9 = vshrl.u32 %v16441_v51, 16  ;;  %v7847_v23 = vshll.u32 %v16441_v51, 16  ;;  %v16451_v13 = vld [vmem:[#allocation2 + $0xb0] sm:$0x1]  ;;  %v16453_v58 = vcombine.low %v5591_v25, %v5601_v14 }
 0x280   : > { %13068 = vmatprep.subr.bf16.mxu0 %v13937_v57  ;;  %v5615_v49 = vsel %vm14180_vm5, %v16415_v41, %v16298_v2  ;;  %v16459_v55 = vld [vmem:[#allocation2 + $0xa0] sm:$0xf]  ;;  %v7720_v17 = vld [vmem:[#allocation2 + $0xa4] sm:$0x1]  ;;  %v7870_v3 = vrot.slane %v7868_v36, 4  ;;  %v7873_v62 = vrot.slane %v7871_v8, 5  ;;  %v5625_v63 = vsel %vm14180_vm5, %v5620_v33, %v16419_v5 }
 0x281   : > { %v12050_v7 = vcombine.low %v16429_v35, %v16449_v48  ;;  %v7846_v18 = vrot.slane %v7844_v9, 4  ;;  %v7849_v6 = vrot.slane %v7847_v23, 5  ;;  %v7853_v50 = vshll.u32 %v16459_v55, 16  ;;  %v8306_v14 = vld [vmem:[#allocation2 + $0x9c] sm:$0xe] }
 0x282   : > { %v7857_v54 = vshrl.u32 %v16459_v55, 16  ;;  %v7863_v27 = vshll.u32 %v7720_v17, 16  ;;  %v7874_v2 = vor.u32 %v7873_v62, %v7870_v3  ;;  %v7877_v32 = vshll.u32 %v16449_v48, 16  ;;  %v8307_v33 = vld [vmem:[#allocation2 + $0xa8] sm:$0xe] }
 0x283   : > { %v7881_v19 = vshrl.u32 %v16449_v48, 16  ;;  %13069 = vmatpush3.bf16.msra.mxu0 %v13937_v57  ;;  %v7850_v15 = vor.u32 %v7849_v6, %v7846_v18  ;;  %v7855_v1 = vrot.slane %v7853_v50, 5  ;;  %v7887_v4 = vshll.u32 %v16451_v13, 16 }
 0x284   : > { %v7859_v40 = vrot.slane %v7857_v54, 4  ;;  %13086 = vmatprep.subr.bf16.mxu0 %v13939_v12  ;;  %v7879_v16 = vrot.slane %v7877_v32, 5  ;;  %v5678_v47 = vshll.u32 %v16403_v22, 16  ;;  %v16475_v25 = vrot.slane %v5684_v24, 5 }
 0x285   : > { %v7883_v52 = vrot.slane %v7881_v19, 4  ;;  %v7851_v41 = vrot.slane %v7850_v15, 4  ;;  %v7875_v57 = vrot.slane %v7874_v2, 4  ;;  %v12049_v5 = vcombine.low %v16441_v51, %v16459_v55  ;;  %v13945_v15 = vld [vmem:[%s17851_s2 + $0x158] sm:$0xff]   ;;  %v16765_v51 = vld [vmem:[#allocation2 + $0x2c] sm:$0x1] }
 0x286   : > { %v7860_v31 = vor.u32 %v7859_v40, %v7855_v1  ;;  %13071 = vmatmul.mubr.bf16.vlgmr.msra.gmra.mrb[16].mxu0 %v16389_v20  ;;  %v11800_v8 = vcombine.low %v5615_v49, %v5625_v63  ;;  %v16481_v9 = vrot.slane %v5688_v37, 4  ;;  %v8362_v24 = vrot.slane %v16459_v55, 5  ;;  %v13943_v20 = vld [vmem:[%s17851_s2 + $0x150] sm:$0xff]   ;;  %v6458_v55 = vld [vmem:[#allocation2 + $0x3c] sm:$0xf] }
 0x287   : > { %v7884_v36 = vor.u32 %v7883_v52, %v7879_v16  ;;  %13074 = vmatprep.mubr.bf16.mxu0 %v16401_v60  ;;  %13087 = vmatpush3.bf16.msra.mxu0 %v13939_v12  ;;  %v7865_v3 = vrot.slane %v7863_v27, 5  ;;  %v7889_v62 = vrot.slane %v7887_v4, 5  ;;  %v12065_v18 = vrot.slane %v8306_v14, 9 }
 0x288   : > { %v7861_v23 = vrot.slane %v7860_v31, 4  ;;  %13088 = vmatprep.subr.bf16.mxu0 %v13941_v44  ;;  %v8364_v50 = vrot.slane %v8362_v24, 4  ;;  %v8365_v54 = vrot.slane %v7720_v17, 5  ;;  %v8369_v60 = vrot.slane %v16449_v48, 5 }
 0x289   : > { %v7885_v6 = vrot.slane %v7884_v36, 4  ;;  %v7856_v12 = vsel %vm14180_vm5, %v7851_v41, %v7855_v1  ;;  %v7880_v49 = vsel %vm14180_vm5, %v7875_v57, %v7879_v16  ;;  %v12066_v63 = vrot.slane %v8307_v33, 9  ;;  %v16507_v1 = vld [vmem:[#allocation2 + $0x68] sm:$0x1]  ;;  %v13947_v36 = vld [vmem:[%s17851_s2 + $0x160] sm:$0xff]  }
 0x28a   : > { %v7866_v37 = vsel %vm14180_vm5, %v7861_v23, %v7865_v3  ;;  %v16498_v17 = vsel %vm14134_vm2, %v12065_v18, %v8362_v24  ;;  %v16502_v32 = vsel %vm14134_vm2, %v8364_v50, %v8365_v54  ;;  %v8371_v4 = vrot.slane %v8369_v60, 4 }
 0x28b   : > { %v12033_v27 = vcombine.low %v7856_v12, %v7866_v37  ;;  %v7890_v2 = vsel %vm14180_vm5, %v7885_v6, %v7889_v62  ;;  %13089 = vmatpush3.bf16.msra.mxu0 %v13941_v44  ;;  %v8372_v44 = vrot.slane %v16451_v13, 5  ;;  %v5639_v16 = vsel %vm14180_vm5, %v16423_v30, %v16312_v45 }
 0x28c   : > { %v12034_v19 = vcombine.low %v7880_v49, %v7890_v2  ;;  %13090 = vmatprep.subr.bf16.mxu0 %v13943_v20  ;;  %v5649_v52 = vsel %vm14180_vm5, %v16425_v21, %v16427_v38  ;;  %v5677_v14 = vrot.slane %v5675_v39, 4  ;;  %v5680_v41 = vrot.slane %v5678_v47, 5  ;;  %v12924_v31 = vpop.f32.mrb[12].mxu1  ;;  %v16536_v39 = vld [vmem:[#allocation2 + $0xc] sm:$0xe] }
 0x28d   : > { %13257 = vmatmul.mubr.bf16.gmra.mrb[40].mxu1 %v12033_v27  ;;  %v5673_v13 = vsel %vm14180_vm5, %v16436_v34, %v16438_v42  ;;  %v16529_v45 = vsel %vm14134_vm2, %v12066_v63, %v8369_v60  ;;  %v16533_v30 = vsel %vm14134_vm2, %v8371_v4, %v8372_v44  ;;  %v4064_v22 = vmax.f32 %v12924_v31, 0.0  ;;  %v4035_v21 = vpop.f32.mrb[13].mxu1  ;;  %v14070_v60 = vld [vmem:[#allocation2 + $0x14] sm:$0x1]  ;;  %v13949_v27 = vld [vmem:[%s17851_s2 + $0x168] sm:$0xff]  }
 0x28e   : > { %13260 = vmatprep.mubr.bf16.mxu1 %v12034_v19  ;;  %13075 = vmatmul.mubr.bf16.gmra.mrb[20].mxu0 %v16453_v58  ;;  %v5694_v38 = vshll.u32 %v16507_v1, 16  ;;  %v16538_v58 = vld [vmem:[#allocation2 + $0x10] sm:$0xf]  ;;  %v4062_v47 = vmax.f32 %v4035_v21, 0.0  ;;  %v12925_v57 = vpop.f32.mrb[14].mxu1  ;;  %v11801_v33 = vcombine.low %v5639_v16, %v5649_v52  ;;  %v5691_v24 = vor.u32 %v16481_v9, %v16475_v25 }
 0x28f   : > { %13078 = vmatprep.mubr.bf16.mxu0 %v11800_v8  ;;  %13091 = vmatpush3.bf16.msra.mxu0 %v13943_v20  ;;  %v5942_v34 = vrot.slane %v16538_v58, 5  ;;  %v5663_v8 = vsel %vm14180_vm5, %v16434_v59, %v16335_v11  ;;  %v12413_v23 = vpack.c.bf16 %v4064_v22, %v4064_v22  ;;  %v4065_v3 = vmax.f32 %v12925_v57, 0.0  ;;  %v4038_v62 = vpop.f32.mrb[15].mxu1  ;;  %v16558_v19 = vld [vmem:[#allocation2 + $0x1c] sm:$0xf] }
 0x290   : > { %13092 = vmatprep.subr.bf16.mxu0 %v13945_v15  ;;  %v11802_v20 = vcombine.low %v5663_v8, %v5673_v13  ;;  %v5681_v18 = vor.u32 %v5680_v41, %v5677_v14  ;;  %v12411_v6 = vpack.c.bf16 %v4062_v47, %v4062_v47  ;;  %v4063_v50 = vmax.f32 %v4038_v62, 0.0  ;;  %v4324_v14 = vld [vmem:[#allocation2 + $0xc0] sm:$0xf]  ;;  %v16561_v22 = vld [vmem:[#allocation2 + $0x28] sm:$0xf] }
 0x291   : > { %v11812_v54 = vrot.slane %v16536_v39, 9  ;;  %v5945_v12 = vrot.slane %v14070_v60, 5  ;;  %v4234_v37 = vshrl.u32 %v12413_v23, 16  ;;  %v12414_v49 = vpack.c.bf16 %v4065_v3, %v4065_v3  ;;  %v4317_v39 = vld [vmem:[#allocation2 + $0xb4] sm:$0xf] }
 0x292   : > { %v5696_v63 = vrot.slane %v5694_v38, 5  ;;  %v5944_v11 = vrot.slane %v5942_v34, 4  ;;  %v4217_v59 = vshrl.u32 %v12411_v6, 16  ;;  %v12412_v9 = vpack.c.bf16 %v4063_v50, %v4063_v50  ;;  %v4321_v60 = vld [vmem:[#allocation2 + $0xbc] sm:$0x1] }
 0x293   : > { %13093 = vmatpush3.bf16.msra.mxu0 %v13945_v15  ;;  %v5692_v2 = vrot.slane %v5691_v24, 4  ;;  %v5949_v4 = vrot.slane %v16558_v19, 5  ;;  %v4236_v44 = vrot.slane %v4234_v37, 7  ;;  %v4237_v16 = vshll.u32 %v12413_v23, 16  ;;  %v4328_v23 = vld [vmem:[#allocation2 + $0xc8] sm:$0x1] }
 0x294   : > { %13094 = vmatprep.subr.bf16.mxu0 %v13947_v36  ;;  %v4242_v52 = vshrl.u32 %v12414_v49, 16  ;;  %v5682_v15 = vrot.slane %v5681_v18, 4  ;;  %v4219_v41 = vrot.slane %v4217_v59, 7  ;;  %v4220_v31 = vshll.u32 %v12411_v6, 16  ;;  %v13951_v18 = vld [vmem:[%s17851_s2 + $0x170] sm:$0xff]  }
 0x295   : > { %v4225_v13 = vshrl.u32 %v12412_v9, 16  ;;  %v5956_v21 = vrot.slane %v16561_v22, 5  ;;  %v4239_v38 = vor.u32 %v4237_v16, %v4236_v44  ;;  %v4245_v57 = vshll.u32 %v12414_v49, 16  ;;  %v14073_v58 = vld [vmem:[#allocation2 + $0x20] sm:$0x1] }
 0x296   : > { %13079 = vmatmul.mubr.bf16.gmra.mrb[24].mxu0 %v11801_v33  ;;  %v4244_v47 = vrot.slane %v4242_v52, 7  ;;  %v5946_v8 = vsel %vm14134_vm2, %v5944_v11, %v5945_v12  ;;  %v4222_v24 = vor.u32 %v4220_v31, %v4219_v41  ;;  %v4228_v62 = vshll.u32 %v12412_v9, 16  ;;  %v5909_v52 = vld [vmem:[#allocation2 + $0x18] sm:$0xe]  ;;  %v14075_v31 = vld [vmem:[#allocation2 + $0x34] sm:$0xf] }
 0x297   : > { %13082 = vmatprep.mubr.bf16.mxu0 %v11802_v20  ;;  %13095 = vmatpush3.bf16.msra.mxu0 %v13947_v36  ;;  %v4227_v3 = vrot.slane %v4225_v13, 7  ;;  %v5697_v33 = vsel %vm14180_vm5, %v5692_v2, %v5696_v63  ;;  %v4240_v6 = vrot.slane %v4236_v44, 4  ;;  %v4325_v20 = vsel %vm15375_vm8, %v4239_v38, %v4324_v14 }
 0x298   : > { %13096 = vmatprep.subr.bf16.mxu0 %v13949_v27  ;;  %v4247_v36 = vor.u32 %v4245_v57, %v4244_v47  ;;  %v4249_v50 = vrot.slane %v4244_v47, 4  ;;  %4326 = vst [vmem:[#allocation2 + $0xc0] sm:$0xf] %v4325_v20  ;;  %v4223_v12 = vrot.slane %v4219_v41, 4  ;;  %v4318_v37 = vsel %vm15375_vm8, %v4222_v24, %v4317_v39  ;;  %v13956_v39 = vld [vmem:[%s17851_s2 + $0x180] sm:$0xff]  }
 0x299   : > { %v4230_v49 = vor.u32 %v4228_v62, %v4227_v3  ;;  %v4232_v11 = vrot.slane %v4227_v3, 4  ;;  %4319 = vst [vmem:[#allocation2 + $0xb4] sm:$0xf] %v4318_v37  ;;  %v5687_v9 = vsel %vm14180_vm5, %v5682_v15, %v16475_v25  ;;  %v5943_v16 = vsel %vm14134_vm2, %v11812_v54, %v5942_v34  ;;  %v5910_v15 = vld [vmem:[#allocation2 + $0x24] sm:$0xe] }
 0x29a   : > { %v4248_v63 = vsel %vm15385_vm9, %v4240_v6, %v4247_v36  ;;  %v4329_v59 = vsel %vm15187_vm6, %v4249_v50, %v4328_v23  ;;  %v11803_v44 = vcombine.low %v5687_v9, %v5697_v33  ;;  %v11836_v25 = vcombine.low %v5943_v16, %v5946_v8  ;;  %v14074_v54 = vld [vmem:[#allocation2 + $0x2c] sm:$0x1]  ;;  %v5911_v57 = vld [vmem:[#allocation2 + $0x30] sm:$0xe]  ;;  %v5912_v23 = vld [vmem:[#allocation2 + $0x3c] sm:$0xe] }
 0x29b   : > { %13097 = vmatpush3.bf16.msra.mxu0 %v13949_v27  ;;  %4327 = vst [vmem:[#allocation2 + $0xc4] sm:$0xf] %v4248_v63  ;;  %4330 = vst [vmem:[#allocation2 + $0xc8] sm:$0x1] %v4329_v59  ;;  %v4231_v10 = vsel %vm15385_vm9, %v4223_v12, %v4230_v49  ;;  %v4322_v2 = vsel %vm15187_vm6, %v4232_v11, %v4321_v60  ;;  %v13954_v27 = vld [vmem:[%s17851_s2 + $0x178] sm:$0xff]   ;;  %v5951_v26 = vrot.slane %v5949_v4, 4 }
 0x29c   : > { %13098 = vmatprep.subr.bf16.mxu0 %v13951_v18  ;;  %4320 = vst [vmem:[#allocation2 + $0xb8] sm:$0xf] %v4231_v10  ;;  %4323 = vst [vmem:[#allocation2 + $0xbc] sm:$0x1] %v4322_v2  ;;  %v5958_v14 = vrot.slane %v5956_v21, 4  ;;  %v5952_v34 = vrot.slane %v14073_v58, 5 }
 0x29d   : > { %v5959_v41 = vrot.slane %v14074_v54, 5  ;;  %v5963_v13 = vrot.slane %v14075_v31, 5  ;;  %v11813_v38 = vrot.slane %v5909_v52, 9  ;;  %v11814_v47 = vrot.slane %v5910_v15, 9  ;;  %v14076_v63 = vld [vmem:[#allocation2 + $0x38] sm:$0x1]  ;;  %vm17998_vm9 = vmmov %vm17897_vm0 }
 0x29e   : > { %13083 = vmatmul.mubr.bf16.gmra.mrb[28].mxu0 %v11803_v44  ;;  %v5953_v8 = vsel %vm14134_vm2, %v5951_v26, %v5952_v34  ;;  %v5970_v6 = vrot.slane %v16134_v43, 5  ;;  %v11815_v19 = vrot.slane %v5911_v57, 9  ;;  %v5966_v59 = vrot.slane %v14076_v63, 5  ;;  %v13962_v52 = vld [vmem:[%s17851_s2 + $0x190] sm:$0xff]   ;;  %v17941_v31 = vld [vmem:[#allocation18_spill] sm:$0xff]  ;;  %v13968_v63 = vld [vmem:[%s17851_s2 + $0x1a0] sm:$0xff]  }
 0x29f   : > { %13099 = vmatpush3.bf16.msra.mxu0 %v13951_v18  ;;  %13102 = vmatprep.mubr.bf16.mxu0 %v11836_v25  ;;  %v5960_v24 = vsel %vm14134_vm2, %v5958_v14, %v5959_v41  ;;  %v5950_v62 = vsel %vm14134_vm2, %v11813_v38, %v5949_v4  ;;  %v5957_v33 = vsel %vm14134_vm2, %v11814_v47, %v5956_v21  ;;  %v13960_v18 = vld [vmem:[%s17851_s2 + $0x188] sm:$0xff]   ;;  %v5965_v50 = vrot.slane %v5963_v13, 4 }
 0x2a0   : > { %13100 = vmatprep.subr.bf16.mxu0 %v13954_v27  ;;  %v16604_v3 = vld [vmem:[#allocation2 + $0xb4] sm:$0xf]  ;;  %v11837_v22 = vcombine.low %v5950_v62, %v5953_v8  ;;  %v11838_v12 = vcombine.low %v5957_v33, %v5960_v24  ;;  %v11816_v9 = vrot.slane %v5912_v23, 9  ;;  %v5972_v10 = vrot.slane %v5970_v6, 4  ;;  %v17942_v47 = vld [vmem:[#allocation22_spill] sm:$0xff] }
 0x2a1   : > { %v7892_v20 = vshrl.u32 %v16604_v3, 16  ;;  %v7895_v36 = vshll.u32 %v16604_v3, 16  ;;  %v8308_v21 = vld [vmem:[#allocation2 + $0xb4] sm:$0xe]  ;;  %v5973_v26 = vrot.slane %v16242_v28, 5  ;;  %v5967_v41 = vsel %vm14134_vm2, %v5965_v50, %v5966_v59  ;;  %v13966_v50 = vld [vmem:[%s17851_s2 + $0x198] sm:$0xff]  }
 0x2a2   : > { %v12067_v15 = vrot.slane %v8308_v21, 9  ;;  %v5977_v38 = vrot.slane %v17941_v31, 5  ;;  %v5984_v57 = vrot.slane %v17942_v47, 5  ;;  %v5964_v62 = vsel %vm14134_vm2, %v11815_v19, %v5963_v13  ;;  %v14079_v31 = vld [vmem:[%s17851_s2 + $0x80] sm:$0xff]  }
 0x2a3   : > { %13101 = vmatpush3.bf16.msra.mxu0 %v13954_v27  ;;  %v16620_v60 = vld [vmem:[#allocation2 + $0xb8] sm:$0xf]  ;;  %v7722_v4 = vld [vmem:[#allocation2 + $0xbc] sm:$0x1]  ;;  %v7894_v37 = vrot.slane %v7892_v20, 4  ;;  %v7897_v49 = vrot.slane %v7895_v36, 5  ;;  %v11839_v20 = vcombine.low %v5964_v62, %v5967_v41  ;;  %v5971_v36 = vsel %vm14134_vm2, %v11816_v9, %v5970_v6 }
 0x2a4   : > { %13118 = vmatprep.subr.bf16.mxu0 %v13956_v39  ;;  %v7901_v11 = vshll.u32 %v16620_v60, 16  ;;  %v7905_v43 = vshrl.u32 %v16620_v60, 16  ;;  %v8376_v2 = vrot.slane %v16620_v60, 5  ;;  %v7911_v25 = vshll.u32 %v7722_v4, 16  ;;  %v13974_v41 = vld [vmem:[%s17851_s2 + $0x1b0] sm:$0xff]  }
 0x2a5   : > { %v7898_v44 = vor.u32 %v7897_v49, %v7894_v37  ;;  %v8379_v58 = vrot.slane %v7722_v4, 5  ;;  %v5979_v13 = vrot.slane %v5977_v38, 4  ;;  %v5986_v21 = vrot.slane %v5984_v57, 4  ;;  %v14077_v37 = vld [vmem:[#allocation2 + $0x60] sm:$0xf] }
 0x2a6   : > { %13103 = vmatmul.mubr.bf16.vlgmr.msra.gmra.mrb[16].mxu0 %v11837_v22  ;;  %v7903_v16 = vrot.slane %v7901_v11, 5  ;;  %v7907_v27 = vrot.slane %v7905_v43, 4  ;;  %v8378_v14 = vrot.slane %v8376_v2, 4  ;;  %v16637_v8 = vsel %vm14134_vm2, %v12067_v15, %v8376_v2  ;;  %v16656_v49 = vld [vmem:[#allocation2 + $0x64] sm:$0xf] }
 0x2a7   : > { %13106 = vmatprep.mubr.bf16.mxu0 %v11838_v12  ;;  %13119 = vmatpush3.bf16.msra.mxu0 %v13956_v39  ;;  %v7899_v34 = vrot.slane %v7898_v44, 4  ;;  %v5974_v39 = vsel %vm14134_vm2, %v5972_v10, %v5973_v26  ;;  %v7913_v23 = vrot.slane %v7911_v25, 5  ;;  %v5913_v12 = vld [vmem:[#allocation2 + $0x48] sm:$0xe]  ;;  %v12044_v6 = vcombine.low %v14077_v37, %v16656_v49  ;;  %v5914_v43 = vld [vmem:[#allocation2 + $0x54] sm:$0xe] }
 0x2a8   : > { %13120 = vmatprep.subr.bf16.mxu0 %v13960_v18  ;;  %v7908_v54 = vor.u32 %v7907_v27, %v7903_v16  ;;  %v16641_v28 = vsel %vm14134_vm2, %v8378_v14, %v8379_v58  ;;  %v11840_v22 = vcombine.low %v5971_v36, %v5974_v39  ;;  %v5980_v11 = vrot.slane %v16333_v61, 5  ;;  %v13972_v25 = vld [vmem:[%s17851_s2 + $0x1a8] sm:$0xff]   ;;  %v5915_v15 = vld [vmem:[#allocation2 + $0x60] sm:$0xe]  ;;  %v17947_v39 = vld [vmem:[#allocation7_spill] sm:$0xff] }
 0x2a9   : > { %v7904_v4 = vsel %vm14180_vm5, %v7899_v34, %v7903_v16  ;;  %v5987_v59 = vrot.slane %v16343_v56, 5  ;;  %v11817_v9 = vrot.slane %v5913_v12, 9  ;;  %v5991_v2 = vrot.slane %v16421_v46, 5  ;;  %v13959_v46 = vld [vmem:[%s17851_s2 + $0x88] sm:$0xff]   ;;  %v17944_v34 = vld [vmem:[#allocation8_spill] sm:$0xff] }
 0x2aa   : > { %v7909_v24 = vrot.slane %v7908_v54, 4  ;;  %v5981_v10 = vsel %vm14134_vm2, %v5979_v13, %v5980_v11  ;;  %v11818_v44 = vrot.slane %v5914_v43, 9  ;;  %v5994_v14 = vrot.slane %v16507_v1, 5  ;;  %v17943_v58 = vld [vmem:[#allocation6_spill] sm:$0xff]  ;;  %v13978_v36 = vld [vmem:[%s17851_s2 + $0x1b8] sm:$0xff]   ;;  %v13981_v43 = vld [vmem:[%s17851_s2 + $0x1c0] sm:$0xff]  }
 0x2ab   : > { %13121 = vmatpush3.bf16.msra.mxu0 %v13960_v18  ;;  %v5988_v61 = vsel %vm14134_vm2, %v5986_v21, %v5987_v59  ;;  %v5978_v16 = vsel %vm14134_vm2, %v11817_v9, %v5977_v38  ;;  %v5993_v26 = vrot.slane %v5991_v2, 4  ;;  %v17945_v54 = vcombine.low %v17943_v58, %v17944_v34  ;;  %v17946_v38 = vld [vmem:[#allocation5_spill] sm:$0xff]  ;;  %v16710_v21 = vld [vmem:[#allocation2 + $0x28] sm:$0xf]  ;;  %v17952_v9 = vld [vmem:[#allocation11_spill] sm:$0xff] }
 0x2ac   : > { %13122 = vmatprep.subr.bf16.mxu0 %v13962_v52  ;;  %v7914_v18 = vsel %vm14180_vm5, %v7909_v24, %v7913_v23  ;;  %v11841_v27 = vcombine.low %v5978_v16, %v5981_v10  ;;  %v5985_v56 = vsel %vm14134_vm2, %v11818_v44, %v5984_v57  ;;  %v17948_v47 = vcombine.low %v17946_v38, %v17947_v39  ;;  %v13961_v24 = vld [vmem:[%s17851_s2 + $0x90] sm:$0xff]   ;;  %v16697_v23 = vld [vmem:[#allocation2 + $0x1c] sm:$0xf]  ;;  %v6452_v12 = vld [vmem:[#allocation2 + $0x24] sm:$0xf] }
 0x2ad   : > { %v12035_v19 = vcombine.low %v7904_v4, %v7914_v18  ;;  %v11819_v57 = vrot.slane %v5915_v15, 9  ;;  %v5995_v1 = vsel %vm14134_vm2, %v5993_v26, %v5994_v14  ;;  %v8327_v4 = vrot.slane %v16656_v49, 5  ;;  %v6449_v18 = vld [vmem:[#allocation2 + $0x18] sm:$0xf]  ;;  %v17949_v37 = vld [vmem:[#allocation14_spill] sm:$0xff]  ;;  %v17953_v10 = vld [vmem:[#allocation15_spill] sm:$0xff] }
 0x2ae   : > { %13107 = vmatmul.mubr.bf16.gmra.mrb[20].mxu0 %v11839_v20  ;;  %v6487_v13 = vshrl.u32 %v16697_v23, 16  ;;  %v6477_v59 = vshll.u32 %v6449_v18, 16  ;;  %v8301_v44 = vld [vmem:[#allocation2 + $0x60] sm:$0xe]  ;;  %v6507_v26 = vshll.u32 %v16710_v21, 16  ;;  %v13980_v34 = vld [vmem:[#allocation2 + $0x24] sm:$0xff]  }
 0x2af   : > { %13110 = vmatprep.mubr.bf16.mxu0 %v11840_v22  ;;  %13123 = vmatpush3.bf16.msra.mxu0 %v13962_v52  ;;  %v11842_v52 = vcombine.low %v5985_v56, %v5988_v61  ;;  %v5992_v62 = vsel %vm14134_vm2, %v11819_v57, %v5991_v2  ;;  %v6483_v22 = vshll.u32 %v16697_v23, 16  ;;  %v17954_v2 = vcombine.low %v17952_v9, %v17953_v10  ;;  %v13967_v56 = vld [vmem:[%s17851_s2 + $0xa0] sm:$0xff]   ;;  %v14080_v15 = vld [vmem:[#allocation2 + $0x68] sm:$0x1]  ;;  %v6455_v58 = vld [vmem:[#allocation2 + $0x30] sm:$0xf] }
 0x2b0   : > { %13261 = vmatmul.mubr.bf16.gmra.mrb[44].mxu1 %v12035_v19  ;;  %13124 = vmatprep.subr.bf16.mxu0 %v13966_v50  ;;  %v11843_v20 = vcombine.low %v5992_v62, %v5995_v1  ;;  %v13965_v19 = vld [vmem:[%s17851_s2 + $0x98] sm:$0xff]   ;;  %v8329_v61 = vrot.slane %v8327_v4, 4  ;;  %v8330_v14 = vrot.slane %v14080_v15, 5  ;;  %v16733_v38 = vld [vmem:[#allocation2 + $0x34] sm:$0xf]  ;;  %v12060_v39 = vrot.slane %v8301_v44, 9 }
 0x2b1   : > { %13280 = vmatprep.mubr.bf16.mxu1 %v12044_v6  ;;  %v17950_v6 = vld [vmem:[#allocation16_spill] sm:$0xff]  ;;  %v16723_v16 = vrot.slane %v6483_v22, 5  ;;  %v13982_v57 = vld [vmem:[#allocation2 + $0x30] sm:$0xff]   ;;  %v16739_v1 = vld [vmem:[#allocation2 + $0x20] sm:$0x1]  ;;  %v16747_v22 = vpop.f32.mrb[16].mxu1 }
 0x2b2   : > { %v17951_v11 = vcombine.low %v17949_v37, %v17950_v6  ;;  %v13971_v62 = vld [vmem:[%s17851_s2 + $0xa8] sm:$0xff]   ;;  %17955 = vst [vmem:[#allocation18_spill] sm:$0xff] %v16747_v22  ;;  %v6535_v37 = vshrl.u32 %v16733_v38, 16  ;;  %v13987_v6 = vld [vmem:[%s17851_s2 + $0x1d0] sm:$0xff]   ;;  %v13986_v44 = vld [vmem:[#allocation2 + $0x3c] sm:$0xff]  }
 0x2b3   : > { %13125 = vmatpush3.bf16.msra.mxu0 %v13966_v50  ;;  %v13976_v50 = vld [vmem:[#allocation2 + $0x18] sm:$0xff]   ;;  %v13973_v9 = vld [vmem:[%s17851_s2 + $0xb0] sm:$0xff]   ;;  %v16780_v10 = vld [vmem:[#allocation2 + $0x4c] sm:$0xf] }
 0x2b4   : > { %13126 = vmatprep.subr.bf16.mxu0 %v13968_v63 }
 0x2b6   : > { %13111 = vmatmul.mubr.bf16.gmra.mrb[24].mxu0 %v11841_v27  ;;  %v6489_v27 = vrot.slane %v6487_v13, 4  ;;  %v6522_v13 = vshrl.u32 %v6455_v58, 16 }
 0x2b7   : > { %13114 = vmatprep.mubr.bf16.mxu0 %v11842_v52  ;;  %13127 = vmatpush3.bf16.msra.mxu0 %v13968_v63  ;;  %v6474_v63 = vshrl.u32 %v6449_v18, 16  ;;  %v6501_v52 = vshll.u32 %v6452_v12, 16 }
 0x2b8   : > { %13281 = vmatmul.mubr.bf16.vlgmr.msra.gmra.mrb[32].mxu1 %v17945_v54  ;;  %13128 = vmatprep.subr.bf16.mxu0 %v13972_v25  ;;  %v13984_v54 = vld [vmem:[%s17851_s2 + $0x1c8] sm:$0xff]  }
 0x2b9   : > { %13297 = vmatpush3.bf16.msra.mxu1 %v14079_v31  ;;  %13284 = vmatprep.mubr.bf16.mxu1 %v17948_v47  ;;  %v6479_v31 = vrot.slane %v6477_v59, 5  ;;  %v16737_v47 = vsel %vm14134_vm2, %v8329_v61, %v8330_v14  ;;  %v16769_v59 = vpop.f32.mrb[17].mxu1  ;;  %v16784_v61 = vrot.slane %v6522_v13, 4 }
 0x2ba   : > { %13298 = vmatprep.subr.bf16.mxu1 %v13959_v46  ;;  %17956 = vst [vmem:[#allocation22_spill] sm:$0xff] %v16769_v59 }
 0x2bb   : > { %13129 = vmatpush3.bf16.msra.mxu0 %v13972_v25  ;;  %v6498_v25 = vshrl.u32 %v6452_v12, 16  ;;  %v6531_v12 = vshll.u32 %v16733_v38, 16 }
 0x2bc   : > { %13130 = vmatprep.subr.bf16.mxu0 %v13974_v41 }
 0x2bd   : > { %13299 = vmatpush3.bf16.msra.mxu1 %v13959_v46  ;;  %v6511_v46 = vshrl.u32 %v16710_v21, 16 }
 0x2be   : > { %13300 = vmatprep.subr.bf16.mxu1 %v13961_v24  ;;  %13115 = vmatmul.mubr.bf16.gmra.mrb[28].mxu0 %v11843_v20  ;;  %v6500_v20 = vrot.slane %v6498_v25, 4  ;;  %v6537_v25 = vrot.slane %v6535_v37, 4  ;;  %v6464_v37 = vld [vmem:[#allocation2 + $0x54] sm:$0xf] }
 0x2bf   : > { %13131 = vmatpush3.bf16.msra.mxu0 %v13974_v41  ;;  %13134 = vmatprep.mubr.bf16.mxu0 %v13976_v50  ;;  %v6476_v41 = vrot.slane %v6474_v63, 4  ;;  %v16745_v50 = vrot.slane %v6507_v26, 5  ;;  %v6513_v18 = vrot.slane %v6511_v46, 4  ;;  %v6493_v63 = vshll.u32 %v16739_v1, 16  ;;  %v13988_v26 = vld [vmem:[#allocation2 + $0x48] sm:$0xff]   ;;  %v13990_v46 = vld [vmem:[%s17851_s2 + $0x1d8] sm:$0xff]  }
 0x2c0   : > { %13285 = vmatmul.mubr.bf16.gmra.mrb[36].mxu1 %v17951_v11  ;;  %13132 = vmatprep.subr.bf16.mxu0 %v13978_v36 }
 0x2c1   : > { %13301 = vmatpush3.bf16.msra.mxu1 %v13961_v24  ;;  %13288 = vmatprep.mubr.bf16.mxu1 %v17954_v2  ;;  %v6490_v24 = vor.u32 %v6489_v27, %v16723_v16  ;;  %v6480_v11 = vor.u32 %v6479_v31, %v6476_v41  ;;  %v6514_v49 = vor.u32 %v6513_v18, %v16745_v50  ;;  %v16782_v2 = vpop.f32.mrb[18].mxu1  ;;  %v6495_v14 = vrot.slane %v6493_v63, 5  ;;  %v6461_v31 = vld [vmem:[#allocation2 + $0x48] sm:$0xf] }
 0x2c2   : > { %13302 = vmatprep.subr.bf16.mxu1 %v13965_v19  ;;  %17957 = vst [vmem:[#allocation6_spill] sm:$0xff] %v16782_v2 }
 0x2c3   : > { %13133 = vmatpush3.bf16.msra.mxu0 %v13978_v36  ;;  %v6503_v36 = vrot.slane %v6501_v52, 5  ;;  %v16775_v48 = vrot.slane %v6490_v24, 4  ;;  %v16790_v52 = vpop.f32.mrb[19].mxu1  ;;  %v6481_v15 = vrot.slane %v6480_v11, 4  ;;  %v13977_v24 = vld [vmem:[%s17851_s2 + $0xb8] sm:$0xff]   ;;  %v16812_v13 = vrot.slane %v6514_v49, 4 }
 0x2c4   : > { %13150 = vmatprep.subr.bf16.mxu0 %v13981_v43  ;;  %17958 = vst [vmem:[#allocation8_spill] sm:$0xff] %v16790_v52  ;;  %v16810_v18 = vpop.f32.mrb[20].mxu1  ;;  %v13993_v11 = vld [vmem:[%s17851_s2 + $0x1e0] sm:$0xff]  }
 0x2c5   : > { %13303 = vmatpush3.bf16.msra.mxu1 %v13965_v19  ;;  %v6525_v19 = vshll.u32 %v6455_v58, 16  ;;  %v6546_v58 = vshrl.u32 %v6458_v55, 16  ;;  %17959 = vst [vmem:[#allocation5_spill] sm:$0xff] %v16810_v18 }
 0x2c6   : > { %13304 = vmatprep.subr.bf16.mxu1 %v13967_v56  ;;  %13135 = vmatmul.mubr.bf16.vlgmr.msra.gmra.mrb[16].mxu0 %v13980_v34  ;;  %v6549_v34 = vshll.u32 %v6458_v55, 16  ;;  %v6573_v55 = vshll.u32 %v6461_v31, 16 }
 0x2c7   : > { %13138 = vmatprep.mubr.bf16.mxu0 %v13982_v57  ;;  %13151 = vmatpush3.bf16.msra.mxu0 %v13981_v43  ;;  %v8328_v43 = vsel %vm14134_vm2, %v12060_v39, %v8327_v4  ;;  %v16778_v4 = vld [vmem:[#allocation2 + $0x38] sm:$0x1]  ;;  %v16786_v27 = vrot.slane %v6525_v19, 5  ;;  %v6579_v39 = vshll.u32 %v16780_v10, 16  ;;  %v12051_v57 = vcombine.low %v16604_v3, %v16620_v60 }
 0x2c8   : > { %13289 = vmatmul.mubr.bf16.gmra.mrb[40].mxu1 %v12049_v5  ;;  %13152 = vmatprep.subr.bf16.mxu0 %v13984_v54  ;;  %v16767_v5 = vld [vmem:[#allocation2 + $0x40] sm:$0xf]  ;;  %v12084_v35 = vcombine.low %v8328_v43, %v16737_v47  ;;  %v6583_v47 = vshrl.u32 %v16780_v10, 16  ;;  %v6541_v19 = vshll.u32 %v16778_v4, 16  ;;  %v16823_v63 = vrot.slane %v6546_v58, 4  ;;  %v13992_v58 = vld [vmem:[#allocation2 + $0x54] sm:$0xff]  }
 0x2c9   : > { %13305 = vmatpush3.bf16.msra.mxu1 %v13967_v56  ;;  %13292 = vmatprep.mubr.bf16.mxu1 %v12050_v7  ;;  %v6504_v7 = vor.u32 %v6503_v36, %v6500_v20  ;;  %v16788_v56 = vrot.slane %v6531_v12, 5  ;;  %v6559_v41 = vshrl.u32 %v16767_v5, 16  ;;  %v6517_v36 = vshll.u32 %v16765_v51, 16  ;;  %v16818_v12 = vld [vmem:[#allocation2 + $0x44] sm:$0x1] }
 0x2ca   : > { %13306 = vmatprep.subr.bf16.mxu1 %v13971_v62  ;;  %v6528_v3 = vor.u32 %v16786_v27, %v16784_v61  ;;  %v6570_v43 = vshrl.u32 %v6461_v31, 16  ;;  %v16829_v49 = vrot.slane %v6579_v39, 5  ;;  %v16833_v61 = vpop.f32.mrb[21].mxu1  ;;  %v13979_v27 = vld [vmem:[%s17851_s2 + $0xc0] sm:$0xff]   ;;  %v6565_v31 = vshll.u32 %v16818_v12, 16 }
 0x2cb   : > { %13153 = vmatpush3.bf16.msra.mxu0 %v13984_v54  ;;  %v6555_v54 = vshll.u32 %v16767_v5, 16  ;;  %v16807_v20 = vrot.slane %v6504_v7, 4  ;;  %v6538_v60 = vor.u32 %v6537_v25, %v16788_v56  ;;  %v6561_v7 = vrot.slane %v6559_v41, 4  ;;  %17960 = vst [vmem:[#allocation7_spill] sm:$0xff] %v16833_v61  ;;  %v17968_v61 = vld [vmem:[#allocation13_spill] sm:$0xff] }
 0x2cc   : > { %13154 = vmatprep.subr.bf16.mxu0 %v13987_v6  ;;  %v6486_v25 = vsel %vm14180_vm5, %v6481_v15, %v16723_v16  ;;  %v16854_v16 = vld [vmem:[#allocation2 + $0x50] sm:$0x1]  ;;  %v16856_v15 = vld [vmem:[#allocation2 + $0x58] sm:$0xf] }
 0x2cd   : > { %13307 = vmatpush3.bf16.msra.mxu1 %v13971_v62  ;;  %v6496_v62 = vsel %vm14180_vm5, %v16775_v48, %v6495_v14  ;;  %v16827_v48 = vrot.slane %v6555_v54, 5  ;;  %v16843_v14 = vpop.f32.mrb[22].mxu1  ;;  %v16851_v41 = vrot.slane %v6538_v60, 4  ;;  %v16869_v60 = vld [vmem:[#allocation2 + $0x64] sm:$0xf] }
 0x2ce   : > { %13308 = vmatprep.subr.bf16.mxu1 %v13973_v9  ;;  %13139 = vmatmul.mubr.bf16.gmra.mrb[20].mxu0 %v13986_v44  ;;  %v16831_v44 = vrot.slane %v6583_v47, 4  ;;  %17961 = vst [vmem:[#allocation14_spill] sm:$0xff] %v16843_v14  ;;  %v16858_v39 = vpop.f32.mrb[23].mxu1  ;;  %v6467_v54 = vld [vmem:[#allocation2 + $0x60] sm:$0xf] }
 0x2cf   : > { %13142 = vmatprep.mubr.bf16.mxu0 %v13988_v26  ;;  %13155 = vmatpush3.bf16.msra.mxu0 %v13987_v6  ;;  %v16825_v6 = vrot.slane %v6549_v34, 5  ;;  %v6597_v26 = vshll.u32 %v6464_v37, 16  ;;  %v16845_v34 = vcombine.low %v6486_v25, %v6496_v62  ;;  %17962 = vst [vmem:[#allocation16_spill] sm:$0xff] %v16858_v39  ;;  %v6572_v62 = vrot.slane %v6570_v43, 4  ;;  %v16878_v47 = vld [vmem:[#allocation2 + $0x70] sm:$0xf] }
 0x2d0   : > { %13293 = vmatmul.mubr.bf16.gmra.mrb[44].mxu1 %v12051_v57  ;;  %13156 = vmatprep.subr.bf16.mxu0 %v13990_v46  ;;  %v16867_v57 = vrot.slane %v6541_v19, 5  ;;  %v16871_v25 = vrot.slane %v6528_v3, 4  ;;  %v6562_v42 = vor.u32 %v6561_v7, %v16827_v48  ;;  %v6586_v40 = vor.u32 %v16831_v44, %v16829_v49  ;;  %v13983_v19 = vld [vmem:[%s17851_s2 + $0xc8] sm:$0xff]  }
 0x2d1   : > { %13309 = vmatpush3.bf16.msra.mxu1 %v13973_v9  ;;  %13312 = vmatprep.mubr.bf16.mxu1 %v12084_v35  ;;  %v16841_v9 = vrot.slane %v6517_v36, 5  ;;  %v6594_v35 = vshrl.u32 %v6464_v37, 16  ;;  %v6575_v36 = vrot.slane %v6573_v55, 5  ;;  %v13994_v37 = vld [vmem:[#allocation2 + $0x60] sm:$0xff]   ;;  %v6552_v33 = vor.u32 %v16825_v6, %v16823_v63  ;;  %v16885_v6 = vpop.f32.mrb[24].mxu1 }
 0x2d2   : > { %13310 = vmatprep.subr.bf16.mxu1 %v13977_v24  ;;  %v6599_v3 = vrot.slane %v6597_v26, 5  ;;  %v6603_v43 = vshll.u32 %v16856_v15, 16  ;;  %v6607_v63 = vshrl.u32 %v16856_v15, 16  ;;  %17963 = vst [vmem:[#allocation11_spill] sm:$0xff] %v16885_v6  ;;  %v6544_v55 = vsel %vm14180_vm5, %v16851_v41, %v16867_v57  ;;  %v17964_v26 = vld [vmem:[#allocation9_spill] sm:$0xff]  ;;  %v17967_v57 = vld [vmem:[#allocation12_spill] sm:$0xff] }
 0x2d3   : > { %13157 = vmatpush3.bf16.msra.mxu0 %v13990_v46  ;;  %v13996_v46 = vld [vmem:[%s17851_s2 + $0x1e8] sm:$0xff]   ;;  %v16891_v7 = vrot.slane %v6565_v31, 5  ;;  %v6627_v44 = vshll.u32 %v16869_v60, 16  ;;  %v6589_v6 = vshll.u32 %v16854_v16, 16  ;;  %v6651_v41 = vshll.u32 %v16878_v47, 16  ;;  %v16911_v2 = vpop.f32.mrb[25].mxu1 }
 0x2d4   : > { %13158 = vmatprep.subr.bf16.mxu0 %v13993_v11  ;;  %v6470_v14 = vld [vmem:[#allocation2 + $0x6c] sm:$0xf]  ;;  %v6655_v31 = vshrl.u32 %v16878_v47, 16  ;;  %v17969_v18 = vcombine.low %v17967_v57, %v17968_v61  ;;  %v6621_v52 = vshll.u32 %v6467_v54, 16  ;;  %17970 = vst [vmem:[#allocation15_spill] sm:$0xff] %v16911_v2  ;;  %v16918_v22 = vrot.slane %v6607_v63, 4 }
 0x2d5   : > { %13311 = vmatpush3.bf16.msra.mxu1 %v13977_v24  ;;  %v6596_v24 = vrot.slane %v6594_v35, 4  ;;  %v6631_v35 = vshrl.u32 %v16869_v60, 16  ;;  %v6642_v61 = vshrl.u32 %v6470_v14, 16  ;;  %v13998_v2 = vld [vmem:[#allocation2 + $0x6c] sm:$0xff]  }
 0x2d6   : > { %13328 = vmatprep.subr.bf16.mxu1 %v13979_v27  ;;  %13143 = vmatmul.mubr.bf16.gmra.mrb[24].mxu0 %v13992_v58  ;;  %v17965_v58 = vld [vmem:[#allocation10_spill] sm:$0xff]  ;;  %v6657_v63 = vrot.slane %v6655_v31, 4 }
 0x2d7   : > { %13146 = vmatprep.mubr.bf16.mxu0 %v13994_v37  ;;  %13159 = vmatpush3.bf16.msra.mxu0 %v13993_v11  ;;  %v17966_v39 = vcombine.low %v17964_v26, %v17965_v58  ;;  %v13999_v11 = vld [vmem:[%s17851_s2 + $0x1f0] sm:$0xff]   ;;  %v6576_v37 = vor.u32 %v6575_v36, %v6572_v62  ;;  %v16907_v26 = vrot.slane %v6552_v33, 4  ;;  %v6618_v58 = vshrl.u32 %v6467_v54, 16 }
 0x2d8   : > { %13160 = vmatprep.subr.bf16.mxu0 %v13996_v46  ;;  %v13985_v62 = vld [vmem:[%s17851_s2 + $0xd0] sm:$0xff]   ;;  %v6587_v36 = vrot.slane %v6586_v40, 4  ;;  %v6600_v59 = vor.u32 %v6599_v3, %v6596_v24  ;;  %v6633_v33 = vrot.slane %v6631_v35, 4  ;;  %v6645_v54 = vshll.u32 %v6470_v14, 16  ;;  %v14002_v40 = vld [vmem:[%s17851_s2 + $0x1f8] sm:$0xff]  }
 0x2d9   : > { %13313 = vmatmul.mubr.bf16.vlgmr.msra.gmra.mrb[32].mxu1 %v17966_v39  ;;  %v16909_v39 = vrot.slane %v6562_v42, 4  ;;  %v16922_v42 = vrot.slane %v6627_v44, 5  ;;  %v6577_v24 = vrot.slane %v6576_v37, 4  ;;  %v6591_v3 = vrot.slane %v6589_v6, 5  ;;  %v16947_v35 = vld [vmem:[#allocation2 + $0x5c] sm:$0x1] }
 0x2da   : > { %13329 = vmatpush3.bf16.msra.mxu1 %v13979_v27  ;;  %13316 = vmatprep.mubr.bf16.mxu1 %v17969_v18  ;;  %v16916_v27 = vrot.slane %v6603_v43, 5  ;;  %v16920_v18 = vpop.f32.mrb[26].mxu1  ;;  %v16929_v43 = vrot.slane %v6651_v41, 5  ;;  %v17973_v14 = vsel %vm14180_vm5, %v16807_v20, %v16745_v50  ;;  %v6534_v6 = vsel %vm14180_vm5, %v16871_v25, %v16788_v56  ;;  %v16962_v25 = vld [vmem:[#allocation2 + $0x74] sm:$0x1] }
 0x2db   : > { %13330 = vmatprep.subr.bf16.mxu1 %v13983_v19  ;;  %13161 = vmatpush3.bf16.msra.mxu0 %v13996_v46  ;;  %v16924_v57 = vpop.f32.mrb[27].mxu1  ;;  %v17972_v46 = vsel %vm14180_vm5, %v16812_v13, %v16841_v9  ;;  %v6620_v37 = vrot.slane %v6618_v58, 4  ;;  %v6623_v41 = vrot.slane %v6621_v52, 5  ;;  %v13989_v13 = vld [vmem:[%s17851_s2 + $0xd8] sm:$0xff]   ;;  %v11902_v50 = vcombine.low %v6534_v6, %v6544_v55 }
 0x2dc   : > { %17971 = vst [vmem:[#allocation9_spill] sm:$0xff] %v16924_v57  ;;  %13162 = vmatprep.subr.bf16.mxu0 %v13999_v11  ;;  %v16941_v44 = vcombine.low %v17973_v14, %v17972_v46  ;;  %v6568_v20 = vsel %vm14180_vm5, %v16909_v39, %v16891_v7  ;;  %v6592_v56 = vsel %vm14180_vm5, %v6587_v36, %v6591_v3  ;;  %v16960_v9 = vrot.slane %v6600_v59, 4  ;;  %v16964_v52 = vpop.f32.mrb[28].mxu1  ;;  %v16970_v7 = vld [vmem:[#allocation2 + $0x70] sm:$0xf]  ;;  %v17975_v39 = vld [vmem:[#allocation17_spill] sm:$0xff] }
 0x2dd   : > { %17974 = vst [vmem:[#allocation10_spill] sm:$0xff] %v16964_v52  ;;  %v6634_v55 = vor.u32 %v6633_v33, %v16922_v42  ;;  %v6644_v31 = vrot.slane %v6642_v61, 4  ;;  %v6647_v58 = vrot.slane %v6645_v54, 5  ;;  %v17976_v36 = vld [vmem:[#allocation19_spill] sm:$0xff]  ;;  %v6613_v33 = vshll.u32 %v16947_v35, 16  ;;  %v17978_v54 = vld [vmem:[#allocation20_spill] sm:$0xff] }
 0x2de   : > { %13331 = vmatpush3.bf16.msra.mxu1 %v13983_v19  ;;  %v16949_v19 = vld [vmem:[#allocation2 + $0x68] sm:$0x1]  ;;  %13147 = vmatmul.mubr.bf16.gmra.mrb[28].mxu0 %v13998_v2  ;;  %v6610_v2 = vor.u32 %v16918_v22, %v16916_v27  ;;  %v17977_v59 = vcombine.low %v17975_v39, %v17976_v36  ;;  %v6558_v22 = vsel %vm14180_vm5, %v16907_v26, %v16827_v48  ;;  %v17979_v3 = vld [vmem:[#allocation21_spill] sm:$0xff]  ;;  %v6661_v39 = vshll.u32 %v16962_v25, 16  ;;  %v8831_v26 = vld [vmem:[#allocation2 + $0x6c] sm:$0xf] }
 0x2df   : > { %13332 = vmatprep.subr.bf16.mxu1 %v13985_v62  ;;  %13163 = vmatpush3.bf16.msra.mxu0 %v13999_v11  ;;  %v14004_v11 = vld [vmem:[%s17851_s2 + $0x200] sm:$0xff]   ;;  %v6658_v61 = vor.u32 %v6657_v63, %v16929_v43  ;;  %v17980_v46 = vcombine.low %v17978_v54, %v17979_v3  ;;  %v6624_v14 = vor.u32 %v6623_v41, %v6620_v37  ;;  %v6637_v6 = vshll.u32 %v16949_v19, 16  ;;  %v16993_v36 = vpop.f32.mrb[29].mxu1  ;;  %v6875_v48 = vld [vmem:[#allocation2 + $0x18] sm:$0xe] }
 0x2e0   : > { %13166 = vmatprep.mubr.bf16.mxu0 %v16845_v34  ;;  %13164 = vmatprep.subr.bf16.mxu0 %v14002_v40  ;;  %v6582_v34 = vsel %vm14180_vm5, %v6577_v24, %v16829_v49  ;;  %17981 = vst [vmem:[#allocation12_spill] sm:$0xff] %v16993_v36  ;;  %v13991_v49 = vld [vmem:[%s17851_s2 + $0xe0] sm:$0xff]   ;;  %v8865_v63 = vshll.u32 %v16970_v7, 16  ;;  %v8869_v37 = vshrl.u32 %v16970_v7, 16  ;;  %v17004_v41 = vpop.f32.mrb[30].mxu1  ;;  %v6611_v54 = vrot.slane %v6610_v2, 4 }
 0x2e1   : > { %13317 = vmatmul.mubr.bf16.gmra.mrb[36].mxu1 %v17977_v59  ;;  %v17000_v24 = vcombine.low %v6582_v34, %v6592_v56  ;;  %17982 = vst [vmem:[#allocation13_spill] sm:$0xff] %v17004_v41  ;;  %v6606_v59 = vsel %vm14180_vm5, %v16960_v9, %v16916_v27  ;;  %v6635_v3 = vrot.slane %v6634_v55, 4  ;;  %v14008_v56 = vld [vmem:[%s17851_s2 + $0x208] sm:$0xff]   ;;  %v6615_v34 = vrot.slane %v6613_v33, 5  ;;  %v14018_v57 = vld [vmem:[#allocation2 + $0xb4] sm:$0xff]  }
 0x2e2   : > { %13333 = vmatpush3.bf16.msra.mxu1 %v13985_v62  ;;  %13320 = vmatprep.mubr.bf16.mxu1 %v17980_v46  ;;  %v16998_v62 = vcombine.low %v6558_v22, %v6568_v20  ;;  %v6648_v46 = vor.u32 %v6647_v58, %v6644_v31  ;;  %v8834_v20 = vld [vmem:[#allocation2 + $0x78] sm:$0xf]  ;;  %v17010_v22 = vpop.f32.mrb[31].mxu1  ;;  %v6659_v41 = vrot.slane %v6658_v61, 4  ;;  %v8859_v36 = vshll.u32 %v8831_v26, 16  ;;  %v13995_v27 = vld [vmem:[%s17851_s2 + $0xe8] sm:$0xff]  }
 0x2e3   : > { %13334 = vmatprep.subr.bf16.mxu1 %v13989_v13  ;;  %13165 = vmatpush3.bf16.msra.mxu0 %v14002_v40  ;;  %17983 = vst [vmem:[#allocation17_spill] sm:$0xff] %v17010_v22  ;;  %v8856_v40 = vshrl.u32 %v8831_v26, 16  ;;  %v6625_v9 = vrot.slane %v6624_v14, 4  ;;  %v6639_v2 = vrot.slane %v6637_v6, 5  ;;  %v6663_v55 = vrot.slane %v6661_v39, 5 }
 0x2e4   : > { %13182 = vmatprep.subr.bf16.mxu0 %v14004_v11  ;;  %v17984_v31 = vrot.slane %v16697_v23, 5  ;;  %v17021_v22 = vrot.slane %v8865_v63, 5  ;;  %v8871_v33 = vrot.slane %v8869_v37, 4  ;;  %v17023_v61 = vld [vmem:[#allocation2 + $0x7c] sm:$0xf]  ;;  %v8880_v26 = vshrl.u32 %v8834_v20, 16 }
 0x2e5   : > { %v6616_v14 = vsel %vm14180_vm5, %v6611_v54, %v6615_v34  ;;  %v6640_v6 = vsel %vm14180_vm5, %v6635_v3, %v6639_v2  ;;  %v6649_v39 = vrot.slane %v6648_v46, 4  ;;  %v14010_v63 = vld [vmem:[%s17851_s2 + $0x210] sm:$0xff]   ;;  %v8858_v37 = vrot.slane %v8856_v40, 4 }
 0x2e6   : > { %13335 = vmatpush3.bf16.msra.mxu1 %v13989_v13  ;;  %v6911_v58 = vrot.slane %v17984_v31, 4  ;;  %13167 = vmatmul.mubr.bf16.vlgmr.msra.gmra.mrb[16].mxu0 %v16941_v44  ;;  %v8883_v13 = vshll.u32 %v8834_v20, 16  ;;  %v6912_v31 = vrot.slane %v16739_v1, 5  ;;  %v17985_v44 = vcombine.low %v16498_v17, %v16502_v32  ;;  %v17045_v32 = vld [vmem:[#allocation2 + $0x74] sm:$0x1] }
 0x2e7   : > { %13336 = vmatprep.subr.bf16.mxu1 %v13991_v49  ;;  %13170 = vmatprep.mubr.bf16.mxu0 %v11902_v50  ;;  %v6664_v50 = vsel %vm14180_vm5, %v6659_v41, %v6663_v55  ;;  %v8861_v54 = vrot.slane %v8859_v36, 5  ;;  %v17986_v3 = vcombine.low %v16529_v45, %v16533_v30  ;;  %v6916_v1 = vrot.slane %v16710_v21, 5  ;;  %v6876_v36 = vld [vmem:[#allocation2 + $0x24] sm:$0xe] }
 0x2e8   : > { %13183 = vmatpush3.bf16.msra.mxu0 %v14004_v11  ;;  %v11916_v11 = vrot.slane %v6875_v48, 9  ;;  %v17043_v17 = vsel %vm14134_vm2, %v6911_v58, %v6912_v31  ;;  %v8889_v46 = vshll.u32 %v17023_v61, 16  ;;  %v8893_v41 = vshrl.u32 %v17023_v61, 16  ;;  %v13997_v48 = vld [vmem:[%s17851_s2 + $0xf0] sm:$0xff]   ;;  %v14001_v31 = vld [vmem:[%s17851_s2 + $0xf8] sm:$0xff]  }
 0x2e9   : > { %13321 = vmatmul.mubr.bf16.gmra.mrb[40].mxu1 %v17985_v44  ;;  %13184 = vmatprep.subr.bf16.mxu0 %v14008_v56  ;;  %v6630_v45 = vsel %vm14180_vm5, %v6625_v9, %v16922_v42  ;;  %v8872_v30 = vor.u32 %v8871_v33, %v17021_v22  ;;  %v8885_v20 = vrot.slane %v8883_v13, 5  ;;  %v17057_v21 = vcombine.low %v6606_v59, %v6616_v14  ;;  %v8837_v42 = vld [vmem:[#allocation2 + $0x84] sm:$0xf]  ;;  %v17078_v33 = vld [vmem:[#allocation2 + $0x30] sm:$0xe] }
 0x2ea   : > { %13337 = vmatpush3.bf16.msra.mxu1 %v13991_v49  ;;  %13324 = vmatprep.mubr.bf16.mxu1 %v17986_v3  ;;  %v8882_v49 = vrot.slane %v8880_v26, 4  ;;  %v17059_v34 = vcombine.low %v6630_v45, %v6640_v6  ;;  %v6654_v40 = vsel %vm14180_vm5, %v6649_v39, %v16929_v43  ;;  %v17987_v2 = vrot.slane %v16697_v23, 5  ;;  %v17080_v23 = vld [vmem:[#allocation2 + $0x88] sm:$0xf]  ;;  %v17082_v14 = vld [vmem:[#allocation2 + $0x80] sm:$0x1] }
 0x2eb   : > { %13338 = vmatprep.subr.bf16.mxu1 %v13995_v27  ;;  %v17073_v59 = vcombine.low %v6654_v40, %v6664_v50  ;;  %v8862_v58 = vor.u32 %v8861_v54, %v8858_v37  ;;  %v8875_v43 = vshll.u32 %v17045_v32, 16  ;;  %v11917_v26 = vrot.slane %v6876_v36, 9  ;;  %v14000_v54 = vld [vmem:[#allocation2 + $0x6c] sm:$0xff]   ;;  %v17114_v40 = vld [vmem:[#allocation2 + $0x94] sm:$0xf] }
 0x2ec   : > { %13185 = vmatpush3.bf16.msra.mxu0 %v14008_v56  ;;  %v17068_v55 = vsel %vm14134_vm2, %v11916_v11, %v17987_v2  ;;  %v14014_v56 = vld [vmem:[%s17851_s2 + $0x218] sm:$0xff]   ;;  %v6918_v13 = vrot.slane %v6916_v1, 4  ;;  %v17084_v6 = vrot.slane %v8889_v46, 5  ;;  %v8895_v39 = vrot.slane %v8893_v41, 4 }
 0x2ed   : > { %13186 = vmatprep.subr.bf16.mxu0 %v14010_v63  ;;  %v8873_v44 = vrot.slane %v8872_v30, 4  ;;  %v8886_v50 = vor.u32 %v8885_v20, %v8882_v49  ;;  %v6923_v11 = vrot.slane %v16733_v38, 5  ;;  %v8904_v37 = vshrl.u32 %v8837_v42, 16  ;;  %v14016_v38 = vld [vmem:[%s17851_s2 + $0x220] sm:$0xff]   ;;  %v8840_v20 = vld [vmem:[#allocation2 + $0x90] sm:$0xf] }
 0x2ee   : > { %13339 = vmatpush3.bf16.msra.mxu1 %v13995_v27  ;;  %13171 = vmatmul.mubr.bf16.gmra.mrb[20].mxu0 %v16998_v62  ;;  %v260_v27 = vld [vmem:[#allocation2 + $0xcc] sm:$0x1]  ;;  %v6919_v3 = vrot.slane %v16765_v51, 5  ;;  %v8907_v46 = vshll.u32 %v8837_v42, 16  ;;  %v8913_v41 = vshll.u32 %v17080_v23, 16  ;;  %v8917_v45 = vshrl.u32 %v17080_v23, 16 }
 0x2ef   : > { %13340 = vmatprep.subr.bf16.mxu1 %v13997_v48  ;;  %13174 = vmatprep.mubr.bf16.mxu0 %v17000_v24  ;;  %v17988_v62 = vcombine.low %v16637_v8, %v16641_v28  ;;  %v8863_v30 = vrot.slane %v8862_v58, 4  ;;  %v8877_v36 = vrot.slane %v8875_v43, 5  ;;  %v17103_v24 = vsel %vm14134_vm2, %v11917_v26, %v6916_v1 }
 0x2f0   : > { %13187 = vmatpush3.bf16.msra.mxu0 %v14010_v63  ;;  %v261_v51 = vsel %vm15187_vm6, 0, %v260_v27  ;;  %v17109_v8 = vsel %vm14134_vm2, %v6918_v13, %v6919_v3  ;;  %v8896_v28 = vor.u32 %v8895_v39, %v17084_v6  ;;  %v8899_v63 = vshll.u32 %v17082_v14, 16  ;;  %v14020_v13 = vld [vmem:[%s17851_s2 + $0x228] sm:$0xff]   ;;  %v17199_v3 = vld [vmem:[#allocation2 + $0xa4] sm:$0x1] }
 0x2f1   : > { %13325 = vmatmul.mubr.bf16.gmra.mrb[44].mxu1 %v17988_v62  ;;  %13188 = vmatprep.subr.bf16.mxu0 %v14014_v56  ;;  %v11918_v49 = vrot.slane %v17078_v33, 9  ;;  %262 = vst [vmem:[#allocation2 + $0xcc] sm:$0x1] %v261_v51  ;;  %v8878_v1 = vsel %vm14180_vm5, %v8873_v44, %v8877_v36  ;;  %v6925_v2 = vrot.slane %v6923_v11, 4  ;;  %v8906_v42 = vrot.slane %v8904_v37, 4  ;;  %v14005_v37 = vld [vmem:[#allocation2 + $0x78] sm:$0xff]  }
 0x2f2   : > { %13341 = vmatpush3.bf16.msra.mxu1 %v13997_v48  ;;  %13344 = vmatprep.mubr.bf16.mxu1 %v14000_v54  ;;  %v17121_v48 = vrot.slane %v8886_v50, 4  ;;  %v8909_v58 = vrot.slane %v8907_v46, 5  ;;  %v17123_v43 = vrot.slane %v8913_v41, 5  ;;  %v8919_v33 = vrot.slane %v8917_v45, 4  ;;  %v14007_v45 = vld [vmem:[%s17851_s2 + $0x108] sm:$0xff]  }
 0x2f3   : > { %13342 = vmatprep.subr.bf16.mxu1 %v14001_v31  ;;  %v17876_v26 = vrot.slane %v16767_v5, 5  ;;  %v8928_v39 = vshrl.u32 %v8840_v20, 16  ;;  %v8931_v27 = vshll.u32 %v8840_v20, 16  ;;  %v8937_v44 = vshll.u32 %v17114_v40, 16  ;;  %v6878_v36 = vld [vmem:[#allocation2 + $0x3c] sm:$0xe] }
 0x2f4   : > { %13189 = vmatpush3.bf16.msra.mxu0 %v14014_v56  ;;  %v8941_v50 = vshrl.u32 %v17114_v40, 16  ;;  %v14006_v56 = vld [vmem:[#allocation2 + $0x84] sm:$0xff]   ;;  %v8868_v54 = vsel %vm14180_vm5, %v8863_v30, %v17021_v22  ;;  %v8897_v46 = vrot.slane %v8896_v28, 4  ;;  %v6926_v41 = vrot.slane %v16778_v4, 5  ;;  %v17151_v4 = vld [vmem:[#allocation2 + $0x8c] sm:$0x1] }
 0x2f5   : > { %13190 = vmatprep.subr.bf16.mxu0 %v14016_v38  ;;  %v8892_v22 = vsel %vm14180_vm5, %v17121_v48, %v17084_v6  ;;  %v8901_v62 = vrot.slane %v8899_v63, 5  ;;  %v17149_v30 = vsel %vm14134_vm2, %v11918_v49, %v6923_v11  ;;  %v17153_v51 = vld [vmem:[#allocation2 + $0xa0] sm:$0xf]  ;;  %v8910_v28 = vor.u32 %v8909_v58, %v8906_v42  ;;  %v17166_v49 = vld [vmem:[#allocation2 + $0x98] sm:$0x1] }
 0x2f6   : > { %13343 = vmatpush3.bf16.msra.mxu1 %v14001_v31  ;;  %13175 = vmatmul.mubr.bf16.gmra.mrb[24].mxu0 %v17057_v21  ;;  %v17141_v31 = vcombine.low %v8868_v54, %v8878_v1  ;;  %v14022_v21 = vld [vmem:[%s17851_s2 + $0x230] sm:$0xff]   ;;  %v17161_v6 = vsel %vm14134_vm2, %v6925_v2, %v6926_v41  ;;  %v8920_v11 = vor.u32 %v8919_v33, %v17123_v43  ;;  %v6932_v63 = vrot.slane %v17876_v26, 4  ;;  %v8843_v20 = vld [vmem:[#allocation2 + $0x9c] sm:$0xf]  ;;  %v6879_v41 = vld [vmem:[#allocation2 + $0x48] sm:$0xe] }
 0x2f7   : > { %13360 = vmatprep.subr.bf16.mxu1 %v14003_v29  ;;  %13178 = vmatprep.mubr.bf16.mxu0 %v17059_v34  ;;  %v8930_v34 = vrot.slane %v8928_v39, 4  ;;  %v17168_v1 = vrot.slane %v8937_v44, 5  ;;  %v8943_v48 = vrot.slane %v8941_v50, 4  ;;  %v8902_v2 = vsel %vm14180_vm5, %v8897_v46, %v8901_v62  ;;  %v14009_v39 = vld [vmem:[%s17851_s2 + $0x110] sm:$0xff]   ;;  %v14025_v62 = vld [vmem:[%s17851_s2 + $0x238] sm:$0xff]  }
 0x2f8   : > { %13191 = vmatpush3.bf16.msra.mxu0 %v14016_v38  ;;  %v8933_v38 = vrot.slane %v8931_v27, 5  ;;  %v8923_v42 = vshll.u32 %v17151_v4, 16  ;;  %v8961_v58 = vshll.u32 %v17153_v51, 16  ;;  %v8965_v33 = vshrl.u32 %v17153_v51, 16 }
 0x2f9   : > { %13345 = vmatmul.mubr.bf16.vlgmr.msra.gmra.mrb[32].mxu1 %v14005_v37  ;;  %13192 = vmatprep.subr.bf16.mxu0 %v14020_v13  ;;  %v8952_v44 = vshrl.u32 %v8843_v20, 16  ;;  %v8955_v50 = vshll.u32 %v8843_v20, 16  ;;  %v17181_v37 = vrot.slane %v8910_v28, 4  ;;  %v11919_v54 = vrot.slane %v6878_v36, 9 }
 0x2fa   : > { %13361 = vmatpush3.bf16.msra.mxu1 %v14003_v29  ;;  %13348 = vmatprep.mubr.bf16.mxu1 %v14006_v56  ;;  %v6933_v29 = vrot.slane %v16818_v12, 5  ;;  %v17183_v56 = vrot.slane %v8920_v11, 4  ;;  %v8947_v46 = vshll.u32 %v17166_v49, 16  ;;  %v8934_v12 = vor.u32 %v8933_v38, %v8930_v34  ;;  %v14011_v11 = vld [vmem:[#allocation2 + $0x90] sm:$0xff]  }
 0x2fb   : > { %13362 = vmatprep.subr.bf16.mxu1 %v14007_v45  ;;  %v6937_v28 = vrot.slane %v16780_v10, 5  ;;  %v17195_v36 = vcombine.low %v8892_v22, %v8902_v2  ;;  %v17197_v20 = vrot.slane %v8923_v42, 5  ;;  %v17201_v9 = vrot.slane %v8961_v58, 5  ;;  %v14012_v2 = vld [vmem:[#allocation2 + $0x9c] sm:$0xff]  }
 0x2fc   : > { %13193 = vmatpush3.bf16.msra.mxu0 %v14020_v13  ;;  %v17191_v27 = vsel %vm14134_vm2, %v6932_v63, %v6933_v29  ;;  %v8944_v13 = vor.u32 %v8943_v48, %v17168_v1  ;;  %v8967_v26 = vrot.slane %v8965_v33, 4  ;;  %v14013_v63 = vld [vmem:[%s17851_s2 + $0x118] sm:$0xff]   ;;  %v17989_v10 = vrot.slane %v16767_v5, 5  ;;  %v17213_v48 = vld [vmem:[#allocation2 + $0xac] sm:$0xf] }
 0x2fd   : > { %13194 = vmatprep.subr.bf16.mxu0 %v14022_v21  ;;  %v11920_v22 = vrot.slane %v6879_v41, 9  ;;  %v8954_v34 = vrot.slane %v8952_v44, 4  ;;  %v8957_v38 = vrot.slane %v8955_v50, 5  ;;  %v17990_v42 = vcombine.low %v17068_v55, %v17043_v17  ;;  %v8846_v29 = vld [vmem:[#allocation2 + $0xa8] sm:$0xf] }
 0x2fe   : > { %13363 = vmatpush3.bf16.msra.mxu1 %v14007_v45  ;;  %13179 = vmatmul.mubr.bf16.gmra.mrb[28].mxu0 %v17073_v59  ;;  %v17211_v45 = vsel %vm14134_vm2, %v11919_v54, %v17989_v10  ;;  %v8916_v5 = vsel %vm14180_vm5, %v17181_v37, %v17123_v43  ;;  %v8926_v59 = vsel %vm14180_vm5, %v17183_v56, %v17197_v20  ;;  %v8949_v33 = vrot.slane %v8947_v46, 5  ;;  %v8849_v50 = vld [vmem:[#allocation2 + $0xb4] sm:$0xf]  ;;  %v10749_v41 = vld [vmem:[%s17852_s3] sm:$0xf] }
 0x2ff   : > { %13364 = vmatprep.subr.bf16.mxu1 %v14009_v39  ;;  %13198 = vmatprep.mubr.bf16.mxu0 %v17990_v42  ;;  %v8935_v17 = vrot.slane %v8934_v12, 4  ;;  %v8945_v55 = vrot.slane %v8944_v13, 4  ;;  %v17232_v44 = vsel %vm14134_vm2, %v11920_v22, %v6937_v28  ;;  %v6940_v43 = vrot.slane %v16854_v16, 5  ;;  %v14015_v12 = vld [vmem:[%s17851_s2 + $0x120] sm:$0xff]   ;;  %v14017_v22 = vld [vmem:[#allocation2 + $0xa8] sm:$0xff]  }
 0x300   : > { %13195 = vmatpush3.bf16.msra.mxu0 %v14022_v21  ;;  %v17228_v21 = vld [vmem:[#allocation2 + $0xb8] sm:$0xf]  ;;  %v6939_v37 = vrot.slane %v6937_v28, 4  ;;  %v8968_v56 = vor.u32 %v8967_v26, %v17201_v9  ;;  %v8985_v54 = vshll.u32 %v17213_v48, 16  ;;  %v8989_v46 = vshrl.u32 %v17213_v48, 16 }
 0x301   : > { %13349 = vmatmul.mubr.bf16.gmra.mrb[36].mxu1 %v14011_v11  ;;  %13196 = vmatprep.subr.bf16.mxu0 %v14025_v62  ;;  %v8958_v16 = vor.u32 %v8957_v38, %v8954_v34  ;;  %v9009_v13 = vshll.u32 %v17228_v21, 16  ;;  %v9013_v26 = vshrl.u32 %v17228_v21, 16  ;;  %v8976_v28 = vshrl.u32 %v8846_v29, 16 }
 0x302   : > { %13365 = vmatpush3.bf16.msra.mxu1 %v14009_v39  ;;  %13352 = vmatprep.mubr.bf16.mxu1 %v14012_v2  ;;  %v8971_v39 = vshll.u32 %v17199_v3, 16  ;;  %v8979_v11 = vshll.u32 %v8846_v29, 16  ;;  %v9000_v20 = vshrl.u32 %v8849_v50, 16  ;;  %v9003_v10 = vshll.u32 %v8849_v50, 16 }
 0x303   : > { %13366 = vmatprep.subr.bf16.mxu1 %v14013_v63  ;;  %v8940_v2 = vsel %vm14180_vm5, %v8935_v17, %v17168_v1  ;;  %v8950_v42 = vsel %vm14180_vm5, %v8945_v55, %v8949_v33  ;;  %v6944_v34 = vrot.slane %v16856_v15, 5  ;;  %vm17991_vm6 = vcmask 1043456   ;;  %v6880_v1 = vld [vmem:[#allocation2 + $0x54] sm:$0xe] }
 0x304   : > { %13197 = vmatpush3.bf16.msra.mxu0 %v14025_v62  ;;  %vm17992_vm8 = vmmov %vm17991_vm6  ;;  %v14019_v62 = vld [vmem:[%s17851_s2 + $0x128] sm:$0xff]   ;;  %v17260_v29 = vsel %vm14134_vm2, %v6939_v37, %v6940_v43  ;;  %v8969_v50 = vrot.slane %v8968_v56, 4  ;;  %v17262_v17 = vrot.slane %v8985_v54, 5  ;;  %v8991_v33 = vrot.slane %v8989_v46, 4 }
 0x305   : > { %13797 = vmatprep.subr.msk.bf16.mxu0 %vm17991_vm6, %v10749_v41  ;;  %v10799_v38 = vsel %vm17992_vm8, %v10749_v41, 0  ;;  %v17993_v15 = vcombine.low %v17103_v24, %v17109_v8  ;;  %v8959_v55 = vrot.slane %v8958_v16, 4  ;;  %v17267_v41 = vld [vmem:[#allocation2 + $0xb0] sm:$0x1]  ;;  %v17269_v58 = vrot.slane %v9009_v13, 5 }
 0x306   : > { %13367 = vmatpush3.bf16.msra.mxu1 %v14013_v63  ;;  %v8973_v63 = vrot.slane %v8971_v39, 5  ;;  %v9015_v52 = vrot.slane %v9013_v26, 4  ;;  %v17994_v43 = vcombine.low %v17149_v30, %v17161_v6  ;;  %v8978_v37 = vrot.slane %v8976_v28, 4  ;;  %v17280_v13 = vld [vmem:[#allocation2 + $0xbc] sm:$0x1] }
 0x307   : > { %13368 = vmatprep.subr.bf16.mxu1 %v14015_v12  ;;  %13199 = vmatmul.mubr.bf16.vlgmr.msra.gmra.mrb[16].mxu0 %v17993_v15  ;;  %v8981_v56 = vrot.slane %v8979_v11, 5  ;;  %v9002_v54 = vrot.slane %v9000_v20, 4  ;;  %v9005_v46 = vrot.slane %v9003_v10, 5  ;;  %v17274_v24 = vcombine.low %v8916_v5, %v8926_v59  ;;  %v6881_v28 = vld [vmem:[#allocation2 + $0x60] sm:$0xe]  ;;  %v14021_v59 = vld [vmem:[%s17851_s2 + $0x130] sm:$0xff]  }
 0x308   : > { %13202 = vmatprep.mubr.bf16.mxu0 %v17994_v43  ;;  %13521 = vmatpush3.bf16.msra.mxu0 %v10799_v38  ;;  %v17276_v8 = vcombine.low %v8940_v2, %v8950_v42  ;;  %v11944_v16 = vcombine.low %v17232_v44, %v17260_v29  ;;  %v6946_v39 = vrot.slane %v6944_v34, 4  ;;  %v8974_v30 = vsel %vm14180_vm5, %v8969_v50, %v8973_v63  ;;  %v8852_v2 = vld [vmem:[#allocation2 + $0xc0] sm:$0xf]  ;;  %v14024_v38 = vld [vmem:[%s17851_s2 + $0x138] sm:$0xff]   ;;  %v17306_v50 = vld [vmem:[#allocation2 + $0xc4] sm:$0xf] }
 0x309   : > { %13353 = vmatmul.mubr.bf16.gmra.mrb[40].mxu1 %v14017_v22  ;;  %v8992_v6 = vor.u32 %v8991_v33, %v17262_v17  ;;  %v8995_v26 = vshll.u32 %v17267_v41, 16  ;;  %v6951_v5 = vrot.slane %v16869_v60, 5  ;;  %v11921_v44 = vrot.slane %v6880_v1, 9  ;;  %v14023_v42 = vld [vmem:[#allocation2 + $0xc0] sm:$0xff]   ;;  %v17309_v63 = vld [vmem:[#allocation2 + $0xc8] sm:$0x1] }
 0x30a   : > { %13369 = vmatpush3.bf16.msra.mxu1 %v14015_v12  ;;  %13356 = vmatprep.mubr.bf16.mxu1 %v14018_v57  ;;  %v6947_v11 = vrot.slane %v16947_v35, 5  ;;  %v9016_v57 = vor.u32 %v9015_v52, %v17269_v58  ;;  %v6958_v12 = vrot.slane %v16878_v47, 5  ;;  %v8964_v20 = vsel %vm14180_vm5, %v8959_v55, %v17201_v9  ;;  %v6882_v9 = vld [vmem:[#allocation2 + $0x6c] sm:$0xe] }
 0x30b   : > { %13370 = vmatprep.subr.bf16.mxu1 %v14019_v62  ;;  %v8982_v10 = vor.u32 %v8981_v56, %v8978_v37  ;;  %v9006_v22 = vor.u32 %v9005_v46, %v9002_v54  ;;  %v9019_v60 = vshll.u32 %v17280_v13, 16  ;;  %v17300_v29 = vcombine.low %v8964_v20, %v8974_v30  ;;  %v316_v46 = vld [vmem:[#allocation2 + $0xd4] sm:$0x1]  ;;  %v17325_v20 = vld [vmem:[#allocation2 + $0x6c] sm:$0xe] }
 0x30c   : > { %v6945_v35 = vsel %vm14134_vm2, %v11921_v44, %v6944_v34  ;;  %v6948_v47 = vsel %vm14134_vm2, %v6946_v39, %v6947_v11  ;;  %v11922_v52 = vrot.slane %v6881_v28, 9  ;;  %v8993_v1 = vrot.slane %v8992_v6, 4 }
 0x30d   : > { %v8997_v33 = vrot.slane %v8995_v26, 5  ;;  %v6953_v15 = vrot.slane %v6951_v5, 4  ;;  %v6954_v55 = vrot.slane %v16949_v19, 5  ;;  %v17995_v43 = vcombine.low %v17211_v45, %v17191_v27 }
 0x30e   : > { %13371 = vmatpush3.bf16.msra.mxu1 %v14019_v62  ;;  %v9017_v34 = vrot.slane %v9016_v57, 4  ;;  %v6960_v37 = vrot.slane %v6958_v12, 4  ;;  %v9024_v56 = vshrl.u32 %v8852_v2, 16  ;;  %v9027_v54 = vshll.u32 %v8852_v2, 16 }
 0x30f   : > { %13372 = vmatprep.subr.bf16.mxu1 %v14021_v59  ;;  %13203 = vmatmul.mubr.bf16.gmra.mrb[20].mxu0 %v17995_v43  ;;  %v8983_v39 = vrot.slane %v8982_v10, 4  ;;  %v9007_v62 = vrot.slane %v9006_v22, 4  ;;  %v9021_v30 = vrot.slane %v9019_v60, 5  ;;  %v317_v26 = vsel %vm15199_vm15, 0, %v316_v46  ;;  %v12310_v43 = vld [vmem:[%s14141_s20 + $0x74] sm:$0x1]  ;;  %vm17997_vm15 = vmmov %vm17897_vm0 }
 0x310   : > { %13206 = vmatprep.mubr.bf16.mxu0 %v11944_v16  ;;  %v6961_v19 = vrot.slane %v16962_v25, 5  ;;  %v9033_v28 = vshll.u32 %v17306_v50, 16  ;;  %v9037_v27 = vshrl.u32 %v17306_v50, 16  ;;  %v9043_v45 = vshll.u32 %v17309_v63, 16  ;;  %318 = vst [vmem:[#allocation2 + $0xd4] sm:$0x1] %v317_v26 }
 0x311   : > { %13357 = vmatmul.mubr.bf16.gmra.mrb[44].mxu1 %v14023_v42  ;;  %v11945_v16 = vcombine.low %v6945_v35, %v6948_v47  ;;  %v8998_v44 = vsel %vm14180_vm5, %v8993_v1, %v8997_v33  ;;  %v6955_v11 = vsel %vm14134_vm2, %v6953_v15, %v6954_v55  ;;  %v11923_v57 = vrot.slane %v6882_v9, 9  ;;  %v14026_v25 = vld [vmem:[%s17851_s2 + $0x140] sm:$0xff]   ;;  %v17355_v33 = vld [vmem:[#allocation2 + $0x78] sm:$0xe]  ;;  %v12308_v15 = vld [vmem:[%s14141_s20 + $0x6c] sm:$0xf] }
 0x312   : > { %13373 = vmatpush3.bf16.msra.mxu1 %v14021_v59  ;;  %13376 = vmatprep.mubr.bf16.mxu1 %v17141_v31  ;;  %v9022_v59 = vsel %vm14180_vm5, %v9017_v34, %v9021_v30  ;;  %v17334_v31 = vsel %vm14134_vm2, %v6960_v37, %v6961_v19  ;;  %v9026_v10 = vrot.slane %v9024_v56, 4  ;;  %v9029_v22 = vrot.slane %v9027_v54, 5  ;;  %v12309_v55 = vld [vmem:[%s14141_s20 + $0x70] sm:$0xf]  ;;  %v14027_v34 = vld [vmem:[%s17851_s2 + $0x148] sm:$0xff]  }
 0x313   : > { %13374 = vmatprep.subr.bf16.mxu1 %v14024_v38  ;;  %v8988_v60 = vsel %vm14180_vm5, %v8983_v39, %v17262_v17  ;;  %v6952_v2 = vsel %vm14134_vm2, %v11922_v52, %v6951_v5  ;;  %v9012_v42 = vsel %vm14180_vm5, %v9007_v62, %v17269_v58  ;;  %v17346_v35 = vsel %vm14134_vm2, %v11923_v57, %v6958_v12  ;;  %v12311_v46 = vld [vmem:[%s14141_s20 + $0x78] sm:$0xf]  ;;  %v12313_v57 = vld [vmem:[%s14141_s20 + $0x80] sm:$0x1] }
 0x314   : > { %v17348_v47 = vrot.slane %v9033_v28, 5  ;;  %v17350_v9 = vrot.slane %v9037_v27, 4  ;;  %v17352_v1 = vrot.slane %v9043_v45, 5  ;;  %v12164_v17 = vrot.slane %v17325_v20, 9  ;;  %v12312_v45 = vld [vmem:[%s14141_s20 + $0x7c] sm:$0xf] }
 0x315   : > { %v17357_v5 = vcombine.low %v8988_v60, %v8998_v44  ;;  %v11946_v52 = vcombine.low %v6952_v2, %v6955_v11  ;;  %v17359_v58 = vcombine.low %v9012_v42, %v9022_v59  ;;  %v11947_v12 = vcombine.low %v17346_v35, %v17334_v31  ;;  %v17383_v20 = vld [vmem:[#allocation2 + $0x84] sm:$0xe] }
 0x316   : > { %13375 = vmatpush3.bf16.msra.mxu1 %v14024_v38  ;;  %v9030_v37 = vor.u32 %v9029_v22, %v9026_v10  ;;  %v10558_v38 = vshrl.u32 %v12308_v15, 16  ;;  %v10561_v56 = vshll.u32 %v12308_v15, 16  ;;  %v10567_v54 = vshll.u32 %v12309_v55, 16 }
 0x317   : > { %13392 = vmatprep.subr.bf16.mxu1 %v14026_v25  ;;  %13207 = vmatmul.mubr.bf16.gmra.mrb[24].mxu0 %v11945_v16  ;;  %v9290_v39 = vrot.slane %v16970_v7, 5  ;;  %v10571_v62 = vshrl.u32 %v12309_v55, 16  ;;  %v10577_v30 = vshll.u32 %v12310_v43, 16  ;;  %v10582_v6 = vshrl.u32 %v12311_v46, 16  ;;  %v12314_v43 = vld [vmem:[%s14141_s20 + $0x84] sm:$0xf] }
 0x318   : > { %13210 = vmatprep.mubr.bf16.mxu0 %v11946_v52  ;;  %v9293_v26 = vrot.slane %v17045_v32, 5  ;;  %v12165_v19 = vrot.slane %v17355_v33, 9  ;;  %v10560_v28 = vrot.slane %v10558_v38, 4  ;;  %v10563_v27 = vrot.slane %v10561_v56, 5  ;;  %v14029_v38 = vld [vmem:[%s17851_s2 + $0x158] sm:$0xff]  }
 0x319   : > { %13377 = vmatmul.mubr.bf16.vlgmr.msra.gmra.mrb[32].mxu1 %v17195_v36  ;;  %v9040_v16 = vor.u32 %v17350_v9, %v17348_v47  ;;  %v9297_v7 = vrot.slane %v17023_v61, 5  ;;  %v10569_v44 = vrot.slane %v10567_v54, 5  ;;  %v10573_v11 = vrot.slane %v10571_v62, 4  ;;  %v14028_v36 = vld [vmem:[%s17851_s2 + $0x150] sm:$0xff]  }
 0x31a   : > { %13393 = vmatpush3.bf16.msra.mxu1 %v14026_v25  ;;  %13380 = vmatprep.mubr.bf16.mxu1 %v17274_v24  ;;  %v10564_v59 = vor.u32 %v10563_v27, %v10560_v28  ;;  %v10584_v31 = vrot.slane %v10582_v6, 4  ;;  %v10585_v25 = vshll.u32 %v12311_v46, 16  ;;  %v10591_v24 = vshll.u32 %v12312_v45, 16  ;;  %v12315_v46 = vld [vmem:[%s14141_s20 + $0x88] sm:$0xf] }
 0x31b   : > { %13394 = vmatprep.subr.bf16.mxu1 %v14027_v34  ;;  %v10574_v10 = vor.u32 %v10573_v11, %v10569_v44  ;;  %v10579_v22 = vrot.slane %v10577_v30, 5  ;;  %v10595_v60 = vshrl.u32 %v12312_v45, 16  ;;  %v10601_v2 = vshll.u32 %v12313_v57, 16 }
 0x31c   : > { %v9300_v61 = vrot.slane %v17082_v14, 5  ;;  %v10565_v42 = vrot.slane %v10564_v59, 4  ;;  %v10587_v35 = vrot.slane %v10585_v25, 5  ;;  %v10593_v9 = vrot.slane %v10591_v24, 5  ;;  %v12317_v59 = vld [vmem:[%s14141_s20 + $0x90] sm:$0xf] }
 0x31d   : > { %v17386_v33 = vrot.slane %v9030_v37, 4  ;;  %v12166_v52 = vrot.slane %v17383_v20, 9  ;;  %v10575_v15 = vrot.slane %v10574_v10, 4  ;;  %v10597_v55 = vrot.slane %v10595_v60, 4  ;;  %v12318_v25 = vld [vmem:[%s14141_s20 + $0x94] sm:$0xf] }
 0x31e   : > { %13395 = vmatpush3.bf16.msra.mxu1 %v14027_v34  ;;  %v17395_v56 = vsel %vm14134_vm2, %v12164_v17, %v9290_v39  ;;  %v9292_v54 = vrot.slane %v9290_v39, 4  ;;  %v10570_v34 = vsel %vm14180_vm5, %v10565_v42, %v10569_v44  ;;  %v10588_v37 = vor.u32 %v10587_v35, %v10584_v31  ;;  %v12316_v17 = vld [vmem:[%s14141_s20 + $0x8c] sm:$0x1]  ;;  %v12319_v60 = vld [vmem:[%s14141_s20 + $0x98] sm:$0x1] }
 0x31f   : > { %13396 = vmatprep.subr.bf16.mxu1 %v14028_v36  ;;  %13211 = vmatmul.mubr.bf16.gmra.mrb[28].mxu0 %v11947_v12  ;;  %v9304_v62 = vrot.slane %v17080_v23, 5  ;;  %v10580_v30 = vsel %vm14180_vm5, %v10575_v15, %v10579_v22  ;;  %v10598_v6 = vor.u32 %v10597_v55, %v10593_v9  ;;  %v10603_v28 = vrot.slane %v10601_v2, 5 }
 0x320   : > { %v12332_v12 = vcombine.low %v10570_v34, %v10580_v30  ;;  %v10589_v27 = vrot.slane %v10588_v37, 4  ;;  %v10606_v45 = vshrl.u32 %v12314_v43, 16  ;;  %v10609_v39 = vshll.u32 %v12314_v43, 16 }
 0x321   : > { %13381 = vmatmul.mubr.bf16.gmra.mrb[36].mxu1 %v17276_v8  ;;  %v17406_v44 = vrot.slane %v9040_v16, 4  ;;  %v17410_v23 = vsel %vm14134_vm2, %v12165_v19, %v9297_v7  ;;  %v10599_v11 = vrot.slane %v10598_v6, 4  ;;  %v10615_v57 = vshll.u32 %v12315_v46, 16  ;;  %v14030_v8 = vld [vmem:[%s17851_s2 + $0x160] sm:$0xff]  }
 0x322   : > { %13397 = vmatpush3.bf16.msra.mxu1 %v14028_v36  ;;  %13384 = vmatprep.mubr.bf16.mxu1 %v17300_v29  ;;  %v10594_v29 = vsel %vm14180_vm5, %v10589_v27, %v10593_v9  ;;  %v10608_v16 = vrot.slane %v10606_v45, 4  ;;  %v10611_v36 = vrot.slane %v10609_v39, 5  ;;  %v10619_v31 = vshrl.u32 %v12315_v46, 16 }
 0x323   : > { %13398 = vmatprep.subr.bf16.mxu1 %v14029_v38  ;;  %13522 = vmatprep.mubr.msk.bf16.mxu0 %vm17997_vm15, %v12332_v12  ;;  %v9299_v19 = vrot.slane %v9297_v7, 4  ;;  %v10604_v24 = vsel %vm14180_vm5, %v10599_v11, %v10603_v28  ;;  %v10617_v10 = vrot.slane %v10615_v57, 5  ;;  %v10625_v22 = vshll.u32 %v12316_v17, 16  ;;  %v14031_v7 = vld [vmem:[%s17851_s2 + $0x168] sm:$0xff]   ;;  %v12320_v11 = vld [vmem:[%s14141_s20 + $0x9c] sm:$0xf] }
 0x324   : > { %v9036_v2 = vsel %vm14180_vm5, %v17386_v33, %v17348_v47  ;;  %v12333_v42 = vcombine.low %v10594_v29, %v10604_v24  ;;  %v10612_v35 = vor.u32 %v10611_v36, %v10608_v16  ;;  %v10621_v15 = vrot.slane %v10619_v31, 4 }
 0x325   : > { %v10627_v9 = vrot.slane %v10625_v22, 5  ;;  %v10630_v55 = vshrl.u32 %v12317_v59, 16  ;;  %v10633_v43 = vshll.u32 %v12317_v59, 16  ;;  %v10639_v34 = vshll.u32 %v12318_v25, 16 }
 0x326   : > { %13399 = vmatpush3.bf16.msra.mxu1 %v14029_v38  ;;  %v10613_v37 = vrot.slane %v10612_v35, 4  ;;  %v10622_v46 = vor.u32 %v10621_v15, %v10617_v10  ;;  %v10643_v30 = vshrl.u32 %v12318_v25, 16  ;;  %v10649_v6 = vshll.u32 %v12319_v60, 16  ;;  %v12322_v25 = vld [vmem:[%s14141_s20 + $0xa4] sm:$0x1] }
 0x327   : > { %13400 = vmatprep.subr.bf16.mxu1 %v14030_v8  ;;  %13523 = vmatmul.mubr.msk.bf16.vlgmr.msra.gmra.mrb[32].mxu0 %vm17998_vm9, %v12333_v42  ;;  %v9306_v47 = vrot.slane %v9304_v62, 4  ;;  %v10632_v33 = vrot.slane %v10630_v55, 4  ;;  %v10635_v28 = vrot.slane %v10633_v43, 5  ;;  %v10641_v38 = vrot.slane %v10639_v34, 5  ;;  %v12325_v35 = vld [vmem:[%s14141_s20 + $0xb0] sm:$0x1] }
 0x328   : > { %v9294_v12 = vsel %vm14134_vm2, %v9292_v54, %v9293_v26  ;;  %v10618_v27 = vsel %vm14180_vm5, %v10613_v37, %v10617_v10  ;;  %v10623_v17 = vrot.slane %v10622_v46, 4  ;;  %v10645_v45 = vrot.slane %v10643_v30, 4  ;;  %v17450_v26 = vld [vmem:[#allocation2 + $0x90] sm:$0xe]  ;;  %v12323_v10 = vld [vmem:[%s14141_s20 + $0xa8] sm:$0xf] }
 0x329   : > { %13385 = vmatmul.mubr.bf16.gmra.mrb[40].mxu1 %v17357_v5  ;;  %v9046_v39 = vsel %vm14180_vm5, %v17406_v44, %v17352_v1  ;;  %v17447_v32 = vsel %vm14134_vm2, %v12166_v52, %v9304_v62  ;;  %v9307_v5 = vrot.slane %v17151_v4, 5  ;;  %v10636_v54 = vor.u32 %v10635_v28, %v10632_v33  ;;  %v12321_v62 = vld [vmem:[%s14141_s20 + $0xa0] sm:$0xf]  ;;  %v9260_v30 = vld [vmem:[#allocation2 + $0x9c] sm:$0xe] }
 0x32a   : > { %13401 = vmatpush3.bf16.msra.mxu1 %v14030_v8  ;;  %13388 = vmatprep.mubr.bf16.mxu1 %v17359_v58  ;;  %v14032_v58 = vld [vmem:[%s17851_s2 + $0x170] sm:$0xff]   ;;  %v17460_v1 = vsel %vm14134_vm2, %v9299_v19, %v9300_v61  ;;  %v10628_v20 = vsel %vm14180_vm5, %v10623_v17, %v10627_v9  ;;  %v10646_v52 = vor.u32 %v10645_v45, %v10641_v38  ;;  %v10651_v4 = vrot.slane %v10649_v6, 5  ;;  %v14033_v61 = vld [vmem:[%s17851_s2 + $0x178] sm:$0xff]  }
 0x32b   : > { %13402 = vmatprep.subr.bf16.mxu1 %v14031_v7  ;;  %v12188_v44 = vcombine.low %v17395_v56, %v9294_v12  ;;  %v17468_v57 = vsel %vm14134_vm2, %v9306_v47, %v9307_v5  ;;  %v12334_v59 = vcombine.low %v10618_v27, %v10628_v20  ;;  %v10637_v14 = vrot.slane %v10636_v54, 4 }
 0x32c   : > { %v12155_v8 = vcombine.low %v9036_v2, %v9046_v39  ;;  %v12167_v29 = vrot.slane %v17450_v26, 9  ;;  %v10647_v16 = vrot.slane %v10646_v52, 4  ;;  %v10654_v36 = vshrl.u32 %v12320_v11, 16 }
 0x32d   : > { %v12189_v56 = vcombine.low %v17410_v23, %v17460_v1  ;;  %13526 = vmatprep.mubr.msk.bf16.mxu0 %vm17999_vm10, %v12334_v59  ;;  %v10642_v31 = vsel %vm14180_vm5, %v10637_v14, %v10641_v38  ;;  %v10657_v19 = vshll.u32 %v12320_v11, 16  ;;  %v10663_v24 = vshll.u32 %v12321_v62, 16  ;;  %v12324_v23 = vld [vmem:[%s14141_s20 + $0xac] sm:$0xf] }
 0x32e   : > { %13403 = vmatpush3.bf16.msra.mxu1 %v14031_v7  ;;  %v12190_v22 = vcombine.low %v17447_v32, %v17468_v57  ;;  %v9311_v60 = vrot.slane %v17114_v40, 5  ;;  %v10652_v2 = vsel %vm14180_vm5, %v10647_v16, %v10651_v4  ;;  %v10656_v42 = vrot.slane %v10654_v36, 4 }
 0x32f   : > { %13404 = vmatprep.subr.bf16.mxu1 %v14032_v58  ;;  %v9318_v15 = vrot.slane %v17153_v51, 5  ;;  %v12335_v9 = vcombine.low %v10642_v31, %v10652_v2  ;;  %v10659_v55 = vrot.slane %v10657_v19, 5  ;;  %v10665_v43 = vrot.slane %v10663_v24, 5  ;;  %v14034_v51 = vld [vmem:[%s17851_s2 + $0x180] sm:$0xff]   ;;  %v12328_v19 = vld [vmem:[%s14141_s20 + $0xbc] sm:$0x1] }
 0x330   : > { %v10667_v34 = vshrl.u32 %v12321_v62, 16  ;;  %v10673_v7 = vshll.u32 %v12322_v25, 16  ;;  %v10678_v37 = vshrl.u32 %v12323_v10, 16  ;;  %v10681_v46 = vshll.u32 %v12323_v10, 16  ;;  %v12327_v25 = vld [vmem:[%s14141_s20 + $0xb8] sm:$0xf] }
 0x331   : > { %13389 = vmatmul.mubr.bf16.gmra.mrb[44].mxu1 %v12155_v8  ;;  %v10660_v40 = vor.u32 %v10659_v55, %v10656_v42  ;;  %v10687_v6 = vshll.u32 %v12324_v23, 16  ;;  %v10691_v47 = vshrl.u32 %v12324_v23, 16  ;;  %v10697_v33 = vshll.u32 %v12325_v35, 16  ;;  %13527 = vmatmul.mubr.msk.bf16.gmra.mrb[36].mxu0 %vm18000_vm11, %v12335_v9  ;;  %v14036_v2 = vld [vmem:[%s17851_s2 + $0x190] sm:$0xff]   ;;  %v12330_v9 = vld [vmem:[%s14141_s20 + $0xc4] sm:$0xf] }
 0x332   : > { %13405 = vmatpush3.bf16.msra.mxu1 %v14032_v58  ;;  %13408 = vmatprep.mubr.bf16.mxu1 %v12188_v44  ;;  %v9313_v28 = vrot.slane %v9311_v60, 4  ;;  %v10669_v38 = vrot.slane %v10667_v34, 4  ;;  %v10680_v12 = vrot.slane %v10678_v37, 4  ;;  %v10683_v27 = vrot.slane %v10681_v46, 5  ;;  %v12326_v58 = vld [vmem:[%s14141_s20 + $0xb4] sm:$0xf] }
 0x333   : > { %13406 = vmatprep.subr.bf16.mxu1 %v14033_v61  ;;  %v9314_v17 = vrot.slane %v17166_v49, 5  ;;  %v10661_v45 = vrot.slane %v10660_v40, 4  ;;  %v10689_v39 = vrot.slane %v10687_v6, 5  ;;  %v10693_v32 = vrot.slane %v10691_v47, 4  ;;  %v14035_v49 = vld [vmem:[%s17851_s2 + $0x188] sm:$0xff]   ;;  %v14037_v47 = vld [vmem:[%s17851_s2 + $0x198] sm:$0xff]  }
 0x334   : > { %v12168_v5 = vrot.slane %v9260_v30, 9  ;;  %v10670_v26 = vor.u32 %v10669_v38, %v10665_v43  ;;  %v10675_v54 = vrot.slane %v10673_v7, 5  ;;  %v10684_v11 = vor.u32 %v10683_v27, %v10680_v12  ;;  %v12331_v46 = vld [vmem:[%s14141_s20 + $0xc8] sm:$0x1]  ;;  %v9261_v38 = vld [vmem:[#allocation2 + $0xa8] sm:$0xe] }
 0x335   : > { %v9312_v1 = vsel %vm14134_vm2, %v12167_v29, %v9311_v60  ;;  %v9320_v20 = vrot.slane %v9318_v15, 4  ;;  %v10694_v52 = vor.u32 %v10693_v32, %v10689_v39  ;;  %v10699_v4 = vrot.slane %v10697_v33, 5  ;;  %v12329_v60 = vld [vmem:[%s14141_s20 + $0xc0] sm:$0xf] }
 0x336   : > { %13407 = vmatpush3.bf16.msra.mxu1 %v14033_v61  ;;  %v9315_v62 = vsel %vm14134_vm2, %v9313_v28, %v9314_v17  ;;  %v10666_v44 = vsel %vm14180_vm5, %v10661_v45, %v10665_v43  ;;  %v10671_v57 = vrot.slane %v10670_v26, 4  ;;  %v10685_v59 = vrot.slane %v10684_v11, 4  ;;  %v9262_v26 = vld [vmem:[#allocation2 + $0xb4] sm:$0xe] }
 0x337   : > { %13424 = vmatprep.subr.bf16.mxu1 %v14034_v51  ;;  %v9321_v14 = vrot.slane %v17199_v3, 5  ;;  %v9325_v8 = vrot.slane %v17213_v48, 5  ;;  %v10695_v61 = vrot.slane %v10694_v52, 4  ;;  %v10702_v29 = vshrl.u32 %v12326_v58, 16 }
 0x338   : > { %v9319_v16 = vsel %vm14134_vm2, %v12168_v5, %v9318_v15  ;;  %v10676_v36 = vsel %vm14180_vm5, %v10671_v57, %v10675_v54  ;;  %v10690_v31 = vsel %vm14180_vm5, %v10685_v59, %v10689_v39  ;;  %v10705_v24 = vshll.u32 %v12326_v58, 16 }
 0x339   : > { %13409 = vmatmul.mubr.bf16.vlgmr.msra.gmra.mrb[32].mxu1 %v12189_v56  ;;  %v12191_v3 = vcombine.low %v9312_v1, %v9315_v62  ;;  %v12336_v10 = vcombine.low %v10666_v44, %v10676_v36  ;;  %v10700_v56 = vsel %vm14180_vm5, %v10695_v61, %v10699_v4  ;;  %v9322_v42 = vsel %vm14134_vm2, %v9320_v20, %v9321_v14 }
 0x33a   : > { %13425 = vmatpush3.bf16.msra.mxu1 %v14034_v51  ;;  %13412 = vmatprep.mubr.bf16.mxu1 %v12190_v22  ;;  %v12337_v23 = vcombine.low %v10690_v31, %v10700_v56  ;;  %v10704_v35 = vrot.slane %v10702_v29, 4  ;;  %v10707_v15 = vrot.slane %v10705_v24, 5  ;;  %v9327_v22 = vrot.slane %v9325_v8, 4  ;;  %v14039_v24 = vld [vmem:[%s17851_s2 + $0x1a8] sm:$0xff]  }
 0x33b   : > { %13426 = vmatprep.subr.bf16.mxu1 %v14035_v49  ;;  %13530 = vmatprep.mubr.msk.bf16.mxu0 %vm18001_vm13, %v12336_v10  ;;  %v10711_v55 = vshll.u32 %v12327_v25, 16  ;;  %v10715_v43 = vshrl.u32 %v12327_v25, 16  ;;  %v10721_v34 = vshll.u32 %v12328_v19, 16  ;;  %v9332_v7 = vrot.slane %v17228_v21, 5 }
 0x33c   : > { %13531 = vmatmul.mubr.msk.bf16.gmra.mrb[40].mxu0 %vm18002_vm14, %v12337_v23  ;;  %v10708_v37 = vor.u32 %v10707_v15, %v10704_v35  ;;  %v10726_v30 = vshrl.u32 %v12329_v60, 16  ;;  %v10729_v40 = vshll.u32 %v12329_v60, 16  ;;  %v12192_v6 = vcombine.low %v9319_v16, %v9322_v42  ;;  %v9263_v60 = vld [vmem:[#allocation2 + $0xc0] sm:$0xe] }
 0x33d   : > { %v10713_v33 = vrot.slane %v10711_v55, 5  ;;  %v10717_v51 = vrot.slane %v10715_v43, 4  ;;  %v10735_v28 = vshll.u32 %v12330_v9, 16  ;;  %v10739_v17 = vshrl.u32 %v12330_v9, 16  ;;  %v14041_v9 = vld [vmem:[#allocation2 + $0x78] sm:$0xff]   ;;  %v14044_v55 = vld [vmem:[#allocation2 + $0x84] sm:$0xff]  }
 0x33e   : > { %13427 = vmatpush3.bf16.msra.mxu1 %v14035_v49  ;;  %v10709_v12 = vrot.slane %v10708_v37, 4  ;;  %v10728_v27 = vrot.slane %v10726_v30, 4  ;;  %v10731_v21 = vrot.slane %v10729_v40, 5  ;;  %v10723_v39 = vrot.slane %v10721_v34, 5  ;;  %v14038_v49 = vld [vmem:[%s17851_s2 + $0x1a0] sm:$0xff]   ;;  %v14046_v43 = vld [vmem:[%s17851_s2 + $0x1c8] sm:$0xff]  }
 0x33f   : > { %13428 = vmatprep.subr.bf16.mxu1 %v14036_v2  ;;  %v10718_v45 = vor.u32 %v10717_v51, %v10713_v33  ;;  %v10737_v32 = vrot.slane %v10735_v28, 5  ;;  %v10745_v5 = vshll.u32 %v12331_v46, 16  ;;  %v9334_v54 = vrot.slane %v9332_v7, 4  ;;  %v14045_v34 = vld [vmem:[#allocation2 + $0x90] sm:$0xff]   ;;  %v9795_v37 = vld [vmem:[#allocation2 + $0x78] sm:$0xf] }
 0x340   : > { %v10732_v11 = vor.u32 %v10731_v21, %v10728_v27  ;;  %v10741_v58 = vrot.slane %v10739_v17, 4  ;;  %v12169_v1 = vrot.slane %v9261_v38, 9  ;;  %v9328_v20 = vrot.slane %v17267_v41, 5  ;;  %v14047_v46 = vld [vmem:[%s17851_s2 + $0x1d0] sm:$0xff]   ;;  %v17585_v51 = vld [vmem:[#allocation2 + $0x88] sm:$0xf] }
 0x341   : > { %13413 = vmatmul.mubr.bf16.gmra.mrb[36].mxu1 %v12191_v3  ;;  %v10714_v52 = vsel %vm14180_vm5, %v10709_v12, %v10713_v33  ;;  %v10719_v4 = vrot.slane %v10718_v45, 4  ;;  %v9335_v62 = vrot.slane %v17280_v13, 5  ;;  %v10747_v59 = vrot.slane %v10745_v5, 5  ;;  %v14048_v28 = vld [vmem:[#allocation2 + $0x9c] sm:$0xff]   ;;  %v14049_v17 = vld [vmem:[#allocation2 + $0xa8] sm:$0xff]  }
 0x342   : > { %13429 = vmatpush3.bf16.msra.mxu1 %v14036_v2  ;;  %13416 = vmatprep.mubr.bf16.mxu1 %v12192_v6  ;;  %v10733_v44 = vrot.slane %v10732_v11, 4  ;;  %v10742_v57 = vor.u32 %v10741_v58, %v10737_v32  ;;  %v9329_v14 = vsel %vm14134_vm2, %v9327_v22, %v9328_v20  ;;  %v12170_v61 = vrot.slane %v9262_v26, 9  ;;  %v14040_v2 = vld [vmem:[%s17851_s2 + $0x1b0] sm:$0xff]   ;;  %v14043_v22 = vld [vmem:[%s17851_s2 + $0x1c0] sm:$0xff]   ;;  %v14050_v38 = vld [vmem:[%s17851_s2 + $0x1d8] sm:$0xff]  }
 0x343   : > { %13430 = vmatprep.subr.bf16.mxu1 %v14037_v47  ;;  %v9339_v41 = vrot.slane %v17306_v50, 5  ;;  %v10724_v29 = vsel %vm14180_vm5, %v10719_v4, %v10723_v39  ;;  %v9336_v16 = vsel %vm14134_vm2, %v9334_v54, %v9335_v62  ;;  %v9326_v25 = vsel %vm14134_vm2, %v12169_v1, %v9325_v8  ;;  %v9798_v6 = vld [vmem:[#allocation2 + $0x84] sm:$0xf]  ;;  %v17592_v45 = vld [vmem:[#allocation2 + $0x80] sm:$0x1] }
 0x344   : > { %v12338_v36 = vcombine.low %v10714_v52, %v10724_v29  ;;  %v10738_v31 = vsel %vm14180_vm5, %v10733_v44, %v10737_v32  ;;  %v10743_v13 = vrot.slane %v10742_v57, 4  ;;  %v12193_v19 = vcombine.low %v9326_v25, %v9329_v14  ;;  %v17596_v11 = vld [vmem:[#allocation2 + $0x94] sm:$0xf]  ;;  %v9801_v58 = vld [vmem:[#allocation2 + $0x90] sm:$0xf]  ;;  %v14051_v1 = vld [vmem:[%s17851_s2 + $0x1e0] sm:$0xff]  }
 0x345   : > { %v9333_v50 = vsel %vm14134_vm2, %v12170_v61, %v9332_v7  ;;  %v9341_v56 = vrot.slane %v9339_v41, 4  ;;  %v9342_v8 = vrot.slane %v17309_v63, 5  ;;  %v12171_v42 = vrot.slane %v9263_v60, 9  ;;  %v14042_v63 = vld [vmem:[%s17851_s2 + $0x1b8] sm:$0xff]   ;;  %v17607_v14 = vld [vmem:[#allocation2 + $0x8c] sm:$0x1] }
 0x346   : > { %13431 = vmatpush3.bf16.msra.mxu1 %v14037_v47  ;;  %13534 = vmatprep.mubr.msk.bf16.mxu0 %vm17897_vm0, %v12338_v36  ;;  %v10748_v3 = vsel %vm14180_vm5, %v10743_v13, %v10747_v59  ;;  %v12194_v10 = vcombine.low %v9333_v50, %v9336_v16  ;;  %v17578_v7 = vld [vmem:[#allocation2 + $0x7c] sm:$0xf]  ;;  %v9820_v47 = vshrl.u32 %v9795_v37, 16  ;;  %v9823_v33 = vshll.u32 %v9795_v37, 16  ;;  %v14052_v16 = vld [vmem:[#allocation2 + $0xb4] sm:$0xff]   ;;  %v14054_v36 = vld [vmem:[%s17851_s2 + $0x1e8] sm:$0xff]  }
 0x347   : > { %13432 = vmatprep.subr.bf16.mxu1 %v14038_v49  ;;  %v12339_v48 = vcombine.low %v10738_v31, %v10748_v3  ;;  %v9343_v23 = vsel %vm14134_vm2, %v9341_v56, %v9342_v8  ;;  %v9340_v35 = vsel %vm14134_vm2, %v12171_v42, %v9339_v41  ;;  %v9829_v30 = vshll.u32 %v17578_v7, 16  ;;  %v9804_v25 = vld [vmem:[#allocation2 + $0x9c] sm:$0xf]  ;;  %v17616_v56 = vld [vmem:[#allocation2 + $0xa0] sm:$0xf] }
 0x348   : > { %v12195_v15 = vcombine.low %v9340_v35, %v9343_v23  ;;  %v9833_v40 = vshrl.u32 %v17578_v7, 16  ;;  %v9844_v21 = vshrl.u32 %v9798_v6, 16  ;;  %v9853_v39 = vshll.u32 %v17585_v51, 16  ;;  %v17618_v42 = vld [vmem:[#allocation2 + $0xac] sm:$0xf] }
 0x349   : > { %13417 = vmatmul.mubr.bf16.gmra.mrb[40].mxu1 %v12193_v19  ;;  %13535 = vmatmul.mubr.msk.bf16.gmra.mrb[44].mxu0 %vm18003_vm1, %v12339_v48  ;;  %v17590_v12 = vrot.slane %v9829_v30, 5  ;;  %v9857_v32 = vshrl.u32 %v17585_v51, 16  ;;  %v9822_v5 = vrot.slane %v9820_v47, 4  ;;  %v9825_v26 = vrot.slane %v9823_v33, 5  ;;  %v14053_v19 = vld [vmem:[#allocation2 + $0xc0] sm:$0xff]  }
 0x34a   : > { %13433 = vmatpush3.bf16.msra.mxu1 %v14038_v49  ;;  %13420 = vmatprep.mubr.bf16.mxu1 %v12194_v10  ;;  %v9835_v27 = vrot.slane %v9833_v40, 4  ;;  %v9847_v54 = vshll.u32 %v9798_v6, 16  ;;  %v9839_v52 = vshll.u32 %v17592_v45, 16  ;;  %v9846_v4 = vrot.slane %v9844_v21, 4  ;;  %v9807_v37 = vld [vmem:[#allocation2 + $0xa8] sm:$0xf] }
 0x34b   : > { %13434 = vmatprep.subr.bf16.mxu1 %v14039_v24  ;;  %v17603_v49 = vrot.slane %v9853_v39, 5  ;;  %v9859_v62 = vrot.slane %v9857_v32, 4  ;;  %v9877_v44 = vshll.u32 %v17596_v11, 16  ;;  %v9881_v57 = vshrl.u32 %v17596_v11, 16  ;;  %v14056_v40 = vld [vmem:[#allocation2 + $0xcc] sm:$0xff]   ;;  %v14057_v32 = vld [vmem:[%s17851_s2 + $0x1f8] sm:$0xff]  }
 0x34c   : > { %v9836_v20 = vor.u32 %v9835_v27, %v17590_v12  ;;  %v9826_v59 = vor.u32 %v9825_v26, %v9822_v5  ;;  %v9849_v61 = vrot.slane %v9847_v54, 5  ;;  %v9868_v41 = vshrl.u32 %v9801_v58, 16  ;;  %v17636_v21 = vld [vmem:[#allocation2 + $0xa4] sm:$0x1] }
 0x34d   : > { %v9871_v29 = vshll.u32 %v9801_v58, 16  ;;  %v9841_v13 = vrot.slane %v9839_v52, 5  ;;  %v9860_v50 = vor.u32 %v9859_v62, %v17603_v49  ;;  %v17614_v3 = vrot.slane %v9877_v44, 5  ;;  %v17647_v62 = vld [vmem:[#allocation2 + $0xb8] sm:$0xf] }
 0x34e   : > { %13435 = vmatpush3.bf16.msra.mxu1 %v14039_v24  ;;  %v9837_v31 = vrot.slane %v9836_v20, 4  ;;  %v9863_v24 = vshll.u32 %v17607_v14, 16  ;;  %v9883_v10 = vrot.slane %v9881_v57, 4  ;;  %v9827_v48 = vrot.slane %v9826_v59, 4 }
 0x34f   : > { %13436 = vmatprep.subr.bf16.mxu1 %v14040_v2  ;;  %v9850_v60 = vor.u32 %v9849_v61, %v9846_v4  ;;  %v9870_v8 = vrot.slane %v9868_v41, 4  ;;  %v9892_v23 = vshrl.u32 %v9804_v25, 16  ;;  %v9895_v35 = vshll.u32 %v9804_v25, 16  ;;  %v9810_v41 = vld [vmem:[#allocation2 + $0xb4] sm:$0xf] }
 0x350   : > { %v9929_v30 = vshrl.u32 %v17618_v42, 16  ;;  %v9832_v6 = vsel %vm14180_vm5, %v9827_v48, %v17590_v12  ;;  %v9865_v33 = vrot.slane %v9863_v24, 5  ;;  %v9916_v12 = vshrl.u32 %v9807_v37, 16  ;;  %v9813_v48 = vld [vmem:[#allocation2 + $0xc0] sm:$0xf] }
 0x351   : > { %13421 = vmatmul.mubr.bf16.gmra.mrb[44].mxu1 %v12195_v15  ;;  %v14055_v15 = vld [vmem:[%s17851_s2 + $0x1f0] sm:$0xff]   ;;  %v9851_v47 = vrot.slane %v9850_v60, 4  ;;  %v9897_v39 = vrot.slane %v9895_v35, 5  ;;  %v9919_v54 = vshll.u32 %v9807_v37, 16  ;;  %v9911_v61 = vshll.u32 %v17636_v21, 16 }
 0x352   : > { %13437 = vmatpush3.bf16.msra.mxu1 %v14040_v2  ;;  %13440 = vmatprep.mubr.bf16.mxu1 %v14041_v9  ;;  %v9873_v2 = vrot.slane %v9871_v29, 5  ;;  %v17625_v9 = vld [vmem:[#allocation2 + $0x98] sm:$0x1]  ;;  %v9931_v52 = vrot.slane %v9929_v30, 4  ;;  %v17653_v29 = vld [vmem:[#allocation2 + $0xc4] sm:$0xf] }
 0x353   : > { %13438 = vmatprep.subr.bf16.mxu1 %v14042_v63  ;;  %v9887_v27 = vshll.u32 %v17625_v9, 16  ;;  %v9856_v44 = vsel %vm14180_vm5, %v9851_v47, %v17603_v49  ;;  %v9918_v25 = vrot.slane %v9916_v12, 4  ;;  %v9949_v24 = vshll.u32 %v17647_v62, 16  ;;  %v9816_v30 = vld [vmem:[#allocation2 + $0xcc] sm:$0xf] }
 0x354   : > { %v9940_v60 = vshrl.u32 %v9810_v41, 16  ;;  %v9964_v37 = vshrl.u32 %v9813_v48, 16 }
 0x355   : > { %v9889_v57 = vrot.slane %v9887_v27, 5 }
 0x356   : > { %13439 = vmatpush3.bf16.msra.mxu1 %v14042_v63  ;;  %v9842_v63 = vsel %vm14180_vm5, %v9837_v31, %v9841_v13  ;;  %v17659_v13 = vld [vmem:[#allocation2 + $0xb0] sm:$0x1] }
 0x357   : > { %13456 = vmatprep.subr.bf16.mxu1 %v14043_v22 }
 0x359   : > { %13441 = vmatmul.mubr.bf16.vlgmr.msra.gmra.mrb[32].mxu1 %v14044_v55  ;;  %v9905_v55 = vshrl.u32 %v17616_v56, 16 }
 0x35a   : > { %13457 = vmatpush3.bf16.msra.mxu1 %v14043_v22  ;;  %13444 = vmatprep.mubr.bf16.mxu1 %v14045_v34  ;;  %v9901_v22 = vshll.u32 %v17616_v56, 16  ;;  %v9884_v34 = vor.u32 %v9883_v10, %v17614_v3  ;;  %v9953_v10 = vshrl.u32 %v17647_v62, 16 }
 0x35b   : > { %13458 = vmatprep.subr.bf16.mxu1 %v14046_v43  ;;  %v9907_v26 = vrot.slane %v9905_v55, 4  ;;  %v9935_v55 = vshll.u32 %v17659_v13, 16 }
 0x35c   : > { %v17641_v5 = vrot.slane %v9901_v22, 5  ;;  %v9913_v22 = vrot.slane %v9911_v61, 5 }
 0x35e   : > { %13459 = vmatpush3.bf16.msra.mxu1 %v14046_v43  ;;  %v9861_v43 = vrot.slane %v9860_v50, 4  ;;  %v9908_v31 = vor.u32 %v9907_v26, %v17641_v5  ;;  %v9991_v26 = vshll.u32 %v9816_v30, 16 }
 0x35f   : > { %13460 = vmatprep.subr.bf16.mxu1 %v14047_v46 }
 0x360   : > { %v9866_v58 = vsel %vm14180_vm5, %v9861_v43, %v9865_v33  ;;  %v17677_v33 = vrot.slane %v9949_v24, 5 }
 0x361   : > { %13445 = vmatmul.mubr.bf16.gmra.mrb[36].mxu1 %v14048_v28  ;;  %v9874_v28 = vor.u32 %v9873_v2, %v9870_v8  ;;  %v9943_v8 = vshll.u32 %v9810_v41, 16  ;;  %v9973_v2 = vshll.u32 %v17653_v29, 16  ;;  %v17694_v41 = vld [vmem:[#allocation2 + $0xc8] sm:$0x1] }
 0x362   : > { %13461 = vmatpush3.bf16.msra.mxu1 %v14047_v46  ;;  %13448 = vmatprep.mubr.bf16.mxu1 %v14049_v17  ;;  %v9925_v46 = vshll.u32 %v17618_v42, 16  ;;  %v9894_v17 = vrot.slane %v9892_v23, 4  ;;  %v9977_v23 = vshrl.u32 %v17653_v29, 16 }
 0x363   : > { %13462 = vmatprep.subr.bf16.mxu1 %v14050_v38  ;;  %v9875_v4 = vrot.slane %v9874_v28, 4  ;;  %v9942_v28 = vrot.slane %v9940_v60, 4  ;;  %v17679_v27 = vrot.slane %v9973_v2, 5  ;;  %v17707_v2 = vld [vmem:[#allocation2 + $0xd4] sm:$0x1] }
 0x364   : > { %v17645_v20 = vrot.slane %v9925_v46, 5  ;;  %v9898_v59 = vor.u32 %v9897_v39, %v9894_v17  ;;  %v9967_v46 = vshll.u32 %v9813_v48, 16  ;;  %v9979_v17 = vrot.slane %v9977_v23, 4  ;;  %v17681_v39 = vld [vmem:[#allocation2 + $0xbc] sm:$0x1] }
 0x365   : > { %v9880_v35 = vsel %vm14180_vm5, %v9875_v4, %v17614_v3  ;;  %v9955_v3 = vrot.slane %v9953_v10, 4  ;;  %v9966_v4 = vrot.slane %v9964_v37, 4  ;;  %v14061_v48 = vld [vmem:[%s17851_s2 + $0x218] sm:$0xff]  }
 0x366   : > { %13463 = vmatpush3.bf16.msra.mxu1 %v14050_v38  ;;  %v12252_v38 = vcombine.low %v9832_v6, %v9842_v63  ;;  %v9932_v50 = vor.u32 %v9931_v52, %v17645_v20  ;;  %v9899_v63 = vrot.slane %v9898_v59, 4  ;;  %v9909_v6 = vrot.slane %v9908_v31, 4 }
 0x367   : > { %13464 = vmatprep.subr.bf16.mxu1 %v14051_v1  ;;  %v9937_v52 = vrot.slane %v9935_v55, 5  ;;  %v9956_v61 = vor.u32 %v9955_v3, %v17677_v33  ;;  %v9959_v31 = vshll.u32 %v17681_v39, 16 }
 0x368   : > { %v9933_v47 = vrot.slane %v9932_v50, 4  ;;  %v9914_v59 = vsel %vm14180_vm5, %v9909_v6, %v9913_v22 }
 0x369   : > { %13449 = vmatmul.mubr.bf16.gmra.mrb[40].mxu1 %v14052_v16  ;;  %v14058_v16 = vld [vmem:[%s17851_s2 + $0x200] sm:$0xff]  }
 0x36a   : > { %13465 = vmatpush3.bf16.msra.mxu1 %v14051_v1  ;;  %13452 = vmatprep.mubr.bf16.mxu1 %v14053_v19  ;;  %v9885_v1 = vrot.slane %v9884_v34, 4  ;;  %v9921_v19 = vrot.slane %v9919_v54, 5 }
 0x36b   : > { %13466 = vmatprep.subr.bf16.mxu1 %v14054_v36 }
 0x36c   : > { %v9890_v49 = vsel %vm14180_vm5, %v9885_v1, %v9889_v57  ;;  %v9922_v34 = vor.u32 %v9921_v19, %v9918_v25  ;;  %v9904_v57 = vsel %vm14180_vm5, %v9899_v63, %v17641_v5  ;;  %v9980_v25 = vor.u32 %v9979_v17, %v17679_v27 }
 0x36d   : > { %v12254_v43 = vcombine.low %v9880_v35, %v9890_v49  ;;  %v9993_v49 = vrot.slane %v9991_v26, 5  ;;  %v12255_v24 = vcombine.low %v9904_v57, %v9914_v59  ;;  %v9957_v35 = vrot.slane %v9956_v61, 4 }
 0x36e   : > { %13467 = vmatpush3.bf16.msra.mxu1 %v14054_v36  ;;  %v12253_v36 = vcombine.low %v9856_v44, %v9866_v58  ;;  %v14060_v58 = vld [vmem:[%s17851_s2 + $0x210] sm:$0xff]   ;;  %v9923_v1 = vrot.slane %v9922_v34, 4  ;;  %v9969_v44 = vrot.slane %v9967_v46, 5  ;;  %v9981_v63 = vrot.slane %v9980_v25, 4  ;;  %v14062_v34 = vld [vmem:[%s17851_s2 + $0x220] sm:$0xff]  }
 0x36f   : > { %13468 = vmatprep.subr.bf16.mxu1 %v14055_v15  ;;  %v10268_v61 = vrot.slane %v17596_v11, 5  ;;  %v10264_v25 = vrot.slane %v17607_v14, 5  ;;  %v10271_v11 = vrot.slane %v17625_v9, 5 }
 0x370   : > { %v9928_v10 = vsel %vm14180_vm5, %v9923_v1, %v17645_v20  ;;  %v9970_v60 = vor.u32 %v9969_v44, %v9966_v4  ;;  %v10007_v20 = vshll.u32 %v17707_v2, 16  ;;  %v10220_v1 = vld [vmem:[#allocation2 + $0x78] sm:$0xe]  ;;  %v10261_v4 = vrot.slane %v17585_v51, 5  ;;  %v10221_v51 = vld [vmem:[#allocation2 + $0x84] sm:$0xe] }
 0x371   : > { %13453 = vmatmul.mubr.bf16.gmra.mrb[44].mxu1 %v14056_v40  ;;  %v17675_v40 = vld [vmem:[#allocation2 + $0xd0] sm:$0xf]  ;;  %v12268_v57 = vrot.slane %v10220_v1, 9 }
 0x372   : > { %13469 = vmatpush3.bf16.msra.mxu1 %v14055_v15  ;;  %13472 = vmatprep.mubr.bf16.mxu1 %v12252_v38  ;;  %v14059_v15 = vld [vmem:[%s17851_s2 + $0x208] sm:$0xff]   ;;  %v9945_v38 = vrot.slane %v9943_v8, 5  ;;  %v9997_v12 = vshll.u32 %v17675_v40, 16  ;;  %v10001_v54 = vshrl.u32 %v17675_v40, 16  ;;  %v9983_v8 = vshll.u32 %v17694_v41, 16 }
 0x373   : > { %13470 = vmatprep.subr.bf16.mxu1 %v14057_v32  ;;  %v9971_v37 = vrot.slane %v9970_v60, 4  ;;  %v10009_v17 = vrot.slane %v10007_v20, 5 }
 0x374   : > { %v9999_v50 = vrot.slane %v9997_v12, 5  ;;  %v10003_v5 = vrot.slane %v10001_v54, 4  ;;  %v9985_v46 = vrot.slane %v9983_v8, 5  ;;  %v14063_v12 = vld [vmem:[%s17851_s2 + $0x228] sm:$0xff]  }
 0x375   : > { %v9976_v26 = vsel %vm14180_vm5, %v9971_v37, %v17679_v27  ;;  %v14064_v27 = vld [vmem:[%s17851_s2 + $0x230] sm:$0xff]   ;;  %v10296_v37 = vrot.slane %v17653_v29, 5  ;;  %v10299_v29 = vrot.slane %v17694_v41, 5 }
 0x376   : > { %13471 = vmatpush3.bf16.msra.mxu1 %v14057_v32  ;;  %v9988_v32 = vshrl.u32 %v9816_v30, 16  ;;  %v9986_v6 = vsel %vm14180_vm5, %v9981_v63, %v9985_v46  ;;  %v10224_v63 = vld [vmem:[#allocation2 + $0xa8] sm:$0xe] }
 0x377   : > { %13488 = vmatprep.subr.bf16.mxu1 %v14058_v16  ;;  %v12258_v54 = vcombine.low %v9976_v26, %v9986_v6  ;;  %v12272_v20 = vrot.slane %v10224_v63, 9 }
 0x378   : > { %v9990_v19 = vrot.slane %v9988_v32, 4 }
 0x379   : > { %13473 = vmatmul.mubr.bf16.vlgmr.msra.gmra.mrb[32].mxu1 %v12253_v36  ;;  %v9946_v36 = vor.u32 %v9945_v38, %v9942_v28 }
 0x37a   : > { %13489 = vmatpush3.bf16.msra.mxu1 %v14058_v16  ;;  %13476 = vmatprep.mubr.bf16.mxu1 %v12254_v43  ;;  %v9938_v16 = vsel %vm14180_vm5, %v9933_v47, %v9937_v52  ;;  %v9994_v55 = vor.u32 %v9993_v49, %v9990_v19  ;;  %v10004_v43 = vor.u32 %v10003_v5, %v9999_v50  ;;  %v10254_v47 = vrot.slane %v17578_v7, 5  ;;  %v10222_v19 = vld [vmem:[#allocation2 + $0x90] sm:$0xe] }
 0x37b   : > { %13490 = vmatprep.subr.bf16.mxu1 %v14059_v15  ;;  %v12256_v23 = vcombine.low %v9928_v10, %v9938_v16  ;;  %v9947_v22 = vrot.slane %v9946_v36, 4  ;;  %v10257_v52 = vrot.slane %v17592_v45, 5  ;;  %v14065_v16 = vld [vmem:[%s17851_s2 + $0x238] sm:$0xff]   ;;  %v10263_v45 = vrot.slane %v10261_v4, 4 }
 0x37c   : > { %v9995_v28 = vrot.slane %v9994_v55, 4  ;;  %v10005_v38 = vrot.slane %v10004_v43, 4  ;;  %v10256_v7 = vrot.slane %v10254_v47, 4  ;;  %v10255_v53 = vsel %vm14134_vm2, %v12268_v57, %v10254_v47  ;;  %v10225_v47 = vld [vmem:[#allocation2 + $0xb4] sm:$0xe]  ;;  %v18004_v57 = vld [vmem:[#allocation18_spill] sm:$0xff] }
 0x37d   : > { %v9952_v3 = vsel %vm14180_vm5, %v9947_v22, %v17677_v33  ;;  %v12269_v49 = vrot.slane %v10221_v51, 9  ;;  %v10275_v5 = vrot.slane %v17616_v56, 5  ;;  %v10278_v56 = vrot.slane %v17636_v21, 5  ;;  %v18006_v51 = vld [vmem:[#allocation6_spill] sm:$0xff] }
 0x37e   : > { %13491 = vmatpush3.bf16.msra.mxu1 %v14059_v15  ;;  %v9961_v15 = vrot.slane %v9959_v31, 5  ;;  %v10000_v33 = vsel %vm14180_vm5, %v9995_v28, %v9999_v50  ;;  %v10258_v59 = vsel %vm14134_vm2, %v10256_v7, %v10257_v52  ;;  %v10270_v31 = vrot.slane %v10268_v61, 4  ;;  %v10226_v28 = vld [vmem:[#allocation2 + $0xc0] sm:$0xe] }
 0x37f   : > { %13492 = vmatprep.subr.bf16.mxu1 %v14060_v58  ;;  %v12292_v36 = vcombine.low %v10255_v53, %v10258_v59  ;;  %v10265_v50 = vsel %vm14134_vm2, %v10263_v45, %v10264_v25  ;;  %v10262_v14 = vsel %vm14134_vm2, %v12269_v49, %v10261_v4  ;;  %v10285_v22 = vrot.slane %v17659_v13, 5  ;;  %v18005_v53 = vld [vmem:[#allocation22_spill] sm:$0xff]  ;;  %v18007_v49 = vld [vmem:[#allocation8_spill] sm:$0xff] }
 0x380   : > { %v9962_v30 = vsel %vm14180_vm5, %v9957_v35, %v9961_v15  ;;  %v10272_v10 = vsel %vm14134_vm2, %v10270_v31, %v10271_v11  ;;  %v12293_v60 = vcombine.low %v10262_v14, %v10265_v50  ;;  %v10223_v35 = vld [vmem:[#allocation2 + $0x9c] sm:$0xe]  ;;  %v10289_v43 = vrot.slane %v17647_v62, 5 }
 0x381   : > { %13477 = vmatmul.mubr.bf16.gmra.mrb[36].mxu1 %v12255_v24  ;;  %v12257_v32 = vcombine.low %v9952_v3, %v9962_v30  ;;  %v12270_v24 = vrot.slane %v10222_v19, 9  ;;  %v10298_v3 = vrot.slane %v10296_v37, 4  ;;  %v10292_v62 = vrot.slane %v17681_v39, 5 }
 0x382   : > { %13493 = vmatpush3.bf16.msra.mxu1 %v14060_v58  ;;  %13480 = vmatprep.mubr.bf16.mxu1 %v12256_v23  ;;  %v10010_v58 = vsel %vm14180_vm5, %v10005_v38, %v10009_v17  ;;  %v10277_v23 = vrot.slane %v10275_v5, 4  ;;  %v10291_v6 = vrot.slane %v10289_v43, 4  ;;  %v10303_v38 = vrot.slane %v17675_v40, 5  ;;  %v10227_v17 = vld [vmem:[#allocation2 + $0xcc] sm:$0xe] }
 0x383   : > { %13494 = vmatprep.subr.bf16.mxu1 %v14061_v48  ;;  %v12259_v44 = vcombine.low %v10000_v33, %v10010_v58  ;;  %v10269_v9 = vsel %vm14134_vm2, %v12270_v24, %v10268_v61  ;;  %v12275_v33 = vrot.slane %v10227_v17, 9  ;;  %v10306_v39 = vrot.slane %v17707_v2, 5 }
 0x384   : > { %v12294_v8 = vcombine.low %v10269_v9, %v10272_v10  ;;  %v10279_v55 = vsel %vm14134_vm2, %v10277_v23, %v10278_v56  ;;  %v10293_v26 = vsel %vm14134_vm2, %v10291_v6, %v10292_v62  ;;  %v10305_v58 = vrot.slane %v10303_v38, 4  ;;  %v18008_v23 = vld [vmem:[#allocation5_spill] sm:$0xff] }
 0x385   : > { %v7556_v59 = vmax.f32 %v18004_v57, 0.0  ;;  %v7557_v31 = vmax.f32 %v18006_v51, 0.0  ;;  %v7555_v0 = vmax.f32 %v18007_v49, 0.0 }
 0x386   : > { %13495 = vmatpush3.bf16.msra.mxu1 %v14061_v48  ;;  %v10282_v48 = vrot.slane %v17618_v42, 5  ;;  %v12271_v42 = vrot.slane %v10223_v35, 9  ;;  %v10307_v52 = vsel %vm14134_vm2, %v10305_v58, %v10306_v39  ;;  %v7560_v35 = vmax.f32 %v18008_v23, 0.0  ;;  %v18013_v39 = vld [vmem:[#allocation15_spill] sm:$0xff] }
 0x387   : > { %13496 = vmatprep.subr.bf16.mxu1 %v14062_v34 }
 0x388   : > { %v10284_v15 = vrot.slane %v10282_v48, 4  ;;  %v10276_v46 = vsel %vm14134_vm2, %v12271_v42, %v10275_v5  ;;  %v10283_v21 = vsel %vm14134_vm2, %v12272_v20, %v10282_v48 }
 0x389   : > { %13481 = vmatmul.mubr.bf16.gmra.mrb[40].mxu1 %v12257_v32  ;;  %v12295_v30 = vcombine.low %v10276_v46, %v10279_v55  ;;  %v12273_v32 = vrot.slane %v10225_v47, 9 }
 0x38a   : > { %13497 = vmatpush3.bf16.msra.mxu1 %v14062_v34  ;;  %13484 = vmatprep.mubr.bf16.mxu1 %v12258_v54  ;;  %v10286_v34 = vsel %vm14134_vm2, %v10284_v15, %v10285_v22  ;;  %v10300_v54 = vsel %vm14134_vm2, %v10298_v3, %v10299_v29  ;;  %v18009_v22 = vld [vmem:[#allocation7_spill] sm:$0xff] }
 0x38b   : > { %13498 = vmatprep.subr.bf16.mxu1 %v14063_v12  ;;  %v12296_v13 = vcombine.low %v10283_v21, %v10286_v34  ;;  %v10290_v7 = vsel %vm14134_vm2, %v12273_v32, %v10289_v43  ;;  %v7558_v42 = vmax.f32 %v18009_v22, 0.0  ;;  %v18010_v34 = vld [vmem:[#allocation14_spill] sm:$0xff] }
 0x38c   : > { %v12297_v1 = vcombine.low %v10290_v7, %v10293_v26 }
 0x38e   : > { %13499 = vmatpush3.bf16.msra.mxu1 %v14063_v12  ;;  %v12274_v12 = vrot.slane %v10226_v28, 9 }
 0x38f   : > { %13500 = vmatprep.subr.bf16.mxu1 %v14064_v27 }
 0x390   : > { %v10297_v40 = vsel %vm14134_vm2, %v12274_v12, %v10296_v37  ;;  %v7561_v37 = vmax.f32 %v18010_v34, 0.0  ;;  %v18012_v12 = vld [vmem:[#allocation11_spill] sm:$0xff] }
 0x391   : > { %13485 = vmatmul.mubr.bf16.gmra.mrb[44].mxu1 %v12259_v44  ;;  %v12298_v41 = vcombine.low %v10297_v40, %v10300_v54  ;;  %v7564_v54 = vmax.f32 %v18012_v12, 0.0 }
 0x392   : > { %13501 = vmatpush3.bf16.msra.mxu1 %v14064_v27  ;;  %13504 = vmatprep.mubr.bf16.mxu1 %v12292_v36  ;;  %v10304_v27 = vsel %vm14134_vm2, %v12275_v33, %v10303_v38 }
 0x393   : > { %13502 = vmatprep.subr.bf16.mxu1 %v14065_v16  ;;  %v12299_v4 = vcombine.low %v10304_v27, %v10307_v52  ;;  %v7565_v52 = vmax.f32 %v16920_v18, 0.0 }
 0x396   : > { %13503 = vmatpush3.bf16.msra.mxu1 %v14065_v16  ;;  %v7554_v16 = vmax.f32 %v18005_v53, 0.0 }
 0x399   : > { %13505 = vmatmul.mubr.bf16.vlgmr.msra.gmra.mrb[32].mxu1 %v12293_v60 }
 0x39a   : > { %13508 = vmatprep.mubr.bf16.mxu1 %v12294_v8 }
 0x3a1   : > { %13509 = vmatmul.mubr.bf16.gmra.mrb[36].mxu1 %v12295_v30 }
 0x3a2   : > { %13512 = vmatprep.mubr.bf16.mxu1 %v12296_v13  ;;  %v18011_v13 = vld [vmem:[#allocation16_spill] sm:$0xff] }
 0x3a3   : > { %v7559_v6 = vmax.f32 %v18011_v13, 0.0 }
 0x3a9   : > { %13513 = vmatmul.mubr.bf16.gmra.mrb[40].mxu1 %v12297_v1  ;;  %v7562_v1 = vmax.f32 %v18013_v39, 0.0 }
 0x3aa   : > { %13516 = vmatprep.mubr.bf16.mxu1 %v12298_v41 }
 0x3b1   : > { %13517 = vmatmul.mubr.bf16.gmra.mrb[44].mxu1 %v12299_v4 }
 0x3da   : > { %v13200_v44 = vpop.f32.mrb[16].mxu0 }
 0x3db   : > { %v7175_v2 = vmax.f32 %v13200_v44, 0.0  ;;  %v7094_v61 = vpop.f32.mrb[17].mxu0 }
 0x3dc   : > { %v7173_v36 = vmax.f32 %v7094_v61, 0.0  ;;  %v13201_v45 = vpop.f32.mrb[18].mxu0 }
 0x3dd   : > { %v7572_v25 = vadd.f32 %v7556_v59, %v7175_v2  ;;  %v7176_v19 = vmax.f32 %v13201_v45, 0.0  ;;  %v7097_v11 = vpop.f32.mrb[19].mxu0  ;;  %v18014_v59 = vld [vmem:[#allocation9_spill] sm:$0xff] }
 0x3de   : > { %v7570_v50 = vadd.f32 %v7554_v16, %v7173_v36  ;;  %v7174_v5 = vmax.f32 %v7097_v11, 0.0  ;;  %v7563_v2 = vmax.f32 %v18014_v59, 0.0  ;;  %v18015_v11 = vld [vmem:[#allocation10_spill] sm:$0xff] }
 0x3df   : > { %v7573_v24 = vadd.f32 %v7557_v31, %v7176_v19  ;;  %v7588_v48 = vmax.f32 %v7572_v25, 0.0  ;;  %v7568_v18 = vmax.f32 %v18015_v11, 0.0 }
 0x3e0   : > { %v7571_v10 = vadd.f32 %v7555_v0, %v7174_v5  ;;  %v7586_v60 = vmax.f32 %v7570_v50, 0.0  ;;  %v18016_v5 = vld [vmem:[#allocation12_spill] sm:$0xff] }
 0x3e1   : > { %v7589_v14 = vmax.f32 %v7573_v24, 0.0  ;;  %v7566_v24 = vmax.f32 %v18016_v5, 0.0 }
 0x3e2   : > { %v7587_v9 = vmax.f32 %v7571_v10, 0.0  ;;  %v13204_v8 = vpop.f32.mrb[20].mxu0 }
 0x3e3   : > { %v12455_v15 = vpack.c.bf16 %v7589_v14, %v7588_v48  ;;  %v7179_v56 = vmax.f32 %v13204_v8, 0.0  ;;  %v7110_v63 = vpop.f32.mrb[21].mxu0 }
 0x3e4   : > { %v12450_v55 = vpack.c.bf16 %v7587_v9, %v7586_v60  ;;  %v7177_v43 = vmax.f32 %v7110_v63, 0.0  ;;  %v13205_v20 = vpop.f32.mrb[22].mxu0  ;;  %v18017_v60 = vld [vmem:[#allocation13_spill] sm:$0xff] }
 0x3e5   : > { %12527 = vst [vmem:[%s17792_s29 + $0x8] sm:$0xff] %v12455_v15   ;;  %v7576_v46 = vadd.f32 %v7560_v35, %v7179_v56  ;;  %v7180_v30 = vmax.f32 %v13205_v20, 0.0  ;;  %v7113_v21 = vpop.f32.mrb[23].mxu0  ;;  %v7569_v9 = vmax.f32 %v18017_v60, 0.0  ;;  %v18018_v15 = vld [vmem:[#allocation17_spill] sm:$0xff] }
 0x3e6   : > { %12451 = vst [vmem:[%s17792_s29] sm:$0xff] %v12450_v55   ;;  %v7574_v47 = vadd.f32 %v7558_v42, %v7177_v43  ;;  %v7178_v3 = vmax.f32 %v7113_v21, 0.0  ;;  %v7567_v56 = vmax.f32 %v18018_v15, 0.0 }
 0x3e7   : > { %v7577_v62 = vadd.f32 %v7561_v37, %v7180_v30  ;;  %v7592_v38 = vmax.f32 %v7576_v46, 0.0 }
 0x3e8   : > { %v7575_v28 = vadd.f32 %v7559_v6, %v7178_v3  ;;  %v7590_v17 = vmax.f32 %v7574_v47, 0.0 }
 0x3e9   : > { %v7593_v29 = vmax.f32 %v7577_v62, 0.0 }
 0x3ea   : > { %v7591_v32 = vmax.f32 %v7575_v28, 0.0  ;;  %v13208_v26 = vpop.f32.mrb[24].mxu0 }
 0x3eb   : > { %v12465_v7 = vpack.c.bf16 %v7593_v29, %v7592_v38  ;;  %v7183_v33 = vmax.f32 %v13208_v26, 0.0  ;;  %v7126_v58 = vpop.f32.mrb[25].mxu0 }
 0x3ec   : > { %v12460_v40 = vpack.c.bf16 %v7591_v32, %v7590_v17  ;;  %v7181_v41 = vmax.f32 %v7126_v58, 0.0  ;;  %v13209_v27 = vpop.f32.mrb[26].mxu0 }
 0x3ed   : > { %12529 = vst [vmem:[%s17792_s29 + $0x18] sm:$0xff] %v12465_v7   ;;  %v7580_v4 = vadd.f32 %v7564_v54, %v7183_v33  ;;  %v7184_v44 = vmax.f32 %v13209_v27, 0.0  ;;  %v7129_v57 = vpop.f32.mrb[27].mxu0 }
 0x3ee   : > { %12528 = vst [vmem:[%s17792_s29 + $0x10] sm:$0xff] %v12460_v40   ;;  %v7578_v61 = vadd.f32 %v7562_v1, %v7181_v41  ;;  %v7182_v53 = vmax.f32 %v7129_v57, 0.0 }
 0x3ef   : > { %v7581_v16 = vadd.f32 %v7565_v52, %v7184_v44  ;;  %v7596_v45 = vmax.f32 %v7580_v4, 0.0 }
 0x3f0   : > { %v7579_v36 = vadd.f32 %v7563_v2, %v7182_v53  ;;  %v7594_v31 = vmax.f32 %v7578_v61, 0.0 }
 0x3f1   : > { %v7597_v51 = vmax.f32 %v7581_v16, 0.0 }
 0x3f2   : > { %v7595_v25 = vmax.f32 %v7579_v36, 0.0  ;;  %v13212_v19 = vpop.f32.mrb[28].mxu0 }
 0x3f3   : > { %v12475_v49 = vpack.c.bf16 %v7597_v51, %v7596_v45  ;;  %v7187_v0 = vmax.f32 %v13212_v19, 0.0  ;;  %v7142_v50 = vpop.f32.mrb[29].mxu0 }
 0x3f4   : > { %v12470_v10 = vpack.c.bf16 %v7595_v25, %v7594_v31  ;;  %v7185_v48 = vmax.f32 %v7142_v50, 0.0  ;;  %v13213_v14 = vpop.f32.mrb[30].mxu0 }
 0x3f5   : > { %12531 = vst [vmem:[%s17792_s29 + $0x28] sm:$0xff] %v12475_v49   ;;  %v7584_v8 = vadd.f32 %v7568_v18, %v7187_v0  ;;  %v7188_v23 = vmax.f32 %v13213_v14, 0.0  ;;  %v7145_v35 = vpop.f32.mrb[31].mxu0 }
 0x3f6   : > { %12530 = vst [vmem:[%s17792_s29 + $0x20] sm:$0xff] %v12470_v10   ;;  %v7582_v63 = vadd.f32 %v7566_v24, %v7185_v48  ;;  %v7186_v22 = vmax.f32 %v7145_v35, 0.0 }
 0x3f7   : > { %v7585_v42 = vadd.f32 %v7569_v9, %v7188_v23  ;;  %v7600_v43 = vmax.f32 %v7584_v8, 0.0 }
 0x3f8   : > { %v7583_v55 = vadd.f32 %v7567_v56, %v7186_v22  ;;  %v7598_v34 = vmax.f32 %v7582_v63, 0.0 }
 0x3f9   : > { %v7601_v20 = vmax.f32 %v7585_v42, 0.0 }
 0x3fa   : > { %v7599_v37 = vmax.f32 %v7583_v55, 0.0  ;;  %v13524_v46 = vpop.f32.mrb[32].mxu0 }
 0x3fb   : > { %v12485_v30 = vpack.c.bf16 %v7601_v20, %v7600_v43  ;;  %v10835_v21 = vpop.f32.mrb[33].mxu0  ;;  %v10900_v58 = vmax.f32 %v13524_v46, 0.0 }
 0x3fc   : > { %v12480_v13 = vpack.c.bf16 %v7599_v37, %v7598_v34  ;;  %v13525_v6 = vpop.f32.mrb[34].mxu0  ;;  %v10898_v39 = vmax.f32 %v10835_v21, 0.0 }
 0x3fd   : > { %12533 = vst [vmem:[%s17792_s29 + $0x38] sm:$0xff] %v12485_v30   ;;  %v10838_v47 = vpop.f32.mrb[35].mxu0  ;;  %v10901_v4 = vmax.f32 %v13525_v6, 0.0 }
 0x3fe   : > { %12532 = vst [vmem:[%s17792_s29 + $0x30] sm:$0xff] %v12480_v13   ;;  %v10899_v2 = vmax.f32 %v10838_v47, 0.0 }
 0x404   : > { %v13528_v3 = vpop.f32.mrb[36].mxu0 }
 0x405   : > { %v10851_v62 = vpop.f32.mrb[37].mxu0  ;;  %v10904_v31 = vmax.f32 %v13528_v3, 0.0 }
 0x406   : > { %v13529_v28 = vpop.f32.mrb[38].mxu0  ;;  %v10902_v11 = vmax.f32 %v10851_v62, 0.0 }
 0x407   : > { %v10854_v38 = vpop.f32.mrb[39].mxu0  ;;  %v10905_v48 = vmax.f32 %v13529_v28, 0.0 }
 0x408   : > { %v10903_v8 = vmax.f32 %v10854_v38, 0.0 }
 0x40f   : > { %v17814_v29 = vpop.f32.mrb[40].mxu0 }
 0x410   : > { %v17816_v17 = vpop.f32.mrb[41].mxu0  ;;  %v10908_v42 = vmax.f32 %v17814_v29, 0.0 }
 0x411   : > { %v17818_v32 = vpop.f32.mrb[42].mxu0  ;;  %v10906_v20 = vmax.f32 %v17816_v17, 0.0 }
 0x412   : > { %v17820_v26 = vpop.f32.mrb[43].mxu0  ;;  %v10909_v47 = vmax.f32 %v17818_v32, 0.0 }
 0x413   : > { %v10907_v38 = vmax.f32 %v17820_v26, 0.0 }
 0x41c   : > { %v17822_v12 = vpop.f32.mrb[44].mxu0 }
 0x41d   : > { %v17824_v54 = vpop.f32.mrb[45].mxu0 }
 0x41e   : > { %v17826_v7 = vpop.f32.mrb[46].mxu0  ;;  %v10910_v32 = vmax.f32 %v17824_v54, 0.0 }
 0x41f   : > { %v17828_v33 = vpop.f32.mrb[47].mxu0 }
 0x46c   : > { %v13506_v1 = vpop.f32.mrb[32].mxu1 }
 0x46d   : > { %v10519_v40 = vmax.f32 %v13506_v1, 0.0  ;;  %v10438_v41 = vpop.f32.mrb[33].mxu1 }
 0x46e   : > { %v10517_v27 = vmax.f32 %v10438_v41, 0.0  ;;  %v13507_v52 = vpop.f32.mrb[34].mxu1  ;;  %v10912_v41 = vmax.f32 %v17822_v12, 0.0 }
 0x46f   : > { %v10916_v44 = vadd.f32 %v10900_v58, %v10519_v40  ;;  %v10520_v57 = vmax.f32 %v13507_v52, 0.0  ;;  %v10441_v59 = vpop.f32.mrb[35].mxu1 }
 0x470   : > { %v10914_v61 = vadd.f32 %v10898_v39, %v10517_v27  ;;  %v10518_v53 = vmax.f32 %v10441_v59, 0.0 }
 0x471   : > { %v10917_v16 = vadd.f32 %v10901_v4, %v10520_v57  ;;  %v10932_v45 = vmax.f32 %v10916_v44, 0.0 }
 0x472   : > { %v10915_v36 = vadd.f32 %v10899_v2, %v10518_v53  ;;  %v10930_v25 = vmax.f32 %v10914_v61, 0.0  ;;  %v10913_v53 = vmax.f32 %v17826_v7, 0.0 }
 0x473   : > { %v10933_v51 = vmax.f32 %v10917_v16, 0.0 }
 0x474   : > { %v10931_v19 = vmax.f32 %v10915_v36, 0.0  ;;  %v13510_v18 = vpop.f32.mrb[36].mxu1 }
 0x475   : > { %v12495_v49 = vpack.c.bf16 %v10933_v51, %v10932_v45  ;;  %v10523_v0 = vmax.f32 %v13510_v18, 0.0  ;;  %v10454_v50 = vpop.f32.mrb[37].mxu1  ;;  %v10911_v45 = vmax.f32 %v17828_v33, 0.0 }
 0x476   : > { %v12490_v5 = vpack.c.bf16 %v10931_v19, %v10930_v25  ;;  %v10521_v24 = vmax.f32 %v10454_v50, 0.0  ;;  %v13511_v10 = vpop.f32.mrb[38].mxu1 }
 0x477   : > { %12535 = vst [vmem:[%s17792_s29 + $0x48] sm:$0xff] %v12495_v49   ;;  %v10920_v14 = vadd.f32 %v10904_v31, %v10523_v0  ;;  %v10524_v60 = vmax.f32 %v13511_v10, 0.0  ;;  %v10457_v9 = vpop.f32.mrb[39].mxu1 }
 0x478   : > { %12534 = vst [vmem:[%s17792_s29 + $0x40] sm:$0xff] %v12490_v5   ;;  %v10918_v23 = vadd.f32 %v10902_v11, %v10521_v24  ;;  %v10522_v35 = vmax.f32 %v10457_v9, 0.0 }
 0x479   : > { %v10921_v15 = vadd.f32 %v10905_v48, %v10524_v60  ;;  %v10936_v63 = vmax.f32 %v10920_v14, 0.0 }
 0x47a   : > { %v10919_v56 = vadd.f32 %v10903_v8, %v10522_v35  ;;  %v10934_v55 = vmax.f32 %v10918_v23, 0.0 }
 0x47b   : > { %v10937_v22 = vmax.f32 %v10921_v15, 0.0 }
 0x47c   : > { %v10935_v43 = vmax.f32 %v10919_v56, 0.0  ;;  %v13514_v34 = vpop.f32.mrb[40].mxu1 }
 0x47d   : > { %v12505_v37 = vpack.c.bf16 %v10937_v22, %v10936_v63  ;;  %v10527_v46 = vmax.f32 %v13514_v34, 0.0  ;;  %v10470_v30 = vpop.f32.mrb[41].mxu1 }
 0x47e   : > { %v12500_v21 = vpack.c.bf16 %v10935_v43, %v10934_v55  ;;  %v10525_v13 = vmax.f32 %v10470_v30, 0.0  ;;  %v13515_v6 = vpop.f32.mrb[42].mxu1 }
 0x47f   : > { %12537 = vst [vmem:[%s17792_s29 + $0x58] sm:$0xff] %v12505_v37   ;;  %v10924_v3 = vadd.f32 %v10908_v42, %v10527_v46  ;;  %v10528_v62 = vmax.f32 %v13515_v6, 0.0  ;;  %v10473_v28 = vpop.f32.mrb[43].mxu1 }
 0x480   : > { %12536 = vst [vmem:[%s17792_s29 + $0x50] sm:$0xff] %v12500_v21   ;;  %v10922_v29 = vadd.f32 %v10906_v20, %v10525_v13  ;;  %v10526_v58 = vmax.f32 %v10473_v28, 0.0 }
 0x481   : > { %v10925_v17 = vadd.f32 %v10909_v47, %v10528_v62  ;;  %v10940_v1 = vmax.f32 %v10924_v3, 0.0 }
 0x482   : > { %v10923_v39 = vadd.f32 %v10907_v38, %v10526_v58  ;;  %v10938_v27 = vmax.f32 %v10922_v29, 0.0 }
 0x483   : > { %v10941_v40 = vmax.f32 %v10925_v17, 0.0 }
 0x484   : > { %v10939_v52 = vmax.f32 %v10923_v39, 0.0  ;;  %v13518_v4 = vpop.f32.mrb[44].mxu1 }
 0x485   : > { %v12515_v44 = vpack.c.bf16 %v10941_v40, %v10940_v1  ;;  %v10531_v57 = vmax.f32 %v13518_v4, 0.0  ;;  %v10486_v59 = vpop.f32.mrb[45].mxu1 }
 0x486   : > { %v12510_v2 = vpack.c.bf16 %v10939_v52, %v10938_v27  ;;  %v10529_v26 = vmax.f32 %v10486_v59, 0.0  ;;  %v13519_v61 = vpop.f32.mrb[46].mxu1 }
 0x487   : > { %12539 = vst [vmem:[%s17792_s29 + $0x68] sm:$0xff] %v12515_v44   ;;  %v10928_v16 = vadd.f32 %v10912_v41, %v10531_v57  ;;  %v10532_v36 = vmax.f32 %v13519_v61, 0.0  ;;  %v10489_v12 = vpop.f32.mrb[47].mxu1 }
 0x488   : > { %12538 = vst [vmem:[%s17792_s29 + $0x60] sm:$0xff] %v12510_v2   ;;  %v10926_v51 = vadd.f32 %v10910_v32, %v10529_v26  ;;  %v10530_v54 = vmax.f32 %v10489_v12, 0.0 }
 0x489   : > { %v10929_v31 = vadd.f32 %v10913_v53, %v10532_v36  ;;  %v10944_v19 = vmax.f32 %v10928_v16, 0.0 }
 0x48a   : > { %v10927_v25 = vadd.f32 %v10911_v45, %v10530_v54  ;;  %v10942_v18 = vmax.f32 %v10926_v51, 0.0 }
 0x48b   : > { %v10945_v11 = vmax.f32 %v10929_v31, 0.0 }
 0x48c   : > { %v10943_v49 = vmax.f32 %v10927_v25, 0.0 }
 0x48d   : > { %v12525_v0 = vpack.c.bf16 %v10945_v11, %v10944_v19 }
 0x48e   : > { %v12520_v50 = vpack.c.bf16 %v10943_v49, %v10942_v18 }
 0x48f   : > { %12541 = vst [vmem:[%s17792_s29 + $0x78] sm:$0xff] %v12525_v0  }
 0x490   : > { %12540 = vst [vmem:[%s17792_s29 + $0x70] sm:$0xff] %v12520_v50  }
 0x491 PF: > { %s14_s15 = sadd.s32 1, %s14087_s15  }
 0x492   : > { %p11_p4 = scmp.ge.s32.totalorder %s14_s15, 4  }
 0x494   :  { %13 = sbr.rel (!%p11_p4) target bundleno = 1 (0x1), region = 86 }

</bundles_post_ra>
